<compile_context>
chip_gen: v7x
topology: tpu7x:2x2x1
jax: 0.10.0
libtpu: 0.0.40
codegen_flags: <defaults>
</compile_context>

<pallas_src>
import jax
import jax.numpy as jnp
import numpy as np
from jax.experimental import pallas as pl
from jax.experimental.pallas import tpu as pltpu

# ---------------------------------------------------------------------------
# Model constants (fixed by the PyTorch module)
# ---------------------------------------------------------------------------
C1, C2 = 10, 20          # conv1 / conv2 output channels
K = 5                    # conv kernel size
H1 = 12                  # pooled conv1 spatial size (12x12)
M1 = H1 * H1             # 144 pooled conv1 positions
T36 = 36                 # de-duplicated conv1 tap offsets (a,b) in [0,6)^2
H2 = 4                   # pooled conv2 spatial size (4x4)
M2 = H2 * H2             # 16 pooled conv2 positions
F1 = C1 * M1             # 1440 conv2 input features (ci, h, w) order
QPAD = 384               # per-quadrant conv2 column block (20*16=320 -> 384, lane aligned)
C2COLS = 4 * QPAD        # 1536 conv2 Toeplitz output columns
X2D = C2 * M2            # 320 flattened x2 features
CO_PAD = 16              # padded conv1 output-channel dim (10 -> 16 sublanes)
FC_PAD = 128             # padded fc widths (50 -> 128, 10 -> 128)
VMEM_LIMIT = 48 * 1024 * 1024


# ---------------------------------------------------------------------------
# Host-side glue: de-duplicated conv1 pooled im2col (pure indexing, tiny)
# ---------------------------------------------------------------------------
def conv1_patches(x):
    """x: (N, 1, 28, 28) -> (N, 36, 144).
    patches[n, a*6+b, i*12+j] = x[n, 0, 2i+a, 2j+b]  for a,b in [0,6)."""
    n = x.shape[0]
    xs = x[:, 0]
    taps = []
    for a in range(6):
        for b in range(6):
            sl = xs[:, a:a + 2 * H1:2, b:b + 2 * H1:2]      # (N, 12, 12)
            taps.append(sl.reshape(n, M1))
    return jnp.stack(taps, axis=1)                          # (N, 36, 144)


# ---------------------------------------------------------------------------
# Kernel 1: conv1 (batched matmul per quadrant) + bias-after-max + 2x2 pool + ReLU
# ---------------------------------------------------------------------------
def conv1_pool_relu(p1, w1q, b1c, NB):
    """p1: (Npad, 36, 144); w1q: (4, 16, 36); b1c: (16, 1) -> x1 (Npad, 10, 144)."""
    Npad = p1.shape[0]
    G = Npad // NB

    def kernel(p_ref, w_ref, b_ref, x1_ref):
        nb = p_ref.shape[0]
        p = p_ref[...]                                              # (nb, 36, 144)

        def quad(q):
            wq = jnp.broadcast_to(w_ref[q], (nb, CO_PAD, T36))      # (nb, 16, 36)
            return jax.lax.dot_general(
                wq, p, (((2,), (1,)), ((0,), (0,))),
                preferred_element_type=jnp.float32)                 # (nb, 16, 144)

        # 2x2 max-pool == elementwise max over the 4 quadrant conv outputs.
        m = jnp.maximum(quad(0), quad(1))
        m = jnp.maximum(m, quad(2))
        m = jnp.maximum(m, quad(3))
        # Bias after the quadrant max (equivalent, saves redundant adds), then ReLU.
        x1_ref[...] = jnp.maximum(m + b_ref[...], 0.0)[:, :C1, :]

    return pl.pallas_call(
        kernel,
        out_shape=jax.ShapeDtypeStruct((Npad, C1, M1), jnp.float32),
        grid=(G,),
        in_specs=[
            pl.BlockSpec((NB, T36, M1), lambda n: (n, 0, 0)),
            pl.BlockSpec((4, CO_PAD, T36), lambda n: (0, 0, 0)),
            pl.BlockSpec((CO_PAD, 1), lambda n: (0, 0)),
        ],
        out_specs=pl.BlockSpec((NB, C1, M1), lambda n: (n, 0, 0)),
        compiler_params=pltpu.CompilerParams(
            dimension_semantics=("parallel",),
            vmem_limit_bytes=VMEM_LIMIT),
    )(p1, w1q, b1c)


# ---------------------------------------------------------------------------
# Kernel 2: conv2 (block-Toeplitz matmul) + pool + ReLU + fc1 + ReLU + fc + log_softmax
# ---------------------------------------------------------------------------
def conv2_fc_head(x1f, w2t, b2r, fw1, fb1, fw2, fb2, NB):
    """x1f: (Npad, 1440) in (ci,h,w) order -> x2 (Npad,320), x3 (Npad,50),
    x4 (Npad,10), logp (Npad,10)."""
    Npad, F = x1f.shape
    G = Npad // NB

    def kernel(x_ref, w2_ref, b2_ref, w3_ref, b3_ref, w4_ref, b4_ref,
               x2_ref, x3_ref, x4_ref, lp_ref):
        x1v = x_ref[...]                                               # (NB, 1440)
        # conv2 for all 4 pooling quadrants in one lane-dense matmul.
        c2 = jnp.dot(x1v, w2_ref[...], preferred_element_type=jnp.float32)  # (NB, 1536)
        # 2x2 max-pool == max over the 4 (lane-aligned) quadrant column blocks.
        m = jnp.maximum(jnp.maximum(c2[:, 0:QPAD], c2[:, QPAD:2 * QPAD]),
                        jnp.maximum(c2[:, 2 * QPAD:3 * QPAD], c2[:, 3 * QPAD:4 * QPAD]))
        x2v = jnp.maximum(m + b2_ref[...], 0.0)                        # (NB, 384), 320 valid
        x2_ref[...] = x2v[:, :X2D]
        # TODO(synk): Dropout2d / F.dropout are identity (eval mode).
        h = jnp.dot(x2v, w3_ref[...], preferred_element_type=jnp.float32) + b3_ref[...]
        x3v = jnp.maximum(h, 0.0)                                      # (NB, 128), 50 valid
        x3_ref[...] = x3v[:, :50]
        x4v = jnp.dot(x3v, w4_ref[...], preferred_element_type=jnp.float32) + b4_ref[...]
        x4s = x4v[:, :10]                                              # (NB, 10)
        x4_ref[...] = x4s
        mx = jnp.max(x4s, axis=-1, keepdims=True)
        e = jnp.exp(x4s - mx)
        s = jnp.sum(e, axis=-1, keepdims=True)
        lp_ref[...] = x4s - mx - jnp.log(s)                            # log_softmax

    return pl.pallas_call(
        kernel,
        out_shape=(jax.ShapeDtypeStruct((Npad, X2D), jnp.float32),
                   jax.ShapeDtypeStruct((Npad, 50), jnp.float32),
                   jax.ShapeDtypeStruct((Npad, 10), jnp.float32),
                   jax.ShapeDtypeStruct((Npad, 10), jnp.float32)),
        grid=(G,),
        in_specs=[
            pl.BlockSpec((NB, F), lambda n: (n, 0)),
            pl.BlockSpec((F, C2COLS), lambda n: (0, 0)),
            pl.BlockSpec((1, QPAD), lambda n: (0, 0)),
            pl.BlockSpec((QPAD, FC_PAD), lambda n: (0, 0)),
            pl.BlockSpec((1, FC_PAD), lambda n: (0, 0)),
            pl.BlockSpec((FC_PAD, FC_PAD), lambda n: (0, 0)),
            pl.BlockSpec((1, FC_PAD), lambda n: (0, 0)),
        ],
        out_specs=(pl.BlockSpec((NB, X2D), lambda n: (n, 0)),
                   pl.BlockSpec((NB, 50), lambda n: (n, 0)),
                   pl.BlockSpec((NB, 10), lambda n: (n, 0)),
                   pl.BlockSpec((NB, 10), lambda n: (n, 0))),
        compiler_params=pltpu.CompilerParams(
            dimension_semantics=("parallel",),
            vmem_limit_bytes=VMEM_LIMIT),
    )(x1f, w2t, b2r, fw1, fb1, fw2, fb2)


# ---------------------------------------------------------------------------
# Host-side parameter preparation (numpy, done once)
# ---------------------------------------------------------------------------
def build_conv2_toeplitz(w2):
    """w2: (20, 10, 5, 5) -> (1440, 1536) block-Toeplitz matrix.
    row r = ci*144 + h*12 + w ; col c = q*384 + co*16 + i*4 + j (q = di*2+dj)."""
    W = np.zeros((F1, C2COLS), np.float32)
    ci = np.arange(C1)[:, None, None]
    co = np.arange(C2)[:, None, None]
    ii = np.arange(H2)[None, :, None]
    jj = np.arange(H2)[None, None, :]
    for di in range(2):
        for dj in range(2):
            q = di * 2 + dj
            for kh in range(K):
                for kw in range(K):
                    h = 2 * ii + di + kh
                    w_ = 2 * jj + dj + kw
                    rows = ci * M1 + h * H1 + w_                 # (10, 4, 4)
                    cols = q * QPAD + co * M2 + ii * H2 + jj     # (20, 4, 4)
                    vals = w2[:, :, kh, kw].T                    # (10, 20)
                    W[rows[:, None, :, :], cols[None, :, :, :]] = vals[:, :, None, None]
    return W


def prepare_params(P):
    Pk = {}
    # conv1: per-quadrant weights over the 36 de-duplicated tap offsets.
    w1 = np.asarray(P["w1"], np.float32).reshape(C1, K, K)
    w1q = np.zeros((4, CO_PAD, T36), np.float32)
    for di in range(2):
        for dj in range(2):
            q = di * 2 + dj
            for kh in range(K):
                for kw in range(K):
                    a, b = di + kh, dj + kw
                    w1q[q, :C1, a * 6 + b] = w1[:, kh, kw]
    b1c = np.zeros((CO_PAD, 1), np.float32)
    b1c[:C1, 0] = np.asarray(P["b1"], np.float32)
    Pk["w1q"], Pk["b1c"] = jnp.asarray(w1q), jnp.asarray(b1c)

    Pk["w2toe"] = jnp.asarray(build_conv2_toeplitz(np.asarray(P["w2"], np.float32)))
    b2r = np.zeros((1, QPAD), np.float32)
    b2r[0, :X2D] = np.repeat(np.asarray(P["b2"], np.float32), M2)
    Pk["b2rep"] = jnp.asarray(b2r)

    fw1 = np.zeros((QPAD, FC_PAD), np.float32)
    fw1[:X2D, :50] = np.asarray(P["fc1_w"], np.float32).T
    fb1 = np.zeros((1, FC_PAD), np.float32)
    fb1[0, :50] = np.asarray(P["fc1_b"], np.float32)
    fw2 = np.zeros((FC_PAD, FC_PAD), np.float32)
    fw2[:50, :10] = np.asarray(P["fc_w"], np.float32).T
    fb2 = np.zeros((1, FC_PAD), np.float32)
    fb2[0, :10] = np.asarray(P["fc_b"], np.float32)
    Pk["fw1"], Pk["fb1"] = jnp.asarray(fw1), jnp.asarray(fb1)
    Pk["fw2"], Pk["fb2"] = jnp.asarray(fw2), jnp.asarray(fb2)
    return Pk


# ---------------------------------------------------------------------------
# Full forward (mirrors cnnmnist.forward)
# ---------------------------------------------------------------------------
def _pick_nb(N):
    if N >= 32:
        return 32
    if N >= 16:
        return 16
    return N


def cnnmnist_forward(x, Pk):
    N = x.shape[0]
    NB = _pick_nb(N)
    Npad = ((N + NB - 1) // NB) * NB
    if Npad != N:
        x = jnp.concatenate([x, jnp.zeros((Npad - N,) + x.shape[1:], x.dtype)], 0)

    p1 = conv1_patches(x)                                          # (Npad, 36, 144)
    x1 = conv1_pool_relu(p1, Pk["w1q"], Pk["b1c"], NB)             # (Npad, 10, 144) (c,h,w)
    x1_flat = x1.reshape(Npad, F1)                                 # free row-major reshape
    x2, x3, x4, logp = conv2_fc_head(x1_flat, Pk["w2toe"], Pk["b2rep"],
                                     Pk["fw1"], Pk["fb1"], Pk["fw2"], Pk["fb2"], NB)
    x1o = x1.reshape(Npad, C1, H1, H1)                             # free reshape
    if Npad != N:
        x1o, x2, x3, x4, logp = (a[:N] for a in (x1o, x2, x3, x4, logp))
    return [x1o, x2, x3, x4], logp


# ---------------------------------------------------------------------------
# Pure-JAX reference (for correctness check only)
# ---------------------------------------------------------------------------
def reference_forward(x, P):
    dn = ("NCHW", "OIHW", "NCHW")
    c1 = jax.lax.conv_general_dilated(x, P["w1"], (1, 1), "VALID",
                                      dimension_numbers=dn) + P["b1"][None, :, None, None]
    p1 = jax.lax.reduce_window(c1, -jnp.inf, jax.lax.max, (1, 1, 2, 2), (1, 1, 2, 2), "VALID")
    x1 = jnp.maximum(p1, 0.0)
    c2 = jax.lax.conv_general_dilated(x1, P["w2"], (1, 1), "VALID",
                                      dimension_numbers=dn) + P["b2"][None, :, None, None]
    p2 = jax.lax.reduce_window(c2, -jnp.inf, jax.lax.max, (1, 1, 2, 2), (1, 1, 2, 2), "VALID")
    x2 = jnp.maximum(p2, 0.0).reshape(x.shape[0], -1)
    x3 = jnp.maximum(x2 @ P["fc1_w"].T + P["fc1_b"], 0.0)
    x4 = x3 @ P["fc_w"].T + P["fc_b"]
    lp = x4 - jax.scipy.special.logsumexp(x4, axis=1, keepdims=True)
    return [x1, x2, x3, x4], lp


if __name__ == "__main__":
    key = jax.random.PRNGKey(0)
    ks = jax.random.split(key, 9)
    P = {
        "w1": jax.random.normal(ks[0], (10, 1, 5, 5), jnp.float32) * 0.2,
        "b1": jax.random.normal(ks[1], (10,), jnp.float32) * 0.1,
        "w2": jax.random.normal(ks[2], (20, 10, 5, 5), jnp.float32) * 0.1,
        "b2": jax.random.normal(ks[3], (20,), jnp.float32) * 0.1,
        "fc1_w": jax.random.normal(ks[4], (50, 320), jnp.float32) * 0.05,
        "fc1_b": jax.random.normal(ks[5], (50,), jnp.float32) * 0.05,
        "fc_w": jax.random.normal(ks[6], (10, 50), jnp.float32) * 0.1,
        "fc_b": jax.random.normal(ks[7], (10,), jnp.float32) * 0.1,
    }
    Pk = prepare_params(P)

    # MNIST-shaped input (fc1 requires 20*4*4 = 320 features): (N=2, 1, 28, 28)
    x = jax.random.normal(ks[8], (2, 1, 28, 28), jnp.float32)

    fwd = jax.jit(cnnmnist_forward)
    (x1, x2, x3, x4), logp = fwd(x, Pk)
    jax.block_until_ready((x1, x2, x3, x4, logp))

    (r1, r2, r3, r4), rlp = reference_forward(x, P)
    for got, ref in [(x1, r1), (x2, r2), (x3, r3), (x4, r4), (logp, rlp)]:
        assert got.shape == ref.shape
        assert np.allclose(np.asarray(got), np.asarray(ref), rtol=1e-4, atol=1e-4)

    print("KERNEL_OK")
</pallas_src>

<mosaic_0001>
module attributes {stable_mosaic.version = 11 : i64} {
  func.func @kernel(%arg0: i32, %arg1: memref<2x36x144xf32, #tpu.memory_space<vmem>>, %arg2: memref<4x16x36xf32, #tpu.memory_space<vmem>>, %arg3: memref<16x1xf32, #tpu.memory_space<vmem>>, %arg4: memref<2x10x144xf32, #tpu.memory_space<vmem>>) attributes {dimension_semantics = [#tpu.dimension_semantics<parallel>], iteration_bounds = array<i64: 1>, scalar_prefetch = 0 : i64, scratch_operands = 0 : i64, tpu.core_type = #tpu.core_type<tc>, window_params = [{transform_indices = @transform_0, window_bounds = array<i64: 2, 36, 144>}, {pipeline_mode = #tpu.pipeline_mode<synchronous>, transform_indices = @transform_1, window_bounds = array<i64: 4, 16, 36>}, {pipeline_mode = #tpu.pipeline_mode<synchronous>, transform_indices = @transform_2, window_bounds = array<i64: 16, 1>}, {transform_indices = @transform_3, window_bounds = array<i64: 2, 10, 144>}]} {
    %c0 = arith.constant 0 : index
    %c0_0 = arith.constant 0 : index
    %c0_1 = arith.constant 0 : index
    %0 = vector.load %arg1[%c0, %c0_0, %c0_1] : memref<2x36x144xf32, #tpu.memory_space<vmem>>, vector<2x36x144xf32>
    %c0_2 = arith.constant 0 : index
    %c0_3 = arith.constant 0 : index
    %c0_4 = arith.constant 0 : index
    %1 = vector.load %arg2[%c0_2, %c0_3, %c0_4] : memref<4x16x36xf32, #tpu.memory_space<vmem>>, vector<1x16x36xf32>
    %2 = vector.shape_cast %1 : vector<1x16x36xf32> to vector<16x36xf32>
    %3 = vector.shape_cast %2 : vector<16x36xf32> to vector<1x16x36xf32>
    %4 = vector.broadcast %3 : vector<1x16x36xf32> to vector<2x16x36xf32>
    %cst = arith.constant dense<0.000000e+00> : vector<2x16x144xf32>
    %5 = tpu.matmul %4, %0, %cst {dimension_numbers = #tpu.dot_dimension_numbers<[2], [1], [1], [2], [0, 0, 0, 1, 1, 2], [0], [0]>} : vector<2x16x36xf32>, vector<2x36x144xf32>, vector<2x16x144xf32> -> vector<2x16x144xf32>
    %c1 = arith.constant 1 : index
    %c0_5 = arith.constant 0 : index
    %c0_6 = arith.constant 0 : index
    %6 = vector.load %arg2[%c1, %c0_5, %c0_6] : memref<4x16x36xf32, #tpu.memory_space<vmem>>, vector<1x16x36xf32>
    %7 = vector.shape_cast %6 : vector<1x16x36xf32> to vector<16x36xf32>
    %8 = vector.shape_cast %7 : vector<16x36xf32> to vector<1x16x36xf32>
    %9 = vector.broadcast %8 : vector<1x16x36xf32> to vector<2x16x36xf32>
    %cst_7 = arith.constant dense<0.000000e+00> : vector<2x16x144xf32>
    %10 = tpu.matmul %9, %0, %cst_7 {dimension_numbers = #tpu.dot_dimension_numbers<[2], [1], [1], [2], [0, 0, 0, 1, 1, 2], [0], [0]>} : vector<2x16x36xf32>, vector<2x36x144xf32>, vector<2x16x144xf32> -> vector<2x16x144xf32>
    %11 = arith.maximumf %5, %10 : vector<2x16x144xf32>
    %c2 = arith.constant 2 : index
    %c0_8 = arith.constant 0 : index
    %c0_9 = arith.constant 0 : index
    %12 = vector.load %arg2[%c2, %c0_8, %c0_9] : memref<4x16x36xf32, #tpu.memory_space<vmem>>, vector<1x16x36xf32>
    %13 = vector.shape_cast %12 : vector<1x16x36xf32> to vector<16x36xf32>
    %14 = vector.shape_cast %13 : vector<16x36xf32> to vector<1x16x36xf32>
    %15 = vector.broadcast %14 : vector<1x16x36xf32> to vector<2x16x36xf32>
    %cst_10 = arith.constant dense<0.000000e+00> : vector<2x16x144xf32>
    %16 = tpu.matmul %15, %0, %cst_10 {dimension_numbers = #tpu.dot_dimension_numbers<[2], [1], [1], [2], [0, 0, 0, 1, 1, 2], [0], [0]>} : vector<2x16x36xf32>, vector<2x36x144xf32>, vector<2x16x144xf32> -> vector<2x16x144xf32>
    %17 = arith.maximumf %11, %16 : vector<2x16x144xf32>
    %c3 = arith.constant 3 : index
    %c0_11 = arith.constant 0 : index
    %c0_12 = arith.constant 0 : index
    %18 = vector.load %arg2[%c3, %c0_11, %c0_12] : memref<4x16x36xf32, #tpu.memory_space<vmem>>, vector<1x16x36xf32>
    %19 = vector.shape_cast %18 : vector<1x16x36xf32> to vector<16x36xf32>
    %20 = vector.shape_cast %19 : vector<16x36xf32> to vector<1x16x36xf32>
    %21 = vector.broadcast %20 : vector<1x16x36xf32> to vector<2x16x36xf32>
    %cst_13 = arith.constant dense<0.000000e+00> : vector<2x16x144xf32>
    %22 = tpu.matmul %21, %0, %cst_13 {dimension_numbers = #tpu.dot_dimension_numbers<[2], [1], [1], [2], [0, 0, 0, 1, 1, 2], [0], [0]>} : vector<2x16x36xf32>, vector<2x36x144xf32>, vector<2x16x144xf32> -> vector<2x16x144xf32>
    %23 = arith.maximumf %17, %22 : vector<2x16x144xf32>
    %c0_14 = arith.constant 0 : index
    %c0_15 = arith.constant 0 : index
    %24 = vector.load %arg3[%c0_14, %c0_15] : memref<16x1xf32, #tpu.memory_space<vmem>>, vector<16x1xf32>
    %25 = vector.shape_cast %24 : vector<16x1xf32> to vector<1x16x1xf32>
    %26 = vector.broadcast %25 : vector<1x16x1xf32> to vector<2x16x144xf32>
    %27 = arith.addf %23, %26 : vector<2x16x144xf32>
    %cst_16 = arith.constant 0.000000e+00 : f32
    %28 = vector.broadcast %cst_16 : f32 to vector<2x16x144xf32>
    %29 = arith.maximumf %27, %28 : vector<2x16x144xf32>
    %30 = vector.extract_strided_slice %29 {offsets = [0, 0, 0], sizes = [2, 10, 144], strides = [1, 1, 1]} : vector<2x16x144xf32> to vector<2x10x144xf32>
    %c0_17 = arith.constant 0 : index
    %c0_18 = arith.constant 0 : index
    %c0_19 = arith.constant 0 : index
    %31 = vector.load %arg4[%c0_17, %c0_18, %c0_19] : memref<2x10x144xf32, #tpu.memory_space<vmem>>, vector<2x10x144xf32>
    tpu.vector_store %arg4[%c0_17, %c0_18, %c0_19], %30 {strides = array<i32>} : memref<2x10x144xf32, #tpu.memory_space<vmem>>, vector<2x10x144xf32>,
    return
  }
  func.func @transform_0(%arg0: i32) -> (i32, i32, i32) {
    %c0_i32 = arith.constant 0 : i32
    %c0_i32_0 = arith.constant 0 : i32
    %c0_i32_1 = arith.constant 0 : i32
    return %arg0, %c0_i32, %c0_i32_0 : i32, i32, i32
  }
  func.func @transform_1(%arg0: i32) -> (i32, i32, i32) {
    %c0_i32 = arith.constant 0 : i32
    %c0_i32_0 = arith.constant 0 : i32
    %c0_i32_1 = arith.constant 0 : i32
    %c0_i32_2 = arith.constant 0 : i32
    return %c0_i32, %c0_i32_0, %c0_i32_1 : i32, i32, i32
  }
  func.func @transform_2(%arg0: i32) -> (i32, i32) {
    %c0_i32 = arith.constant 0 : i32
    %c0_i32_0 = arith.constant 0 : i32
    %c0_i32_1 = arith.constant 0 : i32
    return %c0_i32, %c0_i32_0 : i32, i32
  }
  func.func @transform_3(%arg0: i32) -> (i32, i32, i32) {
    %c0_i32 = arith.constant 0 : i32
    %c0_i32_0 = arith.constant 0 : i32
    %c0_i32_1 = arith.constant 0 : i32
    return %arg0, %c0_i32, %c0_i32_0 : i32, i32, i32
  }
}

module attributes {stable_mosaic.version = 11 : i64} {
  func.func @kernel(%arg0: i32, %arg1: memref<2x1440xf32, #tpu.memory_space<vmem>>, %arg2: memref<1440x1536xf32, #tpu.memory_space<vmem>>, %arg3: memref<1x384xf32, #tpu.memory_space<vmem>>, %arg4: memref<384x128xf32, #tpu.memory_space<vmem>>, %arg5: memref<1x128xf32, #tpu.memory_space<vmem>>, %arg6: memref<128x128xf32, #tpu.memory_space<vmem>>, %arg7: memref<1x128xf32, #tpu.memory_space<vmem>>, %arg8: memref<2x320xf32, #tpu.memory_space<vmem>>, %arg9: memref<2x50xf32, #tpu.memory_space<vmem>>, %arg10: memref<2x10xf32, #tpu.memory_space<vmem>>, %arg11: memref<2x10xf32, #tpu.memory_space<vmem>>) attributes {dimension_semantics = [#tpu.dimension_semantics<parallel>], iteration_bounds = array<i64: 1>, scalar_prefetch = 0 : i64, scratch_operands = 0 : i64, tpu.core_type = #tpu.core_type<tc>, window_params = [{transform_indices = @transform_0, window_bounds = array<i64: 2, 1440>}, {pipeline_mode = #tpu.pipeline_mode<synchronous>, transform_indices = @transform_1, window_bounds = array<i64: 1440, 1536>}, {pipeline_mode = #tpu.pipeline_mode<synchronous>, transform_indices = @transform_2, window_bounds = array<i64: 1, 384>}, {pipeline_mode = #tpu.pipeline_mode<synchronous>, transform_indices = @transform_3, window_bounds = array<i64: 384, 128>}, {pipeline_mode = #tpu.pipeline_mode<synchronous>, transform_indices = @transform_4, window_bounds = array<i64: 1, 128>}, {pipeline_mode = #tpu.pipeline_mode<synchronous>, transform_indices = @transform_5, window_bounds = array<i64: 128, 128>}, {pipeline_mode = #tpu.pipeline_mode<synchronous>, transform_indices = @transform_6, window_bounds = array<i64: 1, 128>}, {transform_indices = @transform_7, window_bounds = array<i64: 2, 320>}, {transform_indices = @transform_8, window_bounds = array<i64: 2, 50>}, {transform_indices = @transform_9, window_bounds = array<i64: 2, 10>}, {transform_indices = @transform_10, window_bounds = array<i64: 2, 10>}]} {
    %c0 = arith.constant 0 : index
    %c0_0 = arith.constant 0 : index
    %0 = vector.load %arg1[%c0, %c0_0] : memref<2x1440xf32, #tpu.memory_space<vmem>>, vector<2x1440xf32>
    %c0_1 = arith.constant 0 : index
    %c0_2 = arith.constant 0 : index
    %1 = vector.load %arg2[%c0_1, %c0_2] : memref<1440x1536xf32, #tpu.memory_space<vmem>>, vector<1440x1536xf32>
    %cst = arith.constant dense<0.000000e+00> : vector<2x1536xf32>
    %2 = tpu.matmul %0, %1, %cst {dimension_numbers = #tpu.dot_dimension_numbers<[1], [0], [0], [1], [0, 0, 1, 1], [], []>} : vector<2x1440xf32>, vector<1440x1536xf32>, vector<2x1536xf32> -> vector<2x1536xf32>
    %3 = vector.extract_strided_slice %2 {offsets = [0, 0], sizes = [2, 384], strides = [1, 1]} : vector<2x1536xf32> to vector<2x384xf32>
    %4 = vector.extract_strided_slice %2 {offsets = [0, 384], sizes = [2, 384], strides = [1, 1]} : vector<2x1536xf32> to vector<2x384xf32>
    %5 = arith.maximumf %3, %4 : vector<2x384xf32>
    %6 = vector.extract_strided_slice %2 {offsets = [0, 768], sizes = [2, 384], strides = [1, 1]} : vector<2x1536xf32> to vector<2x384xf32>
    %7 = vector.extract_strided_slice %2 {offsets = [0, 1152], sizes = [2, 384], strides = [1, 1]} : vector<2x1536xf32> to vector<2x384xf32>
    %8 = arith.maximumf %6, %7 : vector<2x384xf32>
    %9 = arith.maximumf %5, %8 : vector<2x384xf32>
    %c0_3 = arith.constant 0 : index
    %c0_4 = arith.constant 0 : index
    %10 = vector.load %arg3[%c0_3, %c0_4] : memref<1x384xf32, #tpu.memory_space<vmem>>, vector<1x384xf32>
    %11 = vector.broadcast %10 : vector<1x384xf32> to vector<2x384xf32>
    %12 = arith.addf %9, %11 : vector<2x384xf32>
    %cst_5 = arith.constant 0.000000e+00 : f32
    %13 = vector.broadcast %cst_5 : f32 to vector<2x384xf32>
    %14 = arith.maximumf %12, %13 : vector<2x384xf32>
    %15 = vector.extract_strided_slice %14 {offsets = [0, 0], sizes = [2, 320], strides = [1, 1]} : vector<2x384xf32> to vector<2x320xf32>
    %c0_6 = arith.constant 0 : index
    %c0_7 = arith.constant 0 : index
    %16 = vector.load %arg8[%c0_6, %c0_7] : memref<2x320xf32, #tpu.memory_space<vmem>>, vector<2x320xf32>
    tpu.vector_store %arg8[%c0_6, %c0_7], %15 {strides = array<i32>} : memref<2x320xf32, #tpu.memory_space<vmem>>, vector<2x320xf32>,
    %c0_8 = arith.constant 0 : index
    %c0_9 = arith.constant 0 : index
    %17 = vector.load %arg4[%c0_8, %c0_9] : memref<384x128xf32, #tpu.memory_space<vmem>>, vector<384x128xf32>
    %cst_10 = arith.constant dense<0.000000e+00> : vector<2x128xf32>
    %18 = tpu.matmul %14, %17, %cst_10 {dimension_numbers = #tpu.dot_dimension_numbers<[1], [0], [0], [1], [0, 0, 1, 1], [], []>} : vector<2x384xf32>, vector<384x128xf32>, vector<2x128xf32> -> vector<2x128xf32>
    %c0_11 = arith.constant 0 : index
    %c0_12 = arith.constant 0 : index
    %19 = vector.load %arg5[%c0_11, %c0_12] : memref<1x128xf32, #tpu.memory_space<vmem>>, vector<1x128xf32>
    %20 = vector.broadcast %19 : vector<1x128xf32> to vector<2x128xf32>
    %21 = arith.addf %18, %20 : vector<2x128xf32>
    %cst_13 = arith.constant 0.000000e+00 : f32
    %22 = vector.broadcast %cst_13 : f32 to vector<2x128xf32>
    %23 = arith.maximumf %21, %22 : vector<2x128xf32>
    %24 = vector.extract_strided_slice %23 {offsets = [0, 0], sizes = [2, 50], strides = [1, 1]} : vector<2x128xf32> to vector<2x50xf32>
    %c0_14 = arith.constant 0 : index
    %c0_15 = arith.constant 0 : index
    %25 = vector.load %arg9[%c0_14, %c0_15] : memref<2x50xf32, #tpu.memory_space<vmem>>, vector<2x50xf32>
    tpu.vector_store %arg9[%c0_14, %c0_15], %24 {strides = array<i32>} : memref<2x50xf32, #tpu.memory_space<vmem>>, vector<2x50xf32>,
    %c0_16 = arith.constant 0 : index
    %c0_17 = arith.constant 0 : index
    %26 = vector.load %arg6[%c0_16, %c0_17] : memref<128x128xf32, #tpu.memory_space<vmem>>, vector<128x128xf32>
    %cst_18 = arith.constant dense<0.000000e+00> : vector<2x128xf32>
    %27 = tpu.matmul %23, %26, %cst_18 {dimension_numbers = #tpu.dot_dimension_numbers<[1], [0], [0], [1], [0, 0, 1, 1], [], []>} : vector<2x128xf32>, vector<128x128xf32>, vector<2x128xf32> -> vector<2x128xf32>
    %c0_19 = arith.constant 0 : index
    %c0_20 = arith.constant 0 : index
    %28 = vector.load %arg7[%c0_19, %c0_20] : memref<1x128xf32, #tpu.memory_space<vmem>>, vector<1x128xf32>
    %29 = vector.broadcast %28 : vector<1x128xf32> to vector<2x128xf32>
    %30 = arith.addf %27, %29 : vector<2x128xf32>
    %31 = vector.extract_strided_slice %30 {offsets = [0, 0], sizes = [2, 10], strides = [1, 1]} : vector<2x128xf32> to vector<2x10xf32>
    %c0_21 = arith.constant 0 : index
    %c0_22 = arith.constant 0 : index
    %32 = vector.load %arg10[%c0_21, %c0_22] : memref<2x10xf32, #tpu.memory_space<vmem>>, vector<2x10xf32>
    tpu.vector_store %arg10[%c0_21, %c0_22], %31 {strides = array<i32>} : memref<2x10xf32, #tpu.memory_space<vmem>>, vector<2x10xf32>,
    %cst_23 = arith.constant dense<0xFF800000> : vector<2xf32>
    %33 = vector.multi_reduction <maximumf>, %31, %cst_23 [1] : vector<2x10xf32> to vector<2xf32>
    %34 = vector.shape_cast %33 : vector<2xf32> to vector<2x1xf32>
    %35 = vector.broadcast %34 : vector<2x1xf32> to vector<2x10xf32>
    %36 = arith.subf %31, %35 : vector<2x10xf32>
    %37 = math.exp %36 : vector<2x10xf32>
    %cst_24 = arith.constant dense<0.000000e+00> : vector<2xf32>
    %38 = vector.multi_reduction <add>, %37, %cst_24 [1] : vector<2x10xf32> to vector<2xf32>
    %39 = vector.shape_cast %38 : vector<2xf32> to vector<2x1xf32>
    %40 = vector.broadcast %34 : vector<2x1xf32> to vector<2x10xf32>
    %41 = arith.subf %31, %40 : vector<2x10xf32>
    %42 = math.log %39 : vector<2x1xf32>
    %43 = vector.broadcast %42 : vector<2x1xf32> to vector<2x10xf32>
    %44 = arith.subf %41, %43 : vector<2x10xf32>
    %c0_25 = arith.constant 0 : index
    %c0_26 = arith.constant 0 : index
    %45 = vector.load %arg11[%c0_25, %c0_26] : memref<2x10xf32, #tpu.memory_space<vmem>>, vector<2x10xf32>
    tpu.vector_store %arg11[%c0_25, %c0_26], %44 {strides = array<i32>} : memref<2x10xf32, #tpu.memory_space<vmem>>, vector<2x10xf32>,
    return
  }
  func.func @transform_0(%arg0: i32) -> (i32, i32) {
    %c0_i32 = arith.constant 0 : i32
    %c0_i32_0 = arith.constant 0 : i32
    return %arg0, %c0_i32 : i32, i32
  }
  func.func @transform_1(%arg0: i32) -> (i32, i32) {
    %c0_i32 = arith.constant 0 : i32
    %c0_i32_0 = arith.constant 0 : i32
    %c0_i32_1 = arith.constant 0 : i32
    return %c0_i32, %c0_i32_0 : i32, i32
  }
  func.func @transform_2(%arg0: i32) -> (i32, i32) {
    %c0_i32 = arith.constant 0 : i32
    %c0_i32_0 = arith.constant 0 : i32
    %c0_i32_1 = arith.constant 0 : i32
    return %c0_i32, %c0_i32_0 : i32, i32
  }
  func.func @transform_3(%arg0: i32) -> (i32, i32) {
    %c0_i32 = arith.constant 0 : i32
    %c0_i32_0 = arith.constant 0 : i32
    %c0_i32_1 = arith.constant 0 : i32
    return %c0_i32, %c0_i32_0 : i32, i32
  }
  func.func @transform_4(%arg0: i32) -> (i32, i32) {
    %c0_i32 = arith.constant 0 : i32
    %c0_i32_0 = arith.constant 0 : i32
    %c0_i32_1 = arith.constant 0 : i32
    return %c0_i32, %c0_i32_0 : i32, i32
  }
  func.func @transform_5(%arg0: i32) -> (i32, i32) {
    %c0_i32 = arith.constant 0 : i32
    %c0_i32_0 = arith.constant 0 : i32
    %c0_i32_1 = arith.constant 0 : i32
    return %c0_i32, %c0_i32_0 : i32, i32
  }
  func.func @transform_6(%arg0: i32) -> (i32, i32) {
    %c0_i32 = arith.constant 0 : i32
    %c0_i32_0 = arith.constant 0 : i32
    %c0_i32_1 = arith.constant 0 : i32
    return %c0_i32, %c0_i32_0 : i32, i32
  }
  func.func @transform_7(%arg0: i32) -> (i32, i32) {
    %c0_i32 = arith.constant 0 : i32
    %c0_i32_0 = arith.constant 0 : i32
    return %arg0, %c0_i32 : i32, i32
  }
  func.func @transform_8(%arg0: i32) -> (i32, i32) {
    %c0_i32 = arith.constant 0 : i32
    %c0_i32_0 = arith.constant 0 : i32
    return %arg0, %c0_i32 : i32, i32
  }
  func.func @transform_9(%arg0: i32) -> (i32, i32) {
    %c0_i32 = arith.constant 0 : i32
    %c0_i32_0 = arith.constant 0 : i32
    return %arg0, %c0_i32 : i32, i32
  }
  func.func @transform_10(%arg0: i32) -> (i32, i32) {
    %c0_i32 = arith.constant 0 : i32
    %c0_i32_0 = arith.constant 0 : i32
    return %arg0, %c0_i32 : i32, i32
  }
}

</mosaic_0001>

<bundles_post_ra>
// kernel: cnnmnist_forward.2
= control target key start
LH: loop header
LB: loop body
LE: loop exit
PB: predicated region body
PF: predicated region fallthrough
CT: control target
= control target key end

     0   :  { %8 = vsyncpa [#allocation3], 0  ;;  %s906_s12 = smov [#allocation2]   ;;  %s1155_s0 = inlined_call_operand.vmem [shape: f32[2,36,144], index: 0, kind: input, shape index: {}]   ;;  %s1156_s1 = inlined_call_operand.hbm [shape: f32[4,16,36], index: 1, kind: input, shape index: {}]   ;;  %s1157_s2 = inlined_call_operand.vmem [shape: f32[16,1], index: 2, kind: input, shape index: {}]   ;;  %s1158_s3 = inlined_call_operand.vmem [shape: f32[2,10,144], index: 3, kind: output, shape index: {}]  }
   0x1   :  { %s16_s13 = sshll.u32 %s906_s12, 4  ;;  %s882_s16 = scalar_lea.hbm %s1156_s1, 1024  ;;  %s17_s13 = int_to_ptr.vmem [resolvable:$true] %s16_s13 }
   0x2   :  { %p883_p0 = scmp.ne.s32.totalorder %s1156_s1, %s882_s16  ;;  %p886_p1 = scmp.lt.u32.totalorder %s882_s16, %s1156_s1 }
   0x4   :  { %p888_p2 = pnand %p886_p1, %p883_p0 }
   0x6   :  { %891 = shalt.err (!%p888_p2)
}
   0x7   :  { %s892_s21 = scalar_lea.vmem %s17_s13, 1024  ;;  %p897_p4 = scmp.lt.s32.totalorder %s17_s13, %s17_s13 }
   0x8   :  { %p893_p3 = scmp.ne.s32.totalorder %s17_s13, %s892_s21  ;;  %p898_p5 = scmp.lt.s32.totalorder %s892_s21, %s892_s21 }
   0xa   :  { %p899_p6 = por %p898_p5, %p897_p4 }
   0xc   :  { %p900_p7 = pnand %p899_p6, %p893_p3 }
   0xe   :  { %903 = shalt.err (!%p900_p7)
}
   0xf   :  { %s907_s22 = smov 128   ;;  %s908_s23 = smov 8  }
  0x10   :  { %22 = dma.hbm_to_vmem [thread:$0]  %s1156_s1, 1024, %s17_s13, [#allocation3], %s907_s22, %s907_s22, %s908_s23  }
  0x11   :  { %904 = dma.done.wait [#allocation3], 1024  }
  0x12   :  { %905 = vsyncadd [#allocation3], 4294966272  ;;  %v909_v0 = vmov 0.0   ;;  %v910_v1 = vmov 0   ;;  %v29_v2 = vld [vmem:[%s1155_s0 + $0x8] sm:$0xff]  ;;  %v31_v3 = vld [vmem:[%s1155_s0 + $0x18] sm:$0xff] }
  0x13   :  { %128 = vmatprep.mubr.f32.mxu0 %v909_v0  ;;  %211 = vmatprep.mubr.f32.mxu1 %v909_v0  ;;  %v39_v4 = vld [vmem:[%s1155_s0 + $0x58] sm:$0xff]  ;;  %v954_v5 = vpack.c.bf16 %v31_v3, %v29_v2  ;;  %v41_v6 = vld [vmem:[%s1155_s0 + $0x68] sm:$0xff]  ;;  %v28_v7 = vld [vmem:[%s1155_s0] sm:$0xff]  ;;  %vm57_vm0 = vcmask 1043456   ;;  %vm50_vm1 = vcmask 293888   ;;  %vm766_vm2 = vcmask 130048  }
  0x14   :  { %881 = vset.pattern.permute.xlu0 %v910_v1  ;;  %v30_v8 = vld [vmem:[%s1155_s0 + $0x10] sm:$0xff]  ;;  %v965_v9 = vpack.c.bf16 %v41_v6, %v39_v4  ;;  %v40_v12 = vld [vmem:[%s1155_s0 + $0x60] sm:$0xff]  ;;  %v33_v13 = vld [vmem:[%s1155_s0 + $0x28] sm:$0xff]  ;;  %vm769_vm3 = vcmask 123904  }
  0x15   :  { %v967_v10 = vpack.c.bf16 %v30_v8, %v28_v7  ;;  %v38_v11 = vld [vmem:[%s1155_s0 + $0x50] sm:$0xff]  ;;  %813 = vmatprep.subr.bf16.mxu0 %v954_v5  ;;  %v35_v15 = vld [vmem:[%s1155_s0 + $0x38] sm:$0xff]  ;;  %v45_v17 = vld [vmem:[%s1155_s0 + $0x88] sm:$0xff] }
  0x16   :  { %v979_v14 = vpack.c.bf16 %v40_v12, %v38_v11  ;;  %v43_v16 = vld [vmem:[%s1155_s0 + $0x78] sm:$0xff]  ;;  %821 = vmatprep.subr.bf16.mxu1 %v965_v9  ;;  %v992_v18 = vpack.c.bf16 %v35_v15, %v33_v13  ;;  %v32_v20 = vld [vmem:[%s1155_s0 + $0x20] sm:$0xff]  ;;  %v34_v21 = vld [vmem:[%s1155_s0 + $0x30] sm:$0xff] }
  0x17   :  { %815 = vmatpush1.bf16.msra.mxu0 %v967_v10  ;;  %v994_v19 = vpack.c.bf16 %v45_v17, %v43_v16  ;;  %v42_v22 = vld [vmem:[%s1155_s0 + $0x70] sm:$0xff]  ;;  %v1006_v23 = vpack.c.bf16 %v34_v21, %v32_v20  ;;  %v44_v24 = vld [vmem:[%s1155_s0 + $0x80] sm:$0xff]  ;;  %v1018_v26 = vld [vmem:[%s1155_s0 + $0x48] sm:$0xf] }
  0x18   :  { %823 = vmatpush1.bf16.msra.mxu1 %v979_v14  ;;  %817 = vmatprep.subr.bf16.mxu0 %v992_v18  ;;  %v1013_v25 = vpack.c.bf16 %v44_v24, %v42_v22  ;;  %v1023_v27 = vld [vmem:[%s1155_s0 + $0x98] sm:$0xf]  ;;  %v1032_v28 = vld [vmem:[%s1155_s0 + $0x40] sm:$0xf]  ;;  %v1042_v30 = vld [vmem:[%s1155_s0 + $0x90] sm:$0xf] }
  0x19   :  { %825 = vmatprep.subr.bf16.mxu1 %v994_v19  ;;  %v737_v29 = vld [vmem:[%s1157_s2] sm:$0xff]  ;;  %v49_v32 = vld [vmem:[#allocation2 + $0x8] sm:$0xff]  ;;  %v225_v34 = vld [vmem:[#allocation2 + $0x10] sm:$0xff] }
  0x1a   :  { %v48_v31 = vld [vmem:[#allocation2] sm:$0xff]  ;;  %741 = vperm.xlu0 %881, %v737_v29   ;;  %v738_v33 = vld [vmem:[%s1157_s2 + $0x8] sm:$0xff]  ;;  %v226_v35 = vld [vmem:[#allocation2 + $0x18] sm:$0xff] }
  0x1b   :  { %819 = vmatpush1.bf16.msra.mxu0 %v1006_v23  ;;  %v396_v36 = vld [vmem:[#allocation2 + $0x20] sm:$0xff]  ;;  %v397_v37 = vld [vmem:[#allocation2 + $0x28] sm:$0xff]  ;;  %v567_v38 = vld [vmem:[#allocation2 + $0x30] sm:$0xff] }
  0x1c   :  { %827 = vmatpush1.bf16.msra.mxu1 %v1013_v25  ;;  %780 = vmatprep.subr.msk.mxu0 %vm57_vm0, %v1018_v26  ;;  %v568_v39 = vld [vmem:[#allocation2 + $0x38] sm:$0xff] }
  0x1d   :  { %784 = vmatprep.subr.msk.mxu1 %vm57_vm0, %v1023_v27 }
  0x1e   :  { %746 = vperm.xlu0 %881, %v738_v33  }
  0x1f   :  { %781 = vmatpush1.msk.msra.mxu0 %vm57_vm0, %v1032_v28 }
  0x20   :  { %785 = vmatpush1.msk.msra.mxu1 %vm57_vm0, %v1042_v30  ;;  %782 = vmatmul.mubr.msk.f32.vlgmr.msra.gmra.mrb[0].mxu0 %vm50_vm1, %v48_v31 }
  0x21   :  { %786 = vmatmul.mubr.msk.f32.vlgmr.msra.gmra.mrb[0].mxu1 %vm50_vm1, %v48_v31  ;;  %829 = vmatprep.subr.bf16.mxu0 %v954_v5 }
  0x22   :  { %837 = vmatprep.subr.bf16.mxu1 %v965_v9  ;;  %831 = vmatpush1.bf16.msra.mxu0 %v967_v10 }
  0x23   :  { %839 = vmatpush1.bf16.msra.mxu1 %v979_v14  ;;  %833 = vmatprep.subr.bf16.mxu0 %v992_v18 }
  0x24   :  { %841 = vmatprep.subr.bf16.mxu1 %v994_v19  ;;  %134 = vmatprep.mubr.f32.mxu0 %v909_v0 }
  0x25   :  { %217 = vmatprep.mubr.f32.mxu1 %v909_v0  ;;  %783 = vmatmul.mubr.msk.f32.gmra.mrb[2].mxu0 %vm50_vm1, %v49_v32 }
  0x26   :  { %835 = vmatpush1.bf16.msra.mxu0 %v1006_v23  ;;  %787 = vmatmul.mubr.msk.f32.gmra.mrb[2].mxu1 %vm50_vm1, %v49_v32 }
  0x27   :  { %843 = vmatpush1.bf16.msra.mxu1 %v1013_v25  ;;  %788 = vmatprep.subr.msk.mxu0 %vm57_vm0, %v1018_v26 }
  0x28   :  { %792 = vmatprep.subr.msk.mxu1 %vm57_vm0, %v1023_v27  ;;  %297 = vmatprep.mubr.f32.mxu0 %v909_v0 }
  0x29   :  { %374 = vmatprep.mubr.f32.mxu1 %v909_v0 }
  0x2a   :  { %789 = vmatpush1.msk.msra.mxu0 %vm57_vm0, %v1032_v28 }
  0x2b   :  { %793 = vmatpush1.msk.msra.mxu1 %vm57_vm0, %v1042_v30  ;;  %790 = vmatmul.mubr.msk.f32.vlgmr.msra.gmra.mrb[4].mxu0 %vm50_vm1, %v225_v34 }
  0x2c   :  { %794 = vmatmul.mubr.msk.f32.vlgmr.msra.gmra.mrb[4].mxu1 %vm50_vm1, %v225_v34  ;;  %845 = vmatprep.subr.bf16.mxu0 %v954_v5 }
  0x2d   :  { %853 = vmatprep.subr.bf16.mxu1 %v965_v9  ;;  %847 = vmatpush1.bf16.msra.mxu0 %v967_v10 }
  0x2e   :  { %855 = vmatpush1.bf16.msra.mxu1 %v979_v14  ;;  %303 = vmatprep.mubr.f32.mxu0 %v909_v0 }
  0x2f   :  { %380 = vmatprep.mubr.f32.mxu1 %v909_v0  ;;  %791 = vmatmul.mubr.msk.f32.gmra.mrb[6].mxu0 %vm50_vm1, %v226_v35 }
  0x30   :  { %795 = vmatmul.mubr.msk.f32.gmra.mrb[6].mxu1 %vm50_vm1, %v226_v35  ;;  %849 = vmatprep.subr.bf16.mxu0 %v992_v18 }
  0x31   :  { %857 = vmatprep.subr.bf16.mxu1 %v994_v19  ;;  %851 = vmatpush1.bf16.msra.mxu0 %v1006_v23 }
  0x32   :  { %859 = vmatpush1.bf16.msra.mxu1 %v1013_v25  ;;  %796 = vmatprep.subr.msk.mxu0 %vm57_vm0, %v1018_v26 }
  0x33   :  { %800 = vmatprep.subr.msk.mxu1 %vm57_vm0, %v1023_v27  ;;  %468 = vmatprep.mubr.f32.mxu0 %v909_v0 }
  0x34   :  { %545 = vmatprep.mubr.f32.mxu1 %v909_v0 }
  0x35   :  { %797 = vmatpush1.msk.msra.mxu0 %vm57_vm0, %v1032_v28 }
  0x36   :  { %801 = vmatpush1.msk.msra.mxu1 %vm57_vm0, %v1042_v30  ;;  %798 = vmatmul.mubr.msk.f32.vlgmr.msra.gmra.mrb[8].mxu0 %vm50_vm1, %v396_v36 }
  0x37   :  { %802 = vmatmul.mubr.msk.f32.vlgmr.msra.gmra.mrb[8].mxu1 %vm50_vm1, %v396_v36  ;;  %861 = vmatprep.subr.bf16.mxu0 %v954_v5 }
  0x38   :  { %869 = vmatprep.subr.bf16.mxu1 %v965_v9  ;;  %863 = vmatpush1.bf16.msra.mxu0 %v967_v10 }
  0x39   :  { %871 = vmatpush1.bf16.msra.mxu1 %v979_v14  ;;  %474 = vmatprep.mubr.f32.mxu0 %v909_v0 }
  0x3a   :  { %551 = vmatprep.mubr.f32.mxu1 %v909_v0  ;;  %799 = vmatmul.mubr.msk.f32.gmra.mrb[10].mxu0 %vm50_vm1, %v397_v37 }
  0x3b   :  { %803 = vmatmul.mubr.msk.f32.gmra.mrb[10].mxu1 %vm50_vm1, %v397_v37  ;;  %865 = vmatprep.subr.bf16.mxu0 %v992_v18 }
  0x3c   :  { %873 = vmatprep.subr.bf16.mxu1 %v994_v19  ;;  %867 = vmatpush1.bf16.msra.mxu0 %v1006_v23 }
  0x3d   :  { %875 = vmatpush1.bf16.msra.mxu1 %v1013_v25  ;;  %804 = vmatprep.subr.msk.mxu0 %vm57_vm0, %v1018_v26 }
  0x3e   :  { %808 = vmatprep.subr.msk.mxu1 %vm57_vm0, %v1023_v27  ;;  %639 = vmatprep.mubr.f32.mxu0 %v909_v0 }
  0x3f   :  { %716 = vmatprep.mubr.f32.mxu1 %v909_v0 }
  0x40   :  { %805 = vmatpush1.msk.msra.mxu0 %vm57_vm0, %v1032_v28 }
  0x41   :  { %809 = vmatpush1.msk.msra.mxu1 %vm57_vm0, %v1042_v30  ;;  %806 = vmatmul.mubr.msk.f32.vlgmr.msra.gmra.mrb[12].mxu0 %vm50_vm1, %v567_v38 }
  0x42   :  { %810 = vmatmul.mubr.msk.f32.vlgmr.msra.gmra.mrb[12].mxu1 %vm50_vm1, %v567_v38  ;;  %645 = vmatprep.mubr.f32.mxu0 %v909_v0 }
  0x43   :  { %722 = vmatprep.mubr.f32.mxu1 %v909_v0 }
  0x45   :  { %807 = vmatmul.mubr.msk.f32.gmra.mrb[14].mxu0 %vm50_vm1, %v568_v39 }
  0x46   :  { %811 = vmatmul.mubr.msk.f32.gmra.mrb[14].mxu1 %vm50_vm1, %v568_v39 }
  0x99   :  { %v742_v16 = vpop.permute.xlu0 %741 }
  0x9d   :  { %v747_v36 = vpop.permute.xlu0 %746 }
  0xf3   :  { %v130_v40 = vpop.f32.mrb[0].mxu0 }
  0xf4   :  { %v213_v41 = vpop.f32.mrb[0].mxu1  ;;  %v132_v42 = vpop.f32.mrb[1].mxu0 }
  0xf5   :  { %v215_v43 = vpop.f32.mrb[1].mxu1 }
  0xf8   :  { %v136_v44 = vpop.f32.mrb[2].mxu0 }
  0xf9   :  { %v219_v45 = vpop.f32.mrb[2].mxu1  ;;  %v138_v46 = vpop.f32.mrb[3].mxu0 }
  0xfa   :  { %v221_v47 = vpop.f32.mrb[3].mxu1 }
  0xfe   :  { %v299_v48 = vpop.f32.mrb[4].mxu0 }
  0xff   :  { %v387_v49 = vmax.f32 %v130_v40, %v299_v48  ;;  %v376_v50 = vpop.f32.mrb[4].mxu1  ;;  %v301_v51 = vpop.f32.mrb[5].mxu0 }
 0x100   :  { %v391_v52 = vmax.f32 %v213_v41, %v376_v50  ;;  %v388_v53 = vmax.f32 %v132_v42, %v301_v51  ;;  %v378_v54 = vpop.f32.mrb[5].mxu1 }
 0x101   :  { %v392_v55 = vmax.f32 %v215_v43, %v378_v54 }
 0x102   :  { %v305_v56 = vpop.f32.mrb[6].mxu0 }
 0x103   :  { %v389_v57 = vmax.f32 %v136_v44, %v305_v56  ;;  %v382_v58 = vpop.f32.mrb[6].mxu1  ;;  %v307_v59 = vpop.f32.mrb[7].mxu0 }
 0x104   :  { %v393_v60 = vmax.f32 %v219_v45, %v382_v58  ;;  %v390_v61 = vmax.f32 %v138_v46, %v307_v59  ;;  %v384_v62 = vpop.f32.mrb[7].mxu1 }
 0x105   :  { %v394_v63 = vmax.f32 %v221_v47, %v384_v62 }
 0x109   :  { %v470_v0 = vpop.f32.mrb[8].mxu0 }
 0x10a   :  { %v558_v1 = vmax.f32 %v387_v49, %v470_v0  ;;  %v547_v2 = vpop.f32.mrb[8].mxu1  ;;  %v472_v3 = vpop.f32.mrb[9].mxu0 }
 0x10b   :  { %v562_v4 = vmax.f32 %v391_v52, %v547_v2  ;;  %v559_v5 = vmax.f32 %v388_v53, %v472_v3  ;;  %v549_v6 = vpop.f32.mrb[9].mxu1 }
 0x10c   :  { %v563_v7 = vmax.f32 %v392_v55, %v549_v6 }
 0x10d   :  { %v476_v8 = vpop.f32.mrb[10].mxu0 }
 0x10e   :  { %v560_v9 = vmax.f32 %v389_v57, %v476_v8  ;;  %v553_v10 = vpop.f32.mrb[10].mxu1  ;;  %v478_v11 = vpop.f32.mrb[11].mxu0 }
 0x10f   :  { %v564_v12 = vmax.f32 %v393_v60, %v553_v10  ;;  %v561_v13 = vmax.f32 %v390_v61, %v478_v11  ;;  %v555_v14 = vpop.f32.mrb[11].mxu1 }
 0x110   :  { %v565_v15 = vmax.f32 %v394_v63, %v555_v14 }
 0x114   :  { %v641_v17 = vpop.f32.mrb[12].mxu0 }
 0x115   :  { %v729_v18 = vmax.f32 %v558_v1, %v641_v17  ;;  %v718_v19 = vpop.f32.mrb[12].mxu1  ;;  %v643_v20 = vpop.f32.mrb[13].mxu0 }
 0x116   :  { %v733_v21 = vmax.f32 %v562_v4, %v718_v19  ;;  %v730_v22 = vmax.f32 %v559_v5, %v643_v20  ;;  %v720_v23 = vpop.f32.mrb[13].mxu1 }
 0x117   :  { %v749_v24 = vadd.f32 %v742_v16, %v729_v18  ;;  %v734_v25 = vmax.f32 %v563_v7, %v720_v23 }
 0x118   :  { %v753_v26 = vadd.f32 %v742_v16, %v733_v21  ;;  %v750_v27 = vadd.f32 %v742_v16, %v730_v22  ;;  %v647_v28 = vpop.f32.mrb[14].mxu0 }
 0x119   :  { %v757_v29 = vmax.f32 %v749_v24, 0.0  ;;  %v754_v30 = vadd.f32 %v742_v16, %v734_v25  ;;  %v731_v31 = vmax.f32 %v560_v9, %v647_v28  ;;  %v724_v32 = vpop.f32.mrb[14].mxu1  ;;  %v649_v33 = vpop.f32.mrb[15].mxu0 }
 0x11a   :  { %v761_v34 = vmax.f32 %v753_v26, 0.0  ;;  %v758_v35 = vmax.f32 %v750_v27, 0.0  ;;  %v735_v37 = vmax.f32 %v564_v12, %v724_v32  ;;  %v732_v38 = vmax.f32 %v561_v13, %v649_v33  ;;  %v726_v39 = vpop.f32.mrb[15].mxu1 }
 0x11b   :  { %765 = vst [vmem:[%s1158_s3] sm:$0xff] %v757_v29  ;;  %v762_v40 = vmax.f32 %v754_v30, 0.0  ;;  %v751_v41 = vadd.f32 %v747_v36, %v731_v31  ;;  %v736_v42 = vmax.f32 %v565_v15, %v726_v39 }
 0x11c   :  { %771 = vst [vmem:[%s1158_s3 + $0x20] sm:$0xff] %v761_v34  ;;  %767 = vst.msk [vmem:[%s1158_s3 + $0x8] sm:$0xff] %vm766_vm2, %v758_v35  ;;  %v755_v43 = vadd.f32 %v747_v36, %v735_v37  ;;  %v752_v44 = vadd.f32 %v747_v36, %v732_v38 }
 0x11d   :  { %772 = vst.msk [vmem:[%s1158_s3 + $0x28] sm:$0xff] %vm766_vm2, %v762_v40  ;;  %v759_v45 = vmax.f32 %v751_v41, 0.0  ;;  %v756_v46 = vadd.f32 %v747_v36, %v736_v42 }
 0x11e   :  { %v763_v47 = vmax.f32 %v755_v43, 0.0  ;;  %v760_v48 = vmax.f32 %v752_v44, 0.0 }
 0x11f   :  { %768 = vst [vmem:[%s1158_s3 + $0x10] sm:$0x3] %v759_v45  ;;  %v764_v49 = vmax.f32 %v756_v46, 0.0 }
 0x120   :  { %773 = vst [vmem:[%s1158_s3 + $0x30] sm:$0x3] %v763_v47  ;;  %770 = vst.msk [vmem:[%s1158_s3 + $0x18] sm:$0x3] %vm769_vm3, %v760_v48 }
 0x121   :  { %774 = vst.msk [vmem:[%s1158_s3 + $0x38] sm:$0x3] %vm769_vm3, %v764_v49 }
 0x122   :  { %779 = vsyncpa [#allocation3], 1 }

// kernel: cnnmnist_forward.3
= control target key start
LH: loop header
LB: loop body
LE: loop exit
PB: predicated region body
PF: predicated region fallthrough
CT: control target
= control target key end

     0   :  { %16 = vsyncpa [#allocation3], 0  ;;  %s8431_s0 = inlined_call_operand.vmem [shape: f32[2,1440], index: 0, kind: input, shape index: {}]   ;;  %s8432_s1 = inlined_call_operand.hbm [shape: f32[1440,1536], index: 1, kind: input, shape index: {}]   ;;  %s8433_s2 = inlined_call_operand.hbm [shape: f32[1,384], index: 2, kind: input, shape index: {}]   ;;  %s8434_s3 = inlined_call_operand.hbm [shape: f32[384,128], index: 3, kind: input, shape index: {}]   ;;  %s8435_s4 = inlined_call_operand.hbm [shape: f32[1,128], index: 4, kind: input, shape index: {}]   ;;  %s8436_s5 = inlined_call_operand.hbm [shape: f32[128,128], index: 5, kind: input, shape index: {}]   ;;  %s8437_s6 = inlined_call_operand.hbm [shape: f32[1,128], index: 6, kind: input, shape index: {}]   ;;  %s8438_s7 = inlined_call_operand.hbm [shape: f32[2,320], index: 7, kind: output, shape index: {0}]   ;;  %s8439_s8 = inlined_call_operand.hbm [shape: f32[2,50], index: 8, kind: output, shape index: {1}]   ;;  %s8440_s9 = inlined_call_operand.hbm [shape: f32[2,10], index: 9, kind: output, shape index: {2}]   ;;  %s8441_s10 = inlined_call_operand.hbm [shape: f32[2,10], index: 10, kind: output, shape index: {3}]  }
   0x1   :  { %17 = vsyncpa [#allocation6], 0 }
   0x2   :  { %18 = vsyncpa [#allocation9], 0 }
   0x3   :  { %19 = vsyncpa [#allocation12], 0 }
   0x4   :  { %20 = vsyncpa [#allocation4], 0 }
   0x5   :  { %21 = vsyncpa [#allocation15], 0 }
   0x6   :  { %22 = vsyncpa [#allocation18], 0  ;;  %s8025_s13 = smov [#allocation5]   ;;  %s8026_s15 = smov [#allocation8]  }
   0x7   :  { %s43_s14 = sshll.u32 %s8025_s13, 4  ;;  %s65_s16 = sshll.u32 %s8026_s15, 4  ;;  %s44_s14 = int_to_ptr.vmem [resolvable:$true] %s43_s14  ;;  %s66_s16 = int_to_ptr.vmem [resolvable:$true] %s65_s16 }
   0x8   :  { %s7791_s19 = scalar_lea.hbm %s8433_s2, 48 }
   0x9   :  { %p7792_p0 = scmp.ne.s32.totalorder %s8433_s2, %s7791_s19  ;;  %p7795_p1 = scmp.lt.u32.totalorder %s7791_s19, %s8433_s2 }
   0xb   :  { %p7797_p2 = pnand %p7795_p1, %p7792_p0 }
   0xd   :  { %7800 = shalt.err (!%p7797_p2)
}
   0xe   :  { %s7801_s24 = scalar_lea.vmem %s44_s14, 48  ;;  %s7805_s25 = scalar_lea.vmem %s44_s14, 64 }
   0xf   :  { %p7802_p3 = scmp.ne.s32.totalorder %s44_s14, %s7801_s24  ;;  %p7806_p4 = scmp.lt.s32.totalorder %s44_s14, %s44_s14 }
  0x10   :  { %p7807_p5 = scmp.lt.s32.totalorder %s7805_s25, %s7801_s24 }
  0x12   :  { %p7808_p6 = por %p7807_p5, %p7806_p4 }
  0x14   :  { %p7809_p7 = pnand %p7808_p6, %p7802_p3 }
  0x16   :  { %7812 = shalt.err (!%p7809_p7)
}
  0x17   :  { %46 = dma.hbm_to_vmem [thread:$0]  %s8433_s2, 48, %s44_s14, [#allocation6]  }
  0x18   :  { %s7813_s30 = scalar_lea.hbm %s8435_s4, 16 }
  0x19   :  { %p7814_p8 = scmp.ne.s32.totalorder %s8435_s4, %s7813_s30  ;;  %p7817_p9 = scmp.lt.u32.totalorder %s7813_s30, %s8435_s4 }
  0x1b   :  { %p7819_p10 = pnand %p7817_p9, %p7814_p8 }
  0x1d   :  { %7822 = shalt.err (!%p7819_p10)
}
  0x1e   :  { %s7823_s17 = scalar_lea.vmem %s66_s16, 16  ;;  %s7827_s18 = scalar_lea.vmem %s66_s16, 32 }
  0x1f   :  { %p7824_p11 = scmp.ne.s32.totalorder %s66_s16, %s7823_s17  ;;  %p7828_p12 = scmp.lt.s32.totalorder %s66_s16, %s66_s16 }
  0x20   :  { %p7829_p13 = scmp.lt.s32.totalorder %s7827_s18, %s7823_s17 }
  0x22   :  { %p7830_p0 = por %p7829_p13, %p7828_p12 }
  0x24   :  { %p7831_p1 = pnand %p7830_p0, %p7824_p11 }
  0x26   :  { %7834 = shalt.err (!%p7831_p1)
}
  0x27   :  { %68 = dma.hbm_to_vmem [thread:$0]  %s8435_s4, 16, %s66_s16, [#allocation9]  }
  0x28   :  { %s8027_s19 = smov [#allocation2]   ;;  %s7835_s23 = scalar_lea.hbm %s8432_s1, 276480 }
  0x29   :  { %s30_s20 = sshll.u32 %s8027_s19, 4  ;;  %p7836_p2 = scmp.ne.s32.totalorder %s8432_s1, %s7835_s23  ;;  %s31_s20 = int_to_ptr.vmem [resolvable:$true] %s30_s20 }
  0x2a   :  { %p7839_p3 = scmp.lt.u32.totalorder %s7835_s23, %s8432_s1 }
  0x2c   :  { %p7841_p4 = pnand %p7839_p3, %p7836_p2 }
  0x2e   :  { %7844 = shalt.err (!%p7841_p4)
}
  0x2f   :  { %s7845_s28 = scalar_lea.vmem %s31_s20, 276480  ;;  %p7850_p6 = scmp.lt.s32.totalorder %s31_s20, %s31_s20 }
  0x30   :  { %p7846_p5 = scmp.ne.s32.totalorder %s31_s20, %s7845_s28  ;;  %p7851_p7 = scmp.lt.s32.totalorder %s7845_s28, %s7845_s28 }
  0x32   :  { %p7852_p8 = por %p7851_p7, %p7850_p6 }
  0x34   :  { %p7853_p9 = pnand %p7852_p8, %p7846_p5 }
  0x36   :  { %7856 = shalt.err (!%p7853_p9)
}
  0x37   :  { %s8028_s4 = smov 1536   ;;  %s8029_s16 = smov 96  }
  0x38   :  { %36 = dma.hbm_to_vmem [thread:$0]  %s8432_s1, 276480, %s31_s20, [#allocation3], %s8028_s4, %s8028_s4, %s8029_s16  }
  0x39   :  { %s8030_s11 = smov [#allocation7]   ;;  %s7857_s17 = scalar_lea.hbm %s8434_s3, 6144 }
  0x3a   :  { %s52_s12 = sshll.u32 %s8030_s11, 4  ;;  %p7858_p10 = scmp.ne.s32.totalorder %s8434_s3, %s7857_s17  ;;  %s53_s12 = int_to_ptr.vmem [resolvable:$true] %s52_s12 }
  0x3b   :  { %p7861_p11 = scmp.lt.u32.totalorder %s7857_s17, %s8434_s3 }
  0x3d   :  { %p7863_p12 = pnand %p7861_p11, %p7858_p10 }
  0x3f   :  { %7866 = shalt.err (!%p7863_p12)
}
  0x40   :  { %s7867_s21 = scalar_lea.vmem %s53_s12, 6144  ;;  %p7872_p0 = scmp.lt.s32.totalorder %s53_s12, %s53_s12 }
  0x41   :  { %p7868_p13 = scmp.ne.s32.totalorder %s53_s12, %s7867_s21  ;;  %p7873_p1 = scmp.lt.s32.totalorder %s7867_s21, %s7867_s21 }
  0x43   :  { %p7874_p2 = por %p7873_p1, %p7872_p0 }
  0x45   :  { %p7875_p3 = pnand %p7874_p2, %p7868_p13 }
  0x47   :  { %7878 = shalt.err (!%p7875_p3)
}
  0x48   :  { %s8031_s1 = smov 128   ;;  %s8032_s20 = smov 8  }
  0x49   :  { %58 = dma.hbm_to_vmem [thread:$0]  %s8434_s3, 6144, %s53_s12, [#allocation6], %s8031_s1, %s8031_s1, %s8032_s20  }
  0x4a   :  { %s8033_s24 = smov [#allocation10]   ;;  %s8034_s26 = smov [#allocation11]  }
  0x4b   :  { %s74_s25 = sshll.u32 %s8033_s24, 4  ;;  %s87_s27 = sshll.u32 %s8034_s26, 4  ;;  %s75_s25 = int_to_ptr.vmem [resolvable:$true] %s74_s25  ;;  %s88_s27 = int_to_ptr.vmem [resolvable:$true] %s87_s27 }
  0x4c   :  { %s7879_s16 = scalar_lea.hbm %s8436_s5, 2048 }
  0x4d   :  { %p7880_p4 = scmp.ne.s32.totalorder %s8436_s5, %s7879_s16  ;;  %p7883_p5 = scmp.lt.u32.totalorder %s7879_s16, %s8436_s5 }
  0x4f   :  { %p7885_p6 = pnand %p7883_p5, %p7880_p4 }
  0x51   :  { %7888 = shalt.err (!%p7885_p6)
}
  0x52   :  { %s7889_s3 = scalar_lea.vmem %s75_s25, 2048  ;;  %p7894_p8 = scmp.lt.s32.totalorder %s75_s25, %s75_s25 }
  0x53   :  { %p7890_p7 = scmp.ne.s32.totalorder %s75_s25, %s7889_s3  ;;  %p7895_p9 = scmp.lt.s32.totalorder %s7889_s3, %s7889_s3 }
  0x55   :  { %p7896_p10 = por %p7895_p9, %p7894_p8 }
  0x57   :  { %p7897_p11 = pnand %p7896_p10, %p7890_p7 }
  0x59   :  { %7900 = shalt.err (!%p7897_p11)
}
  0x5a   :  { %80 = dma.hbm_to_vmem [thread:$0]  %s8436_s5, 2048, %s75_s25, [#allocation9], %s8031_s1, %s8031_s1, %s8032_s20  }
  0x5b   :  { %s7901_s2 = scalar_lea.hbm %s8437_s6, 16 }
  0x5c   :  { %p7902_p12 = scmp.ne.s32.totalorder %s8437_s6, %s7901_s2  ;;  %p7905_p13 = scmp.lt.u32.totalorder %s7901_s2, %s8437_s6 }
  0x5e   :  { %p7907_p0 = pnand %p7905_p13, %p7902_p12 }
  0x60   :  { %7910 = shalt.err (!%p7907_p0)
}
  0x61   :  { %s7911_s23 = scalar_lea.vmem %s88_s27, 16  ;;  %s7915_s24 = scalar_lea.vmem %s88_s27, 32 }
  0x62   :  { %p7912_p1 = scmp.ne.s32.totalorder %s88_s27, %s7911_s23  ;;  %p7916_p2 = scmp.lt.s32.totalorder %s88_s27, %s88_s27 }
  0x63   :  { %p7917_p3 = scmp.lt.s32.totalorder %s7915_s24, %s7911_s23 }
  0x65   :  { %p7918_p4 = por %p7917_p3, %p7916_p2 }
  0x67   :  { %p7919_p5 = pnand %p7918_p4, %p7912_p1 }
  0x69   :  { %7922 = shalt.err (!%p7919_p5)
}
  0x6a   :  { %90 = dma.hbm_to_vmem [thread:$0]  %s8437_s6, 16, %s88_s27, [#allocation12]  }
  0x6b   :  { %8011 = dma.done.wait [#allocation3], 276480  }
  0x6c   :  { %8012 = vsyncadd [#allocation3], 4294690816 }
  0x6d   :  { %8013 = dma.done.wait [#allocation6], 6192  }
  0x6e   :  { %8014 = vsyncadd [#allocation6], 4294961104 }
  0x6f   :  { %8015 = dma.done.wait [#allocation9], 2064  }
  0x70   :  { %8016 = vsyncadd [#allocation9], 4294965232 }
  0x71   :  { %8017 = dma.done.wait [#allocation12], 16  }
  0x72   :  { %8018 = vsyncadd [#allocation12], 4294967280  ;;  %v113_v0 = vld [vmem:[#allocation2 + $0x8] sm:$0xff]  ;;  %v115_v2 = vld [vmem:[#allocation2 + $0x18] sm:$0xff]  ;;  %vm2337_vm0 = vcmask 261120   ;;  %vm8037_vm1 = vmmov 0  }
  0x73   :  { %v125_v1 = vld [vmem:[#allocation2 + $0x68] sm:$0xff]  ;;  %v127_v4 = vld [vmem:[#allocation2 + $0x78] sm:$0xff]  ;;  %v112_v5 = vld [vmem:[#allocation2] sm:$0xff]  ;;  %vm4948_vm2 = vcmask 1041408   ;;  %vm4949_vm3 = vcmask 1043458   ;;  %vm4951_vm5 = vcmask 521220  }
  0x74   :  { %v5466_v3 = vpack.c.bf16 %v125_v1, %v113_v0  ;;  %v124_v6 = vld [vmem:[#allocation2 + $0x60] sm:$0xff]  ;;  %v5826_v7 = vpack.c.bf16 %v127_v4, %v115_v2  ;;  %v114_v9 = vld [vmem:[#allocation2 + $0x10] sm:$0xff]  ;;  %v137_v11 = vld [vmem:[#allocation2 + $0xc8] sm:$0xff]  ;;  %vm5150_vm7 = vcmask 402432   ;;  %vm5245_vm8 = vcmask 74752   ;;  %s8040_s16 = smov [#allocation13]  }
  0x75   :  { %v5468_v8 = vpack.c.bf16 %v124_v6, %v112_v5  ;;  %v126_v10 = vld [vmem:[#allocation2 + $0x70] sm:$0xff]  ;;  %v149_v13 = vld [vmem:[#allocation2 + $0x128] sm:$0xff]  ;;  %v139_v14 = vld [vmem:[#allocation2 + $0xd8] sm:$0xff]  ;;  %s5266_s29 = sshll.u32 %s8040_s16, 4  ;;  %s5267_s29 = int_to_ptr.vmem [resolvable:$true] %s5266_s29 }
  0x76   :  { %5467 = vmatprep.subr.bf16.mxu0 %v5466_v3  ;;  %v5828_v12 = vpack.c.bf16 %v126_v10, %v114_v9  ;;  %v151_v15 = vld [vmem:[#allocation2 + $0x138] sm:$0xff]  ;;  %5827 = vmatprep.subr.bf16.mxu1 %v5826_v7  ;;  %v5470_v16 = vpack.c.bf16 %v149_v13, %v137_v11  ;;  %v136_v18 = vld [vmem:[#allocation2 + $0xc0] sm:$0xff]  ;;  %v138_v20 = vld [vmem:[#allocation2 + $0xd0] sm:$0xff] }
  0x77   :  { %5469 = vmatpush1.bf16.msra.mxu0 %v5468_v8  ;;  %v5830_v17 = vpack.c.bf16 %v151_v15, %v139_v14  ;;  %v148_v19 = vld [vmem:[#allocation2 + $0x120] sm:$0xff]  ;;  %v150_v22 = vld [vmem:[#allocation2 + $0x130] sm:$0xff]  ;;  %v161_v23 = vld [vmem:[#allocation2 + $0x188] sm:$0xff] }
  0x78   :  { %5829 = vmatpush1.bf16.msra.mxu1 %v5828_v12  ;;  %v5472_v21 = vpack.c.bf16 %v148_v19, %v136_v18  ;;  %v173_v24 = vld [vmem:[#allocation2 + $0x1e8] sm:$0xff]  ;;  %5471 = vmatprep.subr.bf16.mxu0 %v5470_v16  ;;  %v5832_v25 = vpack.c.bf16 %v150_v22, %v138_v20  ;;  %v163_v27 = vld [vmem:[#allocation2 + $0x198] sm:$0xff]  ;;  %v160_v29 = vld [vmem:[#allocation2 + $0x180] sm:$0xff] }
  0x79   :  { %5831 = vmatprep.subr.bf16.mxu1 %v5830_v17  ;;  %v5474_v26 = vpack.c.bf16 %v173_v24, %v161_v23  ;;  %v175_v28 = vld [vmem:[#allocation2 + $0x1f8] sm:$0xff]  ;;  %v172_v31 = vld [vmem:[#allocation2 + $0x1e0] sm:$0xff]  ;;  %v162_v32 = vld [vmem:[#allocation2 + $0x190] sm:$0xff] }
  0x7a   :  { %v5834_v30 = vpack.c.bf16 %v175_v28, %v163_v27  ;;  %v174_v33 = vld [vmem:[#allocation2 + $0x1f0] sm:$0xff]  ;;  %v5476_v34 = vpack.c.bf16 %v172_v31, %v160_v29  ;;  %v185_v35 = vld [vmem:[#allocation2 + $0x248] sm:$0xff]  ;;  %v187_v37 = vld [vmem:[#allocation2 + $0x258] sm:$0xff] }
  0x7b   :  { %5473 = vmatpush1.bf16.msra.mxu0 %v5472_v21  ;;  %v197_v36 = vld [vmem:[#allocation2 + $0x2a8] sm:$0xff]  ;;  %v5836_v38 = vpack.c.bf16 %v174_v33, %v162_v32  ;;  %v199_v40 = vld [vmem:[#allocation2 + $0x2b8] sm:$0xff]  ;;  %v184_v41 = vld [vmem:[#allocation2 + $0x240] sm:$0xff] }
  0x7c   :  { %5833 = vmatpush1.bf16.msra.mxu1 %v5832_v25  ;;  %5475 = vmatprep.subr.bf16.mxu0 %v5474_v26  ;;  %v5478_v39 = vpack.c.bf16 %v197_v36, %v185_v35  ;;  %v196_v42 = vld [vmem:[#allocation2 + $0x2a0] sm:$0xff]  ;;  %v5838_v43 = vpack.c.bf16 %v199_v40, %v187_v37  ;;  %v186_v44 = vld [vmem:[#allocation2 + $0x250] sm:$0xff]  ;;  %v209_v46 = vld [vmem:[#allocation2 + $0x308] sm:$0xff] }
  0x7d   :  { %5835 = vmatprep.subr.bf16.mxu1 %v5834_v30  ;;  %v198_v45 = vld [vmem:[#allocation2 + $0x2b0] sm:$0xff]  ;;  %v221_v47 = vld [vmem:[#allocation2 + $0x368] sm:$0xff]  ;;  %v211_v48 = vld [vmem:[#allocation2 + $0x318] sm:$0xff]  ;;  %v5480_v50 = vpack.c.bf16 %v196_v42, %v184_v41 }
  0x7e   :  { %v223_v49 = vld [vmem:[#allocation2 + $0x378] sm:$0xff]  ;;  %v5840_v51 = vpack.c.bf16 %v198_v45, %v186_v44  ;;  %v5482_v52 = vpack.c.bf16 %v221_v47, %v209_v46  ;;  %v208_v53 = vld [vmem:[#allocation2 + $0x300] sm:$0xff]  ;;  %v210_v55 = vld [vmem:[#allocation2 + $0x310] sm:$0xff]  ;;  %v8035_v46 = vmov 1983009808  }
  0x7f   :  { %5477 = vmatpush1.bf16.msra.mxu0 %v5476_v34  ;;  %v220_v54 = vld [vmem:[#allocation2 + $0x360] sm:$0xff]  ;;  %v5842_v56 = vpack.c.bf16 %v223_v49, %v211_v48  ;;  %v222_v57 = vld [vmem:[#allocation2 + $0x370] sm:$0xff]  ;;  %v233_v58 = vld [vmem:[#allocation2 + $0x3c8] sm:$0xff]  ;;  %v2277_v47 = vunpack.c.l.s4 %v8035_v46  ;;  %v2279_v48 = vlaneseq }
  0x80   :  { %5837 = vmatpush1.bf16.msra.mxu1 %v5836_v38  ;;  %5479 = vmatprep.subr.bf16.mxu0 %v5478_v39  ;;  %v245_v59 = vld [vmem:[#allocation2 + $0x428] sm:$0xff]  ;;  %v235_v60 = vld [vmem:[#allocation2 + $0x3d8] sm:$0xff]  ;;  %v5484_v62 = vpack.c.bf16 %v220_v54, %v208_v53  ;;  %v5844_v63 = vpack.c.bf16 %v222_v57, %v210_v55  ;;  %v232_v1 = vld [vmem:[#allocation2 + $0x3c0] sm:$0xff] }
  0x81   :  { %5839 = vmatprep.subr.bf16.mxu1 %v5838_v43  ;;  %v247_v61 = vld [vmem:[#allocation2 + $0x438] sm:$0xff]  ;;  %v5486_v0 = vpack.c.bf16 %v245_v59, %v233_v58  ;;  %v244_v2 = vld [vmem:[#allocation2 + $0x420] sm:$0xff]  ;;  %v234_v3 = vld [vmem:[#allocation2 + $0x3d0] sm:$0xff] }
  0x82   :  { %v5846_v4 = vpack.c.bf16 %v247_v61, %v235_v60  ;;  %v246_v5 = vld [vmem:[#allocation2 + $0x430] sm:$0xff]  ;;  %v257_v6 = vld [vmem:[#allocation2 + $0x488] sm:$0xff]  ;;  %v259_v8 = vld [vmem:[#allocation2 + $0x498] sm:$0xff]  ;;  %v5488_v10 = vpack.c.bf16 %v244_v2, %v232_v1  ;;  %v2278_v61 = vunpack.c.0.s8 %v2277_v47 }
  0x83   :  { %5481 = vmatpush1.bf16.msra.mxu0 %v5480_v50  ;;  %v269_v7 = vld [vmem:[#allocation2 + $0x4e8] sm:$0xff]  ;;  %v271_v9 = vld [vmem:[#allocation2 + $0x4f8] sm:$0xff]  ;;  %v5848_v11 = vpack.c.bf16 %v246_v5, %v234_v3  ;;  %v256_v13 = vld [vmem:[#allocation2 + $0x480] sm:$0xff] }
  0x84   :  { %5841 = vmatpush1.bf16.msra.mxu1 %v5840_v51  ;;  %5483 = vmatprep.subr.bf16.mxu0 %v5482_v52  ;;  %v5490_v12 = vpack.c.bf16 %v269_v7, %v257_v6  ;;  %v268_v14 = vld [vmem:[#allocation2 + $0x4e0] sm:$0xff]  ;;  %v258_v15 = vld [vmem:[#allocation2 + $0x490] sm:$0xff]  ;;  %v5850_v16 = vpack.c.bf16 %v271_v9, %v259_v8  ;;  %v281_v18 = vld [vmem:[#allocation2 + $0x548] sm:$0xff] }
  0x85   :  { %5843 = vmatprep.subr.bf16.mxu1 %v5842_v56  ;;  %v270_v17 = vld [vmem:[#allocation2 + $0x4f0] sm:$0xff]  ;;  %v293_v19 = vld [vmem:[#allocation2 + $0x5a8] sm:$0xff]  ;;  %v283_v20 = vld [vmem:[#allocation2 + $0x558] sm:$0xff]  ;;  %v5492_v22 = vpack.c.bf16 %v268_v14, %v256_v13 }
  0x86   :  { %v295_v21 = vld [vmem:[#allocation2 + $0x5b8] sm:$0xff]  ;;  %v5852_v23 = vpack.c.bf16 %v270_v17, %v258_v15  ;;  %v5494_v24 = vpack.c.bf16 %v293_v19, %v281_v18  ;;  %v280_v25 = vld [vmem:[#allocation2 + $0x540] sm:$0xff]  ;;  %v282_v27 = vld [vmem:[#allocation2 + $0x550] sm:$0xff] }
  0x87   :  { %5485 = vmatpush1.bf16.msra.mxu0 %v5484_v62  ;;  %v292_v26 = vld [vmem:[#allocation2 + $0x5a0] sm:$0xff]  ;;  %v5854_v28 = vpack.c.bf16 %v295_v21, %v283_v20  ;;  %v294_v29 = vld [vmem:[#allocation2 + $0x5b0] sm:$0xff]  ;;  %v305_v30 = vld [vmem:[#allocation2 + $0x608] sm:$0xff]  ;;  %v8170_v62 = vshrl.u32 %v2279_v48, 7 }
  0x88   :  { %5845 = vmatpush1.bf16.msra.mxu1 %v5844_v63  ;;  %5487 = vmatprep.subr.bf16.mxu0 %v5486_v0  ;;  %v317_v31 = vld [vmem:[#allocation2 + $0x668] sm:$0xff]  ;;  %v307_v32 = vld [vmem:[#allocation2 + $0x618] sm:$0xff]  ;;  %v5496_v34 = vpack.c.bf16 %v292_v26, %v280_v25  ;;  %v5856_v35 = vpack.c.bf16 %v294_v29, %v282_v27  ;;  %v304_v37 = vld [vmem:[#allocation2 + $0x600] sm:$0xff] }
  0x89   :  { %5847 = vmatprep.subr.bf16.mxu1 %v5846_v4  ;;  %v319_v33 = vld [vmem:[#allocation2 + $0x678] sm:$0xff]  ;;  %v5498_v36 = vpack.c.bf16 %v317_v31, %v305_v30  ;;  %v316_v38 = vld [vmem:[#allocation2 + $0x660] sm:$0xff]  ;;  %v306_v39 = vld [vmem:[#allocation2 + $0x610] sm:$0xff] }
  0x8a   :  { %v5858_v40 = vpack.c.bf16 %v319_v33, %v307_v32  ;;  %v318_v41 = vld [vmem:[#allocation2 + $0x670] sm:$0xff]  ;;  %v329_v42 = vld [vmem:[#allocation2 + $0x6c8] sm:$0xff]  ;;  %v331_v44 = vld [vmem:[#allocation2 + $0x6d8] sm:$0xff]  ;;  %v5500_v49 = vpack.c.bf16 %v316_v38, %v304_v37 }
  0x8b   :  { %5489 = vmatpush1.bf16.msra.mxu0 %v5488_v10  ;;  %v341_v43 = vld [vmem:[#allocation2 + $0x728] sm:$0xff]  ;;  %v343_v45 = vld [vmem:[#allocation2 + $0x738] sm:$0xff]  ;;  %v5860_v50 = vpack.c.bf16 %v318_v41, %v306_v39  ;;  %v328_v52 = vld [vmem:[#allocation2 + $0x6c0] sm:$0xff] }
  0x8c   :  { %5849 = vmatpush1.bf16.msra.mxu1 %v5848_v11  ;;  %5491 = vmatprep.subr.bf16.mxu0 %v5490_v12  ;;  %v5502_v51 = vpack.c.bf16 %v341_v43, %v329_v42  ;;  %v340_v53 = vld [vmem:[#allocation2 + $0x720] sm:$0xff]  ;;  %v330_v54 = vld [vmem:[#allocation2 + $0x6d0] sm:$0xff]  ;;  %v5862_v55 = vpack.c.bf16 %v343_v45, %v331_v44  ;;  %v353_v57 = vld [vmem:[#allocation2 + $0x788] sm:$0xff]  ;;  %v8173_v11 = vsub.s32 %v2278_v61, %v8170_v62 }
  0x8d   :  { %5851 = vmatprep.subr.bf16.mxu1 %v5850_v16  ;;  %v342_v56 = vld [vmem:[#allocation2 + $0x730] sm:$0xff]  ;;  %v365_v58 = vld [vmem:[#allocation2 + $0x7e8] sm:$0xff]  ;;  %v355_v59 = vld [vmem:[#allocation2 + $0x798] sm:$0xff]  ;;  %v5504_v63 = vpack.c.bf16 %v340_v53, %v328_v52 }
  0x8e   :  { %v367_v60 = vld [vmem:[#allocation2 + $0x7f8] sm:$0xff]  ;;  %v5864_v0 = vpack.c.bf16 %v342_v56, %v330_v54  ;;  %v5506_v1 = vpack.c.bf16 %v365_v58, %v353_v57  ;;  %v352_v2 = vld [vmem:[#allocation2 + $0x780] sm:$0xff]  ;;  %v354_v4 = vld [vmem:[#allocation2 + $0x790] sm:$0xff] }
  0x8f   :  { %5493 = vmatpush1.bf16.msra.mxu0 %v5492_v22  ;;  %v364_v3 = vld [vmem:[#allocation2 + $0x7e0] sm:$0xff]  ;;  %v5866_v5 = vpack.c.bf16 %v367_v60, %v355_v59  ;;  %v366_v6 = vld [vmem:[#allocation2 + $0x7f0] sm:$0xff]  ;;  %v377_v7 = vld [vmem:[#allocation2 + $0x848] sm:$0xff] }
  0x90   :  { %5853 = vmatpush1.bf16.msra.mxu1 %v5852_v23  ;;  %5495 = vmatprep.subr.bf16.mxu0 %v5494_v24  ;;  %v389_v8 = vld [vmem:[#allocation2 + $0x8a8] sm:$0xff]  ;;  %v379_v9 = vld [vmem:[#allocation2 + $0x858] sm:$0xff]  ;;  %v5508_v12 = vpack.c.bf16 %v364_v3, %v352_v2  ;;  %v376_v13 = vld [vmem:[#allocation2 + $0x840] sm:$0xff]  ;;  %v5868_v14 = vpack.c.bf16 %v366_v6, %v354_v4 }
  0x91   :  { %5855 = vmatprep.subr.bf16.mxu1 %v5854_v28  ;;  %v391_v10 = vld [vmem:[#allocation2 + $0x8b8] sm:$0xff]  ;;  %v5510_v15 = vpack.c.bf16 %v389_v8, %v377_v7  ;;  %v388_v16 = vld [vmem:[#allocation2 + $0x8a0] sm:$0xff]  ;;  %v378_v17 = vld [vmem:[#allocation2 + $0x850] sm:$0xff] }
  0x92   :  { %v390_v18 = vld [vmem:[#allocation2 + $0x8b0] sm:$0xff]  ;;  %v5870_v19 = vpack.c.bf16 %v391_v10, %v379_v9  ;;  %v401_v20 = vld [vmem:[#allocation2 + $0x908] sm:$0xff]  ;;  %v8178_v22 = vld [vmem:[%s8431_s0] sm:$0xff]  ;;  %v5512_v26 = vpack.c.bf16 %v388_v16, %v376_v13 }
  0x93   :  { %5497 = vmatpush1.bf16.msra.mxu0 %v5496_v34  ;;  %v413_v21 = vld [vmem:[#allocation2 + $0x968] sm:$0xff]  ;;  %v403_v23 = vld [vmem:[#allocation2 + $0x918] sm:$0xff]  ;;  %v8182_v25 = vrot.slane %v8178_v22, %v8173_v11  ;;  %v5872_v27 = vpack.c.bf16 %v390_v18, %v378_v17  ;;  %v400_v29 = vld [vmem:[#allocation2 + $0x900] sm:$0xff]  ;;  %v2275_v10 = vcombine.high %v8178_v22, %v8178_v22 }
  0x94   :  { %5857 = vmatpush1.bf16.msra.mxu1 %v5856_v35  ;;  %5499 = vmatprep.subr.bf16.mxu0 %v5498_v36  ;;  %v415_v24 = vld [vmem:[#allocation2 + $0x978] sm:$0xff]  ;;  %v5514_v28 = vpack.c.bf16 %v413_v21, %v401_v20  ;;  %v412_v30 = vld [vmem:[#allocation2 + $0x960] sm:$0xff]  ;;  %v402_v31 = vld [vmem:[#allocation2 + $0x910] sm:$0xff] }
  0x95   :  { %5859 = vmatprep.subr.bf16.mxu1 %v5858_v40  ;;  %v8186_v32 = vcombine.high %v8182_v25, %v8182_v25  ;;  %v5874_v33 = vpack.c.bf16 %v415_v24, %v403_v23  ;;  %v414_v34 = vld [vmem:[#allocation2 + $0x970] sm:$0xff]  ;;  %v425_v35 = vld [vmem:[#allocation2 + $0x9c8] sm:$0xff]  ;;  %v427_v37 = vld [vmem:[#allocation2 + $0x9d8] sm:$0xff]  ;;  %v5516_v39 = vpack.c.bf16 %v412_v30, %v400_v29 }
  0x96   :  { %v437_v36 = vld [vmem:[#allocation2 + $0xa28] sm:$0xff]  ;;  %v439_v38 = vld [vmem:[#allocation2 + $0xa38] sm:$0xff]  ;;  %v5876_v40 = vpack.c.bf16 %v414_v34, %v402_v31  ;;  %v424_v42 = vld [vmem:[#allocation2 + $0x9c0] sm:$0xff] }
  0x97   :  { %5501 = vmatpush1.bf16.msra.mxu0 %v5500_v49  ;;  %2404 = vmatprep.mubr.f32.mxu0 %v8186_v32  ;;  %v5518_v41 = vpack.c.bf16 %v437_v36, %v425_v35  ;;  %v436_v43 = vld [vmem:[#allocation2 + $0xa20] sm:$0xff]  ;;  %v426_v44 = vld [vmem:[#allocation2 + $0x9d0] sm:$0xff]  ;;  %v5878_v45 = vpack.c.bf16 %v439_v38, %v427_v37  ;;  %v449_v47 = vld [vmem:[#allocation2 + $0xa88] sm:$0xff] }
  0x98   :  { %5861 = vmatpush1.bf16.msra.mxu1 %v5860_v50  ;;  %5503 = vmatprep.subr.bf16.mxu0 %v5502_v51  ;;  %v438_v46 = vld [vmem:[#allocation2 + $0xa30] sm:$0xff]  ;;  %v461_v48 = vld [vmem:[#allocation2 + $0xae8] sm:$0xff]  ;;  %v451_v49 = vld [vmem:[#allocation2 + $0xa98] sm:$0xff]  ;;  %v5520_v51 = vpack.c.bf16 %v436_v43, %v424_v42 }
  0x99   :  { %5863 = vmatprep.subr.bf16.mxu1 %v5862_v55  ;;  %2830 = vmatprep.mubr.f32.mxu1 %v8186_v32  ;;  %v463_v50 = vld [vmem:[#allocation2 + $0xaf8] sm:$0xff]  ;;  %v5880_v52 = vpack.c.bf16 %v438_v46, %v426_v44  ;;  %v5522_v53 = vpack.c.bf16 %v461_v48, %v449_v47  ;;  %v448_v54 = vld [vmem:[#allocation2 + $0xa80] sm:$0xff]  ;;  %v450_v56 = vld [vmem:[#allocation2 + $0xa90] sm:$0xff] }
  0x9a   :  { %v460_v55 = vld [vmem:[#allocation2 + $0xae0] sm:$0xff]  ;;  %v5882_v57 = vpack.c.bf16 %v463_v50, %v451_v49  ;;  %v462_v58 = vld [vmem:[#allocation2 + $0xaf0] sm:$0xff]  ;;  %v473_v59 = vld [vmem:[#allocation2 + $0xb48] sm:$0xff] }
  0x9b   :  { %5505 = vmatpush1.bf16.msra.mxu0 %v5504_v63  ;;  %v485_v60 = vld [vmem:[#allocation2 + $0xba8] sm:$0xff]  ;;  %v475_v61 = vld [vmem:[#allocation2 + $0xb58] sm:$0xff]  ;;  %v472_v3 = vld [vmem:[#allocation2 + $0xb40] sm:$0xff] }
  0x9c   :  { %5865 = vmatpush1.bf16.msra.mxu1 %v5864_v0  ;;  %5507 = vmatprep.subr.bf16.mxu0 %v5506_v1  ;;  %v487_v63 = vld [vmem:[#allocation2 + $0xbb8] sm:$0xff]  ;;  %v5524_v0 = vpack.c.bf16 %v460_v55, %v448_v54  ;;  %v5884_v1 = vpack.c.bf16 %v462_v58, %v450_v56  ;;  %v5526_v2 = vpack.c.bf16 %v485_v60, %v473_v59  ;;  %v484_v4 = vld [vmem:[#allocation2 + $0xba0] sm:$0xff]  ;;  %v486_v7 = vld [vmem:[#allocation2 + $0xbb0] sm:$0xff] }
  0x9d   :  { %5867 = vmatprep.subr.bf16.mxu1 %v5866_v5  ;;  %v474_v5 = vld [vmem:[#allocation2 + $0xb50] sm:$0xff]  ;;  %v5886_v6 = vpack.c.bf16 %v487_v63, %v475_v61  ;;  %v497_v8 = vld [vmem:[#allocation2 + $0xc08] sm:$0xff]  ;;  %v511_v13 = vld [vmem:[#allocation2 + $0xc78] sm:$0xff] }
  0x9e   :  { %v509_v9 = vld [vmem:[#allocation2 + $0xc68] sm:$0xff]  ;;  %v496_v17 = vld [vmem:[#allocation2 + $0xc00] sm:$0xff]  ;;  %v510_v21 = vld [vmem:[#allocation2 + $0xc70] sm:$0xff] }
  0x9f   :  { %5509 = vmatpush1.bf16.msra.mxu0 %v5508_v12  ;;  %v499_v12 = vld [vmem:[#allocation2 + $0xc18] sm:$0xff]  ;;  %v5530_v16 = vpack.c.bf16 %v509_v9, %v497_v8  ;;  %v508_v18 = vld [vmem:[#allocation2 + $0xc60] sm:$0xff]  ;;  %v521_v23 = vld [vmem:[#allocation2 + $0xcc8] sm:$0xff] }
  0xa0   :  { %5869 = vmatpush1.bf16.msra.mxu1 %v5868_v14  ;;  %5511 = vmatprep.subr.bf16.mxu0 %v5510_v15  ;;  %v5528_v14 = vpack.c.bf16 %v484_v4, %v472_v3  ;;  %v5888_v15 = vpack.c.bf16 %v486_v7, %v474_v5  ;;  %v5890_v20 = vpack.c.bf16 %v511_v13, %v499_v12  ;;  %v533_v24 = vld [vmem:[#allocation2 + $0xd28] sm:$0xff]  ;;  %v523_v22 = vld [vmem:[#allocation2 + $0xcd8] sm:$0xff]  ;;  %v520_v31 = vld [vmem:[#allocation2 + $0xcc0] sm:$0xff] }
  0xa1   :  { %5871 = vmatprep.subr.bf16.mxu1 %v5870_v19  ;;  %v498_v19 = vld [vmem:[#allocation2 + $0xc10] sm:$0xff]  ;;  %v5534_v30 = vpack.c.bf16 %v533_v24, %v521_v23  ;;  %v545_v37 = vld [vmem:[#allocation2 + $0xd88] sm:$0xff]  ;;  %v556_v46 = vld [vmem:[#allocation2 + $0xde0] sm:$0xff] }
  0xa2   :  { %v5892_v29 = vpack.c.bf16 %v510_v21, %v498_v19  ;;  %v522_v34 = vld [vmem:[#allocation2 + $0xcd0] sm:$0xff]  ;;  %v557_v38 = vld [vmem:[#allocation2 + $0xde8] sm:$0xff]  ;;  %v580_v58 = vld [vmem:[#allocation2 + $0xea0] sm:$0xff] }
  0xa3   :  { %5513 = vmatpush1.bf16.msra.mxu0 %v5512_v26  ;;  %v8193_v26 = vrot.slane %v2275_v10, %v8173_v11  ;;  %v534_v36 = vld [vmem:[#allocation2 + $0xd30] sm:$0xff]  ;;  %v5538_v44 = vpack.c.bf16 %v557_v38, %v545_v37  ;;  %v569_v50 = vld [vmem:[#allocation2 + $0xe48] sm:$0xff]  ;;  %v604_v7 = vld [vmem:[#allocation2 + $0xf60] sm:$0xff] }
  0xa4   :  { %5873 = vmatpush1.bf16.msra.mxu1 %v5872_v27  ;;  %5515 = vmatprep.subr.bf16.mxu0 %v5514_v28  ;;  %v535_v27 = vld [vmem:[#allocation2 + $0xd38] sm:$0xff]  ;;  %v5532_v28 = vpack.c.bf16 %v508_v18, %v496_v17  ;;  %v5896_v43 = vpack.c.bf16 %v534_v36, %v522_v34  ;;  %v546_v47 = vld [vmem:[#allocation2 + $0xd90] sm:$0xff]  ;;  %v593_v63 = vld [vmem:[#allocation2 + $0xf08] sm:$0xff] }
  0xa5   :  { %5875 = vmatprep.subr.bf16.mxu1 %v5874_v33  ;;  %v532_v33 = vld [vmem:[#allocation2 + $0xd20] sm:$0xff]  ;;  %v5894_v35 = vpack.c.bf16 %v535_v27, %v523_v22  ;;  %v558_v49 = vld [vmem:[#allocation2 + $0xdf0] sm:$0xff]  ;;  %v617_v12 = vld [vmem:[#allocation2 + $0xfc8] sm:$0xff] }
  0xa6   :  { %v5536_v42 = vpack.c.bf16 %v532_v33, %v520_v31  ;;  %v5900_v55 = vpack.c.bf16 %v558_v49, %v546_v47  ;;  %v570_v59 = vld [vmem:[#allocation2 + $0xe50] sm:$0xff]  ;;  %v629_v13 = vld [vmem:[#allocation2 + $0x1028] sm:$0xff]  ;;  %v616_v19 = vld [vmem:[#allocation2 + $0xfc0] sm:$0xff] }
  0xa7   :  { %5517 = vmatpush1.bf16.msra.mxu0 %v5516_v39  ;;  %v8197_v39 = vcombine.high %v8193_v26, %v8193_v26  ;;  %v582_v61 = vld [vmem:[#allocation2 + $0xeb0] sm:$0xff]  ;;  %v5550_v18 = vpack.c.bf16 %v629_v13, %v617_v12  ;;  %v641_v22 = vld [vmem:[#allocation2 + $0x1088] sm:$0xff]  ;;  %v640_v34 = vld [vmem:[#allocation2 + $0x1080] sm:$0xff] }
  0xa8   :  { %5877 = vmatpush1.bf16.msra.mxu1 %v5876_v40  ;;  %5519 = vmatprep.subr.bf16.mxu0 %v5518_v41  ;;  %v547_v40 = vld [vmem:[#allocation2 + $0xd98] sm:$0xff]  ;;  %v5904_v4 = vpack.c.bf16 %v582_v61, %v570_v59  ;;  %v594_v8 = vld [vmem:[#allocation2 + $0xf10] sm:$0xff]  ;;  %v653_v27 = vld [vmem:[#allocation2 + $0x10e8] sm:$0xff] }
  0xa9   :  { %5879 = vmatprep.subr.bf16.mxu1 %v5878_v45  ;;  %v559_v41 = vld [vmem:[#allocation2 + $0xdf8] sm:$0xff]  ;;  %v544_v45 = vld [vmem:[#allocation2 + $0xd80] sm:$0xff]  ;;  %v606_v10 = vld [vmem:[#allocation2 + $0xf70] sm:$0xff]  ;;  %v5554_v33 = vpack.c.bf16 %v653_v27, %v641_v22 }
  0xaa   :  { %v5898_v48 = vpack.c.bf16 %v559_v41, %v547_v40  ;;  %v5540_v54 = vpack.c.bf16 %v556_v46, %v544_v45  ;;  %v5908_v17 = vpack.c.bf16 %v606_v10, %v594_v8  ;;  %v618_v21 = vld [vmem:[#allocation2 + $0xfd0] sm:$0xff]  ;;  %v665_v40 = vld [vmem:[#allocation2 + $0x1148] sm:$0xff]  ;;  %v664_v47 = vld [vmem:[#allocation2 + $0x1140] sm:$0xff] }
  0xab   :  { %5521 = vmatpush1.bf16.msra.mxu0 %v5520_v51  ;;  %v581_v51 = vld [vmem:[#allocation2 + $0xea8] sm:$0xff]  ;;  %v630_v24 = vld [vmem:[#allocation2 + $0x1030] sm:$0xff]  ;;  %v688_v59 = vld [vmem:[#allocation2 + $0x1200] sm:$0xff] }
  0xac   :  { %5881 = vmatpush1.bf16.msra.mxu1 %v5880_v52  ;;  %5523 = vmatprep.subr.bf16.mxu0 %v5522_v53  ;;  %v571_v52 = vld [vmem:[#allocation2 + $0xe58] sm:$0xff]  ;;  %v5542_v56 = vpack.c.bf16 %v581_v51, %v569_v50  ;;  %v5912_v31 = vpack.c.bf16 %v630_v24, %v618_v21  ;;  %v642_v36 = vld [vmem:[#allocation2 + $0x1090] sm:$0xff]  ;;  %v677_v41 = vld [vmem:[#allocation2 + $0x11a8] sm:$0xff] }
  0xad   :  { %5883 = vmatprep.subr.bf16.mxu1 %v5882_v57  ;;  %v583_v53 = vld [vmem:[#allocation2 + $0xeb8] sm:$0xff]  ;;  %v568_v57 = vld [vmem:[#allocation2 + $0xe40] sm:$0xff]  ;;  %v654_v38 = vld [vmem:[#allocation2 + $0x10f0] sm:$0xff]  ;;  %v5558_v46 = vpack.c.bf16 %v677_v41, %v665_v40 }
  0xae   :  { %v5902_v60 = vpack.c.bf16 %v583_v53, %v571_v52  ;;  %v5544_v3 = vpack.c.bf16 %v580_v58, %v568_v57  ;;  %v5916_v45 = vpack.c.bf16 %v654_v38, %v642_v36  ;;  %v666_v49 = vld [vmem:[#allocation2 + $0x1150] sm:$0xff]  ;;  %v689_v52 = vld [vmem:[#allocation2 + $0x1208] sm:$0xff]  ;;  %v712_v8 = vld [vmem:[#allocation2 + $0x12c0] sm:$0xff] }
  0xaf   :  { %5525 = vmatpush1.bf16.msra.mxu0 %v5524_v0  ;;  %v605_v0 = vld [vmem:[#allocation2 + $0xf68] sm:$0xff]  ;;  %v678_v51 = vld [vmem:[#allocation2 + $0x11b0] sm:$0xff]  ;;  %v736_v21 = vld [vmem:[#allocation2 + $0x1380] sm:$0xff] }
  0xb0   :  { %5885 = vmatpush1.bf16.msra.mxu1 %v5884_v1  ;;  %5527 = vmatprep.subr.bf16.mxu0 %v5526_v2  ;;  %v595_v1 = vld [vmem:[#allocation2 + $0xf18] sm:$0xff]  ;;  %v5546_v5 = vpack.c.bf16 %v605_v0, %v593_v63  ;;  %v701_v53 = vld [vmem:[#allocation2 + $0x1268] sm:$0xff]  ;;  %v5920_v57 = vpack.c.bf16 %v678_v51, %v666_v49  ;;  %v690_v61 = vld [vmem:[#allocation2 + $0x1210] sm:$0xff] }
  0xb1   :  { %5887 = vmatprep.subr.bf16.mxu1 %v5886_v6  ;;  %v607_v2 = vld [vmem:[#allocation2 + $0xf78] sm:$0xff]  ;;  %v592_v6 = vld [vmem:[#allocation2 + $0xf00] sm:$0xff]  ;;  %v5562_v58 = vpack.c.bf16 %v701_v53, %v689_v52  ;;  %v702_v0 = vld [vmem:[#allocation2 + $0x1270] sm:$0xff] }
  0xb2   :  { %v5906_v9 = vpack.c.bf16 %v607_v2, %v595_v1  ;;  %v713_v1 = vld [vmem:[#allocation2 + $0x12c8] sm:$0xff]  ;;  %v714_v10 = vld [vmem:[#allocation2 + $0x12d0] sm:$0xff]  ;;  %v760_v36 = vld [vmem:[#allocation2 + $0x1440] sm:$0xff] }
  0xb3   :  { %5529 = vmatpush1.bf16.msra.mxu0 %v5528_v14  ;;  %v619_v14 = vld [vmem:[#allocation2 + $0xfd8] sm:$0xff]  ;;  %v725_v2 = vld [vmem:[#allocation2 + $0x1328] sm:$0xff]  ;;  %v726_v13 = vld [vmem:[#allocation2 + $0x1330] sm:$0xff] }
  0xb4   :  { %5889 = vmatpush1.bf16.msra.mxu1 %v5888_v15  ;;  %5531 = vmatprep.subr.bf16.mxu0 %v5530_v16  ;;  %v631_v15 = vld [vmem:[#allocation2 + $0x1038] sm:$0xff]  ;;  %v5548_v16 = vpack.c.bf16 %v604_v7, %v592_v6  ;;  %v5924_v6 = vpack.c.bf16 %v702_v0, %v690_v61  ;;  %v5566_v7 = vpack.c.bf16 %v725_v2, %v713_v1  ;;  %v738_v24 = vld [vmem:[#allocation2 + $0x1390] sm:$0xff]  ;;  %v784_v49 = vld [vmem:[#allocation2 + $0x1500] sm:$0xff] }
  0xb5   :  { %5891 = vmatprep.subr.bf16.mxu1 %v5890_v20  ;;  %v628_v20 = vld [vmem:[#allocation2 + $0x1020] sm:$0xff]  ;;  %v5910_v23 = vpack.c.bf16 %v631_v15, %v619_v14  ;;  %v737_v14 = vld [vmem:[#allocation2 + $0x1388] sm:$0xff]  ;;  %v750_v27 = vld [vmem:[#allocation2 + $0x13f0] sm:$0xff] }
  0xb6   :  { %2405 = vmatmul.mubr.f32.vlgmr.msra.gmra.mrb[0].mxu0 %v8182_v25  ;;  %v749_v15 = vld [vmem:[#allocation2 + $0x13e8] sm:$0xff]  ;;  %v762_v38 = vld [vmem:[#allocation2 + $0x1450] sm:$0xff]  ;;  %v808_v61 = vld [vmem:[#allocation2 + $0x15c0] sm:$0xff] }
  0xb7   :  { %5533 = vmatpush1.bf16.msra.mxu0 %v5532_v28  ;;  %2831 = vmatmul.mubr.f32.vlgmr.msra.gmra.mrb[0].mxu1 %v8182_v25  ;;  %v643_v28 = vld [vmem:[#allocation2 + $0x1098] sm:$0xff]  ;;  %v774_v41 = vld [vmem:[#allocation2 + $0x14b0] sm:$0xff]  ;;  %vm4950_vm4 = vmor %vm4949_vm3, %vm4948_vm2 }
  0xb8   :  { %5893 = vmatpush1.bf16.msra.mxu1 %v5892_v29  ;;  %5535 = vmatprep.subr.bf16.mxu0 %v5534_v30  ;;  %v655_v29 = vld [vmem:[#allocation2 + $0x10f8] sm:$0xff]  ;;  %v5552_v30 = vpack.c.bf16 %v628_v20, %v616_v19  ;;  %v5928_v19 = vpack.c.bf16 %v726_v13, %v714_v10  ;;  %v5570_v20 = vpack.c.bf16 %v749_v15, %v737_v14  ;;  %v786_v51 = vld [vmem:[#allocation2 + $0x1510] sm:$0xff]  ;;  %v832_v10 = vld [vmem:[#allocation2 + $0x1680] sm:$0xff] }
  0xb9   :  { %5895 = vmatprep.subr.bf16.mxu1 %v5894_v35  ;;  %2475 = vmatprep.mubr.f32.mxu0 %v8197_v39  ;;  %v652_v35 = vld [vmem:[#allocation2 + $0x10e0] sm:$0xff]  ;;  %v5914_v37 = vpack.c.bf16 %v655_v29, %v643_v28  ;;  %v761_v28 = vld [vmem:[#allocation2 + $0x1448] sm:$0xff]  ;;  %v798_v53 = vld [vmem:[#allocation2 + $0x1570] sm:$0xff] }
  0xba   :  { %2901 = vmatprep.mubr.f32.mxu1 %v8197_v39  ;;  %v773_v29 = vld [vmem:[#allocation2 + $0x14a8] sm:$0xff]  ;;  %v810_v0 = vld [vmem:[#allocation2 + $0x15d0] sm:$0xff]  ;;  %vm4952_vm6 = vmor %vm4951_vm5, %vm4950_vm4 }
  0xbb   :  { %5537 = vmatpush1.bf16.msra.mxu0 %v5536_v42  ;;  %v667_v42 = vld [vmem:[#allocation2 + $0x1158] sm:$0xff]  ;;  %v822_v2 = vld [vmem:[#allocation2 + $0x1630] sm:$0xff] }
  0xbc   :  { %5897 = vmatpush1.bf16.msra.mxu1 %v5896_v43  ;;  %5539 = vmatprep.subr.bf16.mxu0 %v5538_v44  ;;  %v679_v43 = vld [vmem:[#allocation2 + $0x11b8] sm:$0xff]  ;;  %v5556_v44 = vpack.c.bf16 %v652_v35, %v640_v34  ;;  %v5932_v34 = vpack.c.bf16 %v750_v27, %v738_v24  ;;  %v5574_v35 = vpack.c.bf16 %v773_v29, %v761_v28  ;;  %v834_v13 = vld [vmem:[#allocation2 + $0x1690] sm:$0xff]  ;;  %v856_v24 = vld [vmem:[#allocation2 + $0x1740] sm:$0xff] }
  0xbd   :  { %5899 = vmatprep.subr.bf16.mxu1 %v5898_v48  ;;  %v676_v48 = vld [vmem:[#allocation2 + $0x11a0] sm:$0xff]  ;;  %v5918_v50 = vpack.c.bf16 %v679_v43, %v667_v42  ;;  %v785_v42 = vld [vmem:[#allocation2 + $0x1508] sm:$0xff]  ;;  %v846_v15 = vld [vmem:[#allocation2 + $0x16f0] sm:$0xff] }
  0xbe   :  { %v797_v43 = vld [vmem:[#allocation2 + $0x1568] sm:$0xff]  ;;  %v858_v27 = vld [vmem:[#allocation2 + $0x1750] sm:$0xff] }
  0xbf   :  { %5541 = vmatpush1.bf16.msra.mxu0 %v5540_v54  ;;  %v691_v54 = vld [vmem:[#allocation2 + $0x1218] sm:$0xff]  ;;  %v870_v29 = vld [vmem:[#allocation2 + $0x17b0] sm:$0xff] }
  0xc0   :  { %5901 = vmatpush1.bf16.msra.mxu1 %v5900_v55  ;;  %5543 = vmatprep.subr.bf16.mxu0 %v5542_v56  ;;  %v703_v55 = vld [vmem:[#allocation2 + $0x1278] sm:$0xff]  ;;  %v5560_v56 = vpack.c.bf16 %v676_v48, %v664_v47  ;;  %v5936_v47 = vpack.c.bf16 %v774_v41, %v762_v38  ;;  %v5578_v48 = vpack.c.bf16 %v797_v43, %v785_v42  ;;  %v880_v38 = vld [vmem:[#allocation2 + $0x1800] sm:$0xff]  ;;  %v882_v41 = vld [vmem:[#allocation2 + $0x1810] sm:$0xff] }
  0xc1   :  { %5903 = vmatprep.subr.bf16.mxu1 %v5902_v60  ;;  %v700_v60 = vld [vmem:[#allocation2 + $0x1260] sm:$0xff]  ;;  %v5922_v63 = vpack.c.bf16 %v703_v55, %v691_v54  ;;  %v809_v54 = vld [vmem:[#allocation2 + $0x15c8] sm:$0xff]  ;;  %v894_v43 = vld [vmem:[#allocation2 + $0x1870] sm:$0xff] }
  0xc2   :  { %v821_v55 = vld [vmem:[#allocation2 + $0x1628] sm:$0xff] }
  0xc3   :  { %5545 = vmatpush1.bf16.msra.mxu0 %v5544_v3  ;;  %v715_v3 = vld [vmem:[#allocation2 + $0x12d8] sm:$0xff] }
  0xc4   :  { %5905 = vmatpush1.bf16.msra.mxu1 %v5904_v4  ;;  %5547 = vmatprep.subr.bf16.mxu0 %v5546_v5  ;;  %v727_v4 = vld [vmem:[#allocation2 + $0x1338] sm:$0xff]  ;;  %v5564_v5 = vpack.c.bf16 %v700_v60, %v688_v59  ;;  %v5940_v59 = vpack.c.bf16 %v798_v53, %v786_v51  ;;  %v5582_v60 = vpack.c.bf16 %v821_v55, %v809_v54  ;;  %v916_v53 = vld [vmem:[#allocation2 + $0x1920] sm:$0xff]  ;;  %v906_v54 = vld [vmem:[#allocation2 + $0x18d0] sm:$0xff] }
  0xc5   :  { %5907 = vmatprep.subr.bf16.mxu1 %v5906_v9  ;;  %v724_v9 = vld [vmem:[#allocation2 + $0x1320] sm:$0xff]  ;;  %v5926_v12 = vpack.c.bf16 %v727_v4, %v715_v3  ;;  %v833_v3 = vld [vmem:[#allocation2 + $0x1688] sm:$0xff] }
  0xc6   :  { %v845_v4 = vld [vmem:[#allocation2 + $0x16e8] sm:$0xff] }
  0xc7   :  { %5549 = vmatpush1.bf16.msra.mxu0 %v5548_v16  ;;  %v739_v16 = vld [vmem:[#allocation2 + $0x1398] sm:$0xff] }
  0xc8   :  { %5909 = vmatpush1.bf16.msra.mxu1 %v5908_v17  ;;  %5551 = vmatprep.subr.bf16.mxu0 %v5550_v18  ;;  %v751_v17 = vld [vmem:[#allocation2 + $0x13f8] sm:$0xff]  ;;  %v5568_v18 = vpack.c.bf16 %v724_v9, %v712_v8  ;;  %v5944_v8 = vpack.c.bf16 %v822_v2, %v810_v0  ;;  %v5586_v9 = vpack.c.bf16 %v845_v4, %v833_v3  ;;  %v928_v3 = vld [vmem:[#allocation2 + $0x1980] sm:$0xff] }
  0xc9   :  { %5911 = vmatprep.subr.bf16.mxu1 %v5910_v23  ;;  %v748_v23 = vld [vmem:[#allocation2 + $0x13e0] sm:$0xff]  ;;  %v5930_v22 = vpack.c.bf16 %v751_v17, %v739_v16  ;;  %v857_v16 = vld [vmem:[#allocation2 + $0x1748] sm:$0xff] }
  0xca   :  { %v869_v17 = vld [vmem:[#allocation2 + $0x17a8] sm:$0xff]  ;;  %v940_v4 = vld [vmem:[#allocation2 + $0x19e0] sm:$0xff] }
  0xcb   :  { %5553 = vmatpush1.bf16.msra.mxu0 %v5552_v30  ;;  %v763_v30 = vld [vmem:[#allocation2 + $0x1458] sm:$0xff] }
  0xcc   :  { %5913 = vmatpush1.bf16.msra.mxu1 %v5912_v31  ;;  %5555 = vmatprep.subr.bf16.mxu0 %v5554_v33  ;;  %v775_v31 = vld [vmem:[#allocation2 + $0x14b8] sm:$0xff]  ;;  %v5572_v33 = vpack.c.bf16 %v748_v23, %v736_v21  ;;  %v5948_v21 = vpack.c.bf16 %v846_v15, %v834_v13  ;;  %v5590_v23 = vpack.c.bf16 %v869_v17, %v857_v16  ;;  %v952_v16 = vld [vmem:[#allocation2 + $0x1a40] sm:$0xff] }
  0xcd   :  { %5915 = vmatprep.subr.bf16.mxu1 %v5914_v37  ;;  %v772_v37 = vld [vmem:[#allocation2 + $0x14a0] sm:$0xff]  ;;  %v5934_v40 = vpack.c.bf16 %v775_v31, %v763_v30  ;;  %v881_v30 = vld [vmem:[#allocation2 + $0x1808] sm:$0xff]  ;;  %v5604_v13 = vpack.c.bf16 %v940_v4, %v928_v3  ;;  %v1051_v3 = vld [vmem:[#allocation2 + $0x1d58] sm:$0xff] }
  0xce   :  { %v893_v31 = vld [vmem:[#allocation2 + $0x1868] sm:$0xff]  ;;  %v964_v17 = vld [vmem:[#allocation2 + $0x1aa0] sm:$0xff]  ;;  %v1063_v4 = vld [vmem:[#allocation2 + $0x1db8] sm:$0xff] }
  0xcf   :  { %5557 = vmatpush1.bf16.msra.mxu0 %v5556_v44  ;;  %v787_v44 = vld [vmem:[#allocation2 + $0x1518] sm:$0xff] }
  0xd0   :  { %5917 = vmatpush1.bf16.msra.mxu1 %v5916_v45  ;;  %5559 = vmatprep.subr.bf16.mxu0 %v5558_v46  ;;  %v799_v45 = vld [vmem:[#allocation2 + $0x1578] sm:$0xff]  ;;  %v5576_v46 = vpack.c.bf16 %v772_v37, %v760_v36  ;;  %v5952_v36 = vpack.c.bf16 %v870_v29, %v858_v27  ;;  %v5594_v37 = vpack.c.bf16 %v893_v31, %v881_v30  ;;  %v976_v30 = vld [vmem:[#allocation2 + $0x1b00] sm:$0xff] }
  0xd1   :  { %5919 = vmatprep.subr.bf16.mxu1 %v5918_v50  ;;  %v796_v50 = vld [vmem:[#allocation2 + $0x1560] sm:$0xff]  ;;  %v5938_v52 = vpack.c.bf16 %v799_v45, %v787_v44  ;;  %v905_v44 = vld [vmem:[#allocation2 + $0x18c8] sm:$0xff]  ;;  %v5608_v27 = vpack.c.bf16 %v964_v17, %v952_v16  ;;  %v1075_v16 = vld [vmem:[#allocation2 + $0x1e18] sm:$0xff] }
  0xd2   :  { %v917_v45 = vld [vmem:[#allocation2 + $0x1928] sm:$0xff]  ;;  %v988_v31 = vld [vmem:[#allocation2 + $0x1b60] sm:$0xff]  ;;  %v1087_v17 = vld [vmem:[#allocation2 + $0x1e78] sm:$0xff] }
  0xd3   :  { %5561 = vmatpush1.bf16.msra.mxu0 %v5560_v56  ;;  %v811_v56 = vld [vmem:[#allocation2 + $0x15d8] sm:$0xff]  ;;  %v5598_v51 = vpack.c.bf16 %v917_v45, %v905_v44  ;;  %v1000_v44 = vld [vmem:[#allocation2 + $0x1bc0] sm:$0xff] }
  0xd4   :  { %5921 = vmatpush1.bf16.msra.mxu1 %v5920_v57  ;;  %5563 = vmatprep.subr.bf16.mxu0 %v5562_v58  ;;  %v823_v57 = vld [vmem:[#allocation2 + $0x1638] sm:$0xff]  ;;  %v5580_v58 = vpack.c.bf16 %v796_v50, %v784_v49  ;;  %v8206_v49 = vld [vmem:[%s8431_s0 + $0x8] sm:$0xff]  ;;  %v5956_v50 = vpack.c.bf16 %v894_v43, %v882_v41  ;;  %v5612_v41 = vpack.c.bf16 %v988_v31, %v976_v30  ;;  %v1012_v45 = vld [vmem:[#allocation2 + $0x1c20] sm:$0xff] }
  0xd5   :  { %5923 = vmatprep.subr.bf16.mxu1 %v5922_v63  ;;  %v820_v63 = vld [vmem:[#allocation2 + $0x1620] sm:$0xff]  ;;  %v5942_v1 = vpack.c.bf16 %v823_v57, %v811_v56  ;;  %v8210_v55 = vrot.slane %v8206_v49, %v8173_v11  ;;  %v918_v57 = vld [vmem:[#allocation2 + $0x1930] sm:$0xff]  ;;  %v1099_v30 = vld [vmem:[#allocation2 + $0x1ed8] sm:$0xff] }
  0xd6   :  { %v1111_v31 = vld [vmem:[#allocation2 + $0x1f38] sm:$0xff] }
  0xd7   :  { %5565 = vmatpush1.bf16.msra.mxu0 %v5564_v5  ;;  %v835_v5 = vld [vmem:[#allocation2 + $0x1698] sm:$0xff] }
  0xd8   :  { %5925 = vmatpush1.bf16.msra.mxu1 %v5924_v6  ;;  %5567 = vmatprep.subr.bf16.mxu0 %v5566_v7  ;;  %v847_v6 = vld [vmem:[#allocation2 + $0x16f8] sm:$0xff]  ;;  %v5584_v7 = vpack.c.bf16 %v820_v63, %v808_v61  ;;  %v8215_v63 = vcombine.high %v8210_v55, %v8210_v55 }
  0xd9   :  { %5927 = vmatprep.subr.bf16.mxu1 %v5926_v12  ;;  %v844_v12 = vld [vmem:[#allocation2 + $0x16e0] sm:$0xff]  ;;  %v5946_v14 = vpack.c.bf16 %v847_v6, %v835_v5  ;;  %v943_v61 = vld [vmem:[#allocation2 + $0x19f8] sm:$0xff]  ;;  %v930_v5 = vld [vmem:[#allocation2 + $0x1990] sm:$0xff] }
  0xdb   :  { %5569 = vmatpush1.bf16.msra.mxu0 %v5568_v18  ;;  %v859_v18 = vld [vmem:[#allocation2 + $0x1758] sm:$0xff] }
  0xdc   :  { %5929 = vmatpush1.bf16.msra.mxu1 %v5928_v19  ;;  %5571 = vmatprep.subr.bf16.mxu0 %v5570_v20  ;;  %v871_v19 = vld [vmem:[#allocation2 + $0x17b8] sm:$0xff]  ;;  %v5588_v20 = vpack.c.bf16 %v844_v12, %v832_v10 }
  0xdd   :  { %5931 = vmatprep.subr.bf16.mxu1 %v5930_v22  ;;  %v868_v22 = vld [vmem:[#allocation2 + $0x17a0] sm:$0xff]  ;;  %v5950_v28 = vpack.c.bf16 %v871_v19, %v859_v18  ;;  %v955_v10 = vld [vmem:[#allocation2 + $0x1a58] sm:$0xff]  ;;  %v954_v18 = vld [vmem:[#allocation2 + $0x1a50] sm:$0xff] }
  0xde   :  { %v967_v12 = vld [vmem:[#allocation2 + $0x1ab8] sm:$0xff] }
  0xdf   :  { %5573 = vmatpush1.bf16.msra.mxu0 %v5572_v33  ;;  %v883_v33 = vld [vmem:[#allocation2 + $0x1818] sm:$0xff]  ;;  %v5966_v19 = vpack.c.bf16 %v967_v12, %v955_v10  ;;  %v1050_v10 = vld [vmem:[#allocation2 + $0x1d50] sm:$0xff]  ;;  %v5982_v12 = vpack.c.bf16 %v1063_v4, %v1051_v3 }
  0xe0   :  { %5933 = vmatpush1.bf16.msra.mxu1 %v5932_v34  ;;  %5575 = vmatprep.subr.bf16.mxu0 %v5574_v35  ;;  %v895_v34 = vld [vmem:[#allocation2 + $0x1878] sm:$0xff]  ;;  %v5592_v35 = vpack.c.bf16 %v868_v22, %v856_v24  ;;  %v1146_v3 = vld [vmem:[#allocation2 + $0x2050] sm:$0xff] }
  0xe1   :  { %5935 = vmatprep.subr.bf16.mxu1 %v5934_v40  ;;  %v892_v40 = vld [vmem:[#allocation2 + $0x1860] sm:$0xff]  ;;  %v5954_v42 = vpack.c.bf16 %v895_v34, %v883_v33  ;;  %v979_v24 = vld [vmem:[#allocation2 + $0x1b18] sm:$0xff]  ;;  %v978_v33 = vld [vmem:[#allocation2 + $0x1b10] sm:$0xff] }
  0xe2   :  { %v991_v22 = vld [vmem:[#allocation2 + $0x1b78] sm:$0xff] }
  0xe3   :  { %5577 = vmatpush1.bf16.msra.mxu0 %v5576_v46  ;;  %v907_v46 = vld [vmem:[#allocation2 + $0x18d8] sm:$0xff]  ;;  %v5970_v34 = vpack.c.bf16 %v991_v22, %v979_v24  ;;  %v1074_v24 = vld [vmem:[#allocation2 + $0x1e10] sm:$0xff]  ;;  %v5986_v22 = vpack.c.bf16 %v1087_v17, %v1075_v16 }
  0xe4   :  { %5937 = vmatpush1.bf16.msra.mxu1 %v5936_v47  ;;  %5579 = vmatprep.subr.bf16.mxu0 %v5578_v48  ;;  %v919_v47 = vld [vmem:[#allocation2 + $0x1938] sm:$0xff]  ;;  %v5596_v48 = vpack.c.bf16 %v892_v40, %v880_v38  ;;  %v1170_v16 = vld [vmem:[#allocation2 + $0x2110] sm:$0xff] }
  0xe5   :  { %5939 = vmatprep.subr.bf16.mxu1 %v5938_v52  ;;  %v904_v52 = vld [vmem:[#allocation2 + $0x18c0] sm:$0xff]  ;;  %v5958_v56 = vpack.c.bf16 %v919_v47, %v907_v46  ;;  %v1003_v38 = vld [vmem:[#allocation2 + $0x1bd8] sm:$0xff]  ;;  %v1002_v46 = vld [vmem:[#allocation2 + $0x1bd0] sm:$0xff] }
  0xe6   :  { %v5600_v0 = vpack.c.bf16 %v916_v53, %v904_v52  ;;  %v1015_v40 = vld [vmem:[#allocation2 + $0x1c38] sm:$0xff] }
  0xe7   :  { %5581 = vmatpush1.bf16.msra.mxu0 %v5580_v58  ;;  %v929_v58 = vld [vmem:[#allocation2 + $0x1988] sm:$0xff]  ;;  %v5974_v47 = vpack.c.bf16 %v1015_v40, %v1003_v38  ;;  %v1027_v52 = vld [vmem:[#allocation2 + $0x1c98] sm:$0xff]  ;;  %v1098_v38 = vld [vmem:[#allocation2 + $0x1ed0] sm:$0xff]  ;;  %v5990_v40 = vpack.c.bf16 %v1111_v31, %v1099_v30 }
  0xe8   :  { %5941 = vmatpush1.bf16.msra.mxu1 %v5940_v59  ;;  %5583 = vmatprep.subr.bf16.mxu0 %v5582_v60  ;;  %v941_v59 = vld [vmem:[#allocation2 + $0x19e8] sm:$0xff]  ;;  %v931_v60 = vld [vmem:[#allocation2 + $0x1998] sm:$0xff]  ;;  %v1194_v30 = vld [vmem:[#allocation2 + $0x21d0] sm:$0xff] }
  0xe9   :  { %5943 = vmatprep.subr.bf16.mxu1 %v5942_v1  ;;  %v5960_v1 = vpack.c.bf16 %v918_v57, %v906_v54  ;;  %v5602_v2 = vpack.c.bf16 %v941_v59, %v929_v58  ;;  %v5962_v6 = vpack.c.bf16 %v943_v61, %v931_v60  ;;  %v1039_v53 = vld [vmem:[#allocation2 + $0x1cf8] sm:$0xff]  ;;  %v5616_v54 = vpack.c.bf16 %v1012_v45, %v1000_v44  ;;  %v1024_v58 = vld [vmem:[#allocation2 + $0x1c80] sm:$0xff]  ;;  %v1026_v60 = vld [vmem:[#allocation2 + $0x1c90] sm:$0xff] }
  0xea   :  { %v1036_v59 = vld [vmem:[#allocation2 + $0x1ce0] sm:$0xff]  ;;  %v5978_v61 = vpack.c.bf16 %v1039_v53, %v1027_v52  ;;  %v1123_v44 = vld [vmem:[#allocation2 + $0x1f98] sm:$0xff]  ;;  %v1122_v52 = vld [vmem:[#allocation2 + $0x1f90] sm:$0xff] }
  0xeb   :  { %5585 = vmatpush1.bf16.msra.mxu0 %v5584_v7  ;;  %v942_v7 = vld [vmem:[#allocation2 + $0x19f0] sm:$0xff]  ;;  %v1135_v45 = vld [vmem:[#allocation2 + $0x1ff8] sm:$0xff] }
  0xec   :  { %5945 = vmatpush1.bf16.msra.mxu1 %v5944_v8  ;;  %5587 = vmatprep.subr.bf16.mxu0 %v5586_v9  ;;  %v953_v8 = vld [vmem:[#allocation2 + $0x1a48] sm:$0xff]  ;;  %v5994_v53 = vpack.c.bf16 %v1135_v45, %v1123_v44  ;;  %v1218_v44 = vld [vmem:[#allocation2 + $0x2290] sm:$0xff] }
  0xed   :  { %5947 = vmatprep.subr.bf16.mxu1 %v5946_v14  ;;  %v965_v9 = vld [vmem:[#allocation2 + $0x1aa8] sm:$0xff]  ;;  %v5964_v14 = vpack.c.bf16 %v942_v7, %v930_v5  ;;  %v5620_v5 = vpack.c.bf16 %v1036_v59, %v1024_v58  ;;  %v1147_v58 = vld [vmem:[#allocation2 + $0x2058] sm:$0xff] }
  0xee   :  { %v5606_v15 = vpack.c.bf16 %v965_v9, %v953_v8  ;;  %v1048_v8 = vld [vmem:[#allocation2 + $0x1d40] sm:$0xff]  ;;  %v1159_v59 = vld [vmem:[#allocation2 + $0x20b8] sm:$0xff] }
  0xef   :  { %5589 = vmatpush1.bf16.msra.mxu0 %v5588_v20  ;;  %v966_v20 = vld [vmem:[#allocation2 + $0x1ab0] sm:$0xff]  ;;  %v1060_v9 = vld [vmem:[#allocation2 + $0x1da0] sm:$0xff]  ;;  %v5998_v4 = vpack.c.bf16 %v1159_v59, %v1147_v58 }
  0xf0   :  { %5949 = vmatpush1.bf16.msra.mxu1 %v5948_v21  ;;  %5591 = vmatprep.subr.bf16.mxu0 %v5590_v23  ;;  %v977_v21 = vld [vmem:[#allocation2 + $0x1b08] sm:$0xff]  ;;  %v1242_v58 = vld [vmem:[#allocation2 + $0x2350] sm:$0xff] }
  0xf1   :  { %5951 = vmatprep.subr.bf16.mxu1 %v5950_v28  ;;  %v989_v23 = vld [vmem:[#allocation2 + $0x1b68] sm:$0xff]  ;;  %v5968_v28 = vpack.c.bf16 %v966_v20, %v954_v18  ;;  %v5624_v18 = vpack.c.bf16 %v1060_v9, %v1048_v8  ;;  %v1171_v8 = vld [vmem:[#allocation2 + $0x2118] sm:$0xff] }
  0xf2   :  { %v5610_v29 = vpack.c.bf16 %v989_v23, %v977_v21  ;;  %v1072_v21 = vld [vmem:[#allocation2 + $0x1e00] sm:$0xff]  ;;  %v1183_v9 = vld [vmem:[#allocation2 + $0x2178] sm:$0xff] }
  0xf3   :  { %5593 = vmatpush1.bf16.msra.mxu0 %v5592_v35  ;;  %v990_v35 = vld [vmem:[#allocation2 + $0x1b70] sm:$0xff]  ;;  %v1084_v23 = vld [vmem:[#allocation2 + $0x1e60] sm:$0xff]  ;;  %v6002_v17 = vpack.c.bf16 %v1183_v9, %v1171_v8 }
  0xf4   :  { %5953 = vmatpush1.bf16.msra.mxu1 %v5952_v36  ;;  %5595 = vmatprep.subr.bf16.mxu0 %v5594_v37  ;;  %v1001_v36 = vld [vmem:[#allocation2 + $0x1bc8] sm:$0xff]  ;;  %v1276_v8 = vld [vmem:[#allocation2 + $0x2460] sm:$0xff]  ;;  %v1266_v9 = vld [vmem:[#allocation2 + $0x2410] sm:$0xff] }
  0xf5   :  { %5955 = vmatprep.subr.bf16.mxu1 %v5954_v42  ;;  %v1013_v37 = vld [vmem:[#allocation2 + $0x1c28] sm:$0xff]  ;;  %v5972_v42 = vpack.c.bf16 %v990_v35, %v978_v33  ;;  %v5628_v33 = vpack.c.bf16 %v1084_v23, %v1072_v21  ;;  %v1195_v21 = vld [vmem:[#allocation2 + $0x21d8] sm:$0xff] }
  0xf6   :  { %2476 = vmatmul.mubr.f32.vlgmr.msra.gmra.mrb[0].mxu0 %v8193_v26  ;;  %v5614_v43 = vpack.c.bf16 %v1013_v37, %v1001_v36  ;;  %v1096_v36 = vld [vmem:[#allocation2 + $0x1ec0] sm:$0xff]  ;;  %v1207_v23 = vld [vmem:[#allocation2 + $0x2238] sm:$0xff] }
  0xf7   :  { %5597 = vmatpush1.bf16.msra.mxu0 %v5596_v48  ;;  %2902 = vmatmul.mubr.f32.vlgmr.msra.gmra.mrb[0].mxu1 %v8193_v26  ;;  %v1014_v48 = vld [vmem:[#allocation2 + $0x1c30] sm:$0xff]  ;;  %v1108_v37 = vld [vmem:[#allocation2 + $0x1f20] sm:$0xff]  ;;  %v6006_v31 = vpack.c.bf16 %v1207_v23, %v1195_v21 }
  0xf8   :  { %5957 = vmatpush1.bf16.msra.mxu1 %v5956_v50  ;;  %5599 = vmatprep.subr.bf16.mxu0 %v5598_v51  ;;  %v1025_v50 = vld [vmem:[#allocation2 + $0x1c88] sm:$0xff]  ;;  %v1300_v21 = vld [vmem:[#allocation2 + $0x2520] sm:$0xff]  ;;  %v1290_v23 = vld [vmem:[#allocation2 + $0x24d0] sm:$0xff] }
  0xf9   :  { %5959 = vmatprep.subr.bf16.mxu1 %v5958_v56  ;;  %2546 = vmatprep.mubr.f32.mxu0 %v8215_v63  ;;  %v1037_v51 = vld [vmem:[#allocation2 + $0x1ce8] sm:$0xff]  ;;  %v5976_v56 = vpack.c.bf16 %v1014_v48, %v1002_v46  ;;  %v5632_v46 = vpack.c.bf16 %v1108_v37, %v1096_v36  ;;  %v1219_v36 = vld [vmem:[#allocation2 + $0x2298] sm:$0xff] }
  0xfa   :  { %2972 = vmatprep.mubr.f32.mxu1 %v8215_v63  ;;  %v5618_v57 = vpack.c.bf16 %v1037_v51, %v1025_v50  ;;  %v1120_v50 = vld [vmem:[#allocation2 + $0x1f80] sm:$0xff]  ;;  %v1231_v37 = vld [vmem:[#allocation2 + $0x22f8] sm:$0xff] }
  0xfb   :  { %5601 = vmatpush1.bf16.msra.mxu0 %v5600_v0  ;;  %v1038_v0 = vld [vmem:[#allocation2 + $0x1cf0] sm:$0xff]  ;;  %v1132_v51 = vld [vmem:[#allocation2 + $0x1fe0] sm:$0xff]  ;;  %v6010_v45 = vpack.c.bf16 %v1231_v37, %v1219_v36 }
  0xfc   :  { %5961 = vmatpush1.bf16.msra.mxu1 %v5960_v1  ;;  %5603 = vmatprep.subr.bf16.mxu0 %v5602_v2  ;;  %v1049_v1 = vld [vmem:[#allocation2 + $0x1d48] sm:$0xff]  ;;  %v1312_v36 = vld [vmem:[#allocation2 + $0x2580] sm:$0xff] }
  0xfd   :  { %5963 = vmatprep.subr.bf16.mxu1 %v5962_v6  ;;  %v1061_v2 = vld [vmem:[#allocation2 + $0x1da8] sm:$0xff]  ;;  %v5980_v6 = vpack.c.bf16 %v1038_v0, %v1026_v60  ;;  %v5636_v60 = vpack.c.bf16 %v1132_v51, %v1120_v50  ;;  %v1243_v50 = vld [vmem:[#allocation2 + $0x2358] sm:$0xff]  ;;  %v1324_v37 = vld [vmem:[#allocation2 + $0x25e0] sm:$0xff] }
  0xfe   :  { %v5622_v7 = vpack.c.bf16 %v1061_v2, %v1049_v1  ;;  %v1144_v1 = vld [vmem:[#allocation2 + $0x2040] sm:$0xff]  ;;  %v1255_v51 = vld [vmem:[#allocation2 + $0x23b8] sm:$0xff] }
  0xff   :  { %5605 = vmatpush1.bf16.msra.mxu0 %v5604_v13  ;;  %v1062_v13 = vld [vmem:[#allocation2 + $0x1db0] sm:$0xff]  ;;  %v1156_v2 = vld [vmem:[#allocation2 + $0x20a0] sm:$0xff]  ;;  %v6014_v59 = vpack.c.bf16 %v1255_v51, %v1243_v50 }
 0x100   :  { %5965 = vmatpush1.bf16.msra.mxu1 %v5964_v14  ;;  %5607 = vmatprep.subr.bf16.mxu0 %v5606_v15  ;;  %v1073_v14 = vld [vmem:[#allocation2 + $0x1e08] sm:$0xff]  ;;  %v1336_v50 = vld [vmem:[#allocation2 + $0x2640] sm:$0xff] }
 0x101   :  { %5967 = vmatprep.subr.bf16.mxu1 %v5966_v19  ;;  %v1085_v15 = vld [vmem:[#allocation2 + $0x1e68] sm:$0xff]  ;;  %v5984_v19 = vpack.c.bf16 %v1062_v13, %v1050_v10  ;;  %v5640_v10 = vpack.c.bf16 %v1156_v2, %v1144_v1  ;;  %v2292_v1 = vcombine.high %v8206_v49, %v8206_v49  ;;  %v1267_v2 = vld [vmem:[#allocation2 + $0x2418] sm:$0xff]  ;;  %v1348_v51 = vld [vmem:[#allocation2 + $0x26a0] sm:$0xff] }
 0x102   :  { %v5626_v20 = vpack.c.bf16 %v1085_v15, %v1073_v14  ;;  %v1168_v14 = vld [vmem:[#allocation2 + $0x2100] sm:$0xff]  ;;  %v1291_v49 = vld [vmem:[#allocation2 + $0x24d8] sm:$0xff] }
 0x103   :  { %5609 = vmatpush1.bf16.msra.mxu0 %v5608_v27  ;;  %v1086_v27 = vld [vmem:[#allocation2 + $0x1e70] sm:$0xff]  ;;  %v1180_v15 = vld [vmem:[#allocation2 + $0x2160] sm:$0xff] }
 0x104   :  { %5969 = vmatpush1.bf16.msra.mxu1 %v5968_v28  ;;  %5611 = vmatprep.subr.bf16.mxu0 %v5610_v29  ;;  %v1097_v28 = vld [vmem:[#allocation2 + $0x1ec8] sm:$0xff] }
 0x105   :  { %5971 = vmatprep.subr.bf16.mxu1 %v5970_v34  ;;  %v1109_v29 = vld [vmem:[#allocation2 + $0x1f28] sm:$0xff]  ;;  %v5988_v34 = vpack.c.bf16 %v1086_v27, %v1074_v24  ;;  %v5644_v24 = vpack.c.bf16 %v1180_v15, %v1168_v14  ;;  %v8223_v15 = vrot.slane %v2292_v1, %v8173_v11  ;;  %v1360_v1 = vld [vmem:[#allocation2 + $0x2700] sm:$0xff] }
 0x106   :  { %v5630_v35 = vpack.c.bf16 %v1109_v29, %v1097_v28  ;;  %v1192_v28 = vld [vmem:[#allocation2 + $0x21c0] sm:$0xff]  ;;  %v1301_v14 = vld [vmem:[#allocation2 + $0x2528] sm:$0xff] }
 0x107   :  { %5613 = vmatpush1.bf16.msra.mxu0 %v5612_v41  ;;  %v1110_v41 = vld [vmem:[#allocation2 + $0x1f30] sm:$0xff]  ;;  %v1204_v29 = vld [vmem:[#allocation2 + $0x2220] sm:$0xff] }
 0x108   :  { %5973 = vmatpush1.bf16.msra.mxu1 %v5972_v42  ;;  %5615 = vmatprep.subr.bf16.mxu0 %v5614_v43  ;;  %v1121_v42 = vld [vmem:[#allocation2 + $0x1f88] sm:$0xff] }
 0x109   :  { %5975 = vmatprep.subr.bf16.mxu1 %v5974_v47  ;;  %v1133_v43 = vld [vmem:[#allocation2 + $0x1fe8] sm:$0xff]  ;;  %v5992_v47 = vpack.c.bf16 %v1110_v41, %v1098_v38  ;;  %v5648_v38 = vpack.c.bf16 %v1204_v29, %v1192_v28  ;;  %v8227_v29 = vcombine.high %v8223_v15, %v8223_v15 }
 0x10a   :  { %v5634_v48 = vpack.c.bf16 %v1133_v43, %v1121_v42  ;;  %v1216_v42 = vld [vmem:[#allocation2 + $0x2280] sm:$0xff]  ;;  %v1325_v28 = vld [vmem:[#allocation2 + $0x25e8] sm:$0xff] }
 0x10b   :  { %5617 = vmatpush1.bf16.msra.mxu0 %v5616_v54  ;;  %v1134_v54 = vld [vmem:[#allocation2 + $0x1ff0] sm:$0xff]  ;;  %v1228_v43 = vld [vmem:[#allocation2 + $0x22e0] sm:$0xff] }
 0x10c   :  { %5977 = vmatpush1.bf16.msra.mxu1 %v5976_v56  ;;  %5619 = vmatprep.subr.bf16.mxu0 %v5618_v57  ;;  %v1145_v56 = vld [vmem:[#allocation2 + $0x2048] sm:$0xff] }
 0x10d   :  { %5979 = vmatprep.subr.bf16.mxu1 %v5978_v61  ;;  %v1157_v57 = vld [vmem:[#allocation2 + $0x20a8] sm:$0xff]  ;;  %v5996_v61 = vpack.c.bf16 %v1134_v54, %v1122_v52  ;;  %v5652_v52 = vpack.c.bf16 %v1228_v43, %v1216_v42 }
 0x10e   :  { %v5638_v0 = vpack.c.bf16 %v1157_v57, %v1145_v56  ;;  %v1240_v56 = vld [vmem:[#allocation2 + $0x2340] sm:$0xff]  ;;  %v1337_v42 = vld [vmem:[#allocation2 + $0x2648] sm:$0xff] }
 0x10f   :  { %5621 = vmatpush1.bf16.msra.mxu0 %v5620_v5  ;;  %v1158_v5 = vld [vmem:[#allocation2 + $0x20b0] sm:$0xff]  ;;  %v1252_v57 = vld [vmem:[#allocation2 + $0x23a0] sm:$0xff]  ;;  %v1349_v43 = vld [vmem:[#allocation2 + $0x26a8] sm:$0xff] }
 0x110   :  { %5981 = vmatpush1.bf16.msra.mxu1 %v5980_v6  ;;  %5623 = vmatprep.subr.bf16.mxu0 %v5622_v7  ;;  %v1169_v6 = vld [vmem:[#allocation2 + $0x2108] sm:$0xff] }
 0x111   :  { %5983 = vmatprep.subr.bf16.mxu1 %v5982_v12  ;;  %v1181_v7 = vld [vmem:[#allocation2 + $0x2168] sm:$0xff]  ;;  %v6000_v12 = vpack.c.bf16 %v1158_v5, %v1146_v3  ;;  %v1279_v3 = vld [vmem:[#allocation2 + $0x2478] sm:$0xff] }
 0x112   :  { %v5642_v13 = vpack.c.bf16 %v1181_v7, %v1169_v6  ;;  %v1264_v7 = vld [vmem:[#allocation2 + $0x2400] sm:$0xff] }
 0x113   :  { %5625 = vmatpush1.bf16.msra.mxu0 %v5624_v18  ;;  %v1182_v18 = vld [vmem:[#allocation2 + $0x2170] sm:$0xff] }
 0x114   :  { %5985 = vmatpush1.bf16.msra.mxu1 %v5984_v19  ;;  %5627 = vmatprep.subr.bf16.mxu0 %v5626_v20  ;;  %v1193_v19 = vld [vmem:[#allocation2 + $0x21c8] sm:$0xff] }
 0x115   :  { %5987 = vmatprep.subr.bf16.mxu1 %v5986_v22  ;;  %v1205_v20 = vld [vmem:[#allocation2 + $0x2228] sm:$0xff]  ;;  %v6004_v22 = vpack.c.bf16 %v1182_v18, %v1170_v16  ;;  %v1303_v16 = vld [vmem:[#allocation2 + $0x2538] sm:$0xff] }
 0x116   :  { %v5646_v27 = vpack.c.bf16 %v1205_v20, %v1193_v19  ;;  %v1288_v20 = vld [vmem:[#allocation2 + $0x24c0] sm:$0xff] }
 0x117   :  { %5629 = vmatpush1.bf16.msra.mxu0 %v5628_v33  ;;  %v1206_v33 = vld [vmem:[#allocation2 + $0x2230] sm:$0xff] }
 0x118   :  { %5989 = vmatpush1.bf16.msra.mxu1 %v5988_v34  ;;  %5631 = vmatprep.subr.bf16.mxu0 %v5630_v35  ;;  %v1217_v34 = vld [vmem:[#allocation2 + $0x2288] sm:$0xff] }
 0x119   :  { %5991 = vmatprep.subr.bf16.mxu1 %v5990_v40  ;;  %v1229_v35 = vld [vmem:[#allocation2 + $0x22e8] sm:$0xff]  ;;  %v6008_v40 = vpack.c.bf16 %v1206_v33, %v1194_v30  ;;  %v1315_v30 = vld [vmem:[#allocation2 + $0x2598] sm:$0xff]  ;;  %v5664_v33 = vpack.c.bf16 %v1300_v21, %v1288_v20 }
 0x11a   :  { %v5650_v41 = vpack.c.bf16 %v1229_v35, %v1217_v34  ;;  %v1421_v20 = vld [vmem:[#allocation2 + $0x28e8] sm:$0xff]  ;;  %v1411_v21 = vld [vmem:[#allocation2 + $0x2898] sm:$0xff] }
 0x11b   :  { %5633 = vmatpush1.bf16.msra.mxu0 %v5632_v46  ;;  %v1230_v46 = vld [vmem:[#allocation2 + $0x22f0] sm:$0xff] }
 0x11c   :  { %5993 = vmatpush1.bf16.msra.mxu1 %v5992_v47  ;;  %5635 = vmatprep.subr.bf16.mxu0 %v5634_v48  ;;  %v1241_v47 = vld [vmem:[#allocation2 + $0x2348] sm:$0xff] }
 0x11d   :  { %5995 = vmatprep.subr.bf16.mxu1 %v5994_v53  ;;  %v1253_v48 = vld [vmem:[#allocation2 + $0x23a8] sm:$0xff]  ;;  %v6012_v53 = vpack.c.bf16 %v1230_v46, %v1218_v44  ;;  %v1339_v44 = vld [vmem:[#allocation2 + $0x2658] sm:$0xff]  ;;  %v5668_v46 = vpack.c.bf16 %v1324_v37, %v1312_v36 }
 0x11e   :  { %v5654_v54 = vpack.c.bf16 %v1253_v48, %v1241_v47  ;;  %v5670_v48 = vpack.c.bf16 %v1349_v43, %v1337_v42  ;;  %v1445_v36 = vld [vmem:[#allocation2 + $0x29a8] sm:$0xff]  ;;  %v1435_v37 = vld [vmem:[#allocation2 + $0x2958] sm:$0xff]  ;;  %v1432_v43 = vld [vmem:[#allocation2 + $0x2940] sm:$0xff] }
 0x11f   :  { %5637 = vmatpush1.bf16.msra.mxu0 %v5636_v60  ;;  %v1254_v60 = vld [vmem:[#allocation2 + $0x23b0] sm:$0xff] }
 0x120   :  { %5997 = vmatpush1.bf16.msra.mxu1 %v5996_v61  ;;  %5639 = vmatprep.subr.bf16.mxu0 %v5638_v0  ;;  %v1265_v61 = vld [vmem:[#allocation2 + $0x2408] sm:$0xff]  ;;  %v6016_v5 = vpack.c.bf16 %v1254_v60, %v1242_v58  ;;  %v1363_v58 = vld [vmem:[#allocation2 + $0x2718] sm:$0xff]  ;;  %v5672_v60 = vpack.c.bf16 %v1348_v51, %v1336_v50 }
 0x121   :  { %5999 = vmatprep.subr.bf16.mxu1 %v5998_v4  ;;  %v1277_v0 = vld [vmem:[#allocation2 + $0x2468] sm:$0xff]  ;;  %v5656_v4 = vpack.c.bf16 %v1252_v57, %v1240_v56  ;;  %v1459_v51 = vld [vmem:[#allocation2 + $0x2a18] sm:$0xff] }
 0x122   :  { %v5658_v6 = vpack.c.bf16 %v1277_v0, %v1265_v61  ;;  %v1361_v56 = vld [vmem:[#allocation2 + $0x2708] sm:$0xff] }
 0x123   :  { %5641 = vmatpush1.bf16.msra.mxu0 %v5640_v10  ;;  %v6018_v10 = vpack.c.bf16 %v1279_v3, %v1267_v2  ;;  %v1373_v57 = vld [vmem:[#allocation2 + $0x2768] sm:$0xff]  ;;  %v1372_v2 = vld [vmem:[#allocation2 + $0x2760] sm:$0xff]  ;;  %v1362_v3 = vld [vmem:[#allocation2 + $0x2710] sm:$0xff] }
 0x124   :  { %6001 = vmatpush1.bf16.msra.mxu1 %v6000_v12  ;;  %5643 = vmatprep.subr.bf16.mxu0 %v5642_v13  ;;  %v1278_v12 = vld [vmem:[#allocation2 + $0x2470] sm:$0xff]  ;;  %v1289_v13 = vld [vmem:[#allocation2 + $0x24c8] sm:$0xff]  ;;  %v5674_v0 = vpack.c.bf16 %v1373_v57, %v1361_v56  ;;  %v1456_v57 = vld [vmem:[#allocation2 + $0x2a00] sm:$0xff] }
 0x125   :  { %6003 = vmatprep.subr.bf16.mxu1 %v6002_v17  ;;  %v5660_v17 = vpack.c.bf16 %v1276_v8, %v1264_v7  ;;  %v6020_v18 = vpack.c.bf16 %v1278_v12, %v1266_v9  ;;  %v5662_v19 = vpack.c.bf16 %v1301_v14, %v1289_v13  ;;  %v1397_v7 = vld [vmem:[#allocation2 + $0x2828] sm:$0xff]  ;;  %v1387_v8 = vld [vmem:[#allocation2 + $0x27d8] sm:$0xff]  ;;  %v1384_v14 = vld [vmem:[#allocation2 + $0x27c0] sm:$0xff] }
 0x126   :  { %v1399_v9 = vld [vmem:[#allocation2 + $0x2838] sm:$0xff]  ;;  %v1469_v50 = vld [vmem:[#allocation2 + $0x2a68] sm:$0xff] }
 0x127   :  { %5645 = vmatpush1.bf16.msra.mxu0 %v5644_v24  ;;  %v6022_v24 = vpack.c.bf16 %v1303_v16, %v1291_v49  ;;  %v1396_v49 = vld [vmem:[#allocation2 + $0x2820] sm:$0xff]  ;;  %v1386_v16 = vld [vmem:[#allocation2 + $0x27d0] sm:$0xff] }
 0x128   :  { %6005 = vmatpush1.bf16.msra.mxu1 %v6004_v22  ;;  %5647 = vmatprep.subr.bf16.mxu0 %v5646_v27  ;;  %v1302_v22 = vld [vmem:[#allocation2 + $0x2530] sm:$0xff]  ;;  %v1313_v27 = vld [vmem:[#allocation2 + $0x2588] sm:$0xff] }
 0x129   :  { %6007 = vmatprep.subr.bf16.mxu1 %v6006_v31  ;;  %v1327_v31 = vld [vmem:[#allocation2 + $0x25f8] sm:$0xff]  ;;  %v6024_v34 = vpack.c.bf16 %v1302_v22, %v1290_v23  ;;  %v5666_v35 = vpack.c.bf16 %v1325_v28, %v1313_v27  ;;  %v1408_v28 = vld [vmem:[#allocation2 + $0x2880] sm:$0xff] }
 0x12a   :  { %v1423_v23 = vld [vmem:[#allocation2 + $0x28f8] sm:$0xff] }
 0x12b   :  { %5649 = vmatpush1.bf16.msra.mxu0 %v5648_v38  ;;  %v1314_v38 = vld [vmem:[#allocation2 + $0x2590] sm:$0xff] }
 0x12c   :  { %6009 = vmatpush1.bf16.msra.mxu1 %v6008_v40  ;;  %5651 = vmatprep.subr.bf16.mxu0 %v5650_v41  ;;  %v6026_v40 = vpack.c.bf16 %v1327_v31, %v1315_v30  ;;  %v1326_v41 = vld [vmem:[#allocation2 + $0x25f0] sm:$0xff]  ;;  %v1420_v30 = vld [vmem:[#allocation2 + $0x28e0] sm:$0xff] }
 0x12d   :  { %6011 = vmatprep.subr.bf16.mxu1 %v6010_v45  ;;  %v1351_v45 = vld [vmem:[#allocation2 + $0x26b8] sm:$0xff]  ;;  %v6028_v47 = vpack.c.bf16 %v1326_v41, %v1314_v38  ;;  %v1410_v31 = vld [vmem:[#allocation2 + $0x2890] sm:$0xff] }
 0x12e   :  { %v1447_v38 = vld [vmem:[#allocation2 + $0x29b8] sm:$0xff] }
 0x12f   :  { %5653 = vmatpush1.bf16.msra.mxu0 %v5652_v52  ;;  %v1338_v52 = vld [vmem:[#allocation2 + $0x2650] sm:$0xff] }
 0x130   :  { %6013 = vmatpush1.bf16.msra.mxu1 %v6012_v53  ;;  %5655 = vmatprep.subr.bf16.mxu0 %v5654_v54  ;;  %v6030_v53 = vpack.c.bf16 %v1351_v45, %v1339_v44  ;;  %v1350_v54 = vld [vmem:[#allocation2 + $0x26b0] sm:$0xff]  ;;  %v1444_v44 = vld [vmem:[#allocation2 + $0x29a0] sm:$0xff] }
 0x131   :  { %6015 = vmatprep.subr.bf16.mxu1 %v6014_v59  ;;  %v1375_v59 = vld [vmem:[#allocation2 + $0x2778] sm:$0xff]  ;;  %v6032_v61 = vpack.c.bf16 %v1350_v54, %v1338_v52  ;;  %v1434_v45 = vld [vmem:[#allocation2 + $0x2950] sm:$0xff] }
 0x132   :  { %v1471_v52 = vld [vmem:[#allocation2 + $0x2a78] sm:$0xff] }
 0x133   :  { %5657 = vmatpush1.bf16.msra.mxu0 %v5656_v4  ;;  %v6034_v4 = vpack.c.bf16 %v1375_v59, %v1363_v58  ;;  %v1468_v58 = vld [vmem:[#allocation2 + $0x2a60] sm:$0xff]  ;;  %v1458_v59 = vld [vmem:[#allocation2 + $0x2a10] sm:$0xff] }
 0x134   :  { %6017 = vmatpush1.bf16.msra.mxu1 %v6016_v5  ;;  %5659 = vmatprep.subr.bf16.mxu0 %v5658_v6  ;;  %v1374_v5 = vld [vmem:[#allocation2 + $0x2770] sm:$0xff]  ;;  %v1385_v6 = vld [vmem:[#allocation2 + $0x27c8] sm:$0xff] }
 0x135   :  { %6019 = vmatprep.subr.bf16.mxu1 %v6018_v10  ;;  %v5676_v10 = vpack.c.bf16 %v1372_v2, %v1360_v1  ;;  %v6036_v12 = vpack.c.bf16 %v1374_v5, %v1362_v3  ;;  %v5678_v13 = vpack.c.bf16 %v1397_v7, %v1385_v6  ;;  %v1493_v1 = vld [vmem:[#allocation2 + $0x2b28] sm:$0xff]  ;;  %v1483_v2 = vld [vmem:[#allocation2 + $0x2ad8] sm:$0xff]  ;;  %v1480_v7 = vld [vmem:[#allocation2 + $0x2ac0] sm:$0xff] }
 0x136   :  { %2547 = vmatmul.mubr.f32.vlgmr.msra.gmra.mrb[0].mxu0 %v8210_v55  ;;  %v1495_v3 = vld [vmem:[#allocation2 + $0x2b38] sm:$0xff] }
 0x137   :  { %5661 = vmatpush1.bf16.msra.mxu0 %v5660_v17  ;;  %2973 = vmatmul.mubr.f32.vlgmr.msra.gmra.mrb[0].mxu1 %v8210_v55  ;;  %v6038_v17 = vpack.c.bf16 %v1399_v9, %v1387_v8  ;;  %v1492_v8 = vld [vmem:[#allocation2 + $0x2b20] sm:$0xff]  ;;  %v1482_v9 = vld [vmem:[#allocation2 + $0x2ad0] sm:$0xff] }
 0x138   :  { %6021 = vmatpush1.bf16.msra.mxu1 %v6020_v18  ;;  %5663 = vmatprep.subr.bf16.mxu0 %v5662_v19  ;;  %v1398_v18 = vld [vmem:[#allocation2 + $0x2830] sm:$0xff]  ;;  %v1409_v19 = vld [vmem:[#allocation2 + $0x2888] sm:$0xff] }
 0x139   :  { %6023 = vmatprep.subr.bf16.mxu1 %v6022_v24  ;;  %2617 = vmatprep.mubr.f32.mxu0 %v8227_v29  ;;  %v5680_v24 = vpack.c.bf16 %v1396_v49, %v1384_v14  ;;  %v6040_v22 = vpack.c.bf16 %v1398_v18, %v1386_v16  ;;  %v5682_v27 = vpack.c.bf16 %v1421_v20, %v1409_v19  ;;  %v1517_v14 = vld [vmem:[#allocation2 + $0x2be8] sm:$0xff]  ;;  %v1507_v49 = vld [vmem:[#allocation2 + $0x2b98] sm:$0xff]  ;;  %v1504_v20 = vld [vmem:[#allocation2 + $0x2b80] sm:$0xff] }
 0x13a   :  { %3043 = vmatprep.mubr.f32.mxu1 %v8227_v29  ;;  %v1519_v16 = vld [vmem:[#allocation2 + $0x2bf8] sm:$0xff] }
 0x13b   :  { %5665 = vmatpush1.bf16.msra.mxu0 %v5664_v33  ;;  %v6042_v33 = vpack.c.bf16 %v1423_v23, %v1411_v21  ;;  %v1516_v21 = vld [vmem:[#allocation2 + $0x2be0] sm:$0xff]  ;;  %v1506_v23 = vld [vmem:[#allocation2 + $0x2b90] sm:$0xff] }
 0x13c   :  { %6025 = vmatpush1.bf16.msra.mxu1 %v6024_v34  ;;  %5667 = vmatprep.subr.bf16.mxu0 %v5666_v35  ;;  %v1422_v34 = vld [vmem:[#allocation2 + $0x28f0] sm:$0xff]  ;;  %v1433_v35 = vld [vmem:[#allocation2 + $0x2948] sm:$0xff] }
 0x13d   :  { %6027 = vmatprep.subr.bf16.mxu1 %v6026_v40  ;;  %v5684_v40 = vpack.c.bf16 %v1420_v30, %v1408_v28  ;;  %v6044_v41 = vpack.c.bf16 %v1422_v34, %v1410_v31  ;;  %v5686_v42 = vpack.c.bf16 %v1445_v36, %v1433_v35  ;;  %v1541_v28 = vld [vmem:[#allocation2 + $0x2ca8] sm:$0xff]  ;;  %v1531_v30 = vld [vmem:[#allocation2 + $0x2c58] sm:$0xff]  ;;  %v1528_v36 = vld [vmem:[#allocation2 + $0x2c40] sm:$0xff] }
 0x13e   :  { %v1543_v31 = vld [vmem:[#allocation2 + $0x2cb8] sm:$0xff] }
 0x13f   :  { %5669 = vmatpush1.bf16.msra.mxu0 %v5668_v46  ;;  %v6046_v46 = vpack.c.bf16 %v1447_v38, %v1435_v37  ;;  %v1540_v37 = vld [vmem:[#allocation2 + $0x2ca0] sm:$0xff]  ;;  %v1530_v38 = vld [vmem:[#allocation2 + $0x2c50] sm:$0xff] }
 0x140   :  { %6029 = vmatpush1.bf16.msra.mxu1 %v6028_v47  ;;  %5671 = vmatprep.subr.bf16.mxu0 %v5670_v48  ;;  %v1446_v47 = vld [vmem:[#allocation2 + $0x29b0] sm:$0xff]  ;;  %v1457_v48 = vld [vmem:[#allocation2 + $0x2a08] sm:$0xff] }
 0x141   :  { %6031 = vmatprep.subr.bf16.mxu1 %v6030_v53  ;;  %v5688_v53 = vpack.c.bf16 %v1444_v44, %v1432_v43  ;;  %v6048_v54 = vpack.c.bf16 %v1446_v47, %v1434_v45  ;;  %v5690_v56 = vpack.c.bf16 %v1469_v50, %v1457_v48  ;;  %v1565_v43 = vld [vmem:[#allocation2 + $0x2d68] sm:$0xff]  ;;  %v1555_v44 = vld [vmem:[#allocation2 + $0x2d18] sm:$0xff]  ;;  %v1552_v50 = vld [vmem:[#allocation2 + $0x2d00] sm:$0xff] }
 0x142   :  { %v1567_v45 = vld [vmem:[#allocation2 + $0x2d78] sm:$0xff] }
 0x143   :  { %5673 = vmatpush1.bf16.msra.mxu0 %v5672_v60  ;;  %v6050_v60 = vpack.c.bf16 %v1471_v52, %v1459_v51  ;;  %v1564_v51 = vld [vmem:[#allocation2 + $0x2d60] sm:$0xff]  ;;  %v1554_v52 = vld [vmem:[#allocation2 + $0x2d10] sm:$0xff] }
 0x144   :  { %6033 = vmatpush1.bf16.msra.mxu1 %v6032_v61  ;;  %5675 = vmatprep.subr.bf16.mxu0 %v5674_v0  ;;  %v1470_v61 = vld [vmem:[#allocation2 + $0x2a70] sm:$0xff]  ;;  %v1481_v0 = vld [vmem:[#allocation2 + $0x2ac8] sm:$0xff] }
 0x145   :  { %6035 = vmatprep.subr.bf16.mxu1 %v6034_v4  ;;  %v5692_v4 = vpack.c.bf16 %v1468_v58, %v1456_v57  ;;  %v6052_v5 = vpack.c.bf16 %v1470_v61, %v1458_v59  ;;  %v5694_v6 = vpack.c.bf16 %v1493_v1, %v1481_v0  ;;  %v1589_v57 = vld [vmem:[#allocation2 + $0x2e28] sm:$0xff]  ;;  %v1579_v58 = vld [vmem:[#allocation2 + $0x2dd8] sm:$0xff]  ;;  %v1576_v1 = vld [vmem:[#allocation2 + $0x2dc0] sm:$0xff] }
 0x146   :  { %v1591_v59 = vld [vmem:[#allocation2 + $0x2e38] sm:$0xff] }
 0x147   :  { %5677 = vmatpush1.bf16.msra.mxu0 %v5676_v10  ;;  %v6054_v10 = vpack.c.bf16 %v1495_v3, %v1483_v2  ;;  %v1588_v2 = vld [vmem:[#allocation2 + $0x2e20] sm:$0xff]  ;;  %v1578_v3 = vld [vmem:[#allocation2 + $0x2dd0] sm:$0xff] }
 0x148   :  { %6037 = vmatpush1.bf16.msra.mxu1 %v6036_v12  ;;  %5679 = vmatprep.subr.bf16.mxu0 %v5678_v13  ;;  %v1494_v12 = vld [vmem:[#allocation2 + $0x2b30] sm:$0xff]  ;;  %v1505_v13 = vld [vmem:[#allocation2 + $0x2b88] sm:$0xff] }
 0x149   :  { %6039 = vmatprep.subr.bf16.mxu1 %v6038_v17  ;;  %v5696_v17 = vpack.c.bf16 %v1492_v8, %v1480_v7  ;;  %v6056_v18 = vpack.c.bf16 %v1494_v12, %v1482_v9  ;;  %v5698_v19 = vpack.c.bf16 %v1517_v14, %v1505_v13  ;;  %v1613_v7 = vld [vmem:[#allocation2 + $0x2ee8] sm:$0xff]  ;;  %v1603_v8 = vld [vmem:[#allocation2 + $0x2e98] sm:$0xff]  ;;  %v1600_v14 = vld [vmem:[#allocation2 + $0x2e80] sm:$0xff] }
 0x14a   :  { %v1615_v9 = vld [vmem:[#allocation2 + $0x2ef8] sm:$0xff] }
 0x14b   :  { %5681 = vmatpush1.bf16.msra.mxu0 %v5680_v24  ;;  %v6058_v24 = vpack.c.bf16 %v1519_v16, %v1507_v49  ;;  %v1612_v49 = vld [vmem:[#allocation2 + $0x2ee0] sm:$0xff]  ;;  %v1602_v16 = vld [vmem:[#allocation2 + $0x2e90] sm:$0xff] }
 0x14c   :  { %6041 = vmatpush1.bf16.msra.mxu1 %v6040_v22  ;;  %5683 = vmatprep.subr.bf16.mxu0 %v5682_v27  ;;  %v1518_v22 = vld [vmem:[#allocation2 + $0x2bf0] sm:$0xff]  ;;  %v1529_v27 = vld [vmem:[#allocation2 + $0x2c48] sm:$0xff] }
 0x14d   :  { %6043 = vmatprep.subr.bf16.mxu1 %v6042_v33  ;;  %v5700_v33 = vpack.c.bf16 %v1516_v21, %v1504_v20  ;;  %v6060_v34 = vpack.c.bf16 %v1518_v22, %v1506_v23  ;;  %v5702_v35 = vpack.c.bf16 %v1541_v28, %v1529_v27  ;;  %v1637_v20 = vld [vmem:[#allocation2 + $0x2fa8] sm:$0xff]  ;;  %v1627_v21 = vld [vmem:[#allocation2 + $0x2f58] sm:$0xff]  ;;  %v1624_v28 = vld [vmem:[#allocation2 + $0x2f40] sm:$0xff] }
 0x14e   :  { %v1639_v23 = vld [vmem:[#allocation2 + $0x2fb8] sm:$0xff] }
 0x14f   :  { %5685 = vmatpush1.bf16.msra.mxu0 %v5684_v40  ;;  %v6062_v40 = vpack.c.bf16 %v1543_v31, %v1531_v30  ;;  %v1636_v30 = vld [vmem:[#allocation2 + $0x2fa0] sm:$0xff]  ;;  %v1626_v31 = vld [vmem:[#allocation2 + $0x2f50] sm:$0xff] }
 0x150   :  { %6045 = vmatpush1.bf16.msra.mxu1 %v6044_v41  ;;  %5687 = vmatprep.subr.bf16.mxu0 %v5686_v42  ;;  %v1542_v41 = vld [vmem:[#allocation2 + $0x2cb0] sm:$0xff]  ;;  %v1553_v42 = vld [vmem:[#allocation2 + $0x2d08] sm:$0xff] }
 0x151   :  { %6047 = vmatprep.subr.bf16.mxu1 %v6046_v46  ;;  %v5704_v46 = vpack.c.bf16 %v1540_v37, %v1528_v36  ;;  %v6064_v47 = vpack.c.bf16 %v1542_v41, %v1530_v38  ;;  %v5706_v48 = vpack.c.bf16 %v1565_v43, %v1553_v42  ;;  %v1661_v36 = vld [vmem:[#allocation2 + $0x3068] sm:$0xff]  ;;  %v1651_v37 = vld [vmem:[#allocation2 + $0x3018] sm:$0xff]  ;;  %v5720_v41 = vpack.c.bf16 %v1636_v30, %v1624_v28  ;;  %v1734_v30 = vld [vmem:[#allocation2 + $0x32b0] sm:$0xff] }
 0x152   :  { %v1663_v38 = vld [vmem:[#allocation2 + $0x3078] sm:$0xff] }
 0x153   :  { %5689 = vmatpush1.bf16.msra.mxu0 %v5688_v53  ;;  %v6066_v53 = vpack.c.bf16 %v1567_v45, %v1555_v44  ;;  %v1648_v44 = vld [vmem:[#allocation2 + $0x3000] sm:$0xff] }
 0x154   :  { %6049 = vmatpush1.bf16.msra.mxu1 %v6048_v54  ;;  %5691 = vmatprep.subr.bf16.mxu0 %v5690_v56  ;;  %v1566_v54 = vld [vmem:[#allocation2 + $0x2d70] sm:$0xff]  ;;  %v1577_v56 = vld [vmem:[#allocation2 + $0x2dc8] sm:$0xff]  ;;  %v1660_v45 = vld [vmem:[#allocation2 + $0x3060] sm:$0xff] }
 0x155   :  { %6051 = vmatprep.subr.bf16.mxu1 %v6050_v60  ;;  %v5708_v60 = vpack.c.bf16 %v1564_v51, %v1552_v50  ;;  %v6068_v61 = vpack.c.bf16 %v1566_v54, %v1554_v52  ;;  %v5710_v0 = vpack.c.bf16 %v1589_v57, %v1577_v56  ;;  %v1673_v50 = vld [vmem:[#allocation2 + $0x30c8] sm:$0xff]  ;;  %v1687_v54 = vld [vmem:[#allocation2 + $0x3138] sm:$0xff]  ;;  %v5724_v56 = vpack.c.bf16 %v1660_v45, %v1648_v44  ;;  %v1758_v45 = vld [vmem:[#allocation2 + $0x3370] sm:$0xff] }
 0x156   :  { %v1685_v51 = vld [vmem:[#allocation2 + $0x3128] sm:$0xff] }
 0x157   :  { %5693 = vmatpush1.bf16.msra.mxu0 %v5692_v4  ;;  %v6070_v4 = vpack.c.bf16 %v1591_v59, %v1579_v58  ;;  %v5726_v58 = vpack.c.bf16 %v1685_v51, %v1673_v50  ;;  %v1672_v59 = vld [vmem:[#allocation2 + $0x30c0] sm:$0xff]  ;;  %v1783_v50 = vld [vmem:[#allocation2 + $0x3438] sm:$0xff] }
 0x158   :  { %6053 = vmatpush1.bf16.msra.mxu1 %v6052_v5  ;;  %5695 = vmatprep.subr.bf16.mxu0 %v5694_v6  ;;  %v1590_v5 = vld [vmem:[#allocation2 + $0x2e30] sm:$0xff]  ;;  %v1601_v6 = vld [vmem:[#allocation2 + $0x2e88] sm:$0xff] }
 0x159   :  { %6055 = vmatprep.subr.bf16.mxu1 %v6054_v10  ;;  %v5712_v10 = vpack.c.bf16 %v1588_v2, %v1576_v1  ;;  %v6072_v12 = vpack.c.bf16 %v1590_v5, %v1578_v3  ;;  %v5714_v13 = vpack.c.bf16 %v1613_v7, %v1601_v6  ;;  %v1686_v1 = vld [vmem:[#allocation2 + $0x3130] sm:$0xff]  ;;  %v1697_v2 = vld [vmem:[#allocation2 + $0x3188] sm:$0xff]  ;;  %v1699_v5 = vld [vmem:[#allocation2 + $0x3198] sm:$0xff] }
 0x15a   :  { %v1709_v3 = vld [vmem:[#allocation2 + $0x31e8] sm:$0xff]  ;;  %v1711_v6 = vld [vmem:[#allocation2 + $0x31f8] sm:$0xff] }
 0x15b   :  { %5697 = vmatpush1.bf16.msra.mxu0 %v5696_v17  ;;  %v6074_v17 = vpack.c.bf16 %v1615_v9, %v1603_v8  ;;  %v5730_v9 = vpack.c.bf16 %v1709_v3, %v1697_v2  ;;  %v1807_v2 = vld [vmem:[#allocation2 + $0x34f8] sm:$0xff] }
 0x15c   :  { %6057 = vmatpush1.bf16.msra.mxu1 %v6056_v18  ;;  %5699 = vmatprep.subr.bf16.mxu0 %v5698_v19  ;;  %v1614_v18 = vld [vmem:[#allocation2 + $0x2ef0] sm:$0xff]  ;;  %v1625_v19 = vld [vmem:[#allocation2 + $0x2f48] sm:$0xff] }
 0x15d   :  { %6059 = vmatprep.subr.bf16.mxu1 %v6058_v24  ;;  %v5716_v24 = vpack.c.bf16 %v1612_v49, %v1600_v14  ;;  %v6076_v22 = vpack.c.bf16 %v1614_v18, %v1602_v16  ;;  %v5718_v27 = vpack.c.bf16 %v1637_v20, %v1625_v19  ;;  %v6090_v14 = vpack.c.bf16 %v1711_v6, %v1699_v5  ;;  %v1710_v49 = vld [vmem:[#allocation2 + $0x31f0] sm:$0xff]  ;;  %v1721_v16 = vld [vmem:[#allocation2 + $0x3248] sm:$0xff]  ;;  %v1723_v18 = vld [vmem:[#allocation2 + $0x3258] sm:$0xff] }
 0x15e   :  { %v1735_v19 = vld [vmem:[#allocation2 + $0x32b8] sm:$0xff] }
 0x15f   :  { %5701 = vmatpush1.bf16.msra.mxu0 %v5700_v33  ;;  %v6078_v33 = vpack.c.bf16 %v1639_v23, %v1627_v21  ;;  %v6094_v28 = vpack.c.bf16 %v1735_v19, %v1723_v18 }
 0x160   :  { %6061 = vmatpush1.bf16.msra.mxu1 %v6060_v34  ;;  %5703 = vmatprep.subr.bf16.mxu0 %v5702_v35  ;;  %v1638_v34 = vld [vmem:[#allocation2 + $0x2fb0] sm:$0xff]  ;;  %v1649_v35 = vld [vmem:[#allocation2 + $0x3008] sm:$0xff] }
 0x161   :  { %6063 = vmatprep.subr.bf16.mxu1 %v6062_v40  ;;  %v8236_v40 = vld [vmem:[%s8431_s0 + $0x10] sm:$0xff]  ;;  %v6080_v42 = vpack.c.bf16 %v1638_v34, %v1626_v31  ;;  %v5722_v43 = vpack.c.bf16 %v1661_v36, %v1649_v35  ;;  %v1745_v31 = vld [vmem:[#allocation2 + $0x3308] sm:$0xff]  ;;  %v1747_v34 = vld [vmem:[#allocation2 + $0x3318] sm:$0xff]  ;;  %s8039_s0 = smov [#allocation14]  }
 0x162   :  { %v8240_v52 = vrot.slane %v8236_v40, %v8173_v11  ;;  %v1759_v35 = vld [vmem:[#allocation2 + $0x3378] sm:$0xff]  ;;  %s5276_s4 = sshll.u32 %s8039_s0, 4  ;;  %s5277_s4 = int_to_ptr.vmem [resolvable:$true] %s5276_s4 }
 0x163   :  { %5705 = vmatpush1.bf16.msra.mxu0 %v5704_v46  ;;  %v1650_v46 = vld [vmem:[#allocation2 + $0x3010] sm:$0xff]  ;;  %v6098_v44 = vpack.c.bf16 %v1759_v35, %v1747_v34  ;;  %s7923_s30 = scalar_lea.vmem %s5277_s4, 32  ;;  %p7928_p7 = scmp.lt.s32.totalorder %s5277_s4, %s5277_s4 }
 0x164   :  { %6065 = vmatpush1.bf16.msra.mxu1 %v6064_v47  ;;  %5707 = vmatprep.subr.bf16.mxu0 %v5706_v48  ;;  %v6082_v47 = vpack.c.bf16 %v1663_v38, %v1651_v37  ;;  %v1662_v48 = vld [vmem:[#allocation2 + $0x3070] sm:$0xff]  ;;  %p7924_p6 = scmp.ne.s32.totalorder %s5277_s4, %s7923_s30  ;;  %p7929_p8 = scmp.lt.s32.totalorder %s7923_s30, %s7923_s30 }
 0x165   :  { %6067 = vmatprep.subr.bf16.mxu1 %v6066_v53  ;;  %v1675_v53 = vld [vmem:[#allocation2 + $0x30d8] sm:$0xff]  ;;  %v6084_v57 = vpack.c.bf16 %v1662_v48, %v1650_v46  ;;  %v1769_v46 = vld [vmem:[#allocation2 + $0x33c8] sm:$0xff] }
 0x166   :  { %v1771_v48 = vld [vmem:[#allocation2 + $0x33d8] sm:$0xff]  ;;  %p7930_p9 = por %p7929_p8, %p7928_p7 }
 0x167   :  { %5709 = vmatpush1.bf16.msra.mxu0 %v5708_v60  ;;  %v1684_v60 = vld [vmem:[#allocation2 + $0x3120] sm:$0xff] }
 0x168   :  { %6069 = vmatpush1.bf16.msra.mxu1 %v6068_v61  ;;  %5711 = vmatprep.subr.bf16.mxu0 %v5710_v0  ;;  %v1674_v61 = vld [vmem:[#allocation2 + $0x30d0] sm:$0xff]  ;;  %v6086_v0 = vpack.c.bf16 %v1687_v54, %v1675_v53  ;;  %v5728_v7 = vpack.c.bf16 %v1684_v60, %v1672_v59  ;;  %v6102_v59 = vpack.c.bf16 %v1783_v50, %v1771_v48  ;;  %p7931_p10 = pnand %p7930_p9, %p7924_p6 }
 0x169   :  { %6071 = vmatprep.subr.bf16.mxu1 %v6070_v4  ;;  %v8244_v4 = vcombine.high %v8240_v52, %v8240_v52  ;;  %v6088_v8 = vpack.c.bf16 %v1686_v1, %v1674_v61  ;;  %v1782_v60 = vld [vmem:[#allocation2 + $0x3430] sm:$0xff]  ;;  %v1793_v61 = vld [vmem:[#allocation2 + $0x3488] sm:$0xff]  ;;  %v1795_v1 = vld [vmem:[#allocation2 + $0x3498] sm:$0xff] }
 0x16b   :  { %5713 = vmatpush1.bf16.msra.mxu0 %v5712_v10  ;;  %v1696_v10 = vld [vmem:[#allocation2 + $0x3180] sm:$0xff] }
 0x16c   :  { %6073 = vmatpush1.bf16.msra.mxu1 %v6072_v12  ;;  %5715 = vmatprep.subr.bf16.mxu0 %v5714_v13  ;;  %v1708_v12 = vld [vmem:[#allocation2 + $0x31e0] sm:$0xff]  ;;  %v1698_v13 = vld [vmem:[#allocation2 + $0x3190] sm:$0xff] }
 0x16d   :  { %6075 = vmatprep.subr.bf16.mxu1 %v6074_v17  ;;  %v1733_v17 = vld [vmem:[#allocation2 + $0x32a8] sm:$0xff]  ;;  %v5732_v20 = vpack.c.bf16 %v1708_v12, %v1696_v10  ;;  %v6092_v21 = vpack.c.bf16 %v1710_v49, %v1698_v13  ;;  %v6106_v10 = vpack.c.bf16 %v1807_v2, %v1795_v1  ;;  %v1806_v12 = vld [vmem:[#allocation2 + $0x34f0] sm:$0xff]  ;;  %v1819_v49 = vld [vmem:[#allocation2 + $0x3558] sm:$0xff] }
 0x16e   :  { %v5734_v23 = vpack.c.bf16 %v1733_v17, %v1721_v16  ;;  %v1817_v13 = vld [vmem:[#allocation2 + $0x3548] sm:$0xff]  ;;  %v1831_v16 = vld [vmem:[#allocation2 + $0x35b8] sm:$0xff] }
 0x16f   :  { %5717 = vmatpush1.bf16.msra.mxu0 %v5716_v24  ;;  %v1720_v24 = vld [vmem:[#allocation2 + $0x3240] sm:$0xff] }
 0x170   :  { %6077 = vmatpush1.bf16.msra.mxu1 %v6076_v22  ;;  %5719 = vmatprep.subr.bf16.mxu0 %v5718_v27  ;;  %v1732_v22 = vld [vmem:[#allocation2 + $0x32a0] sm:$0xff]  ;;  %v1722_v27 = vld [vmem:[#allocation2 + $0x3250] sm:$0xff] }
 0x171   :  { %6079 = vmatprep.subr.bf16.mxu1 %v6078_v33  ;;  %v1757_v33 = vld [vmem:[#allocation2 + $0x3368] sm:$0xff]  ;;  %v5736_v36 = vpack.c.bf16 %v1732_v22, %v1720_v24  ;;  %v6096_v37 = vpack.c.bf16 %v1734_v30, %v1722_v27  ;;  %v6110_v24 = vpack.c.bf16 %v1831_v16, %v1819_v49  ;;  %v1830_v22 = vld [vmem:[#allocation2 + $0x35b0] sm:$0xff]  ;;  %v1843_v30 = vld [vmem:[#allocation2 + $0x3618] sm:$0xff] }
 0x172   :  { %v5738_v38 = vpack.c.bf16 %v1757_v33, %v1745_v31  ;;  %v1841_v27 = vld [vmem:[#allocation2 + $0x3608] sm:$0xff]  ;;  %v1855_v31 = vld [vmem:[#allocation2 + $0x3678] sm:$0xff] }
 0x173   :  { %5721 = vmatpush1.bf16.msra.mxu0 %v5720_v41  ;;  %v1744_v41 = vld [vmem:[#allocation2 + $0x3300] sm:$0xff] }
 0x174   :  { %6081 = vmatpush1.bf16.msra.mxu1 %v6080_v42  ;;  %5723 = vmatprep.subr.bf16.mxu0 %v5722_v43  ;;  %v1756_v42 = vld [vmem:[#allocation2 + $0x3360] sm:$0xff]  ;;  %v1746_v43 = vld [vmem:[#allocation2 + $0x3310] sm:$0xff] }
 0x175   :  { %6083 = vmatprep.subr.bf16.mxu1 %v6082_v47  ;;  %v1781_v47 = vld [vmem:[#allocation2 + $0x3428] sm:$0xff]  ;;  %v5740_v51 = vpack.c.bf16 %v1756_v42, %v1744_v41  ;;  %v6100_v53 = vpack.c.bf16 %v1758_v45, %v1746_v43  ;;  %v6114_v41 = vpack.c.bf16 %v1855_v31, %v1843_v30  ;;  %v1854_v42 = vld [vmem:[#allocation2 + $0x3670] sm:$0xff]  ;;  %v1867_v45 = vld [vmem:[#allocation2 + $0x36d8] sm:$0xff] }
 0x176   :  { %2618 = vmatmul.mubr.f32.vlgmr.msra.gmra.mrb[0].mxu0 %v8223_v15  ;;  %v5742_v54 = vpack.c.bf16 %v1781_v47, %v1769_v46  ;;  %v1865_v43 = vld [vmem:[#allocation2 + $0x36c8] sm:$0xff]  ;;  %v1879_v46 = vld [vmem:[#allocation2 + $0x3738] sm:$0xff] }
 0x177   :  { %5725 = vmatpush1.bf16.msra.mxu0 %v5724_v56  ;;  %3044 = vmatmul.mubr.f32.vlgmr.msra.gmra.mrb[0].mxu1 %v8223_v15  ;;  %v1768_v56 = vld [vmem:[#allocation2 + $0x33c0] sm:$0xff] }
 0x178   :  { %6085 = vmatpush1.bf16.msra.mxu1 %v6084_v57  ;;  %5727 = vmatprep.subr.bf16.mxu0 %v5726_v58  ;;  %v1780_v57 = vld [vmem:[#allocation2 + $0x3420] sm:$0xff]  ;;  %v1770_v58 = vld [vmem:[#allocation2 + $0x33d0] sm:$0xff] }
 0x179   :  { %6087 = vmatprep.subr.bf16.mxu1 %v6086_v0  ;;  %2688 = vmatprep.mubr.f32.mxu0 %v8244_v4  ;;  %v1805_v0 = vld [vmem:[#allocation2 + $0x34e8] sm:$0xff]  ;;  %v5744_v3 = vpack.c.bf16 %v1780_v57, %v1768_v56  ;;  %v6104_v5 = vpack.c.bf16 %v1782_v60, %v1770_v58  ;;  %v6118_v56 = vpack.c.bf16 %v1879_v46, %v1867_v45  ;;  %v1878_v57 = vld [vmem:[#allocation2 + $0x3730] sm:$0xff]  ;;  %v1891_v60 = vld [vmem:[#allocation2 + $0x3798] sm:$0xff] }
 0x17a   :  { %3114 = vmatprep.mubr.f32.mxu1 %v8244_v4  ;;  %v5746_v6 = vpack.c.bf16 %v1805_v0, %v1793_v61  ;;  %v1889_v58 = vld [vmem:[#allocation2 + $0x3788] sm:$0xff]  ;;  %v1903_v61 = vld [vmem:[#allocation2 + $0x37f8] sm:$0xff] }
 0x17b   :  { %5729 = vmatpush1.bf16.msra.mxu0 %v5728_v7  ;;  %v1792_v7 = vld [vmem:[#allocation2 + $0x3480] sm:$0xff] }
 0x17c   :  { %6089 = vmatpush1.bf16.msra.mxu1 %v6088_v8  ;;  %5731 = vmatprep.subr.bf16.mxu0 %v5730_v9  ;;  %v1804_v8 = vld [vmem:[#allocation2 + $0x34e0] sm:$0xff]  ;;  %v1794_v9 = vld [vmem:[#allocation2 + $0x3490] sm:$0xff] }
 0x17d   :  { %6091 = vmatprep.subr.bf16.mxu1 %v6090_v14  ;;  %v1829_v14 = vld [vmem:[#allocation2 + $0x35a8] sm:$0xff]  ;;  %v5748_v17 = vpack.c.bf16 %v1804_v8, %v1792_v7  ;;  %v6108_v18 = vpack.c.bf16 %v1806_v12, %v1794_v9  ;;  %v6122_v7 = vpack.c.bf16 %v1903_v61, %v1891_v60  ;;  %v1902_v8 = vld [vmem:[#allocation2 + $0x37f0] sm:$0xff]  ;;  %v1915_v12 = vld [vmem:[#allocation2 + $0x3858] sm:$0xff] }
 0x17e   :  { %v5750_v19 = vpack.c.bf16 %v1829_v14, %v1817_v13  ;;  %v1913_v9 = vld [vmem:[#allocation2 + $0x3848] sm:$0xff]  ;;  %v1927_v13 = vld [vmem:[#allocation2 + $0x38b8] sm:$0xff] }
 0x17f   :  { %5733 = vmatpush1.bf16.msra.mxu0 %v5732_v20  ;;  %v1816_v20 = vld [vmem:[#allocation2 + $0x3540] sm:$0xff] }
 0x180   :  { %6093 = vmatpush1.bf16.msra.mxu1 %v6092_v21  ;;  %5735 = vmatprep.subr.bf16.mxu0 %v5734_v23  ;;  %v1828_v21 = vld [vmem:[#allocation2 + $0x35a0] sm:$0xff]  ;;  %v1818_v23 = vld [vmem:[#allocation2 + $0x3550] sm:$0xff] }
 0x181   :  { %6095 = vmatprep.subr.bf16.mxu1 %v6094_v28  ;;  %v1853_v28 = vld [vmem:[#allocation2 + $0x3668] sm:$0xff]  ;;  %v5752_v33 = vpack.c.bf16 %v1828_v21, %v1816_v20  ;;  %v6112_v34 = vpack.c.bf16 %v1830_v22, %v1818_v23  ;;  %v6126_v20 = vpack.c.bf16 %v1927_v13, %v1915_v12  ;;  %v1926_v21 = vld [vmem:[#allocation2 + $0x38b0] sm:$0xff]  ;;  %v1939_v22 = vld [vmem:[#allocation2 + $0x3918] sm:$0xff] }
 0x182   :  { %v5754_v35 = vpack.c.bf16 %v1853_v28, %v1841_v27  ;;  %v1937_v23 = vld [vmem:[#allocation2 + $0x3908] sm:$0xff]  ;;  %v1951_v27 = vld [vmem:[#allocation2 + $0x3978] sm:$0xff] }
 0x183   :  { %5737 = vmatpush1.bf16.msra.mxu0 %v5736_v36  ;;  %v1840_v36 = vld [vmem:[#allocation2 + $0x3600] sm:$0xff] }
 0x184   :  { %6097 = vmatpush1.bf16.msra.mxu1 %v6096_v37  ;;  %5739 = vmatprep.subr.bf16.mxu0 %v5738_v38  ;;  %v1852_v37 = vld [vmem:[#allocation2 + $0x3660] sm:$0xff]  ;;  %v1842_v38 = vld [vmem:[#allocation2 + $0x3610] sm:$0xff] }
 0x185   :  { %6099 = vmatprep.subr.bf16.mxu1 %v6098_v44  ;;  %v1877_v44 = vld [vmem:[#allocation2 + $0x3728] sm:$0xff]  ;;  %v5756_v47 = vpack.c.bf16 %v1852_v37, %v1840_v36  ;;  %v6116_v48 = vpack.c.bf16 %v1854_v42, %v1842_v38  ;;  %v6130_v36 = vpack.c.bf16 %v1951_v27, %v1939_v22  ;;  %v1950_v37 = vld [vmem:[#allocation2 + $0x3970] sm:$0xff]  ;;  %v1963_v42 = vld [vmem:[#allocation2 + $0x39d8] sm:$0xff] }
 0x186   :  { %v5758_v50 = vpack.c.bf16 %v1877_v44, %v1865_v43  ;;  %v1961_v38 = vld [vmem:[#allocation2 + $0x39c8] sm:$0xff]  ;;  %v1975_v43 = vld [vmem:[#allocation2 + $0x3a38] sm:$0xff] }
 0x187   :  { %5741 = vmatpush1.bf16.msra.mxu0 %v5740_v51  ;;  %v1864_v51 = vld [vmem:[#allocation2 + $0x36c0] sm:$0xff] }
 0x188   :  { %6101 = vmatpush1.bf16.msra.mxu1 %v6100_v53  ;;  %5743 = vmatprep.subr.bf16.mxu0 %v5742_v54  ;;  %v1876_v53 = vld [vmem:[#allocation2 + $0x3720] sm:$0xff]  ;;  %v1866_v54 = vld [vmem:[#allocation2 + $0x36d0] sm:$0xff] }
 0x189   :  { %6103 = vmatprep.subr.bf16.mxu1 %v6102_v59  ;;  %v1901_v59 = vld [vmem:[#allocation2 + $0x37e8] sm:$0xff]  ;;  %v5760_v0 = vpack.c.bf16 %v1876_v53, %v1864_v51  ;;  %v6120_v1 = vpack.c.bf16 %v1878_v57, %v1866_v54  ;;  %v6134_v51 = vpack.c.bf16 %v1975_v43, %v1963_v42  ;;  %v1974_v53 = vld [vmem:[#allocation2 + $0x3a30] sm:$0xff]  ;;  %v1987_v57 = vld [vmem:[#allocation2 + $0x3a98] sm:$0xff] }
 0x18a   :  { %v5762_v2 = vpack.c.bf16 %v1901_v59, %v1889_v58  ;;  %v1985_v54 = vld [vmem:[#allocation2 + $0x3a88] sm:$0xff]  ;;  %v1999_v58 = vld [vmem:[#allocation2 + $0x3af8] sm:$0xff] }
 0x18b   :  { %5745 = vmatpush1.bf16.msra.mxu0 %v5744_v3  ;;  %v1888_v3 = vld [vmem:[#allocation2 + $0x3780] sm:$0xff] }
 0x18c   :  { %6105 = vmatpush1.bf16.msra.mxu1 %v6104_v5  ;;  %5747 = vmatprep.subr.bf16.mxu0 %v5746_v6  ;;  %v1900_v5 = vld [vmem:[#allocation2 + $0x37e0] sm:$0xff]  ;;  %v1890_v6 = vld [vmem:[#allocation2 + $0x3790] sm:$0xff] }
 0x18d   :  { %6107 = vmatprep.subr.bf16.mxu1 %v6106_v10  ;;  %v1925_v10 = vld [vmem:[#allocation2 + $0x38a8] sm:$0xff]  ;;  %v5764_v14 = vpack.c.bf16 %v1900_v5, %v1888_v3  ;;  %v6124_v49 = vpack.c.bf16 %v1902_v8, %v1890_v6  ;;  %v6138_v3 = vpack.c.bf16 %v1999_v58, %v1987_v57  ;;  %v1998_v5 = vld [vmem:[#allocation2 + $0x3af0] sm:$0xff]  ;;  %v2011_v8 = vld [vmem:[#allocation2 + $0x3b58] sm:$0xff] }
 0x18e   :  { %v5766_v16 = vpack.c.bf16 %v1925_v10, %v1913_v9  ;;  %v2009_v6 = vld [vmem:[#allocation2 + $0x3b48] sm:$0xff]  ;;  %v2023_v9 = vld [vmem:[#allocation2 + $0x3bb8] sm:$0xff] }
 0x18f   :  { %5749 = vmatpush1.bf16.msra.mxu0 %v5748_v17  ;;  %v1912_v17 = vld [vmem:[#allocation2 + $0x3840] sm:$0xff]  ;;  %v2095_v57 = vld [vmem:[#allocation2 + $0x3df8] sm:$0xff] }
 0x190   :  { %6109 = vmatpush1.bf16.msra.mxu1 %v6108_v18  ;;  %5751 = vmatprep.subr.bf16.mxu0 %v5750_v19  ;;  %v1924_v18 = vld [vmem:[#allocation2 + $0x38a0] sm:$0xff]  ;;  %v1914_v19 = vld [vmem:[#allocation2 + $0x3850] sm:$0xff] }
 0x191   :  { %6111 = vmatprep.subr.bf16.mxu1 %v6110_v24  ;;  %v1949_v24 = vld [vmem:[#allocation2 + $0x3968] sm:$0xff]  ;;  %v5768_v28 = vpack.c.bf16 %v1924_v18, %v1912_v17  ;;  %v6128_v30 = vpack.c.bf16 %v1926_v21, %v1914_v19  ;;  %v6142_v17 = vpack.c.bf16 %v2023_v9, %v2011_v8  ;;  %v2022_v18 = vld [vmem:[#allocation2 + $0x3bb0] sm:$0xff]  ;;  %v2309_v21 = vcombine.high %v8236_v40, %v8236_v40  ;;  %v2059_v40 = vld [vmem:[#allocation2 + $0x3cd8] sm:$0xff] }
 0x192   :  { %v5770_v31 = vpack.c.bf16 %v1949_v24, %v1937_v23  ;;  %v2033_v19 = vld [vmem:[#allocation2 + $0x3c08] sm:$0xff]  ;;  %v2035_v23 = vld [vmem:[#allocation2 + $0x3c18] sm:$0xff] }
 0x193   :  { %5753 = vmatpush1.bf16.msra.mxu0 %v5752_v33  ;;  %v1936_v33 = vld [vmem:[#allocation2 + $0x3900] sm:$0xff]  ;;  %v2047_v24 = vld [vmem:[#allocation2 + $0x3c78] sm:$0xff] }
 0x194   :  { %6113 = vmatpush1.bf16.msra.mxu1 %v6112_v34  ;;  %5755 = vmatprep.subr.bf16.mxu0 %v5754_v35  ;;  %v1948_v34 = vld [vmem:[#allocation2 + $0x3960] sm:$0xff]  ;;  %v1938_v35 = vld [vmem:[#allocation2 + $0x3910] sm:$0xff]  ;;  %v2119_v8 = vld [vmem:[#allocation2 + $0x3eb8] sm:$0xff] }
 0x195   :  { %6115 = vmatprep.subr.bf16.mxu1 %v6114_v41  ;;  %v1973_v41 = vld [vmem:[#allocation2 + $0x3a28] sm:$0xff]  ;;  %v5772_v44 = vpack.c.bf16 %v1948_v34, %v1936_v33  ;;  %v6132_v45 = vpack.c.bf16 %v1950_v37, %v1938_v35  ;;  %v2034_v33 = vld [vmem:[#allocation2 + $0x3c10] sm:$0xff]  ;;  %v6146_v34 = vpack.c.bf16 %v2047_v24, %v2035_v23 }
 0x196   :  { %v5774_v46 = vpack.c.bf16 %v1973_v41, %v1961_v38  ;;  %v2046_v35 = vld [vmem:[#allocation2 + $0x3c70] sm:$0xff]  ;;  %v2069_v37 = vld [vmem:[#allocation2 + $0x3d28] sm:$0xff]  ;;  %v8253_v38 = vrot.slane %v2309_v21, %v8173_v11  ;;  %v2071_v41 = vld [vmem:[#allocation2 + $0x3d38] sm:$0xff] }
 0x197   :  { %5757 = vmatpush1.bf16.msra.mxu0 %v5756_v47  ;;  %v1960_v47 = vld [vmem:[#allocation2 + $0x39c0] sm:$0xff]  ;;  %v6148_v43 = vpack.c.bf16 %v2046_v35, %v2034_v33  ;;  %v2143_v21 = vld [vmem:[#allocation2 + $0x3f78] sm:$0xff]  ;;  %v2142_v33 = vld [vmem:[#allocation2 + $0x3f70] sm:$0xff] }
 0x198   :  { %6117 = vmatpush1.bf16.msra.mxu1 %v6116_v48  ;;  %5759 = vmatprep.subr.bf16.mxu0 %v5758_v50  ;;  %v1972_v48 = vld [vmem:[#allocation2 + $0x3a20] sm:$0xff]  ;;  %v1962_v50 = vld [vmem:[#allocation2 + $0x39d0] sm:$0xff]  ;;  %v2165_v35 = vld [vmem:[#allocation2 + $0x4028] sm:$0xff] }
 0x199   :  { %6119 = vmatprep.subr.bf16.mxu1 %v6118_v56  ;;  %v1997_v56 = vld [vmem:[#allocation2 + $0x3ae8] sm:$0xff]  ;;  %v5776_v59 = vpack.c.bf16 %v1972_v48, %v1960_v47  ;;  %v6136_v60 = vpack.c.bf16 %v1974_v53, %v1962_v50  ;;  %v2058_v47 = vld [vmem:[#allocation2 + $0x3cd0] sm:$0xff]  ;;  %v6150_v48 = vpack.c.bf16 %v2071_v41, %v2059_v40 }
 0x19a   :  { %v5778_v61 = vpack.c.bf16 %v1997_v56, %v1985_v54  ;;  %v2070_v50 = vld [vmem:[#allocation2 + $0x3d30] sm:$0xff]  ;;  %v2093_v53 = vld [vmem:[#allocation2 + $0x3de8] sm:$0xff]  ;;  %v8257_v54 = vcombine.high %v8253_v38, %v8253_v38  ;;  %v2083_v56 = vld [vmem:[#allocation2 + $0x3d98] sm:$0xff] }
 0x19b   :  { %5761 = vmatpush1.bf16.msra.mxu0 %v5760_v0  ;;  %v1984_v0 = vld [vmem:[#allocation2 + $0x3a80] sm:$0xff] }
 0x19c   :  { %6121 = vmatpush1.bf16.msra.mxu1 %v6120_v1  ;;  %5763 = vmatprep.subr.bf16.mxu0 %v5762_v2  ;;  %v1996_v1 = vld [vmem:[#allocation2 + $0x3ae0] sm:$0xff]  ;;  %v1986_v2 = vld [vmem:[#allocation2 + $0x3a90] sm:$0xff] }
 0x19d   :  { %6123 = vmatprep.subr.bf16.mxu1 %v6122_v7  ;;  %v2021_v7 = vld [vmem:[#allocation2 + $0x3ba8] sm:$0xff]  ;;  %v5780_v10 = vpack.c.bf16 %v1996_v1, %v1984_v0  ;;  %v6140_v12 = vpack.c.bf16 %v1998_v5, %v1986_v2  ;;  %v2092_v0 = vld [vmem:[#allocation2 + $0x3de0] sm:$0xff]  ;;  %v2082_v1 = vld [vmem:[#allocation2 + $0x3d90] sm:$0xff]  ;;  %v6154_v2 = vpack.c.bf16 %v2095_v57, %v2083_v56 }
 0x19e   :  { %v5782_v13 = vpack.c.bf16 %v2021_v7, %v2009_v6  ;;  %v2105_v5 = vld [vmem:[#allocation2 + $0x3e48] sm:$0xff]  ;;  %v2107_v7 = vld [vmem:[#allocation2 + $0x3e58] sm:$0xff] }
 0x19f   :  { %5765 = vmatpush1.bf16.msra.mxu0 %v5764_v14  ;;  %v2008_v14 = vld [vmem:[#allocation2 + $0x3b40] sm:$0xff]  ;;  %v2117_v6 = vld [vmem:[#allocation2 + $0x3ea8] sm:$0xff] }
 0x1a0   :  { %6125 = vmatpush1.bf16.msra.mxu1 %v6124_v49  ;;  %5767 = vmatprep.subr.bf16.mxu0 %v5766_v16  ;;  %v2020_v49 = vld [vmem:[#allocation2 + $0x3ba0] sm:$0xff]  ;;  %v2010_v16 = vld [vmem:[#allocation2 + $0x3b50] sm:$0xff] }
 0x1a1   :  { %6127 = vmatprep.subr.bf16.mxu1 %v6126_v20  ;;  %v2045_v20 = vld [vmem:[#allocation2 + $0x3c68] sm:$0xff]  ;;  %v5784_v22 = vpack.c.bf16 %v2020_v49, %v2008_v14  ;;  %v6144_v27 = vpack.c.bf16 %v2022_v18, %v2010_v16  ;;  %v2116_v14 = vld [vmem:[#allocation2 + $0x3ea0] sm:$0xff]  ;;  %v2106_v49 = vld [vmem:[#allocation2 + $0x3e50] sm:$0xff]  ;;  %v6158_v16 = vpack.c.bf16 %v2119_v8, %v2107_v7 }
 0x1a2   :  { %v2129_v18 = vld [vmem:[#allocation2 + $0x3f08] sm:$0xff] }
 0x1a3   :  { %5769 = vmatpush1.bf16.msra.mxu0 %v5768_v28  ;;  %v5786_v28 = vpack.c.bf16 %v2045_v20, %v2033_v19  ;;  %v2141_v19 = vld [vmem:[#allocation2 + $0x3f68] sm:$0xff]  ;;  %v2131_v20 = vld [vmem:[#allocation2 + $0x3f18] sm:$0xff] }
 0x1a4   :  { %6129 = vmatpush1.bf16.msra.mxu1 %v6128_v30  ;;  %5771 = vmatprep.subr.bf16.mxu0 %v5770_v31  ;;  %v2032_v30 = vld [vmem:[#allocation2 + $0x3c00] sm:$0xff] }
 0x1a5   :  { %6131 = vmatprep.subr.bf16.mxu1 %v6130_v36  ;;  %v2044_v31 = vld [vmem:[#allocation2 + $0x3c60] sm:$0xff]  ;;  %v2057_v36 = vld [vmem:[#allocation2 + $0x3cc8] sm:$0xff] }
 0x1a6   :  { %v5788_v42 = vpack.c.bf16 %v2044_v31, %v2032_v30  ;;  %v2130_v30 = vld [vmem:[#allocation2 + $0x3f10] sm:$0xff]  ;;  %v6162_v31 = vpack.c.bf16 %v2143_v21, %v2131_v20 }
 0x1a7   :  { %5773 = vmatpush1.bf16.msra.mxu0 %v5772_v44  ;;  %v5790_v44 = vpack.c.bf16 %v2069_v37, %v2057_v36  ;;  %v2155_v36 = vld [vmem:[#allocation2 + $0x3fd8] sm:$0xff]  ;;  %v6164_v41 = vpack.c.bf16 %v2142_v33, %v2130_v30  ;;  %v2238_v30 = vld [vmem:[#allocation2 + $0x4270] sm:$0xff]  ;;  %v2261_v33 = vld [vmem:[#allocation2 + $0x4328] sm:$0xff] }
 0x1a8   :  { %6133 = vmatpush1.bf16.msra.mxu1 %v6132_v45  ;;  %5775 = vmatprep.subr.bf16.mxu0 %v5774_v46  ;;  %v2056_v45 = vld [vmem:[#allocation2 + $0x3cc0] sm:$0xff]  ;;  %v2167_v37 = vld [vmem:[#allocation2 + $0x4038] sm:$0xff] }
 0x1a9   :  { %6135 = vmatprep.subr.bf16.mxu1 %v6134_v51  ;;  %v2068_v46 = vld [vmem:[#allocation2 + $0x3d20] sm:$0xff]  ;;  %v2081_v51 = vld [vmem:[#allocation2 + $0x3d88] sm:$0xff] }
 0x1aa   :  { %v5792_v58 = vpack.c.bf16 %v2068_v46, %v2056_v45  ;;  %v2154_v45 = vld [vmem:[#allocation2 + $0x3fd0] sm:$0xff]  ;;  %v6166_v46 = vpack.c.bf16 %v2167_v37, %v2155_v36 }
 0x1ab   :  { %5777 = vmatpush1.bf16.msra.mxu0 %v5776_v59  ;;  %v6152_v59 = vpack.c.bf16 %v2070_v50, %v2058_v47  ;;  %v2166_v47 = vld [vmem:[#allocation2 + $0x4030] sm:$0xff]  ;;  %v2189_v50 = vld [vmem:[#allocation2 + $0x40e8] sm:$0xff] }
 0x1ac   :  { %6137 = vmatpush1.bf16.msra.mxu1 %v6136_v60  ;;  %5779 = vmatprep.subr.bf16.mxu0 %v5778_v61  ;;  %v5794_v60 = vpack.c.bf16 %v2093_v53, %v2081_v51  ;;  %v2080_v61 = vld [vmem:[#allocation2 + $0x3d80] sm:$0xff]  ;;  %v2179_v51 = vld [vmem:[#allocation2 + $0x4098] sm:$0xff]  ;;  %v6168_v57 = vpack.c.bf16 %v2166_v47, %v2154_v45  ;;  %v2262_v45 = vld [vmem:[#allocation2 + $0x4330] sm:$0xff] }
 0x1ad   :  { %6139 = vmatprep.subr.bf16.mxu1 %v6138_v3  ;;  %v2094_v3 = vld [vmem:[#allocation2 + $0x3df0] sm:$0xff]  ;;  %v5796_v9 = vpack.c.bf16 %v2092_v0, %v2080_v61  ;;  %v2191_v53 = vld [vmem:[#allocation2 + $0x40f8] sm:$0xff]  ;;  %v129_v47 = vld [vmem:[#allocation2 + $0x88] sm:$0xff] }
 0x1ae   :  { %v2178_v61 = vld [vmem:[#allocation2 + $0x4090] sm:$0xff]  ;;  %v6170_v0 = vpack.c.bf16 %v2191_v53, %v2179_v51 }
 0x1af   :  { %5781 = vmatpush1.bf16.msra.mxu0 %v5780_v10  ;;  %v6156_v10 = vpack.c.bf16 %v2094_v3, %v2082_v1  ;;  %v2190_v1 = vld [vmem:[#allocation2 + $0x40f0] sm:$0xff]  ;;  %v2213_v3 = vld [vmem:[#allocation2 + $0x41a8] sm:$0xff] }
 0x1b0   :  { %6141 = vmatpush1.bf16.msra.mxu1 %v6140_v12  ;;  %5783 = vmatprep.subr.bf16.mxu0 %v5782_v13  ;;  %v5798_v12 = vpack.c.bf16 %v2117_v6, %v2105_v5  ;;  %v2104_v13 = vld [vmem:[#allocation2 + $0x3e40] sm:$0xff]  ;;  %v2203_v5 = vld [vmem:[#allocation2 + $0x4158] sm:$0xff]  ;;  %v6172_v8 = vpack.c.bf16 %v2190_v1, %v2178_v61  ;;  %v130_v61 = vld [vmem:[#allocation2 + $0x90] sm:$0xff] }
 0x1b1   :  { %6143 = vmatprep.subr.bf16.mxu1 %v6142_v17  ;;  %v2118_v17 = vld [vmem:[#allocation2 + $0x3eb0] sm:$0xff]  ;;  %v5800_v23 = vpack.c.bf16 %v2116_v14, %v2104_v13  ;;  %v2215_v6 = vld [vmem:[#allocation2 + $0x41b8] sm:$0xff]  ;;  %v153_v1 = vld [vmem:[#allocation2 + $0x148] sm:$0xff] }
 0x1b2   :  { %v6160_v24 = vpack.c.bf16 %v2118_v17, %v2106_v49  ;;  %v2202_v13 = vld [vmem:[#allocation2 + $0x4150] sm:$0xff]  ;;  %v6174_v14 = vpack.c.bf16 %v2215_v6, %v2203_v5  ;;  %v2237_v17 = vld [vmem:[#allocation2 + $0x4268] sm:$0xff] }
 0x1b3   :  { %5785 = vmatpush1.bf16.msra.mxu0 %v5784_v22  ;;  %v5802_v22 = vpack.c.bf16 %v2141_v19, %v2129_v18  ;;  %v2214_v49 = vld [vmem:[#allocation2 + $0x41b0] sm:$0xff]  ;;  %v2227_v18 = vld [vmem:[#allocation2 + $0x4218] sm:$0xff] }
 0x1b4   :  { %6145 = vmatpush1.bf16.msra.mxu1 %v6144_v27  ;;  %5787 = vmatprep.subr.bf16.mxu0 %v5786_v28  ;;  %v2128_v27 = vld [vmem:[#allocation2 + $0x3f00] sm:$0xff]  ;;  %v2239_v19 = vld [vmem:[#allocation2 + $0x4278] sm:$0xff]  ;;  %v6176_v21 = vpack.c.bf16 %v2214_v49, %v2202_v13  ;;  %v154_v13 = vld [vmem:[#allocation2 + $0x150] sm:$0xff] }
 0x1b5   :  { %6147 = vmatprep.subr.bf16.mxu1 %v6146_v34  ;;  %v2140_v28 = vld [vmem:[#allocation2 + $0x3f60] sm:$0xff]  ;;  %v2153_v34 = vld [vmem:[#allocation2 + $0x3fc8] sm:$0xff] }
 0x1b6   :  { %2689 = vmatmul.mubr.f32.vlgmr.msra.gmra.mrb[0].mxu0 %v8240_v52  ;;  %v5804_v40 = vpack.c.bf16 %v2140_v28, %v2128_v27  ;;  %v2226_v27 = vld [vmem:[#allocation2 + $0x4210] sm:$0xff]  ;;  %v6178_v28 = vpack.c.bf16 %v2239_v19, %v2227_v18  ;;  %v177_v49 = vld [vmem:[#allocation2 + $0x208] sm:$0xff] }
 0x1b7   :  { %5789 = vmatpush1.bf16.msra.mxu0 %v5788_v42  ;;  %3115 = vmatmul.mubr.f32.vlgmr.msra.gmra.mrb[0].mxu1 %v8240_v52  ;;  %v5806_v42 = vpack.c.bf16 %v2165_v35, %v2153_v34  ;;  %v2251_v34 = vld [vmem:[#allocation2 + $0x42d8] sm:$0xff]  ;;  %v6180_v37 = vpack.c.bf16 %v2238_v30, %v2226_v27  ;;  %v178_v27 = vld [vmem:[#allocation2 + $0x210] sm:$0xff]  ;;  %v201_v30 = vld [vmem:[#allocation2 + $0x2c8] sm:$0xff] }
 0x1b8   :  { %6149 = vmatpush1.bf16.msra.mxu1 %v6148_v43  ;;  %5791 = vmatprep.subr.bf16.mxu0 %v5790_v44  ;;  %v2152_v43 = vld [vmem:[#allocation2 + $0x3fc0] sm:$0xff]  ;;  %v2263_v35 = vld [vmem:[#allocation2 + $0x4338] sm:$0xff] }
 0x1b9   :  { %6151 = vmatprep.subr.bf16.mxu1 %v6150_v48  ;;  %5319 = vmatprep.mubr.msk.f32.mxu0 %vm2337_vm0, %v8257_v54  ;;  %v2164_v44 = vld [vmem:[#allocation2 + $0x4020] sm:$0xff]  ;;  %v2177_v48 = vld [vmem:[#allocation2 + $0x4088] sm:$0xff] }
 0x1ba   :  { %5320 = vmatprep.mubr.msk.f32.mxu1 %vm2337_vm0, %v8257_v54  ;;  %v5808_v56 = vpack.c.bf16 %v2164_v44, %v2152_v43  ;;  %v2250_v43 = vld [vmem:[#allocation2 + $0x42d0] sm:$0xff]  ;;  %v6182_v44 = vpack.c.bf16 %v2263_v35, %v2251_v34 }
 0x1bb   :  { %5793 = vmatpush1.bf16.msra.mxu0 %v5792_v58  ;;  %v5810_v58 = vpack.c.bf16 %v2189_v50, %v2177_v48  ;;  %v119_v48 = vld [vmem:[#allocation2 + $0x38] sm:$0xff]  ;;  %v6184_v53 = vpack.c.bf16 %v2262_v45, %v2250_v43  ;;  %v202_v43 = vld [vmem:[#allocation2 + $0x2d0] sm:$0xff]  ;;  %v225_v45 = vld [vmem:[#allocation2 + $0x388] sm:$0xff] }
 0x1bc   :  { %6153 = vmatpush1.bf16.msra.mxu1 %v6152_v59  ;;  %5795 = vmatprep.subr.bf16.mxu0 %v5794_v60  ;;  %v2176_v59 = vld [vmem:[#allocation2 + $0x4080] sm:$0xff]  ;;  %v131_v50 = vld [vmem:[#allocation2 + $0x98] sm:$0xff] }
 0x1bd   :  { %6155 = vmatprep.subr.bf16.mxu1 %v6154_v2  ;;  %v2188_v60 = vld [vmem:[#allocation2 + $0x40e0] sm:$0xff]  ;;  %v2201_v2 = vld [vmem:[#allocation2 + $0x4148] sm:$0xff] }
 0x1be   :  { %v5812_v7 = vpack.c.bf16 %v2188_v60, %v2176_v59  ;;  %v118_v59 = vld [vmem:[#allocation2 + $0x30] sm:$0xff]  ;;  %v6546_v60 = vpack.c.bf16 %v131_v50, %v119_v48 }
 0x1bf   :  { %5797 = vmatpush1.bf16.msra.mxu0 %v5796_v9  ;;  %v5814_v9 = vpack.c.bf16 %v2213_v3, %v2201_v2  ;;  %v143_v2 = vld [vmem:[#allocation2 + $0xf8] sm:$0xff]  ;;  %v6548_v6 = vpack.c.bf16 %v130_v61, %v118_v59  ;;  %v226_v59 = vld [vmem:[#allocation2 + $0x390] sm:$0xff]  ;;  %v249_v61 = vld [vmem:[#allocation2 + $0x448] sm:$0xff] }
 0x1c0   :  { %6157 = vmatpush1.bf16.msra.mxu1 %v6156_v10  ;;  %5799 = vmatprep.subr.bf16.mxu0 %v5798_v12  ;;  %v2200_v10 = vld [vmem:[#allocation2 + $0x4140] sm:$0xff]  ;;  %v155_v3 = vld [vmem:[#allocation2 + $0x158] sm:$0xff] }
 0x1c1   :  { %6159 = vmatprep.subr.bf16.mxu1 %v6158_v16  ;;  %v2212_v12 = vld [vmem:[#allocation2 + $0x41a0] sm:$0xff]  ;;  %v2225_v16 = vld [vmem:[#allocation2 + $0x4208] sm:$0xff] }
 0x1c2   :  { %v5816_v20 = vpack.c.bf16 %v2212_v12, %v2200_v10  ;;  %v142_v10 = vld [vmem:[#allocation2 + $0xf0] sm:$0xff]  ;;  %v6550_v12 = vpack.c.bf16 %v155_v3, %v143_v2 }
 0x1c3   :  { %5801 = vmatpush1.bf16.msra.mxu0 %v5800_v23  ;;  %v5818_v23 = vpack.c.bf16 %v2237_v17, %v2225_v16  ;;  %v167_v16 = vld [vmem:[#allocation2 + $0x1b8] sm:$0xff]  ;;  %v6552_v19 = vpack.c.bf16 %v154_v13, %v142_v10  ;;  %v250_v10 = vld [vmem:[#allocation2 + $0x450] sm:$0xff]  ;;  %v273_v13 = vld [vmem:[#allocation2 + $0x508] sm:$0xff] }
 0x1c4   :  { %6161 = vmatpush1.bf16.msra.mxu1 %v6160_v24  ;;  %5803 = vmatprep.subr.bf16.mxu0 %v5802_v22  ;;  %v2224_v24 = vld [vmem:[#allocation2 + $0x4200] sm:$0xff]  ;;  %v179_v17 = vld [vmem:[#allocation2 + $0x218] sm:$0xff] }
 0x1c5   :  { %6163 = vmatprep.subr.bf16.mxu1 %v6162_v31  ;;  %v2236_v22 = vld [vmem:[#allocation2 + $0x4260] sm:$0xff]  ;;  %v2249_v31 = vld [vmem:[#allocation2 + $0x42c8] sm:$0xff] }
 0x1c6   :  { %v5820_v36 = vpack.c.bf16 %v2236_v22, %v2224_v24  ;;  %v166_v24 = vld [vmem:[#allocation2 + $0x1b0] sm:$0xff]  ;;  %v6554_v22 = vpack.c.bf16 %v179_v17, %v167_v16 }
 0x1c7   :  { %5805 = vmatpush1.bf16.msra.mxu0 %v5804_v40  ;;  %v5822_v40 = vpack.c.bf16 %v2261_v33, %v2249_v31  ;;  %v191_v31 = vld [vmem:[#allocation2 + $0x278] sm:$0xff]  ;;  %v6556_v35 = vpack.c.bf16 %v178_v27, %v166_v24  ;;  %v274_v24 = vld [vmem:[#allocation2 + $0x510] sm:$0xff]  ;;  %v297_v27 = vld [vmem:[#allocation2 + $0x5c8] sm:$0xff] }
 0x1c8   :  { %6165 = vmatpush1.bf16.msra.mxu1 %v6164_v41  ;;  %5807 = vmatprep.subr.bf16.mxu0 %v5806_v42  ;;  %v2248_v41 = vld [vmem:[#allocation2 + $0x42c0] sm:$0xff]  ;;  %v203_v33 = vld [vmem:[#allocation2 + $0x2d8] sm:$0xff] }
 0x1c9   :  { %6167 = vmatprep.subr.bf16.mxu1 %v6166_v46  ;;  %v2260_v42 = vld [vmem:[#allocation2 + $0x4320] sm:$0xff]  ;;  %v117_v46 = vld [vmem:[#allocation2 + $0x28] sm:$0xff] }
 0x1ca   :  { %v5824_v51 = vpack.c.bf16 %v2260_v42, %v2248_v41  ;;  %v190_v41 = vld [vmem:[#allocation2 + $0x270] sm:$0xff]  ;;  %v6558_v42 = vpack.c.bf16 %v203_v33, %v191_v31 }
 0x1cb   :  { %5809 = vmatpush1.bf16.msra.mxu0 %v5808_v56  ;;  %v6186_v56 = vpack.c.bf16 %v129_v47, %v117_v46  ;;  %v215_v46 = vld [vmem:[#allocation2 + $0x338] sm:$0xff]  ;;  %v6560_v50 = vpack.c.bf16 %v202_v43, %v190_v41  ;;  %v298_v41 = vld [vmem:[#allocation2 + $0x5d0] sm:$0xff]  ;;  %v321_v43 = vld [vmem:[#allocation2 + $0x688] sm:$0xff] }
 0x1cc   :  { %6169 = vmatpush1.bf16.msra.mxu1 %v6168_v57  ;;  %5811 = vmatprep.subr.bf16.mxu0 %v5810_v58  ;;  %v116_v57 = vld [vmem:[#allocation2 + $0x20] sm:$0xff]  ;;  %v227_v47 = vld [vmem:[#allocation2 + $0x398] sm:$0xff] }
 0x1cd   :  { %6171 = vmatprep.subr.bf16.mxu1 %v6170_v0  ;;  %v128_v58 = vld [vmem:[#allocation2 + $0x80] sm:$0xff]  ;;  %v141_v0 = vld [vmem:[#allocation2 + $0xe8] sm:$0xff] }
 0x1ce   :  { %v6188_v5 = vpack.c.bf16 %v128_v58, %v116_v57  ;;  %v214_v57 = vld [vmem:[#allocation2 + $0x330] sm:$0xff]  ;;  %v6562_v58 = vpack.c.bf16 %v227_v47, %v215_v46 }
 0x1cf   :  { %5813 = vmatpush1.bf16.msra.mxu0 %v5812_v7  ;;  %v6190_v7 = vpack.c.bf16 %v153_v1, %v141_v0  ;;  %v239_v0 = vld [vmem:[#allocation2 + $0x3f8] sm:$0xff]  ;;  %v6564_v3 = vpack.c.bf16 %v226_v59, %v214_v57  ;;  %v322_v57 = vld [vmem:[#allocation2 + $0x690] sm:$0xff]  ;;  %v345_v59 = vld [vmem:[#allocation2 + $0x748] sm:$0xff] }
 0x1d0   :  { %6173 = vmatpush1.bf16.msra.mxu1 %v6172_v8  ;;  %5815 = vmatprep.subr.bf16.mxu0 %v5814_v9  ;;  %v140_v8 = vld [vmem:[#allocation2 + $0xe0] sm:$0xff]  ;;  %v251_v1 = vld [vmem:[#allocation2 + $0x458] sm:$0xff] }
 0x1d1   :  { %6175 = vmatprep.subr.bf16.mxu1 %v6174_v14  ;;  %v152_v9 = vld [vmem:[#allocation2 + $0x140] sm:$0xff]  ;;  %v165_v14 = vld [vmem:[#allocation2 + $0x1a8] sm:$0xff] }
 0x1d2   :  { %v6192_v18 = vpack.c.bf16 %v152_v9, %v140_v8  ;;  %v238_v8 = vld [vmem:[#allocation2 + $0x3f0] sm:$0xff]  ;;  %v6566_v9 = vpack.c.bf16 %v251_v1, %v239_v0 }
 0x1d3   :  { %5817 = vmatpush1.bf16.msra.mxu0 %v5816_v20  ;;  %v6194_v20 = vpack.c.bf16 %v177_v49, %v165_v14  ;;  %v263_v14 = vld [vmem:[#allocation2 + $0x4b8] sm:$0xff]  ;;  %v6568_v17 = vpack.c.bf16 %v250_v10, %v238_v8  ;;  %v346_v8 = vld [vmem:[#allocation2 + $0x750] sm:$0xff]  ;;  %v369_v10 = vld [vmem:[#allocation2 + $0x808] sm:$0xff] }
 0x1d4   :  { %6177 = vmatpush1.bf16.msra.mxu1 %v6176_v21  ;;  %5819 = vmatprep.subr.bf16.mxu0 %v5818_v23  ;;  %v164_v21 = vld [vmem:[#allocation2 + $0x1a0] sm:$0xff]  ;;  %v275_v49 = vld [vmem:[#allocation2 + $0x518] sm:$0xff] }
 0x1d5   :  { %6179 = vmatprep.subr.bf16.mxu1 %v6178_v28  ;;  %v176_v23 = vld [vmem:[#allocation2 + $0x200] sm:$0xff]  ;;  %v189_v28 = vld [vmem:[#allocation2 + $0x268] sm:$0xff] }
 0x1d6   :  { %v6196_v34 = vpack.c.bf16 %v176_v23, %v164_v21  ;;  %v262_v21 = vld [vmem:[#allocation2 + $0x4b0] sm:$0xff]  ;;  %v6570_v23 = vpack.c.bf16 %v275_v49, %v263_v14 }
 0x1d7   :  { %5821 = vmatpush1.bf16.msra.mxu0 %v5820_v36  ;;  %v6198_v36 = vpack.c.bf16 %v201_v30, %v189_v28  ;;  %v287_v28 = vld [vmem:[#allocation2 + $0x578] sm:$0xff]  ;;  %v6572_v33 = vpack.c.bf16 %v274_v24, %v262_v21  ;;  %v370_v21 = vld [vmem:[#allocation2 + $0x810] sm:$0xff]  ;;  %v393_v24 = vld [vmem:[#allocation2 + $0x8c8] sm:$0xff] }
 0x1d8   :  { %6181 = vmatpush1.bf16.msra.mxu1 %v6180_v37  ;;  %5823 = vmatprep.subr.bf16.mxu0 %v5822_v40  ;;  %v188_v37 = vld [vmem:[#allocation2 + $0x260] sm:$0xff]  ;;  %v299_v30 = vld [vmem:[#allocation2 + $0x5d8] sm:$0xff] }
 0x1d9   :  { %6183 = vmatprep.subr.bf16.mxu1 %v6182_v44  ;;  %v200_v40 = vld [vmem:[#allocation2 + $0x2c0] sm:$0xff]  ;;  %v213_v44 = vld [vmem:[#allocation2 + $0x328] sm:$0xff] }
 0x1da   :  { %v6200_v48 = vpack.c.bf16 %v200_v40, %v188_v37  ;;  %v286_v37 = vld [vmem:[#allocation2 + $0x570] sm:$0xff]  ;;  %v6574_v40 = vpack.c.bf16 %v299_v30, %v287_v28 }
 0x1db   :  { %5825 = vmatpush1.bf16.msra.mxu0 %v5824_v51  ;;  %v6202_v51 = vpack.c.bf16 %v225_v45, %v213_v44  ;;  %v311_v44 = vld [vmem:[#allocation2 + $0x638] sm:$0xff]  ;;  %v6576_v47 = vpack.c.bf16 %v298_v41, %v286_v37  ;;  %v394_v37 = vld [vmem:[#allocation2 + $0x8d0] sm:$0xff]  ;;  %v417_v41 = vld [vmem:[#allocation2 + $0x988] sm:$0xff] }
 0x1dc   :  { %6185 = vmatpush1.bf16.msra.mxu1 %v6184_v53  ;;  %6187 = vmatprep.subr.bf16.mxu0 %v6186_v56  ;;  %v212_v53 = vld [vmem:[#allocation2 + $0x320] sm:$0xff]  ;;  %v323_v45 = vld [vmem:[#allocation2 + $0x698] sm:$0xff] }
 0x1dd   :  { %6547 = vmatprep.subr.bf16.mxu1 %v6546_v60  ;;  %v224_v56 = vld [vmem:[#allocation2 + $0x380] sm:$0xff]  ;;  %v237_v60 = vld [vmem:[#allocation2 + $0x3e8] sm:$0xff] }
 0x1de   :  { %2760 = vmatmul.mubr.f32.vlgmr.msra.gmra.mrb[0].mxu0 %v8253_v38  ;;  %v6204_v2 = vpack.c.bf16 %v224_v56, %v212_v53  ;;  %v310_v53 = vld [vmem:[#allocation2 + $0x630] sm:$0xff]  ;;  %v6578_v56 = vpack.c.bf16 %v323_v45, %v311_v44 }
 0x1df   :  { %3186 = vmatmul.mubr.f32.vlgmr.msra.gmra.mrb[0].mxu1 %v8253_v38  ;;  %6189 = vmatpush1.bf16.msra.mxu0 %v6188_v5  ;;  %v6206_v5 = vpack.c.bf16 %v249_v61, %v237_v60  ;;  %v335_v60 = vld [vmem:[#allocation2 + $0x6f8] sm:$0xff]  ;;  %v6580_v1 = vpack.c.bf16 %v322_v57, %v310_v53  ;;  %v418_v53 = vld [vmem:[#allocation2 + $0x990] sm:$0xff]  ;;  %v441_v57 = vld [vmem:[#allocation2 + $0xa48] sm:$0xff] }
 0x1e0   :  { %6549 = vmatpush1.bf16.msra.mxu1 %v6548_v6  ;;  %6191 = vmatprep.subr.bf16.mxu0 %v6190_v7  ;;  %v236_v6 = vld [vmem:[#allocation2 + $0x3e0] sm:$0xff]  ;;  %v347_v61 = vld [vmem:[#allocation2 + $0x758] sm:$0xff] }
 0x1e1   :  { %6551 = vmatprep.subr.bf16.mxu1 %v6550_v12  ;;  %3256 = vmatprep.mubr.f32.mxu0 %v8186_v32  ;;  %v248_v7 = vld [vmem:[#allocation2 + $0x440] sm:$0xff]  ;;  %v261_v12 = vld [vmem:[#allocation2 + $0x4a8] sm:$0xff] }
 0x1e2   :  { %3682 = vmatprep.mubr.f32.mxu1 %v8186_v32  ;;  %v6208_v16 = vpack.c.bf16 %v248_v7, %v236_v6  ;;  %v334_v6 = vld [vmem:[#allocation2 + $0x6f0] sm:$0xff]  ;;  %v6582_v7 = vpack.c.bf16 %v347_v61, %v335_v60 }
 0x1e3   :  { %6193 = vmatpush1.bf16.msra.mxu0 %v6192_v18  ;;  %v6210_v18 = vpack.c.bf16 %v273_v13, %v261_v12  ;;  %v359_v12 = vld [vmem:[#allocation2 + $0x7b8] sm:$0xff]  ;;  %v6584_v49 = vpack.c.bf16 %v346_v8, %v334_v6  ;;  %v442_v6 = vld [vmem:[#allocation2 + $0xa50] sm:$0xff]  ;;  %v465_v8 = vld [vmem:[#allocation2 + $0xb08] sm:$0xff] }
 0x1e4   :  { %6553 = vmatpush1.bf16.msra.mxu1 %v6552_v19  ;;  %6195 = vmatprep.subr.bf16.mxu0 %v6194_v20  ;;  %v260_v19 = vld [vmem:[#allocation2 + $0x4a0] sm:$0xff]  ;;  %v371_v13 = vld [vmem:[#allocation2 + $0x818] sm:$0xff] }
 0x1e5   :  { %6555 = vmatprep.subr.bf16.mxu1 %v6554_v22  ;;  %v272_v20 = vld [vmem:[#allocation2 + $0x500] sm:$0xff]  ;;  %v285_v22 = vld [vmem:[#allocation2 + $0x568] sm:$0xff] }
 0x1e6   :  { %v6212_v31 = vpack.c.bf16 %v272_v20, %v260_v19  ;;  %v358_v19 = vld [vmem:[#allocation2 + $0x7b0] sm:$0xff]  ;;  %v6586_v20 = vpack.c.bf16 %v371_v13, %v359_v12 }
 0x1e7   :  { %6197 = vmatpush1.bf16.msra.mxu0 %v6196_v34  ;;  %v6214_v34 = vpack.c.bf16 %v297_v27, %v285_v22  ;;  %v383_v22 = vld [vmem:[#allocation2 + $0x878] sm:$0xff]  ;;  %v6588_v30 = vpack.c.bf16 %v370_v21, %v358_v19  ;;  %v466_v19 = vld [vmem:[#allocation2 + $0xb10] sm:$0xff]  ;;  %v489_v21 = vld [vmem:[#allocation2 + $0xbc8] sm:$0xff] }
 0x1e8   :  { %6557 = vmatpush1.bf16.msra.mxu1 %v6556_v35  ;;  %6199 = vmatprep.subr.bf16.mxu0 %v6198_v36  ;;  %v284_v35 = vld [vmem:[#allocation2 + $0x560] sm:$0xff]  ;;  %v395_v27 = vld [vmem:[#allocation2 + $0x8d8] sm:$0xff] }
 0x1e9   :  { %6559 = vmatprep.subr.bf16.mxu1 %v6558_v42  ;;  %v296_v36 = vld [vmem:[#allocation2 + $0x5c0] sm:$0xff]  ;;  %v309_v42 = vld [vmem:[#allocation2 + $0x628] sm:$0xff] }
 0x1ea   :  { %v6216_v46 = vpack.c.bf16 %v296_v36, %v284_v35  ;;  %v382_v35 = vld [vmem:[#allocation2 + $0x870] sm:$0xff]  ;;  %v6590_v36 = vpack.c.bf16 %v395_v27, %v383_v22 }
 0x1eb   :  { %6201 = vmatpush1.bf16.msra.mxu0 %v6200_v48  ;;  %v6218_v48 = vpack.c.bf16 %v321_v43, %v309_v42  ;;  %v407_v42 = vld [vmem:[#allocation2 + $0x938] sm:$0xff]  ;;  %v6592_v45 = vpack.c.bf16 %v394_v37, %v382_v35  ;;  %v490_v35 = vld [vmem:[#allocation2 + $0xbd0] sm:$0xff]  ;;  %v513_v37 = vld [vmem:[#allocation2 + $0xc88] sm:$0xff] }
 0x1ec   :  { %6561 = vmatpush1.bf16.msra.mxu1 %v6560_v50  ;;  %6203 = vmatprep.subr.bf16.mxu0 %v6202_v51  ;;  %v308_v50 = vld [vmem:[#allocation2 + $0x620] sm:$0xff]  ;;  %v419_v43 = vld [vmem:[#allocation2 + $0x998] sm:$0xff] }
 0x1ed   :  { %6563 = vmatprep.subr.bf16.mxu1 %v6562_v58  ;;  %v320_v51 = vld [vmem:[#allocation2 + $0x680] sm:$0xff]  ;;  %v333_v58 = vld [vmem:[#allocation2 + $0x6e8] sm:$0xff] }
 0x1ee   :  { %v6220_v0 = vpack.c.bf16 %v320_v51, %v308_v50  ;;  %v406_v50 = vld [vmem:[#allocation2 + $0x930] sm:$0xff]  ;;  %v6594_v51 = vpack.c.bf16 %v419_v43, %v407_v42 }
 0x1ef   :  { %6205 = vmatpush1.bf16.msra.mxu0 %v6204_v2  ;;  %v6222_v2 = vpack.c.bf16 %v345_v59, %v333_v58  ;;  %v431_v58 = vld [vmem:[#allocation2 + $0x9f8] sm:$0xff]  ;;  %v6596_v61 = vpack.c.bf16 %v418_v53, %v406_v50  ;;  %v514_v50 = vld [vmem:[#allocation2 + $0xc90] sm:$0xff]  ;;  %v537_v53 = vld [vmem:[#allocation2 + $0xd48] sm:$0xff] }
 0x1f0   :  { %6565 = vmatpush1.bf16.msra.mxu1 %v6564_v3  ;;  %6207 = vmatprep.subr.bf16.mxu0 %v6206_v5  ;;  %v332_v3 = vld [vmem:[#allocation2 + $0x6e0] sm:$0xff]  ;;  %v443_v59 = vld [vmem:[#allocation2 + $0xa58] sm:$0xff] }
 0x1f1   :  { %6567 = vmatprep.subr.bf16.mxu1 %v6566_v9  ;;  %v344_v5 = vld [vmem:[#allocation2 + $0x740] sm:$0xff]  ;;  %v357_v9 = vld [vmem:[#allocation2 + $0x7a8] sm:$0xff] }
 0x1f2   :  { %v6224_v14 = vpack.c.bf16 %v344_v5, %v332_v3  ;;  %v430_v3 = vld [vmem:[#allocation2 + $0x9f0] sm:$0xff]  ;;  %v6598_v5 = vpack.c.bf16 %v443_v59, %v431_v58 }
 0x1f3   :  { %6209 = vmatpush1.bf16.msra.mxu0 %v6208_v16  ;;  %v6226_v16 = vpack.c.bf16 %v369_v10, %v357_v9  ;;  %v455_v9 = vld [vmem:[#allocation2 + $0xab8] sm:$0xff]  ;;  %v6600_v13 = vpack.c.bf16 %v442_v6, %v430_v3  ;;  %v538_v3 = vld [vmem:[#allocation2 + $0xd50] sm:$0xff]  ;;  %v561_v6 = vld [vmem:[#allocation2 + $0xe08] sm:$0xff] }
 0x1f4   :  { %6569 = vmatpush1.bf16.msra.mxu1 %v6568_v17  ;;  %6211 = vmatprep.subr.bf16.mxu0 %v6210_v18  ;;  %v356_v17 = vld [vmem:[#allocation2 + $0x7a0] sm:$0xff]  ;;  %v467_v10 = vld [vmem:[#allocation2 + $0xb18] sm:$0xff] }
 0x1f5   :  { %6571 = vmatprep.subr.bf16.mxu1 %v6570_v23  ;;  %v368_v18 = vld [vmem:[#allocation2 + $0x800] sm:$0xff]  ;;  %v381_v23 = vld [vmem:[#allocation2 + $0x868] sm:$0xff] }
 0x1f6   :  { %v6228_v28 = vpack.c.bf16 %v368_v18, %v356_v17  ;;  %v454_v17 = vld [vmem:[#allocation2 + $0xab0] sm:$0xff]  ;;  %v6602_v18 = vpack.c.bf16 %v467_v10, %v455_v9 }
 0x1f7   :  { %6213 = vmatpush1.bf16.msra.mxu0 %v6212_v31  ;;  %v6230_v31 = vpack.c.bf16 %v393_v24, %v381_v23  ;;  %v479_v23 = vld [vmem:[#allocation2 + $0xb78] sm:$0xff]  ;;  %v6604_v27 = vpack.c.bf16 %v466_v19, %v454_v17  ;;  %v562_v17 = vld [vmem:[#allocation2 + $0xe10] sm:$0xff]  ;;  %v585_v19 = vld [vmem:[#allocation2 + $0xec8] sm:$0xff] }
 0x1f8   :  { %6573 = vmatpush1.bf16.msra.mxu1 %v6572_v33  ;;  %6215 = vmatprep.subr.bf16.mxu0 %v6214_v34  ;;  %v380_v33 = vld [vmem:[#allocation2 + $0x860] sm:$0xff]  ;;  %v491_v24 = vld [vmem:[#allocation2 + $0xbd8] sm:$0xff] }
 0x1f9   :  { %6575 = vmatprep.subr.bf16.mxu1 %v6574_v40  ;;  %v392_v34 = vld [vmem:[#allocation2 + $0x8c0] sm:$0xff]  ;;  %v405_v40 = vld [vmem:[#allocation2 + $0x928] sm:$0xff] }
 0x1fa   :  { %v6232_v44 = vpack.c.bf16 %v392_v34, %v380_v33  ;;  %v478_v33 = vld [vmem:[#allocation2 + $0xb70] sm:$0xff]  ;;  %v6606_v34 = vpack.c.bf16 %v491_v24, %v479_v23 }
 0x1fb   :  { %6217 = vmatpush1.bf16.msra.mxu0 %v6216_v46  ;;  %v6234_v46 = vpack.c.bf16 %v417_v41, %v405_v40  ;;  %v503_v40 = vld [vmem:[#allocation2 + $0xc38] sm:$0xff]  ;;  %v6608_v43 = vpack.c.bf16 %v490_v35, %v478_v33  ;;  %v586_v33 = vld [vmem:[#allocation2 + $0xed0] sm:$0xff]  ;;  %v609_v35 = vld [vmem:[#allocation2 + $0xf88] sm:$0xff] }
 0x1fc   :  { %6577 = vmatpush1.bf16.msra.mxu1 %v6576_v47  ;;  %6219 = vmatprep.subr.bf16.mxu0 %v6218_v48  ;;  %v404_v47 = vld [vmem:[#allocation2 + $0x920] sm:$0xff]  ;;  %v515_v41 = vld [vmem:[#allocation2 + $0xc98] sm:$0xff] }
 0x1fd   :  { %6579 = vmatprep.subr.bf16.mxu1 %v6578_v56  ;;  %v416_v48 = vld [vmem:[#allocation2 + $0x980] sm:$0xff]  ;;  %v429_v56 = vld [vmem:[#allocation2 + $0x9e8] sm:$0xff] }
 0x1fe   :  { %v6236_v60 = vpack.c.bf16 %v416_v48, %v404_v47  ;;  %v502_v47 = vld [vmem:[#allocation2 + $0xc30] sm:$0xff]  ;;  %v6610_v48 = vpack.c.bf16 %v515_v41, %v503_v40 }
 0x1ff   :  { %6221 = vmatpush1.bf16.msra.mxu0 %v6220_v0  ;;  %v6238_v0 = vpack.c.bf16 %v441_v57, %v429_v56  ;;  %v527_v56 = vld [vmem:[#allocation2 + $0xcf8] sm:$0xff]  ;;  %v6612_v59 = vpack.c.bf16 %v514_v50, %v502_v47  ;;  %v610_v47 = vld [vmem:[#allocation2 + $0xf90] sm:$0xff]  ;;  %v633_v50 = vld [vmem:[#allocation2 + $0x1048] sm:$0xff] }
 0x200   :  { %6581 = vmatpush1.bf16.msra.mxu1 %v6580_v1  ;;  %6223 = vmatprep.subr.bf16.mxu0 %v6222_v2  ;;  %v428_v1 = vld [vmem:[#allocation2 + $0x9e0] sm:$0xff]  ;;  %v539_v57 = vld [vmem:[#allocation2 + $0xd58] sm:$0xff] }
 0x201   :  { %6583 = vmatprep.subr.bf16.mxu1 %v6582_v7  ;;  %v440_v2 = vld [vmem:[#allocation2 + $0xa40] sm:$0xff]  ;;  %v453_v7 = vld [vmem:[#allocation2 + $0xaa8] sm:$0xff] }
 0x202   :  { %v6240_v12 = vpack.c.bf16 %v440_v2, %v428_v1  ;;  %v526_v1 = vld [vmem:[#allocation2 + $0xcf0] sm:$0xff]  ;;  %v6614_v2 = vpack.c.bf16 %v539_v57, %v527_v56 }
 0x203   :  { %6225 = vmatpush1.bf16.msra.mxu0 %v6224_v14  ;;  %v6242_v14 = vpack.c.bf16 %v465_v8, %v453_v7  ;;  %v551_v7 = vld [vmem:[#allocation2 + $0xdb8] sm:$0xff]  ;;  %v6616_v10 = vpack.c.bf16 %v538_v3, %v526_v1  ;;  %v634_v1 = vld [vmem:[#allocation2 + $0x1050] sm:$0xff]  ;;  %v657_v3 = vld [vmem:[#allocation2 + $0x1108] sm:$0xff] }
 0x204   :  { %6585 = vmatpush1.bf16.msra.mxu1 %v6584_v49  ;;  %6227 = vmatprep.subr.bf16.mxu0 %v6226_v16  ;;  %v452_v49 = vld [vmem:[#allocation2 + $0xaa0] sm:$0xff]  ;;  %v563_v8 = vld [vmem:[#allocation2 + $0xe18] sm:$0xff] }
 0x205   :  { %6587 = vmatprep.subr.bf16.mxu1 %v6586_v20  ;;  %v464_v16 = vld [vmem:[#allocation2 + $0xb00] sm:$0xff]  ;;  %v477_v20 = vld [vmem:[#allocation2 + $0xb68] sm:$0xff] }
 0x206   :  { %v6244_v22 = vpack.c.bf16 %v464_v16, %v452_v49  ;;  %v550_v49 = vld [vmem:[#allocation2 + $0xdb0] sm:$0xff]  ;;  %v6618_v16 = vpack.c.bf16 %v563_v8, %v551_v7 }
 0x207   :  { %6229 = vmatpush1.bf16.msra.mxu0 %v6228_v28  ;;  %v6246_v28 = vpack.c.bf16 %v489_v21, %v477_v20  ;;  %v575_v20 = vld [vmem:[#allocation2 + $0xe78] sm:$0xff]  ;;  %v6620_v24 = vpack.c.bf16 %v562_v17, %v550_v49  ;;  %v658_v49 = vld [vmem:[#allocation2 + $0x1110] sm:$0xff]  ;;  %v681_v17 = vld [vmem:[#allocation2 + $0x11c8] sm:$0xff] }
 0x208   :  { %6589 = vmatpush1.bf16.msra.mxu1 %v6588_v30  ;;  %6231 = vmatprep.subr.bf16.mxu0 %v6230_v31  ;;  %v476_v30 = vld [vmem:[#allocation2 + $0xb60] sm:$0xff]  ;;  %v587_v21 = vld [vmem:[#allocation2 + $0xed8] sm:$0xff] }
 0x209   :  { %6591 = vmatprep.subr.bf16.mxu1 %v6590_v36  ;;  %v488_v31 = vld [vmem:[#allocation2 + $0xbc0] sm:$0xff]  ;;  %v501_v36 = vld [vmem:[#allocation2 + $0xc28] sm:$0xff] }
 0x20a   :  { %v6248_v42 = vpack.c.bf16 %v488_v31, %v476_v30  ;;  %v574_v30 = vld [vmem:[#allocation2 + $0xe70] sm:$0xff]  ;;  %v6622_v31 = vpack.c.bf16 %v587_v21, %v575_v20 }
 0x20b   :  { %6233 = vmatpush1.bf16.msra.mxu0 %v6232_v44  ;;  %v6250_v44 = vpack.c.bf16 %v513_v37, %v501_v36  ;;  %v599_v36 = vld [vmem:[#allocation2 + $0xf38] sm:$0xff]  ;;  %v6624_v41 = vpack.c.bf16 %v586_v33, %v574_v30  ;;  %v682_v30 = vld [vmem:[#allocation2 + $0x11d0] sm:$0xff]  ;;  %v705_v33 = vld [vmem:[#allocation2 + $0x1288] sm:$0xff] }
 0x20c   :  { %6593 = vmatpush1.bf16.msra.mxu1 %v6592_v45  ;;  %6235 = vmatprep.subr.bf16.mxu0 %v6234_v46  ;;  %v500_v45 = vld [vmem:[#allocation2 + $0xc20] sm:$0xff]  ;;  %v611_v37 = vld [vmem:[#allocation2 + $0xf98] sm:$0xff] }
 0x20d   :  { %6595 = vmatprep.subr.bf16.mxu1 %v6594_v51  ;;  %v512_v46 = vld [vmem:[#allocation2 + $0xc80] sm:$0xff]  ;;  %v525_v51 = vld [vmem:[#allocation2 + $0xce8] sm:$0xff] }
 0x20e   :  { %v6252_v58 = vpack.c.bf16 %v512_v46, %v500_v45  ;;  %v598_v45 = vld [vmem:[#allocation2 + $0xf30] sm:$0xff]  ;;  %v6626_v46 = vpack.c.bf16 %v611_v37, %v599_v36 }
 0x20f   :  { %6237 = vmatpush1.bf16.msra.mxu0 %v6236_v60  ;;  %v6254_v60 = vpack.c.bf16 %v537_v53, %v525_v51  ;;  %v623_v51 = vld [vmem:[#allocation2 + $0xff8] sm:$0xff]  ;;  %v6628_v57 = vpack.c.bf16 %v610_v47, %v598_v45  ;;  %v706_v45 = vld [vmem:[#allocation2 + $0x1290] sm:$0xff]  ;;  %v729_v47 = vld [vmem:[#allocation2 + $0x1348] sm:$0xff] }
 0x210   :  { %6597 = vmatpush1.bf16.msra.mxu1 %v6596_v61  ;;  %6239 = vmatprep.subr.bf16.mxu0 %v6238_v0  ;;  %v524_v61 = vld [vmem:[#allocation2 + $0xce0] sm:$0xff]  ;;  %v635_v53 = vld [vmem:[#allocation2 + $0x1058] sm:$0xff] }
 0x211   :  { %6599 = vmatprep.subr.bf16.mxu1 %v6598_v5  ;;  %v536_v0 = vld [vmem:[#allocation2 + $0xd40] sm:$0xff]  ;;  %v549_v5 = vld [vmem:[#allocation2 + $0xda8] sm:$0xff] }
 0x212   :  { %v6256_v9 = vpack.c.bf16 %v536_v0, %v524_v61  ;;  %v622_v61 = vld [vmem:[#allocation2 + $0xff0] sm:$0xff]  ;;  %v6630_v0 = vpack.c.bf16 %v635_v53, %v623_v51 }
 0x213   :  { %6241 = vmatpush1.bf16.msra.mxu0 %v6240_v12  ;;  %v6258_v12 = vpack.c.bf16 %v561_v6, %v549_v5  ;;  %v647_v5 = vld [vmem:[#allocation2 + $0x10b8] sm:$0xff]  ;;  %v6632_v8 = vpack.c.bf16 %v634_v1, %v622_v61  ;;  %v730_v61 = vld [vmem:[#allocation2 + $0x1350] sm:$0xff]  ;;  %v753_v1 = vld [vmem:[#allocation2 + $0x1408] sm:$0xff] }
 0x214   :  { %6601 = vmatpush1.bf16.msra.mxu1 %v6600_v13  ;;  %6243 = vmatprep.subr.bf16.mxu0 %v6242_v14  ;;  %v548_v13 = vld [vmem:[#allocation2 + $0xda0] sm:$0xff]  ;;  %v659_v6 = vld [vmem:[#allocation2 + $0x1118] sm:$0xff] }
 0x215   :  { %6603 = vmatprep.subr.bf16.mxu1 %v6602_v18  ;;  %v560_v14 = vld [vmem:[#allocation2 + $0xe00] sm:$0xff]  ;;  %v573_v18 = vld [vmem:[#allocation2 + $0xe68] sm:$0xff] }
 0x216   :  { %v6260_v23 = vpack.c.bf16 %v560_v14, %v548_v13  ;;  %v646_v13 = vld [vmem:[#allocation2 + $0x10b0] sm:$0xff]  ;;  %v6634_v14 = vpack.c.bf16 %v659_v6, %v647_v5 }
 0x217   :  { %6245 = vmatpush1.bf16.msra.mxu0 %v6244_v22  ;;  %v6262_v22 = vpack.c.bf16 %v585_v19, %v573_v18  ;;  %v671_v18 = vld [vmem:[#allocation2 + $0x1178] sm:$0xff]  ;;  %v6636_v21 = vpack.c.bf16 %v658_v49, %v646_v13  ;;  %v754_v13 = vld [vmem:[#allocation2 + $0x1410] sm:$0xff]  ;;  %v777_v49 = vld [vmem:[#allocation2 + $0x14c8] sm:$0xff] }
 0x218   :  { %6605 = vmatpush1.bf16.msra.mxu1 %v6604_v27  ;;  %6247 = vmatprep.subr.bf16.mxu0 %v6246_v28  ;;  %v572_v27 = vld [vmem:[#allocation2 + $0xe60] sm:$0xff]  ;;  %v683_v19 = vld [vmem:[#allocation2 + $0x11d8] sm:$0xff] }
 0x219   :  { %6607 = vmatprep.subr.bf16.mxu1 %v6606_v34  ;;  %v584_v28 = vld [vmem:[#allocation2 + $0xec0] sm:$0xff]  ;;  %v597_v34 = vld [vmem:[#allocation2 + $0xf28] sm:$0xff] }
 0x21a   :  { %v6264_v40 = vpack.c.bf16 %v584_v28, %v572_v27  ;;  %v670_v27 = vld [vmem:[#allocation2 + $0x1170] sm:$0xff]  ;;  %v6638_v28 = vpack.c.bf16 %v683_v19, %v671_v18 }
 0x21b   :  { %6249 = vmatpush1.bf16.msra.mxu0 %v6248_v42  ;;  %v6266_v42 = vpack.c.bf16 %v609_v35, %v597_v34  ;;  %v695_v34 = vld [vmem:[#allocation2 + $0x1238] sm:$0xff]  ;;  %v6640_v37 = vpack.c.bf16 %v682_v30, %v670_v27  ;;  %v778_v27 = vld [vmem:[#allocation2 + $0x14d0] sm:$0xff]  ;;  %v801_v30 = vld [vmem:[#allocation2 + $0x1588] sm:$0xff] }
 0x21c   :  { %6609 = vmatpush1.bf16.msra.mxu1 %v6608_v43  ;;  %6251 = vmatprep.subr.bf16.mxu0 %v6250_v44  ;;  %v596_v43 = vld [vmem:[#allocation2 + $0xf20] sm:$0xff]  ;;  %v707_v35 = vld [vmem:[#allocation2 + $0x1298] sm:$0xff] }
 0x21d   :  { %6611 = vmatprep.subr.bf16.mxu1 %v6610_v48  ;;  %v608_v44 = vld [vmem:[#allocation2 + $0xf80] sm:$0xff]  ;;  %v621_v48 = vld [vmem:[#allocation2 + $0xfe8] sm:$0xff] }
 0x21e   :  { %3257 = vmatmul.mubr.f32.vlgmr.msra.gmra.mrb[2].mxu0 %v8182_v25  ;;  %v6268_v56 = vpack.c.bf16 %v608_v44, %v596_v43  ;;  %v694_v43 = vld [vmem:[#allocation2 + $0x1230] sm:$0xff]  ;;  %v6642_v44 = vpack.c.bf16 %v707_v35, %v695_v34 }
 0x21f   :  { %6253 = vmatpush1.bf16.msra.mxu0 %v6252_v58  ;;  %3683 = vmatmul.mubr.f32.vlgmr.msra.gmra.mrb[2].mxu1 %v8182_v25  ;;  %v6270_v58 = vpack.c.bf16 %v633_v50, %v621_v48  ;;  %v719_v48 = vld [vmem:[#allocation2 + $0x12f8] sm:$0xff]  ;;  %v6644_v53 = vpack.c.bf16 %v706_v45, %v694_v43  ;;  %v802_v43 = vld [vmem:[#allocation2 + $0x1590] sm:$0xff]  ;;  %v825_v45 = vld [vmem:[#allocation2 + $0x1648] sm:$0xff] }
 0x220   :  { %6613 = vmatpush1.bf16.msra.mxu1 %v6612_v59  ;;  %6255 = vmatprep.subr.bf16.mxu0 %v6254_v60  ;;  %v620_v59 = vld [vmem:[#allocation2 + $0xfe0] sm:$0xff]  ;;  %v731_v50 = vld [vmem:[#allocation2 + $0x1358] sm:$0xff] }
 0x221   :  { %6615 = vmatprep.subr.bf16.mxu1 %v6614_v2  ;;  %3327 = vmatprep.mubr.f32.mxu0 %v8197_v39  ;;  %v632_v60 = vld [vmem:[#allocation2 + $0x1040] sm:$0xff]  ;;  %v645_v2 = vld [vmem:[#allocation2 + $0x10a8] sm:$0xff] }
 0x222   :  { %3753 = vmatprep.mubr.f32.mxu1 %v8197_v39  ;;  %v6272_v7 = vpack.c.bf16 %v632_v60, %v620_v59  ;;  %v718_v59 = vld [vmem:[#allocation2 + $0x12f0] sm:$0xff]  ;;  %v6646_v60 = vpack.c.bf16 %v731_v50, %v719_v48 }
 0x223   :  { %6257 = vmatpush1.bf16.msra.mxu0 %v6256_v9  ;;  %v6274_v9 = vpack.c.bf16 %v657_v3, %v645_v2  ;;  %v743_v2 = vld [vmem:[#allocation2 + $0x13b8] sm:$0xff]  ;;  %v6648_v6 = vpack.c.bf16 %v730_v61, %v718_v59  ;;  %v826_v59 = vld [vmem:[#allocation2 + $0x1650] sm:$0xff]  ;;  %v849_v61 = vld [vmem:[#allocation2 + $0x1708] sm:$0xff] }
 0x224   :  { %6617 = vmatpush1.bf16.msra.mxu1 %v6616_v10  ;;  %6259 = vmatprep.subr.bf16.mxu0 %v6258_v12  ;;  %v644_v10 = vld [vmem:[#allocation2 + $0x10a0] sm:$0xff]  ;;  %v755_v3 = vld [vmem:[#allocation2 + $0x1418] sm:$0xff] }
 0x225   :  { %6619 = vmatprep.subr.bf16.mxu1 %v6618_v16  ;;  %v656_v12 = vld [vmem:[#allocation2 + $0x1100] sm:$0xff]  ;;  %v669_v16 = vld [vmem:[#allocation2 + $0x1168] sm:$0xff] }
 0x226   :  { %v6276_v20 = vpack.c.bf16 %v656_v12, %v644_v10  ;;  %v742_v10 = vld [vmem:[#allocation2 + $0x13b0] sm:$0xff]  ;;  %v6650_v12 = vpack.c.bf16 %v755_v3, %v743_v2 }
 0x227   :  { %6261 = vmatpush1.bf16.msra.mxu0 %v6260_v23  ;;  %v6278_v23 = vpack.c.bf16 %v681_v17, %v669_v16  ;;  %v767_v16 = vld [vmem:[#allocation2 + $0x1478] sm:$0xff]  ;;  %v6652_v19 = vpack.c.bf16 %v754_v13, %v742_v10  ;;  %v850_v10 = vld [vmem:[#allocation2 + $0x1710] sm:$0xff]  ;;  %v873_v13 = vld [vmem:[#allocation2 + $0x17c8] sm:$0xff] }
 0x228   :  { %6621 = vmatpush1.bf16.msra.mxu1 %v6620_v24  ;;  %6263 = vmatprep.subr.bf16.mxu0 %v6262_v22  ;;  %v668_v24 = vld [vmem:[#allocation2 + $0x1160] sm:$0xff]  ;;  %v779_v17 = vld [vmem:[#allocation2 + $0x14d8] sm:$0xff] }
 0x229   :  { %6623 = vmatprep.subr.bf16.mxu1 %v6622_v31  ;;  %v680_v22 = vld [vmem:[#allocation2 + $0x11c0] sm:$0xff]  ;;  %v693_v31 = vld [vmem:[#allocation2 + $0x1228] sm:$0xff] }
 0x22a   :  { %v6280_v36 = vpack.c.bf16 %v680_v22, %v668_v24  ;;  %v766_v24 = vld [vmem:[#allocation2 + $0x1470] sm:$0xff]  ;;  %v6654_v22 = vpack.c.bf16 %v779_v17, %v767_v16 }
 0x22b   :  { %6265 = vmatpush1.bf16.msra.mxu0 %v6264_v40  ;;  %v6282_v40 = vpack.c.bf16 %v705_v33, %v693_v31  ;;  %v791_v31 = vld [vmem:[#allocation2 + $0x1538] sm:$0xff]  ;;  %v6656_v35 = vpack.c.bf16 %v778_v27, %v766_v24  ;;  %v874_v24 = vld [vmem:[#allocation2 + $0x17d0] sm:$0xff]  ;;  %v897_v27 = vld [vmem:[#allocation2 + $0x1888] sm:$0xff] }
 0x22c   :  { %6625 = vmatpush1.bf16.msra.mxu1 %v6624_v41  ;;  %6267 = vmatprep.subr.bf16.mxu0 %v6266_v42  ;;  %v692_v41 = vld [vmem:[#allocation2 + $0x1220] sm:$0xff]  ;;  %v803_v33 = vld [vmem:[#allocation2 + $0x1598] sm:$0xff] }
 0x22d   :  { %6627 = vmatprep.subr.bf16.mxu1 %v6626_v46  ;;  %v704_v42 = vld [vmem:[#allocation2 + $0x1280] sm:$0xff]  ;;  %v717_v46 = vld [vmem:[#allocation2 + $0x12e8] sm:$0xff] }
 0x22e   :  { %v6284_v51 = vpack.c.bf16 %v704_v42, %v692_v41  ;;  %v790_v41 = vld [vmem:[#allocation2 + $0x1530] sm:$0xff]  ;;  %v6658_v42 = vpack.c.bf16 %v803_v33, %v791_v31 }
 0x22f   :  { %6269 = vmatpush1.bf16.msra.mxu0 %v6268_v56  ;;  %v6286_v56 = vpack.c.bf16 %v729_v47, %v717_v46  ;;  %v815_v46 = vld [vmem:[#allocation2 + $0x15f8] sm:$0xff]  ;;  %v6660_v50 = vpack.c.bf16 %v802_v43, %v790_v41  ;;  %v898_v41 = vld [vmem:[#allocation2 + $0x1890] sm:$0xff]  ;;  %v921_v43 = vld [vmem:[#allocation2 + $0x1948] sm:$0xff] }
 0x230   :  { %6629 = vmatpush1.bf16.msra.mxu1 %v6628_v57  ;;  %6271 = vmatprep.subr.bf16.mxu0 %v6270_v58  ;;  %v716_v57 = vld [vmem:[#allocation2 + $0x12e0] sm:$0xff]  ;;  %v827_v47 = vld [vmem:[#allocation2 + $0x1658] sm:$0xff] }
 0x231   :  { %6631 = vmatprep.subr.bf16.mxu1 %v6630_v0  ;;  %v728_v58 = vld [vmem:[#allocation2 + $0x1340] sm:$0xff]  ;;  %v741_v0 = vld [vmem:[#allocation2 + $0x13a8] sm:$0xff] }
 0x232   :  { %v6288_v5 = vpack.c.bf16 %v728_v58, %v716_v57  ;;  %v814_v57 = vld [vmem:[#allocation2 + $0x15f0] sm:$0xff]  ;;  %v6662_v58 = vpack.c.bf16 %v827_v47, %v815_v46 }
 0x233   :  { %6273 = vmatpush1.bf16.msra.mxu0 %v6272_v7  ;;  %v6290_v7 = vpack.c.bf16 %v753_v1, %v741_v0  ;;  %v839_v0 = vld [vmem:[#allocation2 + $0x16b8] sm:$0xff]  ;;  %v6664_v3 = vpack.c.bf16 %v826_v59, %v814_v57  ;;  %v922_v57 = vld [vmem:[#allocation2 + $0x1950] sm:$0xff]  ;;  %v945_v59 = vld [vmem:[#allocation2 + $0x1a08] sm:$0xff] }
 0x234   :  { %6633 = vmatpush1.bf16.msra.mxu1 %v6632_v8  ;;  %6275 = vmatprep.subr.bf16.mxu0 %v6274_v9  ;;  %v740_v8 = vld [vmem:[#allocation2 + $0x13a0] sm:$0xff]  ;;  %v851_v1 = vld [vmem:[#allocation2 + $0x1718] sm:$0xff] }
 0x235   :  { %6635 = vmatprep.subr.bf16.mxu1 %v6634_v14  ;;  %v752_v9 = vld [vmem:[#allocation2 + $0x1400] sm:$0xff]  ;;  %v765_v14 = vld [vmem:[#allocation2 + $0x1468] sm:$0xff] }
 0x236   :  { %v6292_v18 = vpack.c.bf16 %v752_v9, %v740_v8  ;;  %v838_v8 = vld [vmem:[#allocation2 + $0x16b0] sm:$0xff]  ;;  %v6666_v9 = vpack.c.bf16 %v851_v1, %v839_v0 }
 0x237   :  { %6277 = vmatpush1.bf16.msra.mxu0 %v6276_v20  ;;  %v6294_v20 = vpack.c.bf16 %v777_v49, %v765_v14  ;;  %v863_v14 = vld [vmem:[#allocation2 + $0x1778] sm:$0xff]  ;;  %v6668_v17 = vpack.c.bf16 %v850_v10, %v838_v8  ;;  %v946_v8 = vld [vmem:[#allocation2 + $0x1a10] sm:$0xff]  ;;  %v969_v10 = vld [vmem:[#allocation2 + $0x1ac8] sm:$0xff] }
 0x238   :  { %6637 = vmatpush1.bf16.msra.mxu1 %v6636_v21  ;;  %6279 = vmatprep.subr.bf16.mxu0 %v6278_v23  ;;  %v764_v21 = vld [vmem:[#allocation2 + $0x1460] sm:$0xff]  ;;  %v875_v49 = vld [vmem:[#allocation2 + $0x17d8] sm:$0xff] }
 0x239   :  { %6639 = vmatprep.subr.bf16.mxu1 %v6638_v28  ;;  %v776_v23 = vld [vmem:[#allocation2 + $0x14c0] sm:$0xff]  ;;  %v789_v28 = vld [vmem:[#allocation2 + $0x1528] sm:$0xff] }
 0x23a   :  { %v6296_v34 = vpack.c.bf16 %v776_v23, %v764_v21  ;;  %v862_v21 = vld [vmem:[#allocation2 + $0x1770] sm:$0xff]  ;;  %v6670_v23 = vpack.c.bf16 %v875_v49, %v863_v14 }
 0x23b   :  { %6281 = vmatpush1.bf16.msra.mxu0 %v6280_v36  ;;  %v6298_v36 = vpack.c.bf16 %v801_v30, %v789_v28  ;;  %v887_v28 = vld [vmem:[#allocation2 + $0x1838] sm:$0xff]  ;;  %v6672_v33 = vpack.c.bf16 %v874_v24, %v862_v21  ;;  %v970_v21 = vld [vmem:[#allocation2 + $0x1ad0] sm:$0xff]  ;;  %v993_v24 = vld [vmem:[#allocation2 + $0x1b88] sm:$0xff] }
 0x23c   :  { %6641 = vmatpush1.bf16.msra.mxu1 %v6640_v37  ;;  %6283 = vmatprep.subr.bf16.mxu0 %v6282_v40  ;;  %v788_v37 = vld [vmem:[#allocation2 + $0x1520] sm:$0xff]  ;;  %v899_v30 = vld [vmem:[#allocation2 + $0x1898] sm:$0xff] }
 0x23d   :  { %6643 = vmatprep.subr.bf16.mxu1 %v6642_v44  ;;  %v800_v40 = vld [vmem:[#allocation2 + $0x1580] sm:$0xff]  ;;  %v813_v44 = vld [vmem:[#allocation2 + $0x15e8] sm:$0xff] }
 0x23e   :  { %v6300_v48 = vpack.c.bf16 %v800_v40, %v788_v37  ;;  %v886_v37 = vld [vmem:[#allocation2 + $0x1830] sm:$0xff]  ;;  %v6674_v40 = vpack.c.bf16 %v899_v30, %v887_v28 }
 0x23f   :  { %6285 = vmatpush1.bf16.msra.mxu0 %v6284_v51  ;;  %v6302_v51 = vpack.c.bf16 %v825_v45, %v813_v44  ;;  %v911_v44 = vld [vmem:[#allocation2 + $0x18f8] sm:$0xff]  ;;  %v6676_v47 = vpack.c.bf16 %v898_v41, %v886_v37  ;;  %v994_v37 = vld [vmem:[#allocation2 + $0x1b90] sm:$0xff]  ;;  %v1017_v41 = vld [vmem:[#allocation2 + $0x1c48] sm:$0xff] }
 0x240   :  { %6645 = vmatpush1.bf16.msra.mxu1 %v6644_v53  ;;  %6287 = vmatprep.subr.bf16.mxu0 %v6286_v56  ;;  %v812_v53 = vld [vmem:[#allocation2 + $0x15e0] sm:$0xff]  ;;  %v923_v45 = vld [vmem:[#allocation2 + $0x1958] sm:$0xff] }
 0x241   :  { %6647 = vmatprep.subr.bf16.mxu1 %v6646_v60  ;;  %v824_v56 = vld [vmem:[#allocation2 + $0x1640] sm:$0xff]  ;;  %v837_v60 = vld [vmem:[#allocation2 + $0x16a8] sm:$0xff] }
 0x242   :  { %v6304_v2 = vpack.c.bf16 %v824_v56, %v812_v53  ;;  %v910_v53 = vld [vmem:[#allocation2 + $0x18f0] sm:$0xff]  ;;  %v6678_v56 = vpack.c.bf16 %v923_v45, %v911_v44 }
 0x243   :  { %6289 = vmatpush1.bf16.msra.mxu0 %v6288_v5  ;;  %v6306_v5 = vpack.c.bf16 %v849_v61, %v837_v60  ;;  %v935_v60 = vld [vmem:[#allocation2 + $0x19b8] sm:$0xff]  ;;  %v6680_v1 = vpack.c.bf16 %v922_v57, %v910_v53  ;;  %v1018_v53 = vld [vmem:[#allocation2 + $0x1c50] sm:$0xff]  ;;  %v1041_v57 = vld [vmem:[#allocation2 + $0x1d08] sm:$0xff] }
 0x244   :  { %6649 = vmatpush1.bf16.msra.mxu1 %v6648_v6  ;;  %6291 = vmatprep.subr.bf16.mxu0 %v6290_v7  ;;  %v836_v6 = vld [vmem:[#allocation2 + $0x16a0] sm:$0xff]  ;;  %v947_v61 = vld [vmem:[#allocation2 + $0x1a18] sm:$0xff] }
 0x245   :  { %6651 = vmatprep.subr.bf16.mxu1 %v6650_v12  ;;  %v848_v7 = vld [vmem:[#allocation2 + $0x1700] sm:$0xff]  ;;  %v861_v12 = vld [vmem:[#allocation2 + $0x1768] sm:$0xff] }
 0x246   :  { %v6308_v16 = vpack.c.bf16 %v848_v7, %v836_v6  ;;  %v934_v6 = vld [vmem:[#allocation2 + $0x19b0] sm:$0xff]  ;;  %v6682_v7 = vpack.c.bf16 %v947_v61, %v935_v60 }
 0x247   :  { %6293 = vmatpush1.bf16.msra.mxu0 %v6292_v18  ;;  %v6310_v18 = vpack.c.bf16 %v873_v13, %v861_v12  ;;  %v959_v12 = vld [vmem:[#allocation2 + $0x1a78] sm:$0xff]  ;;  %v6684_v49 = vpack.c.bf16 %v946_v8, %v934_v6  ;;  %v1042_v6 = vld [vmem:[#allocation2 + $0x1d10] sm:$0xff]  ;;  %v1065_v8 = vld [vmem:[#allocation2 + $0x1dc8] sm:$0xff] }
 0x248   :  { %6653 = vmatpush1.bf16.msra.mxu1 %v6652_v19  ;;  %6295 = vmatprep.subr.bf16.mxu0 %v6294_v20  ;;  %v860_v19 = vld [vmem:[#allocation2 + $0x1760] sm:$0xff]  ;;  %v971_v13 = vld [vmem:[#allocation2 + $0x1ad8] sm:$0xff] }
 0x249   :  { %6655 = vmatprep.subr.bf16.mxu1 %v6654_v22  ;;  %v872_v20 = vld [vmem:[#allocation2 + $0x17c0] sm:$0xff]  ;;  %v885_v22 = vld [vmem:[#allocation2 + $0x1828] sm:$0xff] }
 0x24a   :  { %v6312_v31 = vpack.c.bf16 %v872_v20, %v860_v19  ;;  %v958_v19 = vld [vmem:[#allocation2 + $0x1a70] sm:$0xff]  ;;  %v6686_v20 = vpack.c.bf16 %v971_v13, %v959_v12 }
 0x24b   :  { %6297 = vmatpush1.bf16.msra.mxu0 %v6296_v34  ;;  %v6314_v34 = vpack.c.bf16 %v897_v27, %v885_v22  ;;  %v983_v22 = vld [vmem:[#allocation2 + $0x1b38] sm:$0xff]  ;;  %v6688_v30 = vpack.c.bf16 %v970_v21, %v958_v19  ;;  %v1066_v19 = vld [vmem:[#allocation2 + $0x1dd0] sm:$0xff]  ;;  %v1089_v21 = vld [vmem:[#allocation2 + $0x1e88] sm:$0xff] }
 0x24c   :  { %6657 = vmatpush1.bf16.msra.mxu1 %v6656_v35  ;;  %6299 = vmatprep.subr.bf16.mxu0 %v6298_v36  ;;  %v884_v35 = vld [vmem:[#allocation2 + $0x1820] sm:$0xff]  ;;  %v995_v27 = vld [vmem:[#allocation2 + $0x1b98] sm:$0xff] }
 0x24d   :  { %6659 = vmatprep.subr.bf16.mxu1 %v6658_v42  ;;  %v896_v36 = vld [vmem:[#allocation2 + $0x1880] sm:$0xff]  ;;  %v909_v42 = vld [vmem:[#allocation2 + $0x18e8] sm:$0xff] }
 0x24e   :  { %v6316_v46 = vpack.c.bf16 %v896_v36, %v884_v35  ;;  %v982_v35 = vld [vmem:[#allocation2 + $0x1b30] sm:$0xff]  ;;  %v6690_v36 = vpack.c.bf16 %v995_v27, %v983_v22 }
 0x24f   :  { %6301 = vmatpush1.bf16.msra.mxu0 %v6300_v48  ;;  %v6318_v48 = vpack.c.bf16 %v921_v43, %v909_v42  ;;  %v1007_v42 = vld [vmem:[#allocation2 + $0x1bf8] sm:$0xff]  ;;  %v6692_v45 = vpack.c.bf16 %v994_v37, %v982_v35  ;;  %v1090_v35 = vld [vmem:[#allocation2 + $0x1e90] sm:$0xff]  ;;  %v1113_v37 = vld [vmem:[#allocation2 + $0x1f48] sm:$0xff] }
 0x250   :  { %6661 = vmatpush1.bf16.msra.mxu1 %v6660_v50  ;;  %6303 = vmatprep.subr.bf16.mxu0 %v6302_v51  ;;  %v908_v50 = vld [vmem:[#allocation2 + $0x18e0] sm:$0xff]  ;;  %v1019_v43 = vld [vmem:[#allocation2 + $0x1c58] sm:$0xff] }
 0x251   :  { %6663 = vmatprep.subr.bf16.mxu1 %v6662_v58  ;;  %v920_v51 = vld [vmem:[#allocation2 + $0x1940] sm:$0xff]  ;;  %v933_v58 = vld [vmem:[#allocation2 + $0x19a8] sm:$0xff] }
 0x252   :  { %v6320_v0 = vpack.c.bf16 %v920_v51, %v908_v50  ;;  %v1006_v50 = vld [vmem:[#allocation2 + $0x1bf0] sm:$0xff]  ;;  %v6694_v51 = vpack.c.bf16 %v1019_v43, %v1007_v42 }
 0x253   :  { %6305 = vmatpush1.bf16.msra.mxu0 %v6304_v2  ;;  %v6322_v2 = vpack.c.bf16 %v945_v59, %v933_v58  ;;  %v1031_v58 = vld [vmem:[#allocation2 + $0x1cb8] sm:$0xff]  ;;  %v6696_v61 = vpack.c.bf16 %v1018_v53, %v1006_v50  ;;  %v1114_v50 = vld [vmem:[#allocation2 + $0x1f50] sm:$0xff]  ;;  %v1137_v53 = vld [vmem:[#allocation2 + $0x2008] sm:$0xff] }
 0x254   :  { %6665 = vmatpush1.bf16.msra.mxu1 %v6664_v3  ;;  %6307 = vmatprep.subr.bf16.mxu0 %v6306_v5  ;;  %v932_v3 = vld [vmem:[#allocation2 + $0x19a0] sm:$0xff]  ;;  %v1043_v59 = vld [vmem:[#allocation2 + $0x1d18] sm:$0xff] }
 0x255   :  { %6667 = vmatprep.subr.bf16.mxu1 %v6666_v9  ;;  %v944_v5 = vld [vmem:[#allocation2 + $0x1a00] sm:$0xff]  ;;  %v957_v9 = vld [vmem:[#allocation2 + $0x1a68] sm:$0xff] }
 0x256   :  { %v6324_v14 = vpack.c.bf16 %v944_v5, %v932_v3  ;;  %v1030_v3 = vld [vmem:[#allocation2 + $0x1cb0] sm:$0xff]  ;;  %v6698_v5 = vpack.c.bf16 %v1043_v59, %v1031_v58 }
 0x257   :  { %6309 = vmatpush1.bf16.msra.mxu0 %v6308_v16  ;;  %v6326_v16 = vpack.c.bf16 %v969_v10, %v957_v9  ;;  %v1055_v9 = vld [vmem:[#allocation2 + $0x1d78] sm:$0xff]  ;;  %v6700_v13 = vpack.c.bf16 %v1042_v6, %v1030_v3  ;;  %v1138_v3 = vld [vmem:[#allocation2 + $0x2010] sm:$0xff]  ;;  %v1161_v6 = vld [vmem:[#allocation2 + $0x20c8] sm:$0xff] }
 0x258   :  { %6669 = vmatpush1.bf16.msra.mxu1 %v6668_v17  ;;  %6311 = vmatprep.subr.bf16.mxu0 %v6310_v18  ;;  %v956_v17 = vld [vmem:[#allocation2 + $0x1a60] sm:$0xff]  ;;  %v1067_v10 = vld [vmem:[#allocation2 + $0x1dd8] sm:$0xff] }
 0x259   :  { %6671 = vmatprep.subr.bf16.mxu1 %v6670_v23  ;;  %v968_v18 = vld [vmem:[#allocation2 + $0x1ac0] sm:$0xff]  ;;  %v981_v23 = vld [vmem:[#allocation2 + $0x1b28] sm:$0xff] }
 0x25a   :  { %v6328_v28 = vpack.c.bf16 %v968_v18, %v956_v17  ;;  %v1054_v17 = vld [vmem:[#allocation2 + $0x1d70] sm:$0xff]  ;;  %v6702_v18 = vpack.c.bf16 %v1067_v10, %v1055_v9 }
 0x25b   :  { %6313 = vmatpush1.bf16.msra.mxu0 %v6312_v31  ;;  %v6330_v31 = vpack.c.bf16 %v993_v24, %v981_v23  ;;  %v1079_v23 = vld [vmem:[#allocation2 + $0x1e38] sm:$0xff]  ;;  %v6704_v27 = vpack.c.bf16 %v1066_v19, %v1054_v17  ;;  %v1162_v17 = vld [vmem:[#allocation2 + $0x20d0] sm:$0xff]  ;;  %v1185_v19 = vld [vmem:[#allocation2 + $0x2188] sm:$0xff] }
 0x25c   :  { %6673 = vmatpush1.bf16.msra.mxu1 %v6672_v33  ;;  %6315 = vmatprep.subr.bf16.mxu0 %v6314_v34  ;;  %v980_v33 = vld [vmem:[#allocation2 + $0x1b20] sm:$0xff]  ;;  %v1091_v24 = vld [vmem:[#allocation2 + $0x1e98] sm:$0xff] }
 0x25d   :  { %6675 = vmatprep.subr.bf16.mxu1 %v6674_v40  ;;  %v992_v34 = vld [vmem:[#allocation2 + $0x1b80] sm:$0xff]  ;;  %v1005_v40 = vld [vmem:[#allocation2 + $0x1be8] sm:$0xff] }
 0x25e   :  { %3328 = vmatmul.mubr.f32.vlgmr.msra.gmra.mrb[2].mxu0 %v8193_v26  ;;  %v6332_v44 = vpack.c.bf16 %v992_v34, %v980_v33  ;;  %v1078_v33 = vld [vmem:[#allocation2 + $0x1e30] sm:$0xff]  ;;  %v6706_v34 = vpack.c.bf16 %v1091_v24, %v1079_v23 }
 0x25f   :  { %6317 = vmatpush1.bf16.msra.mxu0 %v6316_v46  ;;  %3754 = vmatmul.mubr.f32.vlgmr.msra.gmra.mrb[2].mxu1 %v8193_v26  ;;  %v6334_v46 = vpack.c.bf16 %v1017_v41, %v1005_v40  ;;  %v1103_v40 = vld [vmem:[#allocation2 + $0x1ef8] sm:$0xff]  ;;  %v6708_v43 = vpack.c.bf16 %v1090_v35, %v1078_v33  ;;  %v1186_v33 = vld [vmem:[#allocation2 + $0x2190] sm:$0xff]  ;;  %v1209_v35 = vld [vmem:[#allocation2 + $0x2248] sm:$0xff] }
 0x260   :  { %6677 = vmatpush1.bf16.msra.mxu1 %v6676_v47  ;;  %6319 = vmatprep.subr.bf16.mxu0 %v6318_v48  ;;  %v1004_v47 = vld [vmem:[#allocation2 + $0x1be0] sm:$0xff]  ;;  %v1115_v41 = vld [vmem:[#allocation2 + $0x1f58] sm:$0xff] }
 0x261   :  { %6679 = vmatprep.subr.bf16.mxu1 %v6678_v56  ;;  %3398 = vmatprep.mubr.f32.mxu0 %v8215_v63  ;;  %v1016_v48 = vld [vmem:[#allocation2 + $0x1c40] sm:$0xff]  ;;  %v1029_v56 = vld [vmem:[#allocation2 + $0x1ca8] sm:$0xff] }
 0x262   :  { %3824 = vmatprep.mubr.f32.mxu1 %v8215_v63  ;;  %v6336_v60 = vpack.c.bf16 %v1016_v48, %v1004_v47  ;;  %v1102_v47 = vld [vmem:[#allocation2 + $0x1ef0] sm:$0xff]  ;;  %v6710_v48 = vpack.c.bf16 %v1115_v41, %v1103_v40 }
 0x263   :  { %6321 = vmatpush1.bf16.msra.mxu0 %v6320_v0  ;;  %v6338_v0 = vpack.c.bf16 %v1041_v57, %v1029_v56  ;;  %v1127_v56 = vld [vmem:[#allocation2 + $0x1fb8] sm:$0xff]  ;;  %v6712_v59 = vpack.c.bf16 %v1114_v50, %v1102_v47  ;;  %v1210_v47 = vld [vmem:[#allocation2 + $0x2250] sm:$0xff]  ;;  %v1233_v50 = vld [vmem:[#allocation2 + $0x2308] sm:$0xff] }
 0x264   :  { %6681 = vmatpush1.bf16.msra.mxu1 %v6680_v1  ;;  %6323 = vmatprep.subr.bf16.mxu0 %v6322_v2  ;;  %v1028_v1 = vld [vmem:[#allocation2 + $0x1ca0] sm:$0xff]  ;;  %v1139_v57 = vld [vmem:[#allocation2 + $0x2018] sm:$0xff] }
 0x265   :  { %6683 = vmatprep.subr.bf16.mxu1 %v6682_v7  ;;  %v1040_v2 = vld [vmem:[#allocation2 + $0x1d00] sm:$0xff]  ;;  %v1053_v7 = vld [vmem:[#allocation2 + $0x1d68] sm:$0xff] }
 0x266   :  { %v6340_v12 = vpack.c.bf16 %v1040_v2, %v1028_v1  ;;  %v1126_v1 = vld [vmem:[#allocation2 + $0x1fb0] sm:$0xff]  ;;  %v6714_v2 = vpack.c.bf16 %v1139_v57, %v1127_v56 }
 0x267   :  { %6325 = vmatpush1.bf16.msra.mxu0 %v6324_v14  ;;  %v6342_v14 = vpack.c.bf16 %v1065_v8, %v1053_v7  ;;  %v1151_v7 = vld [vmem:[#allocation2 + $0x2078] sm:$0xff]  ;;  %v6716_v10 = vpack.c.bf16 %v1138_v3, %v1126_v1  ;;  %v1234_v1 = vld [vmem:[#allocation2 + $0x2310] sm:$0xff]  ;;  %v1257_v3 = vld [vmem:[#allocation2 + $0x23c8] sm:$0xff] }
 0x268   :  { %6685 = vmatpush1.bf16.msra.mxu1 %v6684_v49  ;;  %6327 = vmatprep.subr.bf16.mxu0 %v6326_v16  ;;  %v1052_v49 = vld [vmem:[#allocation2 + $0x1d60] sm:$0xff]  ;;  %v1163_v8 = vld [vmem:[#allocation2 + $0x20d8] sm:$0xff] }
 0x269   :  { %6687 = vmatprep.subr.bf16.mxu1 %v6686_v20  ;;  %v1064_v16 = vld [vmem:[#allocation2 + $0x1dc0] sm:$0xff]  ;;  %v1077_v20 = vld [vmem:[#allocation2 + $0x1e28] sm:$0xff] }
 0x26a   :  { %v6344_v22 = vpack.c.bf16 %v1064_v16, %v1052_v49  ;;  %v1150_v49 = vld [vmem:[#allocation2 + $0x2070] sm:$0xff]  ;;  %v6718_v16 = vpack.c.bf16 %v1163_v8, %v1151_v7 }
 0x26b   :  { %6329 = vmatpush1.bf16.msra.mxu0 %v6328_v28  ;;  %v6346_v28 = vpack.c.bf16 %v1089_v21, %v1077_v20  ;;  %v1175_v20 = vld [vmem:[#allocation2 + $0x2138] sm:$0xff]  ;;  %v6720_v24 = vpack.c.bf16 %v1162_v17, %v1150_v49  ;;  %v1258_v49 = vld [vmem:[#allocation2 + $0x23d0] sm:$0xff]  ;;  %v1281_v17 = vld [vmem:[#allocation2 + $0x2488] sm:$0xff] }
 0x26c   :  { %6689 = vmatpush1.bf16.msra.mxu1 %v6688_v30  ;;  %6331 = vmatprep.subr.bf16.mxu0 %v6330_v31  ;;  %v1076_v30 = vld [vmem:[#allocation2 + $0x1e20] sm:$0xff]  ;;  %v1187_v21 = vld [vmem:[#allocation2 + $0x2198] sm:$0xff] }
 0x26d   :  { %6691 = vmatprep.subr.bf16.mxu1 %v6690_v36  ;;  %v1088_v31 = vld [vmem:[#allocation2 + $0x1e80] sm:$0xff]  ;;  %v1101_v36 = vld [vmem:[#allocation2 + $0x1ee8] sm:$0xff] }
 0x26e   :  { %v6348_v42 = vpack.c.bf16 %v1088_v31, %v1076_v30  ;;  %v1174_v30 = vld [vmem:[#allocation2 + $0x2130] sm:$0xff]  ;;  %v6722_v31 = vpack.c.bf16 %v1187_v21, %v1175_v20 }
 0x26f   :  { %6333 = vmatpush1.bf16.msra.mxu0 %v6332_v44  ;;  %v6350_v44 = vpack.c.bf16 %v1113_v37, %v1101_v36  ;;  %v1199_v36 = vld [vmem:[#allocation2 + $0x21f8] sm:$0xff]  ;;  %v6724_v41 = vpack.c.bf16 %v1186_v33, %v1174_v30  ;;  %v1282_v30 = vld [vmem:[#allocation2 + $0x2490] sm:$0xff]  ;;  %v1305_v33 = vld [vmem:[#allocation2 + $0x2548] sm:$0xff] }
 0x270   :  { %6693 = vmatpush1.bf16.msra.mxu1 %v6692_v45  ;;  %6335 = vmatprep.subr.bf16.mxu0 %v6334_v46  ;;  %v1100_v45 = vld [vmem:[#allocation2 + $0x1ee0] sm:$0xff]  ;;  %v1211_v37 = vld [vmem:[#allocation2 + $0x2258] sm:$0xff] }
 0x271   :  { %6695 = vmatprep.subr.bf16.mxu1 %v6694_v51  ;;  %v1112_v46 = vld [vmem:[#allocation2 + $0x1f40] sm:$0xff]  ;;  %v1125_v51 = vld [vmem:[#allocation2 + $0x1fa8] sm:$0xff] }
 0x272   :  { %v6352_v58 = vpack.c.bf16 %v1112_v46, %v1100_v45  ;;  %v1198_v45 = vld [vmem:[#allocation2 + $0x21f0] sm:$0xff]  ;;  %v6726_v46 = vpack.c.bf16 %v1211_v37, %v1199_v36 }
 0x273   :  { %6337 = vmatpush1.bf16.msra.mxu0 %v6336_v60  ;;  %v6354_v60 = vpack.c.bf16 %v1137_v53, %v1125_v51  ;;  %v1223_v51 = vld [vmem:[#allocation2 + $0x22b8] sm:$0xff]  ;;  %v6728_v57 = vpack.c.bf16 %v1210_v47, %v1198_v45  ;;  %v1306_v45 = vld [vmem:[#allocation2 + $0x2550] sm:$0xff]  ;;  %v1329_v47 = vld [vmem:[#allocation2 + $0x2608] sm:$0xff] }
 0x274   :  { %6697 = vmatpush1.bf16.msra.mxu1 %v6696_v61  ;;  %6339 = vmatprep.subr.bf16.mxu0 %v6338_v0  ;;  %v1124_v61 = vld [vmem:[#allocation2 + $0x1fa0] sm:$0xff]  ;;  %v1235_v53 = vld [vmem:[#allocation2 + $0x2318] sm:$0xff] }
 0x275   :  { %6699 = vmatprep.subr.bf16.mxu1 %v6698_v5  ;;  %v1136_v0 = vld [vmem:[#allocation2 + $0x2000] sm:$0xff]  ;;  %v1149_v5 = vld [vmem:[#allocation2 + $0x2068] sm:$0xff] }
 0x276   :  { %v6356_v9 = vpack.c.bf16 %v1136_v0, %v1124_v61  ;;  %v1222_v61 = vld [vmem:[#allocation2 + $0x22b0] sm:$0xff]  ;;  %v6730_v0 = vpack.c.bf16 %v1235_v53, %v1223_v51 }
 0x277   :  { %6341 = vmatpush1.bf16.msra.mxu0 %v6340_v12  ;;  %v6358_v12 = vpack.c.bf16 %v1161_v6, %v1149_v5  ;;  %v1247_v5 = vld [vmem:[#allocation2 + $0x2378] sm:$0xff]  ;;  %v6732_v8 = vpack.c.bf16 %v1234_v1, %v1222_v61  ;;  %v1330_v61 = vld [vmem:[#allocation2 + $0x2610] sm:$0xff]  ;;  %v1353_v1 = vld [vmem:[#allocation2 + $0x26c8] sm:$0xff] }
 0x278   :  { %6701 = vmatpush1.bf16.msra.mxu1 %v6700_v13  ;;  %6343 = vmatprep.subr.bf16.mxu0 %v6342_v14  ;;  %v1148_v13 = vld [vmem:[#allocation2 + $0x2060] sm:$0xff]  ;;  %v1259_v6 = vld [vmem:[#allocation2 + $0x23d8] sm:$0xff] }
 0x279   :  { %6703 = vmatprep.subr.bf16.mxu1 %v6702_v18  ;;  %v1160_v14 = vld [vmem:[#allocation2 + $0x20c0] sm:$0xff]  ;;  %v1173_v18 = vld [vmem:[#allocation2 + $0x2128] sm:$0xff] }
 0x27a   :  { %v6360_v23 = vpack.c.bf16 %v1160_v14, %v1148_v13  ;;  %v1246_v13 = vld [vmem:[#allocation2 + $0x2370] sm:$0xff]  ;;  %v6734_v14 = vpack.c.bf16 %v1259_v6, %v1247_v5 }
 0x27b   :  { %6345 = vmatpush1.bf16.msra.mxu0 %v6344_v22  ;;  %v6362_v22 = vpack.c.bf16 %v1185_v19, %v1173_v18  ;;  %v1271_v18 = vld [vmem:[#allocation2 + $0x2438] sm:$0xff]  ;;  %v6736_v21 = vpack.c.bf16 %v1258_v49, %v1246_v13  ;;  %v1354_v13 = vld [vmem:[#allocation2 + $0x26d0] sm:$0xff]  ;;  %v1377_v49 = vld [vmem:[#allocation2 + $0x2788] sm:$0xff] }
 0x27c   :  { %6705 = vmatpush1.bf16.msra.mxu1 %v6704_v27  ;;  %6347 = vmatprep.subr.bf16.mxu0 %v6346_v28  ;;  %v1172_v27 = vld [vmem:[#allocation2 + $0x2120] sm:$0xff]  ;;  %v1283_v19 = vld [vmem:[#allocation2 + $0x2498] sm:$0xff] }
 0x27d   :  { %6707 = vmatprep.subr.bf16.mxu1 %v6706_v34  ;;  %v1184_v28 = vld [vmem:[#allocation2 + $0x2180] sm:$0xff]  ;;  %v1197_v34 = vld [vmem:[#allocation2 + $0x21e8] sm:$0xff] }
 0x27e   :  { %v6364_v40 = vpack.c.bf16 %v1184_v28, %v1172_v27  ;;  %v1270_v27 = vld [vmem:[#allocation2 + $0x2430] sm:$0xff]  ;;  %v6738_v28 = vpack.c.bf16 %v1283_v19, %v1271_v18 }
 0x27f   :  { %6349 = vmatpush1.bf16.msra.mxu0 %v6348_v42  ;;  %v6366_v42 = vpack.c.bf16 %v1209_v35, %v1197_v34  ;;  %v1295_v34 = vld [vmem:[#allocation2 + $0x24f8] sm:$0xff]  ;;  %v6740_v37 = vpack.c.bf16 %v1282_v30, %v1270_v27  ;;  %v1378_v27 = vld [vmem:[#allocation2 + $0x2790] sm:$0xff]  ;;  %v1401_v30 = vld [vmem:[#allocation2 + $0x2848] sm:$0xff] }
 0x280   :  { %6709 = vmatpush1.bf16.msra.mxu1 %v6708_v43  ;;  %6351 = vmatprep.subr.bf16.mxu0 %v6350_v44  ;;  %v1196_v43 = vld [vmem:[#allocation2 + $0x21e0] sm:$0xff]  ;;  %v1307_v35 = vld [vmem:[#allocation2 + $0x2558] sm:$0xff] }
 0x281   :  { %6711 = vmatprep.subr.bf16.mxu1 %v6710_v48  ;;  %v1208_v44 = vld [vmem:[#allocation2 + $0x2240] sm:$0xff]  ;;  %v1221_v48 = vld [vmem:[#allocation2 + $0x22a8] sm:$0xff] }
 0x282   :  { %v6368_v56 = vpack.c.bf16 %v1208_v44, %v1196_v43  ;;  %v1294_v43 = vld [vmem:[#allocation2 + $0x24f0] sm:$0xff]  ;;  %v6742_v44 = vpack.c.bf16 %v1307_v35, %v1295_v34 }
 0x283   :  { %6353 = vmatpush1.bf16.msra.mxu0 %v6352_v58  ;;  %v6370_v58 = vpack.c.bf16 %v1233_v50, %v1221_v48  ;;  %v1319_v48 = vld [vmem:[#allocation2 + $0x25b8] sm:$0xff]  ;;  %v6744_v53 = vpack.c.bf16 %v1306_v45, %v1294_v43  ;;  %v1402_v43 = vld [vmem:[#allocation2 + $0x2850] sm:$0xff]  ;;  %v1425_v45 = vld [vmem:[#allocation2 + $0x2908] sm:$0xff] }
 0x284   :  { %6713 = vmatpush1.bf16.msra.mxu1 %v6712_v59  ;;  %6355 = vmatprep.subr.bf16.mxu0 %v6354_v60  ;;  %v1220_v59 = vld [vmem:[#allocation2 + $0x22a0] sm:$0xff]  ;;  %v1331_v50 = vld [vmem:[#allocation2 + $0x2618] sm:$0xff] }
 0x285   :  { %6715 = vmatprep.subr.bf16.mxu1 %v6714_v2  ;;  %v1232_v60 = vld [vmem:[#allocation2 + $0x2300] sm:$0xff]  ;;  %v1245_v2 = vld [vmem:[#allocation2 + $0x2368] sm:$0xff] }
 0x286   :  { %v6372_v7 = vpack.c.bf16 %v1232_v60, %v1220_v59  ;;  %v1318_v59 = vld [vmem:[#allocation2 + $0x25b0] sm:$0xff]  ;;  %v6746_v60 = vpack.c.bf16 %v1331_v50, %v1319_v48 }
 0x287   :  { %6357 = vmatpush1.bf16.msra.mxu0 %v6356_v9  ;;  %v6374_v9 = vpack.c.bf16 %v1257_v3, %v1245_v2  ;;  %v1343_v2 = vld [vmem:[#allocation2 + $0x2678] sm:$0xff]  ;;  %v6748_v6 = vpack.c.bf16 %v1330_v61, %v1318_v59  ;;  %v1437_v61 = vld [vmem:[#allocation2 + $0x2968] sm:$0xff] }
 0x288   :  { %6717 = vmatpush1.bf16.msra.mxu1 %v6716_v10  ;;  %6359 = vmatprep.subr.bf16.mxu0 %v6358_v12  ;;  %v1244_v10 = vld [vmem:[#allocation2 + $0x2360] sm:$0xff]  ;;  %v1355_v3 = vld [vmem:[#allocation2 + $0x26d8] sm:$0xff] }
 0x289   :  { %6719 = vmatprep.subr.bf16.mxu1 %v6718_v16  ;;  %v1256_v12 = vld [vmem:[#allocation2 + $0x23c0] sm:$0xff]  ;;  %v1269_v16 = vld [vmem:[#allocation2 + $0x2428] sm:$0xff] }
 0x28a   :  { %v6376_v20 = vpack.c.bf16 %v1256_v12, %v1244_v10  ;;  %v1342_v10 = vld [vmem:[#allocation2 + $0x2670] sm:$0xff]  ;;  %v6750_v12 = vpack.c.bf16 %v1355_v3, %v1343_v2  ;;  %v1439_v3 = vld [vmem:[#allocation2 + $0x2978] sm:$0xff] }
 0x28b   :  { %6361 = vmatpush1.bf16.msra.mxu0 %v6360_v23  ;;  %v6378_v23 = vpack.c.bf16 %v1281_v17, %v1269_v16  ;;  %v1367_v16 = vld [vmem:[#allocation2 + $0x2738] sm:$0xff]  ;;  %v6752_v19 = vpack.c.bf16 %v1354_v13, %v1342_v10  ;;  %v1448_v13 = vld [vmem:[#allocation2 + $0x29c0] sm:$0xff] }
 0x28c   :  { %6721 = vmatpush1.bf16.msra.mxu1 %v6720_v24  ;;  %6363 = vmatprep.subr.bf16.mxu0 %v6362_v22  ;;  %v1268_v24 = vld [vmem:[#allocation2 + $0x2420] sm:$0xff]  ;;  %v1379_v17 = vld [vmem:[#allocation2 + $0x2798] sm:$0xff] }
 0x28d   :  { %6723 = vmatprep.subr.bf16.mxu1 %v6722_v31  ;;  %v1280_v22 = vld [vmem:[#allocation2 + $0x2480] sm:$0xff]  ;;  %v1293_v31 = vld [vmem:[#allocation2 + $0x24e8] sm:$0xff] }
 0x28e   :  { %v6380_v36 = vpack.c.bf16 %v1280_v22, %v1268_v24  ;;  %v1366_v24 = vld [vmem:[#allocation2 + $0x2730] sm:$0xff]  ;;  %v6754_v22 = vpack.c.bf16 %v1379_v17, %v1367_v16  ;;  %v1461_v17 = vld [vmem:[#allocation2 + $0x2a28] sm:$0xff] }
 0x28f   :  { %6365 = vmatpush1.bf16.msra.mxu0 %v6364_v40  ;;  %v6382_v40 = vpack.c.bf16 %v1305_v33, %v1293_v31  ;;  %v1391_v31 = vld [vmem:[#allocation2 + $0x27f8] sm:$0xff]  ;;  %v6756_v35 = vpack.c.bf16 %v1378_v27, %v1366_v24  ;;  %v1450_v16 = vld [vmem:[#allocation2 + $0x29d0] sm:$0xff]  ;;  %v1472_v27 = vld [vmem:[#allocation2 + $0x2a80] sm:$0xff] }
 0x290   :  { %6725 = vmatpush1.bf16.msra.mxu1 %v6724_v41  ;;  %6367 = vmatprep.subr.bf16.mxu0 %v6366_v42  ;;  %v1292_v41 = vld [vmem:[#allocation2 + $0x24e0] sm:$0xff]  ;;  %v1403_v33 = vld [vmem:[#allocation2 + $0x2858] sm:$0xff] }
 0x291   :  { %6727 = vmatprep.subr.bf16.mxu1 %v6726_v46  ;;  %v1304_v42 = vld [vmem:[#allocation2 + $0x2540] sm:$0xff]  ;;  %v1317_v46 = vld [vmem:[#allocation2 + $0x25a8] sm:$0xff] }
 0x292   :  { %v6384_v51 = vpack.c.bf16 %v1304_v42, %v1292_v41  ;;  %v1390_v41 = vld [vmem:[#allocation2 + $0x27f0] sm:$0xff]  ;;  %v6758_v42 = vpack.c.bf16 %v1403_v33, %v1391_v31  ;;  %v1485_v33 = vld [vmem:[#allocation2 + $0x2ae8] sm:$0xff] }
 0x293   :  { %6369 = vmatpush1.bf16.msra.mxu0 %v6368_v56  ;;  %v6386_v56 = vpack.c.bf16 %v1329_v47, %v1317_v46  ;;  %v1415_v46 = vld [vmem:[#allocation2 + $0x28b8] sm:$0xff]  ;;  %v6760_v50 = vpack.c.bf16 %v1402_v43, %v1390_v41  ;;  %v1474_v31 = vld [vmem:[#allocation2 + $0x2a90] sm:$0xff]  ;;  %v1496_v43 = vld [vmem:[#allocation2 + $0x2b40] sm:$0xff] }
 0x294   :  { %6729 = vmatpush1.bf16.msra.mxu1 %v6728_v57  ;;  %6371 = vmatprep.subr.bf16.mxu0 %v6370_v58  ;;  %v1316_v57 = vld [vmem:[#allocation2 + $0x25a0] sm:$0xff]  ;;  %v1427_v47 = vld [vmem:[#allocation2 + $0x2918] sm:$0xff] }
 0x295   :  { %6731 = vmatprep.subr.bf16.mxu1 %v6730_v0  ;;  %v1328_v58 = vld [vmem:[#allocation2 + $0x2600] sm:$0xff]  ;;  %v1341_v0 = vld [vmem:[#allocation2 + $0x2668] sm:$0xff]  ;;  %v6762_v59 = vpack.c.bf16 %v1427_v47, %v1415_v46  ;;  %v1498_v46 = vld [vmem:[#allocation2 + $0x2b50] sm:$0xff] }
 0x296   :  { %v6388_v5 = vpack.c.bf16 %v1328_v58, %v1316_v57  ;;  %v1414_v57 = vld [vmem:[#allocation2 + $0x28b0] sm:$0xff]  ;;  %v1509_v47 = vld [vmem:[#allocation2 + $0x2ba8] sm:$0xff] }
 0x297   :  { %6373 = vmatpush1.bf16.msra.mxu0 %v6372_v7  ;;  %v6390_v7 = vpack.c.bf16 %v1353_v1, %v1341_v0  ;;  %v1449_v0 = vld [vmem:[#allocation2 + $0x29c8] sm:$0xff] }
 0x298   :  { %6733 = vmatpush1.bf16.msra.mxu1 %v6732_v8  ;;  %6375 = vmatprep.subr.bf16.mxu0 %v6374_v9  ;;  %v1340_v8 = vld [vmem:[#allocation2 + $0x2660] sm:$0xff]  ;;  %v6406_v10 = vpack.c.bf16 %v1449_v0, %v1437_v61  ;;  %v1510_v61 = vld [vmem:[#allocation2 + $0x2bb0] sm:$0xff] }
 0x299   :  { %6735 = vmatprep.subr.bf16.mxu1 %v6734_v14  ;;  %v1352_v9 = vld [vmem:[#allocation2 + $0x26c0] sm:$0xff]  ;;  %v1365_v14 = vld [vmem:[#allocation2 + $0x2728] sm:$0xff] }
 0x29a   :  { %v6392_v18 = vpack.c.bf16 %v1352_v9, %v1340_v8 }
 0x29b   :  { %6377 = vmatpush1.bf16.msra.mxu0 %v6376_v20  ;;  %v6394_v20 = vpack.c.bf16 %v1377_v49, %v1365_v14  ;;  %v1438_v14 = vld [vmem:[#allocation2 + $0x2970] sm:$0xff] }
 0x29c   :  { %6737 = vmatpush1.bf16.msra.mxu1 %v6736_v21  ;;  %6379 = vmatprep.subr.bf16.mxu0 %v6378_v23  ;;  %v1364_v21 = vld [vmem:[#allocation2 + $0x2720] sm:$0xff] }
 0x29d   :  { %6739 = vmatprep.subr.bf16.mxu1 %v6738_v28  ;;  %v1376_v23 = vld [vmem:[#allocation2 + $0x2780] sm:$0xff]  ;;  %v1389_v28 = vld [vmem:[#allocation2 + $0x27e8] sm:$0xff] }
 0x29e   :  { %3399 = vmatmul.mubr.f32.vlgmr.msra.gmra.mrb[2].mxu0 %v8210_v55  ;;  %v6396_v34 = vpack.c.bf16 %v1376_v23, %v1364_v21  ;;  %v6768_v23 = vpack.c.bf16 %v1450_v16, %v1438_v14  ;;  %v1544_v16 = vld [vmem:[#allocation2 + $0x2cc0] sm:$0xff] }
 0x29f   :  { %6381 = vmatpush1.bf16.msra.mxu0 %v6380_v36  ;;  %3825 = vmatmul.mubr.f32.vlgmr.msra.gmra.mrb[2].mxu1 %v8210_v55  ;;  %v6398_v36 = vpack.c.bf16 %v1401_v30, %v1389_v28  ;;  %v1462_v28 = vld [vmem:[#allocation2 + $0x2a30] sm:$0xff] }
 0x2a0   :  { %6741 = vmatpush1.bf16.msra.mxu1 %v6740_v37  ;;  %6383 = vmatprep.subr.bf16.mxu0 %v6382_v40  ;;  %v1388_v37 = vld [vmem:[#allocation2 + $0x27e0] sm:$0xff] }
 0x2a1   :  { %6743 = vmatprep.subr.bf16.mxu1 %v6742_v44  ;;  %3469 = vmatprep.mubr.f32.mxu0 %v8227_v29  ;;  %v1400_v40 = vld [vmem:[#allocation2 + $0x2840] sm:$0xff]  ;;  %v1413_v44 = vld [vmem:[#allocation2 + $0x28a8] sm:$0xff] }
 0x2a2   :  { %3895 = vmatprep.mubr.f32.mxu1 %v8227_v29  ;;  %v6400_v48 = vpack.c.bf16 %v1400_v40, %v1388_v37  ;;  %v6772_v40 = vpack.c.bf16 %v1474_v31, %v1462_v28  ;;  %v1568_v31 = vld [vmem:[#allocation2 + $0x2d80] sm:$0xff] }
 0x2a3   :  { %6385 = vmatpush1.bf16.msra.mxu0 %v6384_v51  ;;  %v6402_v51 = vpack.c.bf16 %v1425_v45, %v1413_v44  ;;  %v1486_v44 = vld [vmem:[#allocation2 + $0x2af0] sm:$0xff] }
 0x2a4   :  { %6745 = vmatpush1.bf16.msra.mxu1 %v6744_v53  ;;  %6387 = vmatprep.subr.bf16.mxu0 %v6386_v56  ;;  %v1412_v53 = vld [vmem:[#allocation2 + $0x28a0] sm:$0xff] }
 0x2a5   :  { %6747 = vmatprep.subr.bf16.mxu1 %v6746_v60  ;;  %v1424_v56 = vld [vmem:[#allocation2 + $0x2900] sm:$0xff]  ;;  %v1426_v60 = vld [vmem:[#allocation2 + $0x2910] sm:$0xff] }
 0x2a6   :  { %v6764_v9 = vpack.c.bf16 %v1426_v60, %v1414_v57  ;;  %v1520_v60 = vld [vmem:[#allocation2 + $0x2c00] sm:$0xff] }
 0x2a7   :  { %6389 = vmatpush1.bf16.msra.mxu0 %v6388_v5  ;;  %v1451_v5 = vld [vmem:[#allocation2 + $0x29d8] sm:$0xff] }
 0x2a8   :  { %6749 = vmatpush1.bf16.msra.mxu1 %v6748_v6  ;;  %6391 = vmatprep.subr.bf16.mxu0 %v6390_v7  ;;  %v6404_v7 = vpack.c.bf16 %v1424_v56, %v1412_v53  ;;  %v6766_v49 = vpack.c.bf16 %v1451_v5, %v1439_v3  ;;  %v6776_v56 = vpack.c.bf16 %v1498_v46, %v1486_v44  ;;  %v1522_v3 = vld [vmem:[#allocation2 + $0x2c10] sm:$0xff]  ;;  %v1533_v5 = vld [vmem:[#allocation2 + $0x2c68] sm:$0xff]  ;;  %v1592_v46 = vld [vmem:[#allocation2 + $0x2e40] sm:$0xff] }
 0x2a9   :  { %6751 = vmatprep.subr.bf16.mxu1 %v6750_v12  ;;  %v1436_v12 = vld [vmem:[#allocation2 + $0x2960] sm:$0xff] }
 0x2aa   :  { %v6408_v21 = vpack.c.bf16 %v1448_v13, %v1436_v12  ;;  %v6780_v13 = vpack.c.bf16 %v1522_v3, %v1510_v61  ;;  %v1616_v3 = vld [vmem:[#allocation2 + $0x2f00] sm:$0xff] }
 0x2ab   :  { %6393 = vmatpush1.bf16.msra.mxu0 %v6392_v18  ;;  %v1473_v18 = vld [vmem:[#allocation2 + $0x2a88] sm:$0xff] }
 0x2ac   :  { %6753 = vmatpush1.bf16.msra.mxu1 %v6752_v19  ;;  %6395 = vmatprep.subr.bf16.mxu0 %v6394_v20  ;;  %v1463_v19 = vld [vmem:[#allocation2 + $0x2a38] sm:$0xff]  ;;  %v6410_v24 = vpack.c.bf16 %v1473_v18, %v1461_v17  ;;  %v1534_v17 = vld [vmem:[#allocation2 + $0x2c70] sm:$0xff] }
 0x2ad   :  { %6755 = vmatprep.subr.bf16.mxu1 %v6754_v22  ;;  %v1475_v20 = vld [vmem:[#allocation2 + $0x2a98] sm:$0xff]  ;;  %v1460_v22 = vld [vmem:[#allocation2 + $0x2a20] sm:$0xff] }
 0x2ae   :  { %v6770_v30 = vpack.c.bf16 %v1475_v20, %v1463_v19  ;;  %v6412_v37 = vpack.c.bf16 %v1472_v27, %v1460_v22  ;;  %v1546_v19 = vld [vmem:[#allocation2 + $0x2cd0] sm:$0xff]  ;;  %v1557_v20 = vld [vmem:[#allocation2 + $0x2d28] sm:$0xff] }
 0x2af   :  { %6397 = vmatpush1.bf16.msra.mxu0 %v6396_v34  ;;  %v1497_v34 = vld [vmem:[#allocation2 + $0x2b48] sm:$0xff]  ;;  %v6784_v27 = vpack.c.bf16 %v1546_v19, %v1534_v17  ;;  %v1640_v19 = vld [vmem:[#allocation2 + $0x2fc0] sm:$0xff] }
 0x2b0   :  { %6757 = vmatpush1.bf16.msra.mxu1 %v6756_v35  ;;  %6399 = vmatprep.subr.bf16.mxu0 %v6398_v36  ;;  %v1487_v35 = vld [vmem:[#allocation2 + $0x2af8] sm:$0xff]  ;;  %v6414_v41 = vpack.c.bf16 %v1497_v34, %v1485_v33  ;;  %v1558_v33 = vld [vmem:[#allocation2 + $0x2d30] sm:$0xff] }
 0x2b1   :  { %v8281_v58 = vpop.f32.mrb[0].mxu0  ;;  %6759 = vmatprep.subr.bf16.mxu1 %v6758_v42  ;;  %v1499_v36 = vld [vmem:[#allocation2 + $0x2b58] sm:$0xff]  ;;  %v1484_v42 = vld [vmem:[#allocation2 + $0x2ae0] sm:$0xff] }
 0x2b2   :  { %v8283_v1 = vpop.f32.mrb[0].mxu1  ;;  %v8285_v2 = vpop.f32.mrb[1].mxu0  ;;  %v6774_v45 = vpack.c.bf16 %v1499_v36, %v1487_v35  ;;  %v6416_v53 = vpack.c.bf16 %v1496_v43, %v1484_v42  ;;  %v1570_v35 = vld [vmem:[#allocation2 + $0x2d90] sm:$0xff]  ;;  %v1581_v36 = vld [vmem:[#allocation2 + $0x2de8] sm:$0xff] }
 0x2b3   :  { %v8287_v6 = vpop.f32.mrb[1].mxu1  ;;  %6401 = vmatpush1.bf16.msra.mxu0 %v6400_v48  ;;  %v1521_v48 = vld [vmem:[#allocation2 + $0x2c08] sm:$0xff]  ;;  %v6788_v43 = vpack.c.bf16 %v1570_v35, %v1558_v33  ;;  %v1664_v35 = vld [vmem:[#allocation2 + $0x3080] sm:$0xff] }
 0x2b4   :  { %v4896_v8 = vmax.f32 %v8281_v58, %v8287_v6  ;;  %6761 = vmatpush1.bf16.msra.mxu1 %v6760_v50  ;;  %6403 = vmatprep.subr.bf16.mxu0 %v6402_v51  ;;  %v1511_v50 = vld [vmem:[#allocation2 + $0x2bb8] sm:$0xff]  ;;  %v6418_v57 = vpack.c.bf16 %v1521_v48, %v1509_v47  ;;  %v1582_v47 = vld [vmem:[#allocation2 + $0x2df0] sm:$0xff] }
 0x2b5   :  { %6763 = vmatprep.subr.bf16.mxu1 %v6762_v59  ;;  %v1523_v51 = vld [vmem:[#allocation2 + $0x2c18] sm:$0xff]  ;;  %v1508_v59 = vld [vmem:[#allocation2 + $0x2ba0] sm:$0xff] }
 0x2b6   :  { %v6778_v0 = vpack.c.bf16 %v1523_v51, %v1511_v50  ;;  %v6420_v12 = vpack.c.bf16 %v1520_v60, %v1508_v59  ;;  %v1594_v50 = vld [vmem:[#allocation2 + $0x2e50] sm:$0xff]  ;;  %v1605_v51 = vld [vmem:[#allocation2 + $0x2ea8] sm:$0xff] }
 0x2b7   :  { %6405 = vmatpush1.bf16.msra.mxu0 %v6404_v7  ;;  %v1545_v7 = vld [vmem:[#allocation2 + $0x2cc8] sm:$0xff]  ;;  %v6792_v60 = vpack.c.bf16 %v1594_v50, %v1582_v47  ;;  %v1688_v50 = vld [vmem:[#allocation2 + $0x3140] sm:$0xff] }
 0x2b8   :  { %6765 = vmatpush1.bf16.msra.mxu1 %v6764_v9  ;;  %6407 = vmatprep.subr.bf16.mxu0 %v6406_v10  ;;  %v1535_v9 = vld [vmem:[#allocation2 + $0x2c78] sm:$0xff]  ;;  %v6422_v14 = vpack.c.bf16 %v1545_v7, %v1533_v5  ;;  %v1606_v5 = vld [vmem:[#allocation2 + $0x2eb0] sm:$0xff] }
 0x2b9   :  { %6767 = vmatprep.subr.bf16.mxu1 %v6766_v49  ;;  %v1547_v10 = vld [vmem:[#allocation2 + $0x2cd8] sm:$0xff]  ;;  %v1532_v49 = vld [vmem:[#allocation2 + $0x2c60] sm:$0xff] }
 0x2ba   :  { %v6782_v18 = vpack.c.bf16 %v1547_v10, %v1535_v9  ;;  %v6424_v22 = vpack.c.bf16 %v1544_v16, %v1532_v49  ;;  %v1618_v9 = vld [vmem:[#allocation2 + $0x2f10] sm:$0xff]  ;;  %v1629_v10 = vld [vmem:[#allocation2 + $0x2f68] sm:$0xff] }
 0x2bb   :  { %6409 = vmatpush1.bf16.msra.mxu0 %v6408_v21  ;;  %v1569_v21 = vld [vmem:[#allocation2 + $0x2d88] sm:$0xff]  ;;  %v6796_v16 = vpack.c.bf16 %v1618_v9, %v1606_v5  ;;  %v1712_v9 = vld [vmem:[#allocation2 + $0x3200] sm:$0xff] }
 0x2bc   :  { %6769 = vmatpush1.bf16.msra.mxu1 %v6768_v23  ;;  %6411 = vmatprep.subr.bf16.mxu0 %v6410_v24  ;;  %v1559_v23 = vld [vmem:[#allocation2 + $0x2d38] sm:$0xff]  ;;  %v6426_v28 = vpack.c.bf16 %v1569_v21, %v1557_v20  ;;  %v1630_v20 = vld [vmem:[#allocation2 + $0x2f70] sm:$0xff] }
 0x2bd   :  { %6771 = vmatprep.subr.bf16.mxu1 %v6770_v30  ;;  %v1571_v24 = vld [vmem:[#allocation2 + $0x2d98] sm:$0xff]  ;;  %v1556_v30 = vld [vmem:[#allocation2 + $0x2d20] sm:$0xff] }
 0x2be   :  { %v6786_v34 = vpack.c.bf16 %v1571_v24, %v1559_v23  ;;  %v6428_v42 = vpack.c.bf16 %v1568_v31, %v1556_v30  ;;  %v1642_v23 = vld [vmem:[#allocation2 + $0x2fd0] sm:$0xff]  ;;  %v1653_v24 = vld [vmem:[#allocation2 + $0x3028] sm:$0xff] }
 0x2bf   :  { %6413 = vmatpush1.bf16.msra.mxu0 %v6412_v37  ;;  %v1593_v37 = vld [vmem:[#allocation2 + $0x2e48] sm:$0xff]  ;;  %v6800_v31 = vpack.c.bf16 %v1642_v23, %v1630_v20  ;;  %v1736_v23 = vld [vmem:[#allocation2 + $0x32c0] sm:$0xff] }
 0x2c0   :  { %6773 = vmatpush1.bf16.msra.mxu1 %v6772_v40  ;;  %6415 = vmatprep.subr.bf16.mxu0 %v6414_v41  ;;  %v1583_v40 = vld [vmem:[#allocation2 + $0x2df8] sm:$0xff]  ;;  %v6430_v44 = vpack.c.bf16 %v1593_v37, %v1581_v36  ;;  %v1654_v36 = vld [vmem:[#allocation2 + $0x3030] sm:$0xff] }
 0x2c1   :  { %6775 = vmatprep.subr.bf16.mxu1 %v6774_v45  ;;  %v1595_v41 = vld [vmem:[#allocation2 + $0x2e58] sm:$0xff]  ;;  %v1580_v45 = vld [vmem:[#allocation2 + $0x2de0] sm:$0xff] }
 0x2c2   :  { %v6790_v48 = vpack.c.bf16 %v1595_v41, %v1583_v40  ;;  %v6432_v59 = vpack.c.bf16 %v1592_v46, %v1580_v45  ;;  %v1666_v40 = vld [vmem:[#allocation2 + $0x3090] sm:$0xff]  ;;  %v1677_v41 = vld [vmem:[#allocation2 + $0x30e8] sm:$0xff] }
 0x2c3   :  { %6417 = vmatpush1.bf16.msra.mxu0 %v6416_v53  ;;  %v1617_v53 = vld [vmem:[#allocation2 + $0x2f08] sm:$0xff]  ;;  %v6804_v46 = vpack.c.bf16 %v1666_v40, %v1654_v36  ;;  %v1760_v40 = vld [vmem:[#allocation2 + $0x3380] sm:$0xff] }
 0x2c4   :  { %6777 = vmatpush1.bf16.msra.mxu1 %v6776_v56  ;;  %6419 = vmatprep.subr.bf16.mxu0 %v6418_v57  ;;  %v1607_v56 = vld [vmem:[#allocation2 + $0x2eb8] sm:$0xff]  ;;  %v6434_v61 = vpack.c.bf16 %v1617_v53, %v1605_v51  ;;  %v1678_v51 = vld [vmem:[#allocation2 + $0x30f0] sm:$0xff] }
 0x2c5   :  { %6779 = vmatprep.subr.bf16.mxu1 %v6778_v0  ;;  %v1619_v57 = vld [vmem:[#allocation2 + $0x2f18] sm:$0xff]  ;;  %v1604_v0 = vld [vmem:[#allocation2 + $0x2ea0] sm:$0xff] }
 0x2c6   :  { %v6794_v7 = vpack.c.bf16 %v1619_v57, %v1607_v56  ;;  %v6436_v49 = vpack.c.bf16 %v1616_v3, %v1604_v0  ;;  %v1690_v56 = vld [vmem:[#allocation2 + $0x3150] sm:$0xff]  ;;  %v1701_v57 = vld [vmem:[#allocation2 + $0x31a8] sm:$0xff] }
 0x2c7   :  { %6421 = vmatpush1.bf16.msra.mxu0 %v6420_v12  ;;  %v1641_v12 = vld [vmem:[#allocation2 + $0x2fc8] sm:$0xff]  ;;  %v6808_v3 = vpack.c.bf16 %v1690_v56, %v1678_v51  ;;  %v1784_v56 = vld [vmem:[#allocation2 + $0x3440] sm:$0xff] }
 0x2c8   :  { %6781 = vmatpush1.bf16.msra.mxu1 %v6780_v13  ;;  %6423 = vmatprep.subr.bf16.mxu0 %v6422_v14  ;;  %v1631_v13 = vld [vmem:[#allocation2 + $0x2f78] sm:$0xff]  ;;  %v6438_v17 = vpack.c.bf16 %v1641_v12, %v1629_v10  ;;  %v1702_v10 = vld [vmem:[#allocation2 + $0x31b0] sm:$0xff] }
 0x2c9   :  { %6783 = vmatprep.subr.bf16.mxu1 %v6782_v18  ;;  %v1643_v14 = vld [vmem:[#allocation2 + $0x2fd8] sm:$0xff]  ;;  %v1628_v18 = vld [vmem:[#allocation2 + $0x2f60] sm:$0xff] }
 0x2ca   :  { %v6798_v21 = vpack.c.bf16 %v1643_v14, %v1631_v13  ;;  %v6440_v30 = vpack.c.bf16 %v1640_v19, %v1628_v18  ;;  %v1714_v13 = vld [vmem:[#allocation2 + $0x3210] sm:$0xff]  ;;  %v1725_v14 = vld [vmem:[#allocation2 + $0x3268] sm:$0xff] }
 0x2cb   :  { %6425 = vmatpush1.bf16.msra.mxu0 %v6424_v22  ;;  %v1665_v22 = vld [vmem:[#allocation2 + $0x3088] sm:$0xff]  ;;  %v6812_v19 = vpack.c.bf16 %v1714_v13, %v1702_v10  ;;  %v1808_v13 = vld [vmem:[#allocation2 + $0x3500] sm:$0xff] }
 0x2cc   :  { %6785 = vmatpush1.bf16.msra.mxu1 %v6784_v27  ;;  %6427 = vmatprep.subr.bf16.mxu0 %v6426_v28  ;;  %v1655_v27 = vld [vmem:[#allocation2 + $0x3038] sm:$0xff]  ;;  %v6442_v33 = vpack.c.bf16 %v1665_v22, %v1653_v24  ;;  %v1726_v24 = vld [vmem:[#allocation2 + $0x3270] sm:$0xff] }
 0x2cd   :  { %6787 = vmatprep.subr.bf16.mxu1 %v6786_v34  ;;  %v1667_v28 = vld [vmem:[#allocation2 + $0x3098] sm:$0xff]  ;;  %v1652_v34 = vld [vmem:[#allocation2 + $0x3020] sm:$0xff] }
 0x2ce   :  { %v6802_v37 = vpack.c.bf16 %v1667_v28, %v1655_v27  ;;  %v6444_v45 = vpack.c.bf16 %v1664_v35, %v1652_v34  ;;  %v1738_v27 = vld [vmem:[#allocation2 + $0x32d0] sm:$0xff]  ;;  %v1749_v28 = vld [vmem:[#allocation2 + $0x3328] sm:$0xff] }
 0x2cf   :  { %6429 = vmatpush1.bf16.msra.mxu0 %v6428_v42  ;;  %v1689_v42 = vld [vmem:[#allocation2 + $0x3148] sm:$0xff]  ;;  %v6816_v35 = vpack.c.bf16 %v1738_v27, %v1726_v24  ;;  %v1832_v27 = vld [vmem:[#allocation2 + $0x35c0] sm:$0xff] }
 0x2d0   :  { %6789 = vmatpush1.bf16.msra.mxu1 %v6788_v43  ;;  %6431 = vmatprep.subr.bf16.mxu0 %v6430_v44  ;;  %v1679_v43 = vld [vmem:[#allocation2 + $0x30f8] sm:$0xff]  ;;  %v6446_v47 = vpack.c.bf16 %v1689_v42, %v1677_v41  ;;  %v1750_v41 = vld [vmem:[#allocation2 + $0x3330] sm:$0xff] }
 0x2d1   :  { %6791 = vmatprep.subr.bf16.mxu1 %v6790_v48  ;;  %v1691_v44 = vld [vmem:[#allocation2 + $0x3158] sm:$0xff]  ;;  %v1676_v48 = vld [vmem:[#allocation2 + $0x30e0] sm:$0xff] }
 0x2d2   :  { %v6806_v53 = vpack.c.bf16 %v1691_v44, %v1679_v43  ;;  %v6448_v0 = vpack.c.bf16 %v1688_v50, %v1676_v48  ;;  %v1762_v43 = vld [vmem:[#allocation2 + $0x3390] sm:$0xff]  ;;  %v1773_v44 = vld [vmem:[#allocation2 + $0x33e8] sm:$0xff] }
 0x2d3   :  { %6433 = vmatpush1.bf16.msra.mxu0 %v6432_v59  ;;  %v1713_v59 = vld [vmem:[#allocation2 + $0x3208] sm:$0xff]  ;;  %v6820_v50 = vpack.c.bf16 %v1762_v43, %v1750_v41  ;;  %v1856_v43 = vld [vmem:[#allocation2 + $0x3680] sm:$0xff] }
 0x2d4   :  { %6793 = vmatpush1.bf16.msra.mxu1 %v6792_v60  ;;  %6435 = vmatprep.subr.bf16.mxu0 %v6434_v61  ;;  %v1703_v60 = vld [vmem:[#allocation2 + $0x31b8] sm:$0xff]  ;;  %v6450_v5 = vpack.c.bf16 %v1713_v59, %v1701_v57  ;;  %v1774_v57 = vld [vmem:[#allocation2 + $0x33f0] sm:$0xff] }
 0x2d5   :  { %6795 = vmatprep.subr.bf16.mxu1 %v6794_v7  ;;  %v1715_v61 = vld [vmem:[#allocation2 + $0x3218] sm:$0xff]  ;;  %v1700_v7 = vld [vmem:[#allocation2 + $0x31a0] sm:$0xff] }
 0x2d6   :  { %v6810_v12 = vpack.c.bf16 %v1715_v61, %v1703_v60  ;;  %v6452_v18 = vpack.c.bf16 %v1712_v9, %v1700_v7  ;;  %v1786_v60 = vld [vmem:[#allocation2 + $0x3450] sm:$0xff]  ;;  %v1797_v61 = vld [vmem:[#allocation2 + $0x34a8] sm:$0xff] }
 0x2d7   :  { %6437 = vmatpush1.bf16.msra.mxu0 %v6436_v49  ;;  %v1737_v49 = vld [vmem:[#allocation2 + $0x32c8] sm:$0xff]  ;;  %v6824_v9 = vpack.c.bf16 %v1786_v60, %v1774_v57  ;;  %v1880_v60 = vld [vmem:[#allocation2 + $0x3740] sm:$0xff] }
 0x2d8   :  { %6797 = vmatpush1.bf16.msra.mxu1 %v6796_v16  ;;  %6439 = vmatprep.subr.bf16.mxu0 %v6438_v17  ;;  %v1727_v16 = vld [vmem:[#allocation2 + $0x3278] sm:$0xff]  ;;  %v6454_v20 = vpack.c.bf16 %v1737_v49, %v1725_v14  ;;  %v1798_v14 = vld [vmem:[#allocation2 + $0x34b0] sm:$0xff] }
 0x2d9   :  { %6799 = vmatprep.subr.bf16.mxu1 %v6798_v21  ;;  %v1739_v17 = vld [vmem:[#allocation2 + $0x32d8] sm:$0xff]  ;;  %v1724_v21 = vld [vmem:[#allocation2 + $0x3260] sm:$0xff] }
 0x2da   :  { %v6814_v22 = vpack.c.bf16 %v1739_v17, %v1727_v16  ;;  %v6456_v34 = vpack.c.bf16 %v1736_v23, %v1724_v21  ;;  %v1810_v16 = vld [vmem:[#allocation2 + $0x3510] sm:$0xff]  ;;  %v1821_v17 = vld [vmem:[#allocation2 + $0x3568] sm:$0xff] }
 0x2db   :  { %6441 = vmatpush1.bf16.msra.mxu0 %v6440_v30  ;;  %v1761_v30 = vld [vmem:[#allocation2 + $0x3388] sm:$0xff]  ;;  %v6828_v23 = vpack.c.bf16 %v1810_v16, %v1798_v14  ;;  %v1904_v16 = vld [vmem:[#allocation2 + $0x3800] sm:$0xff] }
 0x2dc   :  { %6801 = vmatpush1.bf16.msra.mxu1 %v6800_v31  ;;  %6443 = vmatprep.subr.bf16.mxu0 %v6442_v33  ;;  %v1751_v31 = vld [vmem:[#allocation2 + $0x3338] sm:$0xff]  ;;  %v6458_v36 = vpack.c.bf16 %v1761_v30, %v1749_v28  ;;  %v1822_v28 = vld [vmem:[#allocation2 + $0x3570] sm:$0xff] }
 0x2dd   :  { %6803 = vmatprep.subr.bf16.mxu1 %v6802_v37  ;;  %v1763_v33 = vld [vmem:[#allocation2 + $0x3398] sm:$0xff]  ;;  %v1748_v37 = vld [vmem:[#allocation2 + $0x3320] sm:$0xff] }
 0x2de   :  { %3470 = vmatmul.mubr.f32.vlgmr.msra.gmra.mrb[2].mxu0 %v8223_v15  ;;  %v6818_v42 = vpack.c.bf16 %v1763_v33, %v1751_v31  ;;  %v6460_v48 = vpack.c.bf16 %v1760_v40, %v1748_v37  ;;  %v1834_v31 = vld [vmem:[#allocation2 + $0x35d0] sm:$0xff]  ;;  %v1845_v33 = vld [vmem:[#allocation2 + $0x3628] sm:$0xff] }
 0x2df   :  { %6445 = vmatpush1.bf16.msra.mxu0 %v6444_v45  ;;  %3896 = vmatmul.mubr.f32.vlgmr.msra.gmra.mrb[2].mxu1 %v8223_v15  ;;  %v1785_v45 = vld [vmem:[#allocation2 + $0x3448] sm:$0xff]  ;;  %v6832_v40 = vpack.c.bf16 %v1834_v31, %v1822_v28  ;;  %v1928_v31 = vld [vmem:[#allocation2 + $0x38c0] sm:$0xff] }
 0x2e0   :  { %6805 = vmatpush1.bf16.msra.mxu1 %v6804_v46  ;;  %6447 = vmatprep.subr.bf16.mxu0 %v6446_v47  ;;  %v1775_v46 = vld [vmem:[#allocation2 + $0x33f8] sm:$0xff]  ;;  %v6462_v51 = vpack.c.bf16 %v1785_v45, %v1773_v44  ;;  %v1846_v44 = vld [vmem:[#allocation2 + $0x3630] sm:$0xff] }
 0x2e1   :  { %6807 = vmatprep.subr.bf16.mxu1 %v6806_v53  ;;  %3540 = vmatprep.mubr.f32.mxu0 %v8244_v4  ;;  %v1787_v47 = vld [vmem:[#allocation2 + $0x3458] sm:$0xff]  ;;  %v1772_v53 = vld [vmem:[#allocation2 + $0x33e0] sm:$0xff] }
 0x2e2   :  { %3966 = vmatprep.mubr.f32.mxu1 %v8244_v4  ;;  %v6822_v59 = vpack.c.bf16 %v1787_v47, %v1775_v46  ;;  %v6464_v7 = vpack.c.bf16 %v1784_v56, %v1772_v53  ;;  %v1858_v46 = vld [vmem:[#allocation2 + $0x3690] sm:$0xff]  ;;  %v1869_v47 = vld [vmem:[#allocation2 + $0x36e8] sm:$0xff] }
 0x2e3   :  { %6449 = vmatpush1.bf16.msra.mxu0 %v6448_v0  ;;  %v1809_v0 = vld [vmem:[#allocation2 + $0x3508] sm:$0xff]  ;;  %v6836_v56 = vpack.c.bf16 %v1858_v46, %v1846_v44  ;;  %v1952_v46 = vld [vmem:[#allocation2 + $0x3980] sm:$0xff] }
 0x2e4   :  { %6809 = vmatpush1.bf16.msra.mxu1 %v6808_v3  ;;  %6451 = vmatprep.subr.bf16.mxu0 %v6450_v5  ;;  %v1799_v3 = vld [vmem:[#allocation2 + $0x34b8] sm:$0xff]  ;;  %v6466_v10 = vpack.c.bf16 %v1809_v0, %v1797_v61  ;;  %v1870_v61 = vld [vmem:[#allocation2 + $0x36f0] sm:$0xff] }
 0x2e5   :  { %6811 = vmatprep.subr.bf16.mxu1 %v6810_v12  ;;  %v1811_v5 = vld [vmem:[#allocation2 + $0x3518] sm:$0xff]  ;;  %v1796_v12 = vld [vmem:[#allocation2 + $0x34a0] sm:$0xff] }
 0x2e6   :  { %v6826_v49 = vpack.c.bf16 %v1811_v5, %v1799_v3  ;;  %v6468_v21 = vpack.c.bf16 %v1808_v13, %v1796_v12  ;;  %v1882_v3 = vld [vmem:[#allocation2 + $0x3750] sm:$0xff]  ;;  %v1893_v5 = vld [vmem:[#allocation2 + $0x37a8] sm:$0xff] }
 0x2e7   :  { %6453 = vmatpush1.bf16.msra.mxu0 %v6452_v18  ;;  %v1833_v18 = vld [vmem:[#allocation2 + $0x35c8] sm:$0xff]  ;;  %v6840_v13 = vpack.c.bf16 %v1882_v3, %v1870_v61  ;;  %v1976_v3 = vld [vmem:[#allocation2 + $0x3a40] sm:$0xff] }
 0x2e8   :  { %6813 = vmatpush1.bf16.msra.mxu1 %v6812_v19  ;;  %6455 = vmatprep.subr.bf16.mxu0 %v6454_v20  ;;  %v1823_v19 = vld [vmem:[#allocation2 + $0x3578] sm:$0xff]  ;;  %v6470_v24 = vpack.c.bf16 %v1833_v18, %v1821_v17  ;;  %v1894_v17 = vld [vmem:[#allocation2 + $0x37b0] sm:$0xff] }
 0x2e9   :  { %6815 = vmatprep.subr.bf16.mxu1 %v6814_v22  ;;  %v1835_v20 = vld [vmem:[#allocation2 + $0x35d8] sm:$0xff]  ;;  %v1820_v22 = vld [vmem:[#allocation2 + $0x3560] sm:$0xff] }
 0x2ea   :  { %v6830_v30 = vpack.c.bf16 %v1835_v20, %v1823_v19  ;;  %v6472_v37 = vpack.c.bf16 %v1832_v27, %v1820_v22  ;;  %v1906_v19 = vld [vmem:[#allocation2 + $0x3810] sm:$0xff]  ;;  %v1917_v20 = vld [vmem:[#allocation2 + $0x3868] sm:$0xff] }
 0x2eb   :  { %6457 = vmatpush1.bf16.msra.mxu0 %v6456_v34  ;;  %v1857_v34 = vld [vmem:[#allocation2 + $0x3688] sm:$0xff]  ;;  %v6844_v27 = vpack.c.bf16 %v1906_v19, %v1894_v17  ;;  %v2000_v19 = vld [vmem:[#allocation2 + $0x3b00] sm:$0xff] }
 0x2ec   :  { %6817 = vmatpush1.bf16.msra.mxu1 %v6816_v35  ;;  %6459 = vmatprep.subr.bf16.mxu0 %v6458_v36  ;;  %v1847_v35 = vld [vmem:[#allocation2 + $0x3638] sm:$0xff]  ;;  %v6474_v41 = vpack.c.bf16 %v1857_v34, %v1845_v33  ;;  %v1918_v33 = vld [vmem:[#allocation2 + $0x3870] sm:$0xff] }
 0x2ed   :  { %6819 = vmatprep.subr.bf16.mxu1 %v6818_v42  ;;  %v1859_v36 = vld [vmem:[#allocation2 + $0x3698] sm:$0xff]  ;;  %v1844_v42 = vld [vmem:[#allocation2 + $0x3620] sm:$0xff] }
 0x2ee   :  { %v6834_v45 = vpack.c.bf16 %v1859_v36, %v1847_v35  ;;  %v6476_v53 = vpack.c.bf16 %v1856_v43, %v1844_v42  ;;  %v1930_v35 = vld [vmem:[#allocation2 + $0x38d0] sm:$0xff]  ;;  %v1941_v36 = vld [vmem:[#allocation2 + $0x3928] sm:$0xff] }
 0x2ef   :  { %6461 = vmatpush1.bf16.msra.mxu0 %v6460_v48  ;;  %v1881_v48 = vld [vmem:[#allocation2 + $0x3748] sm:$0xff]  ;;  %v6848_v43 = vpack.c.bf16 %v1930_v35, %v1918_v33  ;;  %v2024_v35 = vld [vmem:[#allocation2 + $0x3bc0] sm:$0xff] }
 0x2f0   :  { %6821 = vmatpush1.bf16.msra.mxu1 %v6820_v50  ;;  %6463 = vmatprep.subr.bf16.mxu0 %v6462_v51  ;;  %v1871_v50 = vld [vmem:[#allocation2 + $0x36f8] sm:$0xff]  ;;  %v6478_v57 = vpack.c.bf16 %v1881_v48, %v1869_v47  ;;  %v1942_v47 = vld [vmem:[#allocation2 + $0x3930] sm:$0xff] }
 0x2f1   :  { %6823 = vmatprep.subr.bf16.mxu1 %v6822_v59  ;;  %v1883_v51 = vld [vmem:[#allocation2 + $0x3758] sm:$0xff]  ;;  %v1868_v59 = vld [vmem:[#allocation2 + $0x36e0] sm:$0xff] }
 0x2f2   :  { %v6838_v0 = vpack.c.bf16 %v1883_v51, %v1871_v50  ;;  %v6480_v12 = vpack.c.bf16 %v1880_v60, %v1868_v59  ;;  %v1954_v50 = vld [vmem:[#allocation2 + $0x3990] sm:$0xff]  ;;  %v1965_v51 = vld [vmem:[#allocation2 + $0x39e8] sm:$0xff] }
 0x2f3   :  { %6465 = vmatpush1.bf16.msra.mxu0 %v6464_v7  ;;  %v1905_v7 = vld [vmem:[#allocation2 + $0x3808] sm:$0xff]  ;;  %v6852_v60 = vpack.c.bf16 %v1954_v50, %v1942_v47  ;;  %v2048_v50 = vld [vmem:[#allocation2 + $0x3c80] sm:$0xff] }
 0x2f4   :  { %6825 = vmatpush1.bf16.msra.mxu1 %v6824_v9  ;;  %6467 = vmatprep.subr.bf16.mxu0 %v6466_v10  ;;  %v1895_v9 = vld [vmem:[#allocation2 + $0x37b8] sm:$0xff]  ;;  %v6482_v14 = vpack.c.bf16 %v1905_v7, %v1893_v5  ;;  %v1966_v5 = vld [vmem:[#allocation2 + $0x39f0] sm:$0xff] }
 0x2f5   :  { %6827 = vmatprep.subr.bf16.mxu1 %v6826_v49  ;;  %v1907_v10 = vld [vmem:[#allocation2 + $0x3818] sm:$0xff]  ;;  %v1892_v49 = vld [vmem:[#allocation2 + $0x37a0] sm:$0xff] }
 0x2f6   :  { %v6842_v18 = vpack.c.bf16 %v1907_v10, %v1895_v9  ;;  %v6484_v22 = vpack.c.bf16 %v1904_v16, %v1892_v49  ;;  %v1978_v9 = vld [vmem:[#allocation2 + $0x3a50] sm:$0xff]  ;;  %v1989_v10 = vld [vmem:[#allocation2 + $0x3aa8] sm:$0xff] }
 0x2f7   :  { %6469 = vmatpush1.bf16.msra.mxu0 %v6468_v21  ;;  %v1929_v21 = vld [vmem:[#allocation2 + $0x38c8] sm:$0xff]  ;;  %v6856_v16 = vpack.c.bf16 %v1978_v9, %v1966_v5  ;;  %v2072_v9 = vld [vmem:[#allocation2 + $0x3d40] sm:$0xff] }
 0x2f8   :  { %6829 = vmatpush1.bf16.msra.mxu1 %v6828_v23  ;;  %6471 = vmatprep.subr.bf16.mxu0 %v6470_v24  ;;  %v1919_v23 = vld [vmem:[#allocation2 + $0x3878] sm:$0xff]  ;;  %v6486_v28 = vpack.c.bf16 %v1929_v21, %v1917_v20  ;;  %v1990_v20 = vld [vmem:[#allocation2 + $0x3ab0] sm:$0xff] }
 0x2f9   :  { %6831 = vmatprep.subr.bf16.mxu1 %v6830_v30  ;;  %v1931_v24 = vld [vmem:[#allocation2 + $0x38d8] sm:$0xff]  ;;  %v1916_v30 = vld [vmem:[#allocation2 + $0x3860] sm:$0xff] }
 0x2fa   :  { %v6846_v34 = vpack.c.bf16 %v1931_v24, %v1919_v23  ;;  %v6488_v42 = vpack.c.bf16 %v1928_v31, %v1916_v30  ;;  %v2002_v23 = vld [vmem:[#allocation2 + $0x3b10] sm:$0xff]  ;;  %v2013_v24 = vld [vmem:[#allocation2 + $0x3b68] sm:$0xff] }
 0x2fb   :  { %6473 = vmatpush1.bf16.msra.mxu0 %v6472_v37  ;;  %v1953_v37 = vld [vmem:[#allocation2 + $0x3988] sm:$0xff]  ;;  %v6860_v31 = vpack.c.bf16 %v2002_v23, %v1990_v20  ;;  %v2096_v23 = vld [vmem:[#allocation2 + $0x3e00] sm:$0xff] }
 0x2fc   :  { %6833 = vmatpush1.bf16.msra.mxu1 %v6832_v40  ;;  %6475 = vmatprep.subr.bf16.mxu0 %v6474_v41  ;;  %v1943_v40 = vld [vmem:[#allocation2 + $0x3938] sm:$0xff]  ;;  %v6490_v44 = vpack.c.bf16 %v1953_v37, %v1941_v36  ;;  %v2014_v36 = vld [vmem:[#allocation2 + $0x3b70] sm:$0xff] }
 0x2fd   :  { %6835 = vmatprep.subr.bf16.mxu1 %v6834_v45  ;;  %v1955_v41 = vld [vmem:[#allocation2 + $0x3998] sm:$0xff]  ;;  %v1940_v45 = vld [vmem:[#allocation2 + $0x3920] sm:$0xff] }
 0x2fe   :  { %v6850_v48 = vpack.c.bf16 %v1955_v41, %v1943_v40  ;;  %v6492_v59 = vpack.c.bf16 %v1952_v46, %v1940_v45  ;;  %v2026_v40 = vld [vmem:[#allocation2 + $0x3bd0] sm:$0xff]  ;;  %v2037_v41 = vld [vmem:[#allocation2 + $0x3c28] sm:$0xff] }
 0x2ff   :  { %6477 = vmatpush1.bf16.msra.mxu0 %v6476_v53  ;;  %v1977_v53 = vld [vmem:[#allocation2 + $0x3a48] sm:$0xff]  ;;  %v6864_v46 = vpack.c.bf16 %v2026_v40, %v2014_v36  ;;  %v2120_v40 = vld [vmem:[#allocation2 + $0x3ec0] sm:$0xff] }
 0x300   :  { %6837 = vmatpush1.bf16.msra.mxu1 %v6836_v56  ;;  %6479 = vmatprep.subr.bf16.mxu0 %v6478_v57  ;;  %v1967_v56 = vld [vmem:[#allocation2 + $0x39f8] sm:$0xff]  ;;  %v6494_v61 = vpack.c.bf16 %v1977_v53, %v1965_v51  ;;  %v2038_v51 = vld [vmem:[#allocation2 + $0x3c30] sm:$0xff] }
 0x301   :  { %6839 = vmatprep.subr.bf16.mxu1 %v6838_v0  ;;  %v1979_v57 = vld [vmem:[#allocation2 + $0x3a58] sm:$0xff]  ;;  %v1964_v0 = vld [vmem:[#allocation2 + $0x39e0] sm:$0xff] }
 0x302   :  { %v6854_v7 = vpack.c.bf16 %v1979_v57, %v1967_v56  ;;  %v6496_v49 = vpack.c.bf16 %v1976_v3, %v1964_v0  ;;  %v2050_v56 = vld [vmem:[#allocation2 + $0x3c90] sm:$0xff]  ;;  %v2061_v57 = vld [vmem:[#allocation2 + $0x3ce8] sm:$0xff] }
 0x303   :  { %6481 = vmatpush1.bf16.msra.mxu0 %v6480_v12  ;;  %v2001_v12 = vld [vmem:[#allocation2 + $0x3b08] sm:$0xff]  ;;  %v6868_v3 = vpack.c.bf16 %v2050_v56, %v2038_v51  ;;  %v2144_v56 = vld [vmem:[#allocation2 + $0x3f80] sm:$0xff] }
 0x304   :  { %6841 = vmatpush1.bf16.msra.mxu1 %v6840_v13  ;;  %6483 = vmatprep.subr.bf16.mxu0 %v6482_v14  ;;  %v1991_v13 = vld [vmem:[#allocation2 + $0x3ab8] sm:$0xff]  ;;  %v6498_v17 = vpack.c.bf16 %v2001_v12, %v1989_v10  ;;  %v2062_v10 = vld [vmem:[#allocation2 + $0x3cf0] sm:$0xff] }
 0x305   :  { %6843 = vmatprep.subr.bf16.mxu1 %v6842_v18  ;;  %v2003_v14 = vld [vmem:[#allocation2 + $0x3b18] sm:$0xff]  ;;  %v1988_v18 = vld [vmem:[#allocation2 + $0x3aa0] sm:$0xff] }
 0x306   :  { %v6858_v21 = vpack.c.bf16 %v2003_v14, %v1991_v13  ;;  %v6500_v30 = vpack.c.bf16 %v2000_v19, %v1988_v18  ;;  %v2074_v13 = vld [vmem:[#allocation2 + $0x3d50] sm:$0xff]  ;;  %v2085_v14 = vld [vmem:[#allocation2 + $0x3da8] sm:$0xff] }
 0x307   :  { %6485 = vmatpush1.bf16.msra.mxu0 %v6484_v22  ;;  %v2025_v22 = vld [vmem:[#allocation2 + $0x3bc8] sm:$0xff]  ;;  %v6872_v19 = vpack.c.bf16 %v2074_v13, %v2062_v10  ;;  %v2168_v13 = vld [vmem:[#allocation2 + $0x4040] sm:$0xff] }
 0x308   :  { %6845 = vmatpush1.bf16.msra.mxu1 %v6844_v27  ;;  %6487 = vmatprep.subr.bf16.mxu0 %v6486_v28  ;;  %v2015_v27 = vld [vmem:[#allocation2 + $0x3b78] sm:$0xff]  ;;  %v6502_v33 = vpack.c.bf16 %v2025_v22, %v2013_v24  ;;  %v2086_v24 = vld [vmem:[#allocation2 + $0x3db0] sm:$0xff] }
 0x309   :  { %6847 = vmatprep.subr.bf16.mxu1 %v6846_v34  ;;  %v2027_v28 = vld [vmem:[#allocation2 + $0x3bd8] sm:$0xff]  ;;  %v2012_v34 = vld [vmem:[#allocation2 + $0x3b60] sm:$0xff] }
 0x30a   :  { %v6862_v37 = vpack.c.bf16 %v2027_v28, %v2015_v27  ;;  %v6504_v45 = vpack.c.bf16 %v2024_v35, %v2012_v34  ;;  %v2098_v27 = vld [vmem:[#allocation2 + $0x3e10] sm:$0xff]  ;;  %v2109_v28 = vld [vmem:[#allocation2 + $0x3e68] sm:$0xff] }
 0x30b   :  { %6489 = vmatpush1.bf16.msra.mxu0 %v6488_v42  ;;  %v2049_v42 = vld [vmem:[#allocation2 + $0x3c88] sm:$0xff]  ;;  %v6876_v35 = vpack.c.bf16 %v2098_v27, %v2086_v24  ;;  %v2192_v27 = vld [vmem:[#allocation2 + $0x4100] sm:$0xff] }
 0x30c   :  { %6849 = vmatpush1.bf16.msra.mxu1 %v6848_v43  ;;  %6491 = vmatprep.subr.bf16.mxu0 %v6490_v44  ;;  %v2039_v43 = vld [vmem:[#allocation2 + $0x3c38] sm:$0xff]  ;;  %v6506_v47 = vpack.c.bf16 %v2049_v42, %v2037_v41  ;;  %v2110_v41 = vld [vmem:[#allocation2 + $0x3e70] sm:$0xff] }
 0x30d   :  { %6851 = vmatprep.subr.bf16.mxu1 %v6850_v48  ;;  %v2051_v44 = vld [vmem:[#allocation2 + $0x3c98] sm:$0xff]  ;;  %v2036_v48 = vld [vmem:[#allocation2 + $0x3c20] sm:$0xff] }
 0x30e   :  { %v6866_v53 = vpack.c.bf16 %v2051_v44, %v2039_v43  ;;  %v6508_v0 = vpack.c.bf16 %v2048_v50, %v2036_v48  ;;  %v2122_v43 = vld [vmem:[#allocation2 + $0x3ed0] sm:$0xff]  ;;  %v2133_v44 = vld [vmem:[#allocation2 + $0x3f28] sm:$0xff] }
 0x30f   :  { %6493 = vmatpush1.bf16.msra.mxu0 %v6492_v59  ;;  %v2073_v59 = vld [vmem:[#allocation2 + $0x3d48] sm:$0xff]  ;;  %v6880_v50 = vpack.c.bf16 %v2122_v43, %v2110_v41  ;;  %v2216_v43 = vld [vmem:[#allocation2 + $0x41c0] sm:$0xff] }
 0x310   :  { %6853 = vmatpush1.bf16.msra.mxu1 %v6852_v60  ;;  %6495 = vmatprep.subr.bf16.mxu0 %v6494_v61  ;;  %v2063_v60 = vld [vmem:[#allocation2 + $0x3cf8] sm:$0xff]  ;;  %v6510_v5 = vpack.c.bf16 %v2073_v59, %v2061_v57  ;;  %v2134_v57 = vld [vmem:[#allocation2 + $0x3f30] sm:$0xff] }
 0x311   :  { %6855 = vmatprep.subr.bf16.mxu1 %v6854_v7  ;;  %v2075_v61 = vld [vmem:[#allocation2 + $0x3d58] sm:$0xff]  ;;  %v2060_v7 = vld [vmem:[#allocation2 + $0x3ce0] sm:$0xff] }
 0x312   :  { %v6870_v12 = vpack.c.bf16 %v2075_v61, %v2063_v60  ;;  %v6512_v18 = vpack.c.bf16 %v2072_v9, %v2060_v7  ;;  %v2146_v60 = vld [vmem:[#allocation2 + $0x3f90] sm:$0xff]  ;;  %v2157_v61 = vld [vmem:[#allocation2 + $0x3fe8] sm:$0xff] }
 0x313   :  { %6497 = vmatpush1.bf16.msra.mxu0 %v6496_v49  ;;  %v2097_v49 = vld [vmem:[#allocation2 + $0x3e08] sm:$0xff]  ;;  %v6884_v9 = vpack.c.bf16 %v2146_v60, %v2134_v57  ;;  %v2240_v60 = vld [vmem:[#allocation2 + $0x4280] sm:$0xff] }
 0x314   :  { %6857 = vmatpush1.bf16.msra.mxu1 %v6856_v16  ;;  %6499 = vmatprep.subr.bf16.mxu0 %v6498_v17  ;;  %v2087_v16 = vld [vmem:[#allocation2 + $0x3db8] sm:$0xff]  ;;  %v6514_v20 = vpack.c.bf16 %v2097_v49, %v2085_v14  ;;  %v2158_v14 = vld [vmem:[#allocation2 + $0x3ff0] sm:$0xff] }
 0x315   :  { %6859 = vmatprep.subr.bf16.mxu1 %v6858_v21  ;;  %v2099_v17 = vld [vmem:[#allocation2 + $0x3e18] sm:$0xff]  ;;  %v2084_v21 = vld [vmem:[#allocation2 + $0x3da0] sm:$0xff] }
 0x316   :  { %v6874_v22 = vpack.c.bf16 %v2099_v17, %v2087_v16  ;;  %v6516_v34 = vpack.c.bf16 %v2096_v23, %v2084_v21  ;;  %v2170_v16 = vld [vmem:[#allocation2 + $0x4050] sm:$0xff]  ;;  %v2181_v17 = vld [vmem:[#allocation2 + $0x40a8] sm:$0xff] }
 0x317   :  { %6501 = vmatpush1.bf16.msra.mxu0 %v6500_v30  ;;  %v2121_v30 = vld [vmem:[#allocation2 + $0x3ec8] sm:$0xff]  ;;  %v6888_v23 = vpack.c.bf16 %v2170_v16, %v2158_v14  ;;  %v2264_v16 = vld [vmem:[#allocation2 + $0x4340] sm:$0xff] }
 0x318   :  { %6861 = vmatpush1.bf16.msra.mxu1 %v6860_v31  ;;  %6503 = vmatprep.subr.bf16.mxu0 %v6502_v33  ;;  %v2111_v31 = vld [vmem:[#allocation2 + $0x3e78] sm:$0xff]  ;;  %v6518_v36 = vpack.c.bf16 %v2121_v30, %v2109_v28  ;;  %v2182_v28 = vld [vmem:[#allocation2 + $0x40b0] sm:$0xff] }
 0x319   :  { %6863 = vmatprep.subr.bf16.mxu1 %v6862_v37  ;;  %v2123_v33 = vld [vmem:[#allocation2 + $0x3ed8] sm:$0xff]  ;;  %v2108_v37 = vld [vmem:[#allocation2 + $0x3e60] sm:$0xff] }
 0x31a   :  { %v6878_v42 = vpack.c.bf16 %v2123_v33, %v2111_v31  ;;  %v6520_v48 = vpack.c.bf16 %v2120_v40, %v2108_v37  ;;  %v2194_v31 = vld [vmem:[#allocation2 + $0x4110] sm:$0xff]  ;;  %v2205_v33 = vld [vmem:[#allocation2 + $0x4168] sm:$0xff] }
 0x31b   :  { %6505 = vmatpush1.bf16.msra.mxu0 %v6504_v45  ;;  %v2145_v45 = vld [vmem:[#allocation2 + $0x3f88] sm:$0xff]  ;;  %v6892_v40 = vpack.c.bf16 %v2194_v31, %v2182_v28  ;;  %v132_v31 = vld [vmem:[#allocation2 + $0xa0] sm:$0xff] }
 0x31c   :  { %6865 = vmatpush1.bf16.msra.mxu1 %v6864_v46  ;;  %6507 = vmatprep.subr.bf16.mxu0 %v6506_v47  ;;  %v2135_v46 = vld [vmem:[#allocation2 + $0x3f38] sm:$0xff]  ;;  %v6522_v51 = vpack.c.bf16 %v2145_v45, %v2133_v44  ;;  %v2206_v44 = vld [vmem:[#allocation2 + $0x4170] sm:$0xff] }
 0x31d   :  { %6867 = vmatprep.subr.bf16.mxu1 %v6866_v53  ;;  %v2147_v47 = vld [vmem:[#allocation2 + $0x3f98] sm:$0xff]  ;;  %v2132_v53 = vld [vmem:[#allocation2 + $0x3f20] sm:$0xff] }
 0x31e   :  { %3541 = vmatmul.mubr.f32.vlgmr.msra.gmra.mrb[2].mxu0 %v8240_v52  ;;  %v6882_v59 = vpack.c.bf16 %v2147_v47, %v2135_v46  ;;  %v6524_v7 = vpack.c.bf16 %v2144_v56, %v2132_v53  ;;  %v2218_v46 = vld [vmem:[#allocation2 + $0x41d0] sm:$0xff]  ;;  %v2229_v47 = vld [vmem:[#allocation2 + $0x4228] sm:$0xff] }
 0x31f   :  { %6509 = vmatpush1.bf16.msra.mxu0 %v6508_v0  ;;  %3967 = vmatmul.mubr.f32.vlgmr.msra.gmra.mrb[2].mxu1 %v8240_v52  ;;  %v2169_v0 = vld [vmem:[#allocation2 + $0x4048] sm:$0xff]  ;;  %v6896_v56 = vpack.c.bf16 %v2218_v46, %v2206_v44  ;;  %v156_v46 = vld [vmem:[#allocation2 + $0x160] sm:$0xff] }
 0x320   :  { %6869 = vmatpush1.bf16.msra.mxu1 %v6868_v3  ;;  %6511 = vmatprep.subr.bf16.mxu0 %v6510_v5  ;;  %v2159_v3 = vld [vmem:[#allocation2 + $0x3ff8] sm:$0xff]  ;;  %v6526_v10 = vpack.c.bf16 %v2169_v0, %v2157_v61  ;;  %v2230_v61 = vld [vmem:[#allocation2 + $0x4230] sm:$0xff] }
 0x321   :  { %6871 = vmatprep.subr.bf16.mxu1 %v6870_v12  ;;  %5321 = vmatprep.mubr.msk.f32.mxu0 %vm2337_vm0, %v8257_v54  ;;  %v2171_v5 = vld [vmem:[#allocation2 + $0x4058] sm:$0xff]  ;;  %v2156_v12 = vld [vmem:[#allocation2 + $0x3fe0] sm:$0xff] }
 0x322   :  { %5322 = vmatprep.mubr.msk.f32.mxu1 %vm2337_vm0, %v8257_v54  ;;  %v6886_v49 = vpack.c.bf16 %v2171_v5, %v2159_v3  ;;  %v6528_v21 = vpack.c.bf16 %v2168_v13, %v2156_v12  ;;  %v2242_v3 = vld [vmem:[#allocation2 + $0x4290] sm:$0xff]  ;;  %v2253_v5 = vld [vmem:[#allocation2 + $0x42e8] sm:$0xff] }
 0x323   :  { %6513 = vmatpush1.bf16.msra.mxu0 %v6512_v18  ;;  %v2193_v18 = vld [vmem:[#allocation2 + $0x4108] sm:$0xff]  ;;  %v6900_v13 = vpack.c.bf16 %v2242_v3, %v2230_v61  ;;  %v180_v3 = vld [vmem:[#allocation2 + $0x220] sm:$0xff] }
 0x324   :  { %6873 = vmatpush1.bf16.msra.mxu1 %v6872_v19  ;;  %6515 = vmatprep.subr.bf16.mxu0 %v6514_v20  ;;  %v2183_v19 = vld [vmem:[#allocation2 + $0x40b8] sm:$0xff]  ;;  %v6530_v24 = vpack.c.bf16 %v2193_v18, %v2181_v17  ;;  %v2254_v17 = vld [vmem:[#allocation2 + $0x42f0] sm:$0xff] }
 0x325   :  { %6875 = vmatprep.subr.bf16.mxu1 %v6874_v22  ;;  %v2195_v20 = vld [vmem:[#allocation2 + $0x4118] sm:$0xff]  ;;  %v2180_v22 = vld [vmem:[#allocation2 + $0x40a0] sm:$0xff] }
 0x326   :  { %v6890_v30 = vpack.c.bf16 %v2195_v20, %v2183_v19  ;;  %v6532_v37 = vpack.c.bf16 %v2192_v27, %v2180_v22  ;;  %v2266_v19 = vld [vmem:[#allocation2 + $0x4350] sm:$0xff]  ;;  %v121_v20 = vld [vmem:[#allocation2 + $0x48] sm:$0xff] }
 0x327   :  { %6517 = vmatpush1.bf16.msra.mxu0 %v6516_v34  ;;  %v2217_v34 = vld [vmem:[#allocation2 + $0x41c8] sm:$0xff]  ;;  %v6904_v27 = vpack.c.bf16 %v2266_v19, %v2254_v17  ;;  %v204_v19 = vld [vmem:[#allocation2 + $0x2e0] sm:$0xff] }
 0x328   :  { %6877 = vmatpush1.bf16.msra.mxu1 %v6876_v35  ;;  %6519 = vmatprep.subr.bf16.mxu0 %v6518_v36  ;;  %v2207_v35 = vld [vmem:[#allocation2 + $0x4178] sm:$0xff]  ;;  %v6534_v41 = vpack.c.bf16 %v2217_v34, %v2205_v33  ;;  %v122_v33 = vld [vmem:[#allocation2 + $0x50] sm:$0xff] }
 0x329   :  { %6879 = vmatprep.subr.bf16.mxu1 %v6878_v42  ;;  %v2219_v36 = vld [vmem:[#allocation2 + $0x41d8] sm:$0xff]  ;;  %v2204_v42 = vld [vmem:[#allocation2 + $0x4160] sm:$0xff] }
 0x32a   :  { %v6894_v45 = vpack.c.bf16 %v2219_v36, %v2207_v35  ;;  %v6536_v53 = vpack.c.bf16 %v2216_v43, %v2204_v42  ;;  %v134_v35 = vld [vmem:[#allocation2 + $0xb0] sm:$0xff]  ;;  %v145_v36 = vld [vmem:[#allocation2 + $0x108] sm:$0xff] }
 0x32b   :  { %6521 = vmatpush1.bf16.msra.mxu0 %v6520_v48  ;;  %v2241_v48 = vld [vmem:[#allocation2 + $0x4288] sm:$0xff]  ;;  %v7268_v43 = vpack.c.bf16 %v134_v35, %v122_v33  ;;  %v216_v33 = vld [vmem:[#allocation2 + $0x340] sm:$0xff]  ;;  %v218_v35 = vld [vmem:[#allocation2 + $0x350] sm:$0xff] }
 0x32c   :  { %6881 = vmatpush1.bf16.msra.mxu1 %v6880_v50  ;;  %6523 = vmatprep.subr.bf16.mxu0 %v6522_v51  ;;  %v2231_v50 = vld [vmem:[#allocation2 + $0x4238] sm:$0xff]  ;;  %v6538_v57 = vpack.c.bf16 %v2241_v48, %v2229_v47  ;;  %v146_v47 = vld [vmem:[#allocation2 + $0x110] sm:$0xff] }
 0x32d   :  { %6883 = vmatprep.subr.bf16.mxu1 %v6882_v59  ;;  %v2243_v51 = vld [vmem:[#allocation2 + $0x4298] sm:$0xff]  ;;  %v2228_v59 = vld [vmem:[#allocation2 + $0x4220] sm:$0xff] }
 0x32e   :  { %v6898_v0 = vpack.c.bf16 %v2243_v51, %v2231_v50  ;;  %v6540_v12 = vpack.c.bf16 %v2240_v60, %v2228_v59  ;;  %v158_v50 = vld [vmem:[#allocation2 + $0x170] sm:$0xff]  ;;  %v169_v51 = vld [vmem:[#allocation2 + $0x1c8] sm:$0xff] }
 0x32f   :  { %6525 = vmatpush1.bf16.msra.mxu0 %v6524_v7  ;;  %v2265_v7 = vld [vmem:[#allocation2 + $0x4348] sm:$0xff]  ;;  %v7272_v60 = vpack.c.bf16 %v158_v50, %v146_v47  ;;  %v240_v47 = vld [vmem:[#allocation2 + $0x400] sm:$0xff]  ;;  %v242_v50 = vld [vmem:[#allocation2 + $0x410] sm:$0xff] }
 0x330   :  { %6885 = vmatpush1.bf16.msra.mxu1 %v6884_v9  ;;  %6527 = vmatprep.subr.bf16.mxu0 %v6526_v10  ;;  %v2255_v9 = vld [vmem:[#allocation2 + $0x42f8] sm:$0xff]  ;;  %v6542_v14 = vpack.c.bf16 %v2265_v7, %v2253_v5  ;;  %v170_v5 = vld [vmem:[#allocation2 + $0x1d0] sm:$0xff] }
 0x331   :  { %6887 = vmatprep.subr.bf16.mxu1 %v6886_v49  ;;  %v2267_v10 = vld [vmem:[#allocation2 + $0x4358] sm:$0xff]  ;;  %v2252_v49 = vld [vmem:[#allocation2 + $0x42e0] sm:$0xff] }
 0x332   :  { %v6902_v18 = vpack.c.bf16 %v2267_v10, %v2255_v9  ;;  %v6544_v22 = vpack.c.bf16 %v2264_v16, %v2252_v49  ;;  %v182_v9 = vld [vmem:[#allocation2 + $0x230] sm:$0xff]  ;;  %v193_v10 = vld [vmem:[#allocation2 + $0x288] sm:$0xff] }
 0x333   :  { %6529 = vmatpush1.bf16.msra.mxu0 %v6528_v21  ;;  %v133_v21 = vld [vmem:[#allocation2 + $0xa8] sm:$0xff]  ;;  %v7276_v16 = vpack.c.bf16 %v182_v9, %v170_v5  ;;  %v264_v5 = vld [vmem:[#allocation2 + $0x4c0] sm:$0xff]  ;;  %v266_v9 = vld [vmem:[#allocation2 + $0x4d0] sm:$0xff] }
 0x334   :  { %6889 = vmatpush1.bf16.msra.mxu1 %v6888_v23  ;;  %6531 = vmatprep.subr.bf16.mxu0 %v6530_v24  ;;  %v123_v23 = vld [vmem:[#allocation2 + $0x58] sm:$0xff]  ;;  %v6906_v28 = vpack.c.bf16 %v133_v21, %v121_v20  ;;  %v194_v20 = vld [vmem:[#allocation2 + $0x290] sm:$0xff] }
 0x335   :  { %6891 = vmatprep.subr.bf16.mxu1 %v6890_v30  ;;  %v135_v24 = vld [vmem:[#allocation2 + $0xb8] sm:$0xff]  ;;  %v120_v30 = vld [vmem:[#allocation2 + $0x40] sm:$0xff] }
 0x336   :  { %v7266_v34 = vpack.c.bf16 %v135_v24, %v123_v23  ;;  %v6908_v42 = vpack.c.bf16 %v132_v31, %v120_v30  ;;  %v206_v23 = vld [vmem:[#allocation2 + $0x2f0] sm:$0xff]  ;;  %v217_v24 = vld [vmem:[#allocation2 + $0x348] sm:$0xff] }
 0x337   :  { %6533 = vmatpush1.bf16.msra.mxu0 %v6532_v37  ;;  %v157_v37 = vld [vmem:[#allocation2 + $0x168] sm:$0xff] }
 0x338   :  { %6893 = vmatpush1.bf16.msra.mxu1 %v6892_v40  ;;  %6535 = vmatprep.subr.bf16.mxu0 %v6534_v41  ;;  %v147_v40 = vld [vmem:[#allocation2 + $0x118] sm:$0xff]  ;;  %v6910_v44 = vpack.c.bf16 %v157_v37, %v145_v36  ;;  %v230_v37 = vld [vmem:[#allocation2 + $0x3b0] sm:$0xff] }
 0x339   :  { %6895 = vmatprep.subr.bf16.mxu1 %v6894_v45  ;;  %v159_v41 = vld [vmem:[#allocation2 + $0x178] sm:$0xff]  ;;  %v144_v45 = vld [vmem:[#allocation2 + $0x100] sm:$0xff] }
 0x33a   :  { %v7270_v48 = vpack.c.bf16 %v159_v41, %v147_v40  ;;  %v6912_v59 = vpack.c.bf16 %v156_v46, %v144_v45  ;;  %v241_v40 = vld [vmem:[#allocation2 + $0x408] sm:$0xff]  ;;  %v7284_v45 = vpack.c.bf16 %v230_v37, %v218_v35  ;;  %v312_v35 = vld [vmem:[#allocation2 + $0x640] sm:$0xff]  ;;  %v314_v37 = vld [vmem:[#allocation2 + $0x650] sm:$0xff] }
 0x33b   :  { %6537 = vmatpush1.bf16.msra.mxu0 %v6536_v53  ;;  %v181_v53 = vld [vmem:[#allocation2 + $0x228] sm:$0xff] }
 0x33c   :  { %6897 = vmatpush1.bf16.msra.mxu1 %v6896_v56  ;;  %6539 = vmatprep.subr.bf16.mxu0 %v6538_v57  ;;  %v171_v56 = vld [vmem:[#allocation2 + $0x1d8] sm:$0xff]  ;;  %v6914_v61 = vpack.c.bf16 %v181_v53, %v169_v51  ;;  %v253_v41 = vld [vmem:[#allocation2 + $0x468] sm:$0xff]  ;;  %v254_v53 = vld [vmem:[#allocation2 + $0x470] sm:$0xff] }
 0x33d   :  { %6899 = vmatprep.subr.bf16.mxu1 %v6898_v0  ;;  %v183_v57 = vld [vmem:[#allocation2 + $0x238] sm:$0xff]  ;;  %v168_v0 = vld [vmem:[#allocation2 + $0x1c0] sm:$0xff]  ;;  %v6926_v46 = vpack.c.bf16 %v253_v41, %v241_v40  ;;  %v326_v41 = vld [vmem:[#allocation2 + $0x6b0] sm:$0xff] }
 0x33e   :  { %v7274_v7 = vpack.c.bf16 %v183_v57, %v171_v56  ;;  %v6916_v49 = vpack.c.bf16 %v180_v3, %v168_v0  ;;  %v265_v56 = vld [vmem:[#allocation2 + $0x4c8] sm:$0xff]  ;;  %v7288_v0 = vpack.c.bf16 %v254_v53, %v242_v50  ;;  %v336_v50 = vld [vmem:[#allocation2 + $0x700] sm:$0xff]  ;;  %v338_v53 = vld [vmem:[#allocation2 + $0x710] sm:$0xff] }
 0x33f   :  { %6541 = vmatpush1.bf16.msra.mxu0 %v6540_v12  ;;  %v205_v12 = vld [vmem:[#allocation2 + $0x2e8] sm:$0xff] }
 0x340   :  { %6901 = vmatpush1.bf16.msra.mxu1 %v6900_v13  ;;  %6543 = vmatprep.subr.bf16.mxu0 %v6542_v14  ;;  %v195_v13 = vld [vmem:[#allocation2 + $0x298] sm:$0xff]  ;;  %v6918_v17 = vpack.c.bf16 %v205_v12, %v193_v10  ;;  %v277_v57 = vld [vmem:[#allocation2 + $0x528] sm:$0xff]  ;;  %v278_v12 = vld [vmem:[#allocation2 + $0x530] sm:$0xff] }
 0x341   :  { %6903 = vmatprep.subr.bf16.mxu1 %v6902_v18  ;;  %v207_v14 = vld [vmem:[#allocation2 + $0x2f8] sm:$0xff]  ;;  %v192_v18 = vld [vmem:[#allocation2 + $0x280] sm:$0xff]  ;;  %v6930_v3 = vpack.c.bf16 %v277_v57, %v265_v56  ;;  %v350_v57 = vld [vmem:[#allocation2 + $0x770] sm:$0xff] }
 0x342   :  { %v7278_v21 = vpack.c.bf16 %v207_v14, %v195_v13  ;;  %v6920_v30 = vpack.c.bf16 %v204_v19, %v192_v18  ;;  %v289_v13 = vld [vmem:[#allocation2 + $0x588] sm:$0xff]  ;;  %v7292_v18 = vpack.c.bf16 %v278_v12, %v266_v9  ;;  %v360_v9 = vld [vmem:[#allocation2 + $0x7c0] sm:$0xff]  ;;  %v362_v12 = vld [vmem:[#allocation2 + $0x7d0] sm:$0xff] }
 0x343   :  { %6545 = vmatpush1.bf16.msra.mxu0 %v6544_v22  ;;  %v229_v22 = vld [vmem:[#allocation2 + $0x3a8] sm:$0xff] }
 0x344   :  { %6905 = vmatpush1.bf16.msra.mxu1 %v6904_v27  ;;  %6907 = vmatprep.subr.bf16.mxu0 %v6906_v28  ;;  %v219_v27 = vld [vmem:[#allocation2 + $0x358] sm:$0xff]  ;;  %v6922_v31 = vpack.c.bf16 %v229_v22, %v217_v24  ;;  %v301_v14 = vld [vmem:[#allocation2 + $0x5e8] sm:$0xff]  ;;  %v302_v22 = vld [vmem:[#allocation2 + $0x5f0] sm:$0xff] }
 0x345   :  { %7267 = vmatprep.subr.bf16.mxu1 %v7266_v34  ;;  %v231_v28 = vld [vmem:[#allocation2 + $0x3b8] sm:$0xff]  ;;  %v228_v34 = vld [vmem:[#allocation2 + $0x3a0] sm:$0xff]  ;;  %v6934_v19 = vpack.c.bf16 %v301_v14, %v289_v13  ;;  %v374_v14 = vld [vmem:[#allocation2 + $0x830] sm:$0xff] }
 0x346   :  { %3612 = vmatmul.mubr.f32.vlgmr.msra.gmra.mrb[2].mxu0 %v8253_v38  ;;  %v7282_v36 = vpack.c.bf16 %v231_v28, %v219_v27  ;;  %v313_v27 = vld [vmem:[#allocation2 + $0x648] sm:$0xff] }
 0x347   :  { %4038 = vmatmul.mubr.f32.vlgmr.msra.gmra.mrb[2].mxu1 %v8253_v38  ;;  %6909 = vmatpush1.bf16.msra.mxu0 %v6908_v42  ;;  %v243_v42 = vld [vmem:[#allocation2 + $0x418] sm:$0xff]  ;;  %v325_v28 = vld [vmem:[#allocation2 + $0x6a8] sm:$0xff] }
 0x348   :  { %7269 = vmatpush1.bf16.msra.mxu1 %v7268_v43  ;;  %6911 = vmatprep.subr.bf16.mxu0 %v6910_v44  ;;  %v255_v43 = vld [vmem:[#allocation2 + $0x478] sm:$0xff]  ;;  %v6924_v44 = vpack.c.bf16 %v228_v34, %v216_v33  ;;  %v6938_v34 = vpack.c.bf16 %v325_v28, %v313_v27  ;;  %v398_v28 = vld [vmem:[#allocation2 + $0x8f0] sm:$0xff] }
 0x349   :  { %7271 = vmatprep.subr.bf16.mxu1 %v7270_v48  ;;  %4108 = vmatprep.mubr.f32.mxu0 %v8186_v32  ;;  %v252_v48 = vld [vmem:[#allocation2 + $0x460] sm:$0xff]  ;;  %v7286_v51 = vpack.c.bf16 %v255_v43, %v243_v42  ;;  %v337_v42 = vld [vmem:[#allocation2 + $0x708] sm:$0xff] }
 0x34a   :  { %4534 = vmatprep.mubr.f32.mxu1 %v8186_v32  ;;  %v7280_v32 = vpack.c.bf16 %v206_v23, %v194_v20  ;;  %v288_v20 = vld [vmem:[#allocation2 + $0x580] sm:$0xff]  ;;  %v290_v23 = vld [vmem:[#allocation2 + $0x590] sm:$0xff]  ;;  %v349_v43 = vld [vmem:[#allocation2 + $0x768] sm:$0xff] }
 0x34b   :  { %6913 = vmatpush1.bf16.msra.mxu0 %v6912_v59  ;;  %v267_v59 = vld [vmem:[#allocation2 + $0x4d8] sm:$0xff]  ;;  %v7296_v33 = vpack.c.bf16 %v302_v22, %v290_v23  ;;  %v384_v23 = vld [vmem:[#allocation2 + $0x880] sm:$0xff]  ;;  %v386_v22 = vld [vmem:[#allocation2 + $0x890] sm:$0xff] }
 0x34c   :  { %7273 = vmatpush1.bf16.msra.mxu1 %v7272_v60  ;;  %6915 = vmatprep.subr.bf16.mxu0 %v6914_v61  ;;  %v279_v60 = vld [vmem:[#allocation2 + $0x538] sm:$0xff]  ;;  %v6928_v61 = vpack.c.bf16 %v252_v48, %v240_v47  ;;  %v7300_v47 = vpack.c.bf16 %v326_v41, %v314_v37  ;;  %v6942_v48 = vpack.c.bf16 %v349_v43, %v337_v42  ;;  %v408_v37 = vld [vmem:[#allocation2 + $0x940] sm:$0xff]  ;;  %v410_v41 = vld [vmem:[#allocation2 + $0x950] sm:$0xff] }
 0x34d   :  { %7275 = vmatprep.subr.bf16.mxu1 %v7274_v7  ;;  %v276_v7 = vld [vmem:[#allocation2 + $0x520] sm:$0xff]  ;;  %v7290_v10 = vpack.c.bf16 %v279_v60, %v267_v59  ;;  %v361_v59 = vld [vmem:[#allocation2 + $0x7c8] sm:$0xff]  ;;  %v422_v43 = vld [vmem:[#allocation2 + $0x9b0] sm:$0xff] }
 0x34e   :  { %v373_v60 = vld [vmem:[#allocation2 + $0x828] sm:$0xff] }
 0x34f   :  { %6917 = vmatpush1.bf16.msra.mxu0 %v6916_v49  ;;  %v291_v49 = vld [vmem:[#allocation2 + $0x598] sm:$0xff] }
 0x350   :  { %7277 = vmatpush1.bf16.msra.mxu1 %v7276_v16  ;;  %6919 = vmatprep.subr.bf16.mxu0 %v6918_v17  ;;  %v303_v16 = vld [vmem:[#allocation2 + $0x5f8] sm:$0xff]  ;;  %v6932_v17 = vpack.c.bf16 %v276_v7, %v264_v5  ;;  %v7304_v5 = vpack.c.bf16 %v350_v57, %v338_v53  ;;  %v6946_v7 = vpack.c.bf16 %v373_v60, %v361_v59  ;;  %v432_v53 = vld [vmem:[#allocation2 + $0xa00] sm:$0xff]  ;;  %v434_v57 = vld [vmem:[#allocation2 + $0xa10] sm:$0xff] }
 0x351   :  { %7279 = vmatprep.subr.bf16.mxu1 %v7278_v21  ;;  %v300_v21 = vld [vmem:[#allocation2 + $0x5e0] sm:$0xff]  ;;  %v7294_v24 = vpack.c.bf16 %v303_v16, %v291_v49  ;;  %v385_v49 = vld [vmem:[#allocation2 + $0x888] sm:$0xff]  ;;  %v446_v60 = vld [vmem:[#allocation2 + $0xa70] sm:$0xff] }
 0x352   :  { %v397_v16 = vld [vmem:[#allocation2 + $0x8e8] sm:$0xff] }
 0x353   :  { %6921 = vmatpush1.bf16.msra.mxu0 %v6920_v30  ;;  %v315_v30 = vld [vmem:[#allocation2 + $0x658] sm:$0xff] }
 0x354   :  { %7281 = vmatpush1.bf16.msra.mxu1 %v7280_v32  ;;  %6923 = vmatprep.subr.bf16.mxu0 %v6922_v31  ;;  %v327_v32 = vld [vmem:[#allocation2 + $0x6b8] sm:$0xff]  ;;  %v6936_v31 = vpack.c.bf16 %v300_v21, %v288_v20  ;;  %v7308_v20 = vpack.c.bf16 %v374_v14, %v362_v12  ;;  %v6950_v21 = vpack.c.bf16 %v397_v16, %v385_v49  ;;  %v456_v12 = vld [vmem:[#allocation2 + $0xac0] sm:$0xff]  ;;  %v458_v14 = vld [vmem:[#allocation2 + $0xad0] sm:$0xff] }
 0x355   :  { %7283 = vmatprep.subr.bf16.mxu1 %v7282_v36  ;;  %v324_v36 = vld [vmem:[#allocation2 + $0x6a0] sm:$0xff]  ;;  %v7298_v40 = vpack.c.bf16 %v327_v32, %v315_v30  ;;  %v409_v30 = vld [vmem:[#allocation2 + $0x948] sm:$0xff]  ;;  %v470_v16 = vld [vmem:[#allocation2 + $0xb30] sm:$0xff] }
 0x356   :  { %v421_v32 = vld [vmem:[#allocation2 + $0x9a8] sm:$0xff] }
 0x357   :  { %6925 = vmatpush1.bf16.msra.mxu0 %v6924_v44  ;;  %v339_v44 = vld [vmem:[#allocation2 + $0x718] sm:$0xff] }
 0x358   :  { %7285 = vmatpush1.bf16.msra.mxu1 %v7284_v45  ;;  %6927 = vmatprep.subr.bf16.mxu0 %v6926_v46  ;;  %v351_v45 = vld [vmem:[#allocation2 + $0x778] sm:$0xff]  ;;  %v6940_v46 = vpack.c.bf16 %v324_v36, %v312_v35  ;;  %v7312_v35 = vpack.c.bf16 %v398_v28, %v386_v22  ;;  %v6954_v36 = vpack.c.bf16 %v421_v32, %v409_v30  ;;  %v480_v22 = vld [vmem:[#allocation2 + $0xb80] sm:$0xff]  ;;  %v482_v28 = vld [vmem:[#allocation2 + $0xb90] sm:$0xff] }
 0x359   :  { %7287 = vmatprep.subr.bf16.mxu1 %v7286_v51  ;;  %v348_v51 = vld [vmem:[#allocation2 + $0x760] sm:$0xff]  ;;  %v7302_v56 = vpack.c.bf16 %v351_v45, %v339_v44  ;;  %v433_v44 = vld [vmem:[#allocation2 + $0xa08] sm:$0xff]  ;;  %v494_v32 = vld [vmem:[#allocation2 + $0xbf0] sm:$0xff] }
 0x35a   :  { %v445_v45 = vld [vmem:[#allocation2 + $0xa68] sm:$0xff] }
 0x35b   :  { %6929 = vmatpush1.bf16.msra.mxu0 %v6928_v61  ;;  %v363_v61 = vld [vmem:[#allocation2 + $0x7d8] sm:$0xff] }
 0x35c   :  { %7289 = vmatpush1.bf16.msra.mxu1 %v7288_v0  ;;  %6931 = vmatprep.subr.bf16.mxu0 %v6930_v3  ;;  %v375_v0 = vld [vmem:[#allocation2 + $0x838] sm:$0xff]  ;;  %v6944_v3 = vpack.c.bf16 %v348_v51, %v336_v50  ;;  %v7316_v50 = vpack.c.bf16 %v422_v43, %v410_v41  ;;  %v6958_v51 = vpack.c.bf16 %v445_v45, %v433_v44  ;;  %v504_v41 = vld [vmem:[#allocation2 + $0xc40] sm:$0xff]  ;;  %v506_v43 = vld [vmem:[#allocation2 + $0xc50] sm:$0xff] }
 0x35d   :  { %7291 = vmatprep.subr.bf16.mxu1 %v7290_v10  ;;  %v372_v10 = vld [vmem:[#allocation2 + $0x820] sm:$0xff]  ;;  %v7306_v13 = vpack.c.bf16 %v375_v0, %v363_v61  ;;  %v457_v61 = vld [vmem:[#allocation2 + $0xac8] sm:$0xff]  ;;  %v518_v45 = vld [vmem:[#allocation2 + $0xcb0] sm:$0xff] }
 0x35e   :  { %v469_v0 = vld [vmem:[#allocation2 + $0xb28] sm:$0xff] }
 0x35f   :  { %6933 = vmatpush1.bf16.msra.mxu0 %v6932_v17  ;;  %v387_v17 = vld [vmem:[#allocation2 + $0x898] sm:$0xff] }
 0x360   :  { %7293 = vmatpush1.bf16.msra.mxu1 %v7292_v18  ;;  %6935 = vmatprep.subr.bf16.mxu0 %v6934_v19  ;;  %v399_v18 = vld [vmem:[#allocation2 + $0x8f8] sm:$0xff]  ;;  %v6948_v19 = vpack.c.bf16 %v372_v10, %v360_v9  ;;  %v7320_v9 = vpack.c.bf16 %v446_v60, %v434_v57  ;;  %v6962_v10 = vpack.c.bf16 %v469_v0, %v457_v61  ;;  %v528_v57 = vld [vmem:[#allocation2 + $0xd00] sm:$0xff]  ;;  %v530_v60 = vld [vmem:[#allocation2 + $0xd10] sm:$0xff] }
 0x361   :  { %7295 = vmatprep.subr.bf16.mxu1 %v7294_v24  ;;  %v396_v24 = vld [vmem:[#allocation2 + $0x8e0] sm:$0xff]  ;;  %v7310_v27 = vpack.c.bf16 %v399_v18, %v387_v17  ;;  %v481_v17 = vld [vmem:[#allocation2 + $0xb88] sm:$0xff]  ;;  %v542_v0 = vld [vmem:[#allocation2 + $0xd70] sm:$0xff] }
 0x362   :  { %v493_v18 = vld [vmem:[#allocation2 + $0xbe8] sm:$0xff] }
 0x363   :  { %6937 = vmatpush1.bf16.msra.mxu0 %v6936_v31  ;;  %v411_v31 = vld [vmem:[#allocation2 + $0x958] sm:$0xff] }
 0x364   :  { %7297 = vmatpush1.bf16.msra.mxu1 %v7296_v33  ;;  %6939 = vmatprep.subr.bf16.mxu0 %v6938_v34  ;;  %v423_v33 = vld [vmem:[#allocation2 + $0x9b8] sm:$0xff]  ;;  %v6952_v34 = vpack.c.bf16 %v396_v24, %v384_v23  ;;  %v7324_v23 = vpack.c.bf16 %v470_v16, %v458_v14  ;;  %v6966_v24 = vpack.c.bf16 %v493_v18, %v481_v17  ;;  %v552_v14 = vld [vmem:[#allocation2 + $0xdc0] sm:$0xff]  ;;  %v554_v16 = vld [vmem:[#allocation2 + $0xdd0] sm:$0xff] }
 0x365   :  { %7299 = vmatprep.subr.bf16.mxu1 %v7298_v40  ;;  %v420_v40 = vld [vmem:[#allocation2 + $0x9a0] sm:$0xff]  ;;  %v7314_v42 = vpack.c.bf16 %v423_v33, %v411_v31  ;;  %v505_v31 = vld [vmem:[#allocation2 + $0xc48] sm:$0xff]  ;;  %v566_v18 = vld [vmem:[#allocation2 + $0xe30] sm:$0xff] }
 0x366   :  { %v517_v33 = vld [vmem:[#allocation2 + $0xca8] sm:$0xff] }
 0x367   :  { %6941 = vmatpush1.bf16.msra.mxu0 %v6940_v46  ;;  %v435_v46 = vld [vmem:[#allocation2 + $0xa18] sm:$0xff] }
 0x368   :  { %7301 = vmatpush1.bf16.msra.mxu1 %v7300_v47  ;;  %6943 = vmatprep.subr.bf16.mxu0 %v6942_v48  ;;  %v447_v47 = vld [vmem:[#allocation2 + $0xa78] sm:$0xff]  ;;  %v6956_v48 = vpack.c.bf16 %v420_v40, %v408_v37  ;;  %v7328_v37 = vpack.c.bf16 %v494_v32, %v482_v28  ;;  %v6970_v40 = vpack.c.bf16 %v517_v33, %v505_v31  ;;  %v588_v28 = vld [vmem:[#allocation2 + $0xee0] sm:$0xff]  ;;  %v590_v31 = vld [vmem:[#allocation2 + $0xef0] sm:$0xff] }
 0x369   :  { %7303 = vmatprep.subr.bf16.mxu1 %v7302_v56  ;;  %v444_v56 = vld [vmem:[#allocation2 + $0xa60] sm:$0xff]  ;;  %v7318_v59 = vpack.c.bf16 %v447_v47, %v435_v46  ;;  %v529_v46 = vld [vmem:[#allocation2 + $0xd08] sm:$0xff] }
 0x36a   :  { %v541_v47 = vld [vmem:[#allocation2 + $0xd68] sm:$0xff] }
 0x36b   :  { %6945 = vmatpush1.bf16.msra.mxu0 %v6944_v3  ;;  %v459_v3 = vld [vmem:[#allocation2 + $0xad8] sm:$0xff]  ;;  %v601_v33 = vld [vmem:[#allocation2 + $0xf48] sm:$0xff] }
 0x36c   :  { %7305 = vmatpush1.bf16.msra.mxu1 %v7304_v5  ;;  %6947 = vmatprep.subr.bf16.mxu0 %v6946_v7  ;;  %v471_v5 = vld [vmem:[#allocation2 + $0xb38] sm:$0xff]  ;;  %v6960_v7 = vpack.c.bf16 %v444_v56, %v432_v53  ;;  %v7332_v53 = vpack.c.bf16 %v518_v45, %v506_v43  ;;  %v6974_v56 = vpack.c.bf16 %v541_v47, %v529_v46  ;;  %v602_v43 = vld [vmem:[#allocation2 + $0xf50] sm:$0xff]  ;;  %v625_v46 = vld [vmem:[#allocation2 + $0x1008] sm:$0xff] }
 0x36d   :  { %7307 = vmatprep.subr.bf16.mxu1 %v7306_v13  ;;  %v468_v13 = vld [vmem:[#allocation2 + $0xb20] sm:$0xff]  ;;  %v7322_v49 = vpack.c.bf16 %v471_v5, %v459_v3  ;;  %v553_v3 = vld [vmem:[#allocation2 + $0xdc8] sm:$0xff]  ;;  %v614_v45 = vld [vmem:[#allocation2 + $0xfb0] sm:$0xff] }
 0x36e   :  { %v565_v5 = vld [vmem:[#allocation2 + $0xe28] sm:$0xff] }
 0x36f   :  { %6949 = vmatpush1.bf16.msra.mxu0 %v6948_v19  ;;  %v483_v19 = vld [vmem:[#allocation2 + $0xb98] sm:$0xff]  ;;  %v637_v47 = vld [vmem:[#allocation2 + $0x1068] sm:$0xff] }
 0x370   :  { %7309 = vmatpush1.bf16.msra.mxu1 %v7308_v20  ;;  %6951 = vmatprep.subr.bf16.mxu0 %v6950_v21  ;;  %v495_v20 = vld [vmem:[#allocation2 + $0xbf8] sm:$0xff]  ;;  %v6964_v21 = vpack.c.bf16 %v468_v13, %v456_v12  ;;  %v7336_v12 = vpack.c.bf16 %v542_v0, %v530_v60  ;;  %v6978_v13 = vpack.c.bf16 %v565_v5, %v553_v3  ;;  %v626_v60 = vld [vmem:[#allocation2 + $0x1010] sm:$0xff]  ;;  %v649_v3 = vld [vmem:[#allocation2 + $0x10c8] sm:$0xff] }
 0x371   :  { %7311 = vmatprep.subr.bf16.mxu1 %v7310_v27  ;;  %v492_v27 = vld [vmem:[#allocation2 + $0xbe0] sm:$0xff]  ;;  %v7326_v30 = vpack.c.bf16 %v495_v20, %v483_v19  ;;  %v577_v19 = vld [vmem:[#allocation2 + $0xe88] sm:$0xff]  ;;  %v638_v0 = vld [vmem:[#allocation2 + $0x1070] sm:$0xff] }
 0x372   :  { %v589_v20 = vld [vmem:[#allocation2 + $0xee8] sm:$0xff] }
 0x373   :  { %6953 = vmatpush1.bf16.msra.mxu0 %v6952_v34  ;;  %v507_v34 = vld [vmem:[#allocation2 + $0xc58] sm:$0xff]  ;;  %v661_v5 = vld [vmem:[#allocation2 + $0x1128] sm:$0xff] }
 0x374   :  { %7313 = vmatpush1.bf16.msra.mxu1 %v7312_v35  ;;  %6955 = vmatprep.subr.bf16.mxu0 %v6954_v36  ;;  %v519_v35 = vld [vmem:[#allocation2 + $0xcb8] sm:$0xff]  ;;  %v6968_v36 = vpack.c.bf16 %v492_v27, %v480_v22  ;;  %v6982_v22 = vpack.c.bf16 %v589_v20, %v577_v19  ;;  %v576_v27 = vld [vmem:[#allocation2 + $0xe80] sm:$0xff]  ;;  %v673_v19 = vld [vmem:[#allocation2 + $0x1188] sm:$0xff] }
 0x375   :  { %7315 = vmatprep.subr.bf16.mxu1 %v7314_v42  ;;  %v516_v42 = vld [vmem:[#allocation2 + $0xca0] sm:$0xff]  ;;  %v7330_v44 = vpack.c.bf16 %v519_v35, %v507_v34  ;;  %v613_v34 = vld [vmem:[#allocation2 + $0xfa8] sm:$0xff]  ;;  %v603_v35 = vld [vmem:[#allocation2 + $0xf58] sm:$0xff] }
 0x376   :  { %v685_v20 = vld [vmem:[#allocation2 + $0x11e8] sm:$0xff] }
 0x377   :  { %6957 = vmatpush1.bf16.msra.mxu0 %v6956_v48  ;;  %v531_v48 = vld [vmem:[#allocation2 + $0xd18] sm:$0xff] }
 0x378   :  { %7317 = vmatpush1.bf16.msra.mxu1 %v7316_v50  ;;  %6959 = vmatprep.subr.bf16.mxu0 %v6958_v51  ;;  %v543_v50 = vld [vmem:[#allocation2 + $0xd78] sm:$0xff]  ;;  %v6972_v51 = vpack.c.bf16 %v516_v42, %v504_v41  ;;  %v600_v41 = vld [vmem:[#allocation2 + $0xf40] sm:$0xff] }
 0x379   :  { %7319 = vmatprep.subr.bf16.mxu1 %v7318_v59  ;;  %v540_v59 = vld [vmem:[#allocation2 + $0xd60] sm:$0xff]  ;;  %v7334_v61 = vpack.c.bf16 %v543_v50, %v531_v48  ;;  %v627_v48 = vld [vmem:[#allocation2 + $0x1018] sm:$0xff] }
 0x37a   :  { %v612_v42 = vld [vmem:[#allocation2 + $0xfa0] sm:$0xff]  ;;  %v639_v50 = vld [vmem:[#allocation2 + $0x1078] sm:$0xff] }
 0x37b   :  { %6961 = vmatpush1.bf16.msra.mxu0 %v6960_v7  ;;  %v555_v7 = vld [vmem:[#allocation2 + $0xdd8] sm:$0xff] }
 0x37c   :  { %7321 = vmatpush1.bf16.msra.mxu1 %v7320_v9  ;;  %6963 = vmatprep.subr.bf16.mxu0 %v6962_v10  ;;  %v567_v9 = vld [vmem:[#allocation2 + $0xe38] sm:$0xff]  ;;  %v6976_v10 = vpack.c.bf16 %v540_v59, %v528_v57  ;;  %v624_v57 = vld [vmem:[#allocation2 + $0x1000] sm:$0xff] }
 0x37d   :  { %7323 = vmatprep.subr.bf16.mxu1 %v7322_v49  ;;  %v564_v49 = vld [vmem:[#allocation2 + $0xe20] sm:$0xff]  ;;  %v7338_v17 = vpack.c.bf16 %v567_v9, %v555_v7  ;;  %v651_v7 = vld [vmem:[#allocation2 + $0x10d8] sm:$0xff] }
 0x37e   :  { %v636_v59 = vld [vmem:[#allocation2 + $0x1060] sm:$0xff]  ;;  %v663_v9 = vld [vmem:[#allocation2 + $0x1138] sm:$0xff] }
 0x37f   :  { %6965 = vmatpush1.bf16.msra.mxu0 %v6964_v21  ;;  %v579_v21 = vld [vmem:[#allocation2 + $0xe98] sm:$0xff] }
 0x380   :  { %7325 = vmatpush1.bf16.msra.mxu1 %v7324_v23  ;;  %6967 = vmatprep.subr.bf16.mxu0 %v6966_v24  ;;  %v591_v23 = vld [vmem:[#allocation2 + $0xef8] sm:$0xff]  ;;  %v7340_v24 = vpack.c.bf16 %v566_v18, %v554_v16  ;;  %v650_v16 = vld [vmem:[#allocation2 + $0x10d0] sm:$0xff] }
 0x381   :  { %7327 = vmatprep.subr.bf16.mxu1 %v7326_v30  ;;  %v578_v30 = vld [vmem:[#allocation2 + $0xe90] sm:$0xff]  ;;  %v7342_v32 = vpack.c.bf16 %v591_v23, %v579_v21  ;;  %v675_v21 = vld [vmem:[#allocation2 + $0x1198] sm:$0xff] }
 0x382   :  { %v662_v18 = vld [vmem:[#allocation2 + $0x1130] sm:$0xff]  ;;  %v687_v23 = vld [vmem:[#allocation2 + $0x11f8] sm:$0xff] }
 0x383   :  { %6969 = vmatpush1.bf16.msra.mxu0 %v6968_v36  ;;  %v615_v36 = vld [vmem:[#allocation2 + $0xfb8] sm:$0xff] }
 0x384   :  { %7329 = vmatpush1.bf16.msra.mxu1 %v7328_v37  ;;  %6971 = vmatprep.subr.bf16.mxu0 %v6970_v40  ;;  %v6984_v37 = vpack.c.bf16 %v588_v28, %v576_v27  ;;  %v6986_v40 = vpack.c.bf16 %v613_v34, %v601_v33  ;;  %v672_v27 = vld [vmem:[#allocation2 + $0x1180] sm:$0xff]  ;;  %v697_v33 = vld [vmem:[#allocation2 + $0x1248] sm:$0xff] }
 0x385   :  { %7331 = vmatprep.subr.bf16.mxu1 %v7330_v44  ;;  %v7346_v44 = vpack.c.bf16 %v615_v36, %v603_v35  ;;  %v684_v28 = vld [vmem:[#allocation2 + $0x11e0] sm:$0xff]  ;;  %v709_v34 = vld [vmem:[#allocation2 + $0x12a8] sm:$0xff]  ;;  %v699_v35 = vld [vmem:[#allocation2 + $0x1258] sm:$0xff] }
 0x386   :  { %4109 = vmatmul.mubr.f32.vlgmr.msra.gmra.mrb[4].mxu0 %v8182_v25  ;;  %v711_v36 = vld [vmem:[#allocation2 + $0x12b8] sm:$0xff] }
 0x387   :  { %6973 = vmatpush1.bf16.msra.mxu0 %v6972_v51  ;;  %4535 = vmatmul.mubr.f32.vlgmr.msra.gmra.mrb[4].mxu1 %v8182_v25  ;;  %v6980_v25 = vpack.c.bf16 %v564_v49, %v552_v14  ;;  %v6988_v51 = vpack.c.bf16 %v612_v42, %v600_v41  ;;  %v648_v14 = vld [vmem:[#allocation2 + $0x10c0] sm:$0xff] }
 0x388   :  { %7333 = vmatpush1.bf16.msra.mxu1 %v7332_v53  ;;  %6975 = vmatprep.subr.bf16.mxu0 %v6974_v56  ;;  %v7348_v53 = vpack.c.bf16 %v614_v45, %v602_v43  ;;  %v6990_v56 = vpack.c.bf16 %v637_v47, %v625_v46  ;;  %v660_v49 = vld [vmem:[#allocation2 + $0x1120] sm:$0xff]  ;;  %v698_v43 = vld [vmem:[#allocation2 + $0x1250] sm:$0xff]  ;;  %v721_v46 = vld [vmem:[#allocation2 + $0x1308] sm:$0xff] }
 0x389   :  { %7335 = vmatprep.subr.bf16.mxu1 %v7334_v61  ;;  %4179 = vmatprep.mubr.f32.mxu0 %v8197_v39  ;;  %v7350_v61 = vpack.c.bf16 %v639_v50, %v627_v48  ;;  %v696_v41 = vld [vmem:[#allocation2 + $0x1240] sm:$0xff]  ;;  %v710_v45 = vld [vmem:[#allocation2 + $0x12b0] sm:$0xff]  ;;  %v733_v47 = vld [vmem:[#allocation2 + $0x1368] sm:$0xff] }
 0x38a   :  { %4605 = vmatprep.mubr.f32.mxu1 %v8197_v39  ;;  %v7344_v39 = vpack.c.bf16 %v590_v31, %v578_v30  ;;  %v674_v30 = vld [vmem:[#allocation2 + $0x1190] sm:$0xff]  ;;  %v708_v42 = vld [vmem:[#allocation2 + $0x12a0] sm:$0xff]  ;;  %v723_v48 = vld [vmem:[#allocation2 + $0x1318] sm:$0xff] }
 0x38b   :  { %6977 = vmatpush1.bf16.msra.mxu0 %v6976_v10  ;;  %v6992_v10 = vpack.c.bf16 %v636_v59, %v624_v57  ;;  %v686_v31 = vld [vmem:[#allocation2 + $0x11f0] sm:$0xff]  ;;  %v735_v50 = vld [vmem:[#allocation2 + $0x1378] sm:$0xff]  ;;  %v720_v57 = vld [vmem:[#allocation2 + $0x1300] sm:$0xff] }
 0x38c   :  { %7337 = vmatpush1.bf16.msra.mxu1 %v7336_v12  ;;  %6979 = vmatprep.subr.bf16.mxu0 %v6978_v13  ;;  %v7352_v12 = vpack.c.bf16 %v638_v0, %v626_v60  ;;  %v6994_v13 = vpack.c.bf16 %v661_v5, %v649_v3  ;;  %v732_v59 = vld [vmem:[#allocation2 + $0x1360] sm:$0xff]  ;;  %v722_v60 = vld [vmem:[#allocation2 + $0x1310] sm:$0xff]  ;;  %v745_v3 = vld [vmem:[#allocation2 + $0x13c8] sm:$0xff] }
 0x38d   :  { %7339 = vmatprep.subr.bf16.mxu1 %v7338_v17  ;;  %v7354_v17 = vpack.c.bf16 %v663_v9, %v651_v7  ;;  %v734_v0 = vld [vmem:[#allocation2 + $0x1370] sm:$0xff]  ;;  %v757_v5 = vld [vmem:[#allocation2 + $0x1428] sm:$0xff]  ;;  %v747_v7 = vld [vmem:[#allocation2 + $0x13d8] sm:$0xff] }
 0x38e   :  { %v759_v9 = vld [vmem:[#allocation2 + $0x1438] sm:$0xff] }
 0x38f   :  { %6981 = vmatpush1.bf16.msra.mxu0 %v6980_v25  ;;  %v6996_v25 = vpack.c.bf16 %v660_v49, %v648_v14  ;;  %v744_v14 = vld [vmem:[#allocation2 + $0x13c0] sm:$0xff] }
 0x390   :  { %7341 = vmatpush1.bf16.msra.mxu1 %v7340_v24  ;;  %6983 = vmatprep.subr.bf16.mxu0 %v6982_v22  ;;  %v7356_v24 = vpack.c.bf16 %v662_v18, %v650_v16  ;;  %v6998_v22 = vpack.c.bf16 %v685_v20, %v673_v19  ;;  %v756_v49 = vld [vmem:[#allocation2 + $0x1420] sm:$0xff]  ;;  %v746_v16 = vld [vmem:[#allocation2 + $0x13d0] sm:$0xff]  ;;  %v769_v19 = vld [vmem:[#allocation2 + $0x1488] sm:$0xff] }
 0x391   :  { %7343 = vmatprep.subr.bf16.mxu1 %v7342_v32  ;;  %v7358_v32 = vpack.c.bf16 %v687_v23, %v675_v21  ;;  %v758_v18 = vld [vmem:[#allocation2 + $0x1430] sm:$0xff]  ;;  %v781_v20 = vld [vmem:[#allocation2 + $0x14e8] sm:$0xff]  ;;  %v771_v21 = vld [vmem:[#allocation2 + $0x1498] sm:$0xff] }
 0x392   :  { %v783_v23 = vld [vmem:[#allocation2 + $0x14f8] sm:$0xff] }
 0x393   :  { %6985 = vmatpush1.bf16.msra.mxu0 %v6984_v37  ;;  %v7000_v37 = vpack.c.bf16 %v684_v28, %v672_v27  ;;  %v768_v27 = vld [vmem:[#allocation2 + $0x1480] sm:$0xff] }
 0x394   :  { %7345 = vmatpush1.bf16.msra.mxu1 %v7344_v39  ;;  %6987 = vmatprep.subr.bf16.mxu0 %v6986_v40  ;;  %v7360_v39 = vpack.c.bf16 %v686_v31, %v674_v30  ;;  %v7002_v40 = vpack.c.bf16 %v709_v34, %v697_v33  ;;  %v780_v28 = vld [vmem:[#allocation2 + $0x14e0] sm:$0xff]  ;;  %v770_v30 = vld [vmem:[#allocation2 + $0x1490] sm:$0xff]  ;;  %v793_v33 = vld [vmem:[#allocation2 + $0x1548] sm:$0xff] }
 0x395   :  { %7347 = vmatprep.subr.bf16.mxu1 %v7346_v44  ;;  %v7362_v44 = vpack.c.bf16 %v711_v36, %v699_v35  ;;  %v782_v31 = vld [vmem:[#allocation2 + $0x14f0] sm:$0xff]  ;;  %v805_v34 = vld [vmem:[#allocation2 + $0x15a8] sm:$0xff]  ;;  %v795_v35 = vld [vmem:[#allocation2 + $0x1558] sm:$0xff] }
 0x396   :  { %v807_v36 = vld [vmem:[#allocation2 + $0x15b8] sm:$0xff] }
 0x397   :  { %6989 = vmatpush1.bf16.msra.mxu0 %v6988_v51  ;;  %v7004_v51 = vpack.c.bf16 %v708_v42, %v696_v41  ;;  %v792_v41 = vld [vmem:[#allocation2 + $0x1540] sm:$0xff] }
 0x398   :  { %7349 = vmatpush1.bf16.msra.mxu1 %v7348_v53  ;;  %6991 = vmatprep.subr.bf16.mxu0 %v6990_v56  ;;  %v7364_v53 = vpack.c.bf16 %v710_v45, %v698_v43  ;;  %v7006_v56 = vpack.c.bf16 %v733_v47, %v721_v46  ;;  %v804_v42 = vld [vmem:[#allocation2 + $0x15a0] sm:$0xff]  ;;  %v794_v43 = vld [vmem:[#allocation2 + $0x1550] sm:$0xff]  ;;  %v817_v46 = vld [vmem:[#allocation2 + $0x1608] sm:$0xff] }
 0x399   :  { %7351 = vmatprep.subr.bf16.mxu1 %v7350_v61  ;;  %v7366_v61 = vpack.c.bf16 %v735_v50, %v723_v48  ;;  %v806_v45 = vld [vmem:[#allocation2 + $0x15b0] sm:$0xff]  ;;  %v829_v47 = vld [vmem:[#allocation2 + $0x1668] sm:$0xff]  ;;  %v819_v48 = vld [vmem:[#allocation2 + $0x1618] sm:$0xff] }
 0x39a   :  { %v831_v50 = vld [vmem:[#allocation2 + $0x1678] sm:$0xff] }
 0x39b   :  { %6993 = vmatpush1.bf16.msra.mxu0 %v6992_v10  ;;  %v7008_v10 = vpack.c.bf16 %v732_v59, %v720_v57  ;;  %v816_v57 = vld [vmem:[#allocation2 + $0x1600] sm:$0xff] }
 0x39c   :  { %7353 = vmatpush1.bf16.msra.mxu1 %v7352_v12  ;;  %6995 = vmatprep.subr.bf16.mxu0 %v6994_v13  ;;  %v7368_v12 = vpack.c.bf16 %v734_v0, %v722_v60  ;;  %v7010_v13 = vpack.c.bf16 %v757_v5, %v745_v3  ;;  %v828_v59 = vld [vmem:[#allocation2 + $0x1660] sm:$0xff]  ;;  %v818_v60 = vld [vmem:[#allocation2 + $0x1610] sm:$0xff]  ;;  %v841_v3 = vld [vmem:[#allocation2 + $0x16c8] sm:$0xff] }
 0x39d   :  { %7355 = vmatprep.subr.bf16.mxu1 %v7354_v17  ;;  %v7370_v17 = vpack.c.bf16 %v759_v9, %v747_v7  ;;  %v830_v0 = vld [vmem:[#allocation2 + $0x1670] sm:$0xff]  ;;  %v853_v5 = vld [vmem:[#allocation2 + $0x1728] sm:$0xff]  ;;  %v843_v7 = vld [vmem:[#allocation2 + $0x16d8] sm:$0xff] }
 0x39e   :  { %v855_v9 = vld [vmem:[#allocation2 + $0x1738] sm:$0xff] }
 0x39f   :  { %6997 = vmatpush1.bf16.msra.mxu0 %v6996_v25  ;;  %v7012_v25 = vpack.c.bf16 %v756_v49, %v744_v14  ;;  %v840_v14 = vld [vmem:[#allocation2 + $0x16c0] sm:$0xff] }
 0x3a0   :  { %7357 = vmatpush1.bf16.msra.mxu1 %v7356_v24  ;;  %6999 = vmatprep.subr.bf16.mxu0 %v6998_v22  ;;  %v7372_v24 = vpack.c.bf16 %v758_v18, %v746_v16  ;;  %v7014_v22 = vpack.c.bf16 %v781_v20, %v769_v19  ;;  %v852_v49 = vld [vmem:[#allocation2 + $0x1720] sm:$0xff]  ;;  %v842_v16 = vld [vmem:[#allocation2 + $0x16d0] sm:$0xff]  ;;  %v865_v19 = vld [vmem:[#allocation2 + $0x1788] sm:$0xff] }
 0x3a1   :  { %7359 = vmatprep.subr.bf16.mxu1 %v7358_v32  ;;  %v7374_v32 = vpack.c.bf16 %v783_v23, %v771_v21  ;;  %v854_v18 = vld [vmem:[#allocation2 + $0x1730] sm:$0xff]  ;;  %v877_v20 = vld [vmem:[#allocation2 + $0x17e8] sm:$0xff]  ;;  %v867_v21 = vld [vmem:[#allocation2 + $0x1798] sm:$0xff] }
 0x3a2   :  { %v879_v23 = vld [vmem:[#allocation2 + $0x17f8] sm:$0xff] }
 0x3a3   :  { %7001 = vmatpush1.bf16.msra.mxu0 %v7000_v37  ;;  %v7016_v37 = vpack.c.bf16 %v780_v28, %v768_v27  ;;  %v864_v27 = vld [vmem:[#allocation2 + $0x1780] sm:$0xff] }
 0x3a4   :  { %7361 = vmatpush1.bf16.msra.mxu1 %v7360_v39  ;;  %7003 = vmatprep.subr.bf16.mxu0 %v7002_v40  ;;  %v7376_v39 = vpack.c.bf16 %v782_v31, %v770_v30  ;;  %v7018_v40 = vpack.c.bf16 %v805_v34, %v793_v33  ;;  %v876_v28 = vld [vmem:[#allocation2 + $0x17e0] sm:$0xff]  ;;  %v866_v30 = vld [vmem:[#allocation2 + $0x1790] sm:$0xff]  ;;  %v889_v33 = vld [vmem:[#allocation2 + $0x1848] sm:$0xff] }
 0x3a5   :  { %7363 = vmatprep.subr.bf16.mxu1 %v7362_v44  ;;  %v7378_v44 = vpack.c.bf16 %v807_v36, %v795_v35  ;;  %v878_v31 = vld [vmem:[#allocation2 + $0x17f0] sm:$0xff]  ;;  %v901_v34 = vld [vmem:[#allocation2 + $0x18a8] sm:$0xff]  ;;  %v891_v35 = vld [vmem:[#allocation2 + $0x1858] sm:$0xff] }
 0x3a6   :  { %v903_v36 = vld [vmem:[#allocation2 + $0x18b8] sm:$0xff] }
 0x3a7   :  { %7005 = vmatpush1.bf16.msra.mxu0 %v7004_v51  ;;  %v7020_v51 = vpack.c.bf16 %v804_v42, %v792_v41  ;;  %v888_v41 = vld [vmem:[#allocation2 + $0x1840] sm:$0xff] }
 0x3a8   :  { %7365 = vmatpush1.bf16.msra.mxu1 %v7364_v53  ;;  %7007 = vmatprep.subr.bf16.mxu0 %v7006_v56  ;;  %v7380_v53 = vpack.c.bf16 %v806_v45, %v794_v43  ;;  %v7022_v56 = vpack.c.bf16 %v829_v47, %v817_v46  ;;  %v900_v42 = vld [vmem:[#allocation2 + $0x18a0] sm:$0xff]  ;;  %v890_v43 = vld [vmem:[#allocation2 + $0x1850] sm:$0xff]  ;;  %v913_v46 = vld [vmem:[#allocation2 + $0x1908] sm:$0xff] }
 0x3a9   :  { %7367 = vmatprep.subr.bf16.mxu1 %v7366_v61  ;;  %v7382_v61 = vpack.c.bf16 %v831_v50, %v819_v48  ;;  %v902_v45 = vld [vmem:[#allocation2 + $0x18b0] sm:$0xff]  ;;  %v925_v47 = vld [vmem:[#allocation2 + $0x1968] sm:$0xff]  ;;  %v915_v48 = vld [vmem:[#allocation2 + $0x1918] sm:$0xff] }
 0x3aa   :  { %v927_v50 = vld [vmem:[#allocation2 + $0x1978] sm:$0xff] }
 0x3ab   :  { %7009 = vmatpush1.bf16.msra.mxu0 %v7008_v10  ;;  %v7024_v10 = vpack.c.bf16 %v828_v59, %v816_v57  ;;  %v912_v57 = vld [vmem:[#allocation2 + $0x1900] sm:$0xff] }
 0x3ac   :  { %7369 = vmatpush1.bf16.msra.mxu1 %v7368_v12  ;;  %7011 = vmatprep.subr.bf16.mxu0 %v7010_v13  ;;  %v7384_v12 = vpack.c.bf16 %v830_v0, %v818_v60  ;;  %v7026_v13 = vpack.c.bf16 %v853_v5, %v841_v3  ;;  %v924_v59 = vld [vmem:[#allocation2 + $0x1960] sm:$0xff]  ;;  %v914_v60 = vld [vmem:[#allocation2 + $0x1910] sm:$0xff]  ;;  %v937_v3 = vld [vmem:[#allocation2 + $0x19c8] sm:$0xff] }
 0x3ad   :  { %7371 = vmatprep.subr.bf16.mxu1 %v7370_v17  ;;  %v7386_v17 = vpack.c.bf16 %v855_v9, %v843_v7  ;;  %v926_v0 = vld [vmem:[#allocation2 + $0x1970] sm:$0xff]  ;;  %v949_v5 = vld [vmem:[#allocation2 + $0x1a28] sm:$0xff]  ;;  %v939_v7 = vld [vmem:[#allocation2 + $0x19d8] sm:$0xff] }
 0x3ae   :  { %v951_v9 = vld [vmem:[#allocation2 + $0x1a38] sm:$0xff] }
 0x3af   :  { %7013 = vmatpush1.bf16.msra.mxu0 %v7012_v25  ;;  %v7028_v25 = vpack.c.bf16 %v852_v49, %v840_v14  ;;  %v936_v14 = vld [vmem:[#allocation2 + $0x19c0] sm:$0xff] }
 0x3b0   :  { %7373 = vmatpush1.bf16.msra.mxu1 %v7372_v24  ;;  %7015 = vmatprep.subr.bf16.mxu0 %v7014_v22  ;;  %v7388_v24 = vpack.c.bf16 %v854_v18, %v842_v16  ;;  %v7030_v22 = vpack.c.bf16 %v877_v20, %v865_v19  ;;  %v948_v49 = vld [vmem:[#allocation2 + $0x1a20] sm:$0xff]  ;;  %v938_v16 = vld [vmem:[#allocation2 + $0x19d0] sm:$0xff]  ;;  %v961_v19 = vld [vmem:[#allocation2 + $0x1a88] sm:$0xff] }
 0x3b1   :  { %7375 = vmatprep.subr.bf16.mxu1 %v7374_v32  ;;  %v7390_v32 = vpack.c.bf16 %v879_v23, %v867_v21  ;;  %v950_v18 = vld [vmem:[#allocation2 + $0x1a30] sm:$0xff]  ;;  %v973_v20 = vld [vmem:[#allocation2 + $0x1ae8] sm:$0xff]  ;;  %v963_v21 = vld [vmem:[#allocation2 + $0x1a98] sm:$0xff] }
 0x3b2   :  { %v975_v23 = vld [vmem:[#allocation2 + $0x1af8] sm:$0xff] }
 0x3b3   :  { %7017 = vmatpush1.bf16.msra.mxu0 %v7016_v37  ;;  %v7032_v37 = vpack.c.bf16 %v876_v28, %v864_v27  ;;  %v972_v27 = vld [vmem:[#allocation2 + $0x1ae0] sm:$0xff]  ;;  %v962_v28 = vld [vmem:[#allocation2 + $0x1a90] sm:$0xff] }
 0x3b4   :  { %7377 = vmatpush1.bf16.msra.mxu1 %v7376_v39  ;;  %7019 = vmatprep.subr.bf16.mxu0 %v7018_v40  ;;  %v7392_v39 = vpack.c.bf16 %v878_v31, %v866_v30  ;;  %v7034_v40 = vpack.c.bf16 %v901_v34, %v889_v33  ;;  %v7406_v30 = vpack.c.bf16 %v975_v23, %v963_v21  ;;  %v985_v31 = vld [vmem:[#allocation2 + $0x1b48] sm:$0xff]  ;;  %v987_v34 = vld [vmem:[#allocation2 + $0x1b58] sm:$0xff] }
 0x3b5   :  { %7379 = vmatprep.subr.bf16.mxu1 %v7378_v44  ;;  %v7394_v44 = vpack.c.bf16 %v903_v36, %v891_v35  ;;  %v997_v33 = vld [vmem:[#allocation2 + $0x1ba8] sm:$0xff]  ;;  %v999_v35 = vld [vmem:[#allocation2 + $0x1bb8] sm:$0xff] }
 0x3b7   :  { %7021 = vmatpush1.bf16.msra.mxu0 %v7020_v51  ;;  %v7036_v51 = vpack.c.bf16 %v900_v42, %v888_v41  ;;  %v986_v41 = vld [vmem:[#allocation2 + $0x1b50] sm:$0xff]  ;;  %v7410_v42 = vpack.c.bf16 %v999_v35, %v987_v34 }
 0x3b8   :  { %7381 = vmatpush1.bf16.msra.mxu1 %v7380_v53  ;;  %7023 = vmatprep.subr.bf16.mxu0 %v7022_v56  ;;  %v7396_v53 = vpack.c.bf16 %v902_v45, %v890_v43  ;;  %v7038_v56 = vpack.c.bf16 %v925_v47, %v913_v46  ;;  %v998_v43 = vld [vmem:[#allocation2 + $0x1bb0] sm:$0xff]  ;;  %v1021_v45 = vld [vmem:[#allocation2 + $0x1c68] sm:$0xff]  ;;  %v1011_v46 = vld [vmem:[#allocation2 + $0x1c18] sm:$0xff] }
 0x3b9   :  { %7383 = vmatprep.subr.bf16.mxu1 %v7382_v61  ;;  %v7398_v61 = vpack.c.bf16 %v927_v50, %v915_v48  ;;  %v1023_v47 = vld [vmem:[#allocation2 + $0x1c78] sm:$0xff]  ;;  %v7412_v50 = vpack.c.bf16 %v998_v43, %v986_v41  ;;  %v1094_v41 = vld [vmem:[#allocation2 + $0x1eb0] sm:$0xff]  ;;  %v1117_v43 = vld [vmem:[#allocation2 + $0x1f68] sm:$0xff] }
 0x3bb   :  { %7025 = vmatpush1.bf16.msra.mxu0 %v7024_v10  ;;  %v7040_v10 = vpack.c.bf16 %v924_v59, %v912_v57  ;;  %v1010_v57 = vld [vmem:[#allocation2 + $0x1c10] sm:$0xff]  ;;  %v7414_v59 = vpack.c.bf16 %v1023_v47, %v1011_v46 }
 0x3bc   :  { %7385 = vmatpush1.bf16.msra.mxu1 %v7384_v12  ;;  %7027 = vmatprep.subr.bf16.mxu0 %v7026_v13  ;;  %v7400_v12 = vpack.c.bf16 %v926_v0, %v914_v60  ;;  %v7042_v13 = vpack.c.bf16 %v949_v5, %v937_v3  ;;  %v1022_v60 = vld [vmem:[#allocation2 + $0x1c70] sm:$0xff]  ;;  %v1045_v0 = vld [vmem:[#allocation2 + $0x1d28] sm:$0xff]  ;;  %v1035_v3 = vld [vmem:[#allocation2 + $0x1cd8] sm:$0xff] }
 0x3bd   :  { %7387 = vmatprep.subr.bf16.mxu1 %v7386_v17  ;;  %v7402_v17 = vpack.c.bf16 %v951_v9, %v939_v7  ;;  %v1047_v5 = vld [vmem:[#allocation2 + $0x1d38] sm:$0xff]  ;;  %v7416_v9 = vpack.c.bf16 %v1022_v60, %v1010_v57  ;;  %v1118_v57 = vld [vmem:[#allocation2 + $0x1f70] sm:$0xff]  ;;  %v1141_v60 = vld [vmem:[#allocation2 + $0x2028] sm:$0xff] }
 0x3bf   :  { %7029 = vmatpush1.bf16.msra.mxu0 %v7028_v25  ;;  %v7404_v25 = vpack.c.bf16 %v950_v18, %v938_v16  ;;  %v1046_v16 = vld [vmem:[#allocation2 + $0x1d30] sm:$0xff]  ;;  %v1069_v18 = vld [vmem:[#allocation2 + $0x1de8] sm:$0xff] }
 0x3c0   :  { %7389 = vmatpush1.bf16.msra.mxu1 %v7388_v24  ;;  %7031 = vmatprep.subr.bf16.mxu0 %v7030_v22  ;;  %v7046_v24 = vpack.c.bf16 %v973_v20, %v961_v19  ;;  %v960_v22 = vld [vmem:[#allocation2 + $0x1a80] sm:$0xff]  ;;  %v1059_v19 = vld [vmem:[#allocation2 + $0x1d98] sm:$0xff] }
 0x3c1   :  { %7391 = vmatprep.subr.bf16.mxu1 %v7390_v32  ;;  %v974_v32 = vld [vmem:[#allocation2 + $0x1af0] sm:$0xff]  ;;  %v7048_v36 = vpack.c.bf16 %v972_v27, %v960_v22  ;;  %v1071_v20 = vld [vmem:[#allocation2 + $0x1df8] sm:$0xff] }
 0x3c2   :  { %v1058_v22 = vld [vmem:[#allocation2 + $0x1d90] sm:$0xff]  ;;  %v7422_v27 = vpack.c.bf16 %v1071_v20, %v1059_v19 }
 0x3c3   :  { %7033 = vmatpush1.bf16.msra.mxu0 %v7032_v37  ;;  %v7050_v37 = vpack.c.bf16 %v997_v33, %v985_v31  ;;  %v1083_v31 = vld [vmem:[#allocation2 + $0x1e58] sm:$0xff] }
 0x3c4   :  { %7393 = vmatpush1.bf16.msra.mxu1 %v7392_v39  ;;  %7035 = vmatprep.subr.bf16.mxu0 %v7034_v40  ;;  %v984_v39 = vld [vmem:[#allocation2 + $0x1b40] sm:$0xff]  ;;  %v1095_v33 = vld [vmem:[#allocation2 + $0x1eb8] sm:$0xff] }
 0x3c5   :  { %7395 = vmatprep.subr.bf16.mxu1 %v7394_v44  ;;  %v996_v40 = vld [vmem:[#allocation2 + $0x1ba0] sm:$0xff]  ;;  %v1009_v44 = vld [vmem:[#allocation2 + $0x1c08] sm:$0xff] }
 0x3c6   :  { %4180 = vmatmul.mubr.f32.vlgmr.msra.gmra.mrb[4].mxu0 %v8193_v26  ;;  %v7052_v48 = vpack.c.bf16 %v996_v40, %v984_v39  ;;  %v1082_v39 = vld [vmem:[#allocation2 + $0x1e50] sm:$0xff]  ;;  %v7426_v40 = vpack.c.bf16 %v1095_v33, %v1083_v31 }
 0x3c7   :  { %7037 = vmatpush1.bf16.msra.mxu0 %v7036_v51  ;;  %4606 = vmatmul.mubr.f32.vlgmr.msra.gmra.mrb[4].mxu1 %v8193_v26  ;;  %v7044_v26 = vpack.c.bf16 %v948_v49, %v936_v14  ;;  %v7054_v51 = vpack.c.bf16 %v1021_v45, %v1009_v44  ;;  %v1034_v14 = vld [vmem:[#allocation2 + $0x1cd0] sm:$0xff]  ;;  %v7418_v49 = vpack.c.bf16 %v1047_v5, %v1035_v3  ;;  %v1107_v44 = vld [vmem:[#allocation2 + $0x1f18] sm:$0xff] }
 0x3c8   :  { %7397 = vmatpush1.bf16.msra.mxu1 %v7396_v53  ;;  %7039 = vmatprep.subr.bf16.mxu0 %v7038_v56  ;;  %v1008_v53 = vld [vmem:[#allocation2 + $0x1c00] sm:$0xff]  ;;  %v7420_v23 = vpack.c.bf16 %v1046_v16, %v1034_v14  ;;  %v1119_v45 = vld [vmem:[#allocation2 + $0x1f78] sm:$0xff]  ;;  %v7428_v47 = vpack.c.bf16 %v1094_v41, %v1082_v39  ;;  %v1142_v14 = vld [vmem:[#allocation2 + $0x2030] sm:$0xff] }
 0x3c9   :  { %7399 = vmatprep.subr.bf16.mxu1 %v7398_v61  ;;  %4250 = vmatprep.mubr.f32.mxu0 %v8215_v63  ;;  %v1020_v56 = vld [vmem:[#allocation2 + $0x1c60] sm:$0xff]  ;;  %v1033_v61 = vld [vmem:[#allocation2 + $0x1cc8] sm:$0xff]  ;;  %v1190_v39 = vld [vmem:[#allocation2 + $0x21b0] sm:$0xff] }
 0x3ca   :  { %4676 = vmatprep.mubr.f32.mxu1 %v8215_v63  ;;  %v7408_v63 = vpack.c.bf16 %v974_v32, %v962_v28  ;;  %v7056_v7 = vpack.c.bf16 %v1020_v56, %v1008_v53  ;;  %v1070_v28 = vld [vmem:[#allocation2 + $0x1df0] sm:$0xff]  ;;  %v1093_v32 = vld [vmem:[#allocation2 + $0x1ea8] sm:$0xff]  ;;  %v7430_v56 = vpack.c.bf16 %v1119_v45, %v1107_v44 }
 0x3cb   :  { %7041 = vmatpush1.bf16.msra.mxu0 %v7040_v10  ;;  %v7058_v10 = vpack.c.bf16 %v1045_v0, %v1033_v61  ;;  %v7424_v35 = vpack.c.bf16 %v1070_v28, %v1058_v22  ;;  %v1106_v53 = vld [vmem:[#allocation2 + $0x1f10] sm:$0xff]  ;;  %v1131_v61 = vld [vmem:[#allocation2 + $0x1fd8] sm:$0xff]  ;;  %v1165_v16 = vld [vmem:[#allocation2 + $0x20e8] sm:$0xff] }
 0x3cc   :  { %7401 = vmatpush1.bf16.msra.mxu1 %v7400_v12  ;;  %7043 = vmatprep.subr.bf16.mxu0 %v7042_v13  ;;  %v1032_v12 = vld [vmem:[#allocation2 + $0x1cc0] sm:$0xff]  ;;  %v1143_v0 = vld [vmem:[#allocation2 + $0x2038] sm:$0xff]  ;;  %v7432_v5 = vpack.c.bf16 %v1118_v57, %v1106_v53  ;;  %v1166_v22 = vld [vmem:[#allocation2 + $0x20f0] sm:$0xff] }
 0x3cd   :  { %7403 = vmatprep.subr.bf16.mxu1 %v7402_v17  ;;  %v1044_v13 = vld [vmem:[#allocation2 + $0x1d20] sm:$0xff]  ;;  %v1057_v17 = vld [vmem:[#allocation2 + $0x1d88] sm:$0xff]  ;;  %v1214_v53 = vld [vmem:[#allocation2 + $0x2270] sm:$0xff] }
 0x3ce   :  { %v7060_v21 = vpack.c.bf16 %v1044_v13, %v1032_v12  ;;  %v1130_v12 = vld [vmem:[#allocation2 + $0x1fd0] sm:$0xff]  ;;  %v7434_v13 = vpack.c.bf16 %v1143_v0, %v1131_v61  ;;  %v1189_v28 = vld [vmem:[#allocation2 + $0x21a8] sm:$0xff] }
 0x3cf   :  { %7045 = vmatpush1.bf16.msra.mxu0 %v7044_v26  ;;  %v7062_v26 = vpack.c.bf16 %v1069_v18, %v1057_v17  ;;  %v1155_v17 = vld [vmem:[#allocation2 + $0x2098] sm:$0xff]  ;;  %v7436_v20 = vpack.c.bf16 %v1142_v14, %v1130_v12  ;;  %v1213_v41 = vld [vmem:[#allocation2 + $0x2268] sm:$0xff]  ;;  %v1238_v12 = vld [vmem:[#allocation2 + $0x2330] sm:$0xff] }
 0x3d0   :  { %7405 = vmatpush1.bf16.msra.mxu1 %v7404_v25  ;;  %7047 = vmatprep.subr.bf16.mxu0 %v7046_v24  ;;  %v1056_v25 = vld [vmem:[#allocation2 + $0x1d80] sm:$0xff]  ;;  %v1167_v18 = vld [vmem:[#allocation2 + $0x20f8] sm:$0xff]  ;;  %v1237_v57 = vld [vmem:[#allocation2 + $0x2328] sm:$0xff] }
 0x3d1   :  { %7407 = vmatprep.subr.bf16.mxu1 %v7406_v30  ;;  %v1068_v24 = vld [vmem:[#allocation2 + $0x1de0] sm:$0xff]  ;;  %v1081_v30 = vld [vmem:[#allocation2 + $0x1e48] sm:$0xff] }
 0x3d2   :  { %v7064_v34 = vpack.c.bf16 %v1068_v24, %v1056_v25  ;;  %v1154_v25 = vld [vmem:[#allocation2 + $0x2090] sm:$0xff]  ;;  %v7438_v24 = vpack.c.bf16 %v1167_v18, %v1155_v17  ;;  %v1261_v14 = vld [vmem:[#allocation2 + $0x23e8] sm:$0xff] }
 0x3d3   :  { %7049 = vmatpush1.bf16.msra.mxu0 %v7048_v36  ;;  %v7066_v36 = vpack.c.bf16 %v1093_v32, %v1081_v30  ;;  %v1179_v30 = vld [vmem:[#allocation2 + $0x2158] sm:$0xff]  ;;  %v7440_v33 = vpack.c.bf16 %v1166_v22, %v1154_v25  ;;  %v1262_v25 = vld [vmem:[#allocation2 + $0x23f0] sm:$0xff]  ;;  %v1285_v22 = vld [vmem:[#allocation2 + $0x24a8] sm:$0xff] }
 0x3d4   :  { %7409 = vmatpush1.bf16.msra.mxu1 %v7408_v63  ;;  %7051 = vmatprep.subr.bf16.mxu0 %v7050_v37  ;;  %v1080_v63 = vld [vmem:[#allocation2 + $0x1e40] sm:$0xff]  ;;  %v1191_v32 = vld [vmem:[#allocation2 + $0x21b8] sm:$0xff] }
 0x3d5   :  { %7411 = vmatprep.subr.bf16.mxu1 %v7410_v42  ;;  %v1092_v37 = vld [vmem:[#allocation2 + $0x1ea0] sm:$0xff]  ;;  %v1105_v42 = vld [vmem:[#allocation2 + $0x1f08] sm:$0xff] }
 0x3d6   :  { %v7068_v46 = vpack.c.bf16 %v1092_v37, %v1080_v63  ;;  %v1178_v63 = vld [vmem:[#allocation2 + $0x2150] sm:$0xff]  ;;  %v7442_v37 = vpack.c.bf16 %v1191_v32, %v1179_v30 }
 0x3d7   :  { %7053 = vmatpush1.bf16.msra.mxu0 %v7052_v48  ;;  %v7070_v48 = vpack.c.bf16 %v1117_v43, %v1105_v42  ;;  %v1203_v42 = vld [vmem:[#allocation2 + $0x2218] sm:$0xff]  ;;  %v7444_v45 = vpack.c.bf16 %v1190_v39, %v1178_v63  ;;  %v1286_v63 = vld [vmem:[#allocation2 + $0x24b0] sm:$0xff]  ;;  %v1309_v39 = vld [vmem:[#allocation2 + $0x2568] sm:$0xff] }
 0x3d8   :  { %7413 = vmatpush1.bf16.msra.mxu1 %v7412_v50  ;;  %7055 = vmatprep.subr.bf16.mxu0 %v7054_v51  ;;  %v1104_v50 = vld [vmem:[#allocation2 + $0x1f00] sm:$0xff]  ;;  %v1215_v43 = vld [vmem:[#allocation2 + $0x2278] sm:$0xff] }
 0x3d9   :  { %7415 = vmatprep.subr.bf16.mxu1 %v7414_v59  ;;  %v1116_v51 = vld [vmem:[#allocation2 + $0x1f60] sm:$0xff]  ;;  %v1129_v59 = vld [vmem:[#allocation2 + $0x1fc8] sm:$0xff] }
 0x3da   :  { %v7072_v3 = vpack.c.bf16 %v1116_v51, %v1104_v50  ;;  %v1202_v50 = vld [vmem:[#allocation2 + $0x2210] sm:$0xff]  ;;  %v7446_v51 = vpack.c.bf16 %v1215_v43, %v1203_v42 }
 0x3db   :  { %7057 = vmatpush1.bf16.msra.mxu0 %v7056_v7  ;;  %v7074_v7 = vpack.c.bf16 %v1141_v60, %v1129_v59  ;;  %v1227_v59 = vld [vmem:[#allocation2 + $0x22d8] sm:$0xff]  ;;  %v7448_v0 = vpack.c.bf16 %v1214_v53, %v1202_v50  ;;  %v1310_v50 = vld [vmem:[#allocation2 + $0x2570] sm:$0xff]  ;;  %v1333_v53 = vld [vmem:[#allocation2 + $0x2628] sm:$0xff] }
 0x3dc   :  { %7417 = vmatpush1.bf16.msra.mxu1 %v7416_v9  ;;  %7059 = vmatprep.subr.bf16.mxu0 %v7058_v10  ;;  %v1128_v9 = vld [vmem:[#allocation2 + $0x1fc0] sm:$0xff]  ;;  %v1239_v60 = vld [vmem:[#allocation2 + $0x2338] sm:$0xff] }
 0x3dd   :  { %7419 = vmatprep.subr.bf16.mxu1 %v7418_v49  ;;  %v1140_v10 = vld [vmem:[#allocation2 + $0x2020] sm:$0xff]  ;;  %v1153_v49 = vld [vmem:[#allocation2 + $0x2088] sm:$0xff] }
 0x3de   :  { %v7076_v19 = vpack.c.bf16 %v1140_v10, %v1128_v9  ;;  %v1226_v9 = vld [vmem:[#allocation2 + $0x22d0] sm:$0xff]  ;;  %v7450_v10 = vpack.c.bf16 %v1239_v60, %v1227_v59 }
 0x3df   :  { %7061 = vmatpush1.bf16.msra.mxu0 %v7060_v21  ;;  %v7078_v21 = vpack.c.bf16 %v1165_v16, %v1153_v49  ;;  %v1251_v49 = vld [vmem:[#allocation2 + $0x2398] sm:$0xff]  ;;  %v7452_v18 = vpack.c.bf16 %v1238_v12, %v1226_v9  ;;  %v1334_v9 = vld [vmem:[#allocation2 + $0x2630] sm:$0xff]  ;;  %v1357_v12 = vld [vmem:[#allocation2 + $0x26e8] sm:$0xff] }
 0x3e0   :  { %7421 = vmatpush1.bf16.msra.mxu1 %v7420_v23  ;;  %7063 = vmatprep.subr.bf16.mxu0 %v7062_v26  ;;  %v1152_v23 = vld [vmem:[#allocation2 + $0x2080] sm:$0xff]  ;;  %v1263_v16 = vld [vmem:[#allocation2 + $0x23f8] sm:$0xff] }
 0x3e1   :  { %7423 = vmatprep.subr.bf16.mxu1 %v7422_v27  ;;  %v1164_v26 = vld [vmem:[#allocation2 + $0x20e0] sm:$0xff]  ;;  %v1177_v27 = vld [vmem:[#allocation2 + $0x2148] sm:$0xff] }
 0x3e2   :  { %v7080_v31 = vpack.c.bf16 %v1164_v26, %v1152_v23  ;;  %v1250_v23 = vld [vmem:[#allocation2 + $0x2390] sm:$0xff]  ;;  %v7454_v26 = vpack.c.bf16 %v1263_v16, %v1251_v49 }
 0x3e3   :  { %7065 = vmatpush1.bf16.msra.mxu0 %v7064_v34  ;;  %v7082_v34 = vpack.c.bf16 %v1189_v28, %v1177_v27  ;;  %v1275_v27 = vld [vmem:[#allocation2 + $0x2458] sm:$0xff]  ;;  %v7456_v32 = vpack.c.bf16 %v1262_v25, %v1250_v23  ;;  %v1369_v23 = vld [vmem:[#allocation2 + $0x2748] sm:$0xff] }
 0x3e4   :  { %7425 = vmatpush1.bf16.msra.mxu1 %v7424_v35  ;;  %7067 = vmatprep.subr.bf16.mxu0 %v7066_v36  ;;  %v1176_v35 = vld [vmem:[#allocation2 + $0x2140] sm:$0xff]  ;;  %v1287_v28 = vld [vmem:[#allocation2 + $0x24b8] sm:$0xff] }
 0x3e5   :  { %7427 = vmatprep.subr.bf16.mxu1 %v7426_v40  ;;  %v1188_v36 = vld [vmem:[#allocation2 + $0x21a0] sm:$0xff]  ;;  %v1201_v40 = vld [vmem:[#allocation2 + $0x2208] sm:$0xff]  ;;  %v1371_v25 = vld [vmem:[#allocation2 + $0x2758] sm:$0xff] }
 0x3e6   :  { %v7084_v44 = vpack.c.bf16 %v1188_v36, %v1176_v35  ;;  %v1274_v35 = vld [vmem:[#allocation2 + $0x2450] sm:$0xff]  ;;  %v7458_v36 = vpack.c.bf16 %v1287_v28, %v1275_v27  ;;  %v1368_v28 = vld [vmem:[#allocation2 + $0x2740] sm:$0xff] }
 0x3e7   :  { %7069 = vmatpush1.bf16.msra.mxu0 %v7068_v46  ;;  %v7086_v46 = vpack.c.bf16 %v1213_v41, %v1201_v40  ;;  %v1299_v40 = vld [vmem:[#allocation2 + $0x2518] sm:$0xff]  ;;  %v7460_v43 = vpack.c.bf16 %v1286_v63, %v1274_v35  ;;  %v1405_v35 = vld [vmem:[#allocation2 + $0x2868] sm:$0xff] }
 0x3e8   :  { %7429 = vmatpush1.bf16.msra.mxu1 %v7428_v47  ;;  %7071 = vmatprep.subr.bf16.mxu0 %v7070_v48  ;;  %v1200_v47 = vld [vmem:[#allocation2 + $0x2200] sm:$0xff]  ;;  %v1311_v41 = vld [vmem:[#allocation2 + $0x2578] sm:$0xff] }
 0x3e9   :  { %7431 = vmatprep.subr.bf16.mxu1 %v7430_v56  ;;  %v1212_v48 = vld [vmem:[#allocation2 + $0x2260] sm:$0xff]  ;;  %v1225_v56 = vld [vmem:[#allocation2 + $0x22c8] sm:$0xff]  ;;  %v1407_v63 = vld [vmem:[#allocation2 + $0x2878] sm:$0xff] }
 0x3ea   :  { %v7088_v61 = vpack.c.bf16 %v1212_v48, %v1200_v47  ;;  %v1298_v47 = vld [vmem:[#allocation2 + $0x2510] sm:$0xff]  ;;  %v7462_v48 = vpack.c.bf16 %v1311_v41, %v1299_v40  ;;  %v1392_v41 = vld [vmem:[#allocation2 + $0x2800] sm:$0xff] }
 0x3eb   :  { %7073 = vmatpush1.bf16.msra.mxu0 %v7072_v3  ;;  %v7090_v3 = vpack.c.bf16 %v1237_v57, %v1225_v56  ;;  %v1323_v56 = vld [vmem:[#allocation2 + $0x25d8] sm:$0xff]  ;;  %v7464_v60 = vpack.c.bf16 %v1310_v50, %v1298_v47  ;;  %v1429_v47 = vld [vmem:[#allocation2 + $0x2928] sm:$0xff] }
 0x3ec   :  { %7433 = vmatpush1.bf16.msra.mxu1 %v7432_v5  ;;  %7075 = vmatprep.subr.bf16.mxu0 %v7074_v7  ;;  %v1224_v5 = vld [vmem:[#allocation2 + $0x22c0] sm:$0xff]  ;;  %v1335_v57 = vld [vmem:[#allocation2 + $0x2638] sm:$0xff] }
 0x3ed   :  { %7435 = vmatprep.subr.bf16.mxu1 %v7434_v13  ;;  %v1236_v7 = vld [vmem:[#allocation2 + $0x2320] sm:$0xff]  ;;  %v1249_v13 = vld [vmem:[#allocation2 + $0x2388] sm:$0xff]  ;;  %v1431_v50 = vld [vmem:[#allocation2 + $0x2938] sm:$0xff] }
 0x3ee   :  { %v7092_v17 = vpack.c.bf16 %v1236_v7, %v1224_v5  ;;  %v1322_v5 = vld [vmem:[#allocation2 + $0x25d0] sm:$0xff]  ;;  %v7466_v7 = vpack.c.bf16 %v1335_v57, %v1323_v56  ;;  %v1416_v57 = vld [vmem:[#allocation2 + $0x28c0] sm:$0xff] }
 0x3ef   :  { %7077 = vmatpush1.bf16.msra.mxu0 %v7076_v19  ;;  %v7094_v19 = vpack.c.bf16 %v1261_v14, %v1249_v13  ;;  %v1347_v13 = vld [vmem:[#allocation2 + $0x2698] sm:$0xff]  ;;  %v7468_v49 = vpack.c.bf16 %v1334_v9, %v1322_v5  ;;  %v1441_v5 = vld [vmem:[#allocation2 + $0x2988] sm:$0xff] }
 0x3f0   :  { %7437 = vmatpush1.bf16.msra.mxu1 %v7436_v20  ;;  %7079 = vmatprep.subr.bf16.mxu0 %v7078_v21  ;;  %v1248_v20 = vld [vmem:[#allocation2 + $0x2380] sm:$0xff]  ;;  %v1359_v14 = vld [vmem:[#allocation2 + $0x26f8] sm:$0xff] }
 0x3f1   :  { %7439 = vmatprep.subr.bf16.mxu1 %v7438_v24  ;;  %v1260_v21 = vld [vmem:[#allocation2 + $0x23e0] sm:$0xff]  ;;  %v1273_v24 = vld [vmem:[#allocation2 + $0x2448] sm:$0xff] }
 0x3f2   :  { %v7096_v30 = vpack.c.bf16 %v1260_v21, %v1248_v20  ;;  %v7470_v20 = vpack.c.bf16 %v1359_v14, %v1347_v13  ;;  %v1358_v21 = vld [vmem:[#allocation2 + $0x26f0] sm:$0xff]  ;;  %v1443_v13 = vld [vmem:[#allocation2 + $0x2998] sm:$0xff] }
 0x3f3   :  { %7081 = vmatpush1.bf16.msra.mxu0 %v7080_v31  ;;  %v7098_v31 = vpack.c.bf16 %v1285_v22, %v1273_v24  ;;  %v1383_v24 = vld [vmem:[#allocation2 + $0x27b8] sm:$0xff] }
 0x3f4   :  { %7441 = vmatpush1.bf16.msra.mxu1 %v7440_v33  ;;  %7083 = vmatprep.subr.bf16.mxu0 %v7082_v34  ;;  %v1272_v33 = vld [vmem:[#allocation2 + $0x2440] sm:$0xff]  ;;  %v1455_v14 = vld [vmem:[#allocation2 + $0x29f8] sm:$0xff] }
 0x3f5   :  { %7443 = vmatprep.subr.bf16.mxu1 %v7442_v37  ;;  %v1284_v34 = vld [vmem:[#allocation2 + $0x24a0] sm:$0xff]  ;;  %v1297_v37 = vld [vmem:[#allocation2 + $0x2508] sm:$0xff] }
 0x3f6   :  { %v7100_v42 = vpack.c.bf16 %v1284_v34, %v1272_v33  ;;  %v1382_v33 = vld [vmem:[#allocation2 + $0x27b0] sm:$0xff]  ;;  %v1393_v34 = vld [vmem:[#allocation2 + $0x2808] sm:$0xff] }
 0x3f7   :  { %7085 = vmatpush1.bf16.msra.mxu0 %v7084_v44  ;;  %v7102_v44 = vpack.c.bf16 %v1309_v39, %v1297_v37  ;;  %v7118_v40 = vpack.c.bf16 %v1405_v35, %v1393_v34  ;;  %v1478_v35 = vld [vmem:[#allocation2 + $0x2ab0] sm:$0xff] }
 0x3f8   :  { %7445 = vmatpush1.bf16.msra.mxu1 %v7444_v45  ;;  %7087 = vmatprep.subr.bf16.mxu0 %v7086_v46  ;;  %v1296_v45 = vld [vmem:[#allocation2 + $0x2500] sm:$0xff] }
 0x3f9   :  { %7447 = vmatprep.subr.bf16.mxu1 %v7446_v51  ;;  %v1308_v46 = vld [vmem:[#allocation2 + $0x2560] sm:$0xff]  ;;  %v1321_v51 = vld [vmem:[#allocation2 + $0x25c8] sm:$0xff] }
 0x3fa   :  { %v7104_v59 = vpack.c.bf16 %v1308_v46, %v1296_v45  ;;  %v1406_v45 = vld [vmem:[#allocation2 + $0x2870] sm:$0xff]  ;;  %v1417_v46 = vld [vmem:[#allocation2 + $0x28c8] sm:$0xff] }
 0x3fb   :  { %7089 = vmatpush1.bf16.msra.mxu0 %v7088_v61  ;;  %v7106_v61 = vpack.c.bf16 %v1333_v53, %v1321_v51  ;;  %v7122_v56 = vpack.c.bf16 %v1429_v47, %v1417_v46  ;;  %v1502_v47 = vld [vmem:[#allocation2 + $0x2b70] sm:$0xff] }
 0x3fc   :  { %7449 = vmatpush1.bf16.msra.mxu1 %v7448_v0  ;;  %7091 = vmatprep.subr.bf16.mxu0 %v7090_v3  ;;  %v1320_v0 = vld [vmem:[#allocation2 + $0x25c0] sm:$0xff] }
 0x3fd   :  { %7451 = vmatprep.subr.bf16.mxu1 %v7450_v10  ;;  %v1332_v3 = vld [vmem:[#allocation2 + $0x2620] sm:$0xff]  ;;  %v1345_v10 = vld [vmem:[#allocation2 + $0x2688] sm:$0xff] }
 0x3fe   :  { %v7110_v16 = vpack.c.bf16 %v1357_v12, %v1345_v10 }
 0x3ff   :  { %7093 = vmatpush1.bf16.msra.mxu0 %v7092_v17  ;;  %v1344_v17 = vld [vmem:[#allocation2 + $0x2680] sm:$0xff] }
 0x400   :  { %7453 = vmatpush1.bf16.msra.mxu1 %v7452_v18  ;;  %7095 = vmatprep.subr.bf16.mxu0 %v7094_v19  ;;  %v1356_v18 = vld [vmem:[#allocation2 + $0x26e0] sm:$0xff]  ;;  %v1346_v19 = vld [vmem:[#allocation2 + $0x2690] sm:$0xff] }
 0x401   :  { %7455 = vmatprep.subr.bf16.mxu1 %v7454_v26  ;;  %v1381_v26 = vld [vmem:[#allocation2 + $0x27a8] sm:$0xff]  ;;  %v7112_v22 = vpack.c.bf16 %v1356_v18, %v1344_v17 }
 0x402   :  { %v7114_v27 = vpack.c.bf16 %v1381_v26, %v1369_v23  ;;  %v7486_v23 = vpack.c.bf16 %v1455_v14, %v1443_v13  ;;  %v1454_v26 = vld [vmem:[#allocation2 + $0x29f0] sm:$0xff]  ;;  %v1537_v13 = vld [vmem:[#allocation2 + $0x2c88] sm:$0xff] }
 0x403   :  { %7097 = vmatpush1.bf16.msra.mxu0 %v7096_v30  ;;  %v1380_v30 = vld [vmem:[#allocation2 + $0x27a0] sm:$0xff]  ;;  %v1549_v14 = vld [vmem:[#allocation2 + $0x2ce8] sm:$0xff] }
 0x404   :  { %7457 = vmatpush1.bf16.msra.mxu1 %v7456_v32  ;;  %7099 = vmatprep.subr.bf16.mxu0 %v7098_v31  ;;  %v1370_v32 = vld [vmem:[#allocation2 + $0x2750] sm:$0xff]  ;;  %v7474_v31 = vpack.c.bf16 %v1383_v24, %v1371_v25  ;;  %v7116_v37 = vpack.c.bf16 %v1380_v30, %v1368_v28  ;;  %v1465_v25 = vld [vmem:[#allocation2 + $0x2a48] sm:$0xff] }
 0x405   :  { %7459 = vmatprep.subr.bf16.mxu1 %v7458_v36  ;;  %v1395_v36 = vld [vmem:[#allocation2 + $0x2818] sm:$0xff]  ;;  %v7476_v39 = vpack.c.bf16 %v1382_v33, %v1370_v32  ;;  %v1477_v24 = vld [vmem:[#allocation2 + $0x2aa8] sm:$0xff]  ;;  %v1464_v32 = vld [vmem:[#allocation2 + $0x2a40] sm:$0xff] }
 0x406   :  { %4251 = vmatmul.mubr.f32.vlgmr.msra.gmra.mrb[4].mxu0 %v8210_v55  ;;  %v7130_v30 = vpack.c.bf16 %v1477_v24, %v1465_v25  ;;  %v1466_v33 = vld [vmem:[#allocation2 + $0x2a50] sm:$0xff] }
 0x407   :  { %7101 = vmatpush1.bf16.msra.mxu0 %v7100_v42  ;;  %4677 = vmatmul.mubr.f32.vlgmr.msra.gmra.mrb[4].mxu1 %v8210_v55  ;;  %v7108_v55 = vpack.c.bf16 %v1332_v3, %v1320_v0  ;;  %v1404_v42 = vld [vmem:[#allocation2 + $0x2860] sm:$0xff]  ;;  %v1430_v3 = vld [vmem:[#allocation2 + $0x2930] sm:$0xff] }
 0x408   :  { %7461 = vmatpush1.bf16.msra.mxu1 %v7460_v43  ;;  %7103 = vmatprep.subr.bf16.mxu0 %v7102_v44  ;;  %v1394_v43 = vld [vmem:[#allocation2 + $0x2810] sm:$0xff]  ;;  %v7478_v44 = vpack.c.bf16 %v1407_v63, %v1395_v36  ;;  %v7120_v51 = vpack.c.bf16 %v1404_v42, %v1392_v41  ;;  %v1489_v36 = vld [vmem:[#allocation2 + $0x2b08] sm:$0xff]  ;;  %v7492_v41 = vpack.c.bf16 %v1478_v35, %v1466_v33  ;;  %v1560_v33 = vld [vmem:[#allocation2 + $0x2d40] sm:$0xff] }
 0x409   :  { %7463 = vmatprep.subr.bf16.mxu1 %v7462_v48  ;;  %4321 = vmatprep.mubr.f32.mxu0 %v8227_v29  ;;  %v1419_v48 = vld [vmem:[#allocation2 + $0x28d8] sm:$0xff]  ;;  %v7480_v53 = vpack.c.bf16 %v1406_v45, %v1394_v43  ;;  %v1501_v63 = vld [vmem:[#allocation2 + $0x2b68] sm:$0xff]  ;;  %v1488_v43 = vld [vmem:[#allocation2 + $0x2b00] sm:$0xff] }
 0x40a   :  { %4747 = vmatprep.mubr.f32.mxu1 %v8227_v29  ;;  %v7472_v29 = vpack.c.bf16 %v1358_v21, %v1346_v19  ;;  %v7482_v0 = vpack.c.bf16 %v1431_v50, %v1419_v48  ;;  %v1440_v19 = vld [vmem:[#allocation2 + $0x2980] sm:$0xff]  ;;  %v1442_v21 = vld [vmem:[#allocation2 + $0x2990] sm:$0xff]  ;;  %v7134_v42 = vpack.c.bf16 %v1501_v63, %v1489_v36  ;;  %v1513_v48 = vld [vmem:[#allocation2 + $0x2bc8] sm:$0xff] }
 0x40b   :  { %7105 = vmatpush1.bf16.msra.mxu0 %v7104_v59  ;;  %v1428_v59 = vld [vmem:[#allocation2 + $0x2920] sm:$0xff]  ;;  %v7488_v28 = vpack.c.bf16 %v1454_v26, %v1442_v21  ;;  %v1490_v45 = vld [vmem:[#allocation2 + $0x2b10] sm:$0xff]  ;;  %v1525_v50 = vld [vmem:[#allocation2 + $0x2c28] sm:$0xff] }
 0x40c   :  { %7465 = vmatpush1.bf16.msra.mxu1 %v7464_v60  ;;  %7107 = vmatprep.subr.bf16.mxu0 %v7106_v61  ;;  %v1418_v60 = vld [vmem:[#allocation2 + $0x28d0] sm:$0xff]  ;;  %v1536_v21 = vld [vmem:[#allocation2 + $0x2c80] sm:$0xff] }
 0x40d   :  { %7467 = vmatprep.subr.bf16.mxu1 %v7466_v7  ;;  %v1453_v7 = vld [vmem:[#allocation2 + $0x29e8] sm:$0xff]  ;;  %v7484_v17 = vpack.c.bf16 %v1430_v3, %v1418_v60  ;;  %v1512_v60 = vld [vmem:[#allocation2 + $0x2bc0] sm:$0xff]  ;;  %v1514_v3 = vld [vmem:[#allocation2 + $0x2bd0] sm:$0xff] }
 0x40e   :  { %v7126_v18 = vpack.c.bf16 %v1453_v7, %v1441_v5  ;;  %v1526_v7 = vld [vmem:[#allocation2 + $0x2c30] sm:$0xff] }
 0x40f   :  { %7109 = vmatpush1.bf16.msra.mxu0 %v7108_v55  ;;  %v1538_v26 = vld [vmem:[#allocation2 + $0x2c90] sm:$0xff] }
 0x410   :  { %7469 = vmatpush1.bf16.msra.mxu1 %v7468_v49  ;;  %7111 = vmatprep.subr.bf16.mxu0 %v7110_v16  ;;  %v7124_v16 = vpack.c.bf16 %v1428_v59, %v1416_v57  ;;  %v7496_v57 = vpack.c.bf16 %v1502_v47, %v1490_v45  ;;  %v7138_v59 = vpack.c.bf16 %v1525_v50, %v1513_v48  ;;  %v1550_v24 = vld [vmem:[#allocation2 + $0x2cf0] sm:$0xff]  ;;  %v1584_v45 = vld [vmem:[#allocation2 + $0x2e00] sm:$0xff] }
 0x411   :  { %7471 = vmatprep.subr.bf16.mxu1 %v7470_v20  ;;  %v1452_v20 = vld [vmem:[#allocation2 + $0x29e0] sm:$0xff]  ;;  %v1562_v35 = vld [vmem:[#allocation2 + $0x2d50] sm:$0xff] }
 0x412   :  { %v1574_v63 = vld [vmem:[#allocation2 + $0x2db0] sm:$0xff] }
 0x413   :  { %7113 = vmatpush1.bf16.msra.mxu0 %v7112_v22  ;;  %v1467_v22 = vld [vmem:[#allocation2 + $0x2a58] sm:$0xff]  ;;  %v1586_v47 = vld [vmem:[#allocation2 + $0x2e10] sm:$0xff] }
 0x414   :  { %7473 = vmatpush1.bf16.msra.mxu1 %v7472_v29  ;;  %7115 = vmatprep.subr.bf16.mxu0 %v7114_v27  ;;  %v1479_v29 = vld [vmem:[#allocation2 + $0x2ab8] sm:$0xff]  ;;  %v7128_v27 = vpack.c.bf16 %v1452_v20, %v1440_v19  ;;  %v7500_v19 = vpack.c.bf16 %v1526_v7, %v1514_v3  ;;  %v7142_v20 = vpack.c.bf16 %v1549_v14, %v1537_v13  ;;  %v1598_v50 = vld [vmem:[#allocation2 + $0x2e70] sm:$0xff]  ;;  %v1608_v3 = vld [vmem:[#allocation2 + $0x2ec0] sm:$0xff] }
 0x415   :  { %7475 = vmatprep.subr.bf16.mxu1 %v7474_v31  ;;  %v1476_v31 = vld [vmem:[#allocation2 + $0x2aa0] sm:$0xff]  ;;  %v7490_v34 = vpack.c.bf16 %v1479_v29, %v1467_v22  ;;  %v1561_v22 = vld [vmem:[#allocation2 + $0x2d48] sm:$0xff]  ;;  %v1610_v7 = vld [vmem:[#allocation2 + $0x2ed0] sm:$0xff] }
 0x416   :  { %v1573_v29 = vld [vmem:[#allocation2 + $0x2da8] sm:$0xff]  ;;  %v1622_v14 = vld [vmem:[#allocation2 + $0x2f30] sm:$0xff] }
 0x417   :  { %7117 = vmatpush1.bf16.msra.mxu0 %v7116_v37  ;;  %v1491_v37 = vld [vmem:[#allocation2 + $0x2b18] sm:$0xff] }
 0x418   :  { %7477 = vmatpush1.bf16.msra.mxu1 %v7476_v39  ;;  %7119 = vmatprep.subr.bf16.mxu0 %v7118_v40  ;;  %v1503_v39 = vld [vmem:[#allocation2 + $0x2b78] sm:$0xff]  ;;  %v7132_v40 = vpack.c.bf16 %v1476_v31, %v1464_v32  ;;  %v7504_v32 = vpack.c.bf16 %v1550_v24, %v1538_v26  ;;  %v7146_v31 = vpack.c.bf16 %v1573_v29, %v1561_v22  ;;  %v1632_v26 = vld [vmem:[#allocation2 + $0x2f80] sm:$0xff]  ;;  %v1634_v24 = vld [vmem:[#allocation2 + $0x2f90] sm:$0xff] }
 0x419   :  { %v8317_v61 = vpop.f32.mrb[2].mxu0  ;;  %7479 = vmatprep.subr.bf16.mxu1 %v7478_v44  ;;  %v1500_v44 = vld [vmem:[#allocation2 + $0x2b60] sm:$0xff]  ;;  %v7494_v46 = vpack.c.bf16 %v1503_v39, %v1491_v37  ;;  %v1585_v37 = vld [vmem:[#allocation2 + $0x2e08] sm:$0xff]  ;;  %v1646_v29 = vld [vmem:[#allocation2 + $0x2ff0] sm:$0xff] }
 0x41a   :  { %v4897_v9 = vmax.f32 %v8285_v2, %v8317_v61  ;;  %v8321_v10 = vpop.f32.mrb[2].mxu1  ;;  %v8323_v12 = vpop.f32.mrb[3].mxu0  ;;  %v1597_v39 = vld [vmem:[#allocation2 + $0x2e68] sm:$0xff]  ;;  %v5154_v61 = vld [vmem:[#allocation10 + $0x10] sm:$0xff] }
 0x41b   :  { %v4898_v55 = vmax.f32 %v8283_v1, %v8323_v12  ;;  %v8327_v49 = vpop.f32.mrb[3].mxu1  ;;  %7121 = vmatpush1.bf16.msra.mxu0 %v7120_v51  ;;  %v1515_v51 = vld [vmem:[#allocation2 + $0x2bd8] sm:$0xff]  ;;  %v5157_v12 = vld [vmem:[#allocation10 + $0x28] sm:$0xff] }
 0x41c   :  { %7481 = vmatpush1.bf16.msra.mxu1 %v7480_v53  ;;  %7123 = vmatprep.subr.bf16.mxu0 %v7122_v56  ;;  %v1527_v53 = vld [vmem:[#allocation2 + $0x2c38] sm:$0xff]  ;;  %v7136_v56 = vpack.c.bf16 %v1500_v44, %v1488_v43  ;;  %v7508_v43 = vpack.c.bf16 %v1574_v63, %v1562_v35  ;;  %v7150_v44 = vpack.c.bf16 %v1597_v39, %v1585_v37  ;;  %v1656_v35 = vld [vmem:[#allocation2 + $0x3040] sm:$0xff]  ;;  %v1658_v63 = vld [vmem:[#allocation2 + $0x3050] sm:$0xff] }
 0x41d   :  { %7483 = vmatprep.subr.bf16.mxu1 %v7482_v0  ;;  %v1524_v0 = vld [vmem:[#allocation2 + $0x2c20] sm:$0xff]  ;;  %v7498_v5 = vpack.c.bf16 %v1527_v53, %v1515_v51  ;;  %v1609_v51 = vld [vmem:[#allocation2 + $0x2ec8] sm:$0xff]  ;;  %v1670_v39 = vld [vmem:[#allocation2 + $0x30b0] sm:$0xff] }
 0x41e   :  { %v1621_v53 = vld [vmem:[#allocation2 + $0x2f28] sm:$0xff] }
 0x41f   :  { %7125 = vmatpush1.bf16.msra.mxu0 %v7124_v16  ;;  %v1539_v16 = vld [vmem:[#allocation2 + $0x2c98] sm:$0xff] }
 0x420   :  { %7485 = vmatpush1.bf16.msra.mxu1 %v7484_v17  ;;  %7127 = vmatprep.subr.bf16.mxu0 %v7126_v18  ;;  %v1551_v17 = vld [vmem:[#allocation2 + $0x2cf8] sm:$0xff]  ;;  %v7140_v18 = vpack.c.bf16 %v1524_v0, %v1512_v60  ;;  %v7512_v60 = vpack.c.bf16 %v1598_v50, %v1586_v47  ;;  %v7154_v0 = vpack.c.bf16 %v1621_v53, %v1609_v51  ;;  %v1680_v47 = vld [vmem:[#allocation2 + $0x3100] sm:$0xff]  ;;  %v1682_v50 = vld [vmem:[#allocation2 + $0x3110] sm:$0xff] }
 0x421   :  { %7487 = vmatprep.subr.bf16.mxu1 %v7486_v23  ;;  %v1548_v23 = vld [vmem:[#allocation2 + $0x2ce0] sm:$0xff]  ;;  %v7502_v25 = vpack.c.bf16 %v1551_v17, %v1539_v16  ;;  %v1633_v16 = vld [vmem:[#allocation2 + $0x2f88] sm:$0xff]  ;;  %v1694_v53 = vld [vmem:[#allocation2 + $0x3170] sm:$0xff] }
 0x422   :  { %v1645_v17 = vld [vmem:[#allocation2 + $0x2fe8] sm:$0xff] }
 0x423   :  { %7129 = vmatpush1.bf16.msra.mxu0 %v7128_v27  ;;  %v1563_v27 = vld [vmem:[#allocation2 + $0x2d58] sm:$0xff] }
 0x424   :  { %7489 = vmatpush1.bf16.msra.mxu1 %v7488_v28  ;;  %7131 = vmatprep.subr.bf16.mxu0 %v7130_v30  ;;  %v1575_v28 = vld [vmem:[#allocation2 + $0x2db8] sm:$0xff]  ;;  %v7144_v30 = vpack.c.bf16 %v1548_v23, %v1536_v21  ;;  %v7516_v21 = vpack.c.bf16 %v1622_v14, %v1610_v7  ;;  %v7158_v23 = vpack.c.bf16 %v1645_v17, %v1633_v16  ;;  %v1704_v7 = vld [vmem:[#allocation2 + $0x31c0] sm:$0xff]  ;;  %v1706_v14 = vld [vmem:[#allocation2 + $0x31d0] sm:$0xff] }
 0x425   :  { %7491 = vmatprep.subr.bf16.mxu1 %v7490_v34  ;;  %v1572_v34 = vld [vmem:[#allocation2 + $0x2da0] sm:$0xff]  ;;  %v7506_v36 = vpack.c.bf16 %v1575_v28, %v1563_v27  ;;  %v1657_v27 = vld [vmem:[#allocation2 + $0x3048] sm:$0xff]  ;;  %v1718_v17 = vld [vmem:[#allocation2 + $0x3230] sm:$0xff] }
 0x426   :  { %v1669_v28 = vld [vmem:[#allocation2 + $0x30a8] sm:$0xff] }
 0x427   :  { %7133 = vmatpush1.bf16.msra.mxu0 %v7132_v40  ;;  %v1587_v40 = vld [vmem:[#allocation2 + $0x2e18] sm:$0xff] }
 0x428   :  { %7493 = vmatpush1.bf16.msra.mxu1 %v7492_v41  ;;  %7135 = vmatprep.subr.bf16.mxu0 %v7134_v42  ;;  %v1599_v41 = vld [vmem:[#allocation2 + $0x2e78] sm:$0xff]  ;;  %v7148_v42 = vpack.c.bf16 %v1572_v34, %v1560_v33  ;;  %v7520_v33 = vpack.c.bf16 %v1646_v29, %v1634_v24  ;;  %v7162_v34 = vpack.c.bf16 %v1669_v28, %v1657_v27  ;;  %v1740_v24 = vld [vmem:[#allocation2 + $0x32e0] sm:$0xff]  ;;  %v1742_v27 = vld [vmem:[#allocation2 + $0x32f0] sm:$0xff] }
 0x429   :  { %7495 = vmatprep.subr.bf16.mxu1 %v7494_v46  ;;  %v1596_v46 = vld [vmem:[#allocation2 + $0x2e60] sm:$0xff]  ;;  %v7510_v48 = vpack.c.bf16 %v1599_v41, %v1587_v40  ;;  %v1681_v40 = vld [vmem:[#allocation2 + $0x3108] sm:$0xff] }
 0x42a   :  { %v1693_v41 = vld [vmem:[#allocation2 + $0x3168] sm:$0xff] }
 0x42b   :  { %7137 = vmatpush1.bf16.msra.mxu0 %v7136_v56  ;;  %v1611_v56 = vld [vmem:[#allocation2 + $0x2ed8] sm:$0xff]  ;;  %v1753_v28 = vld [vmem:[#allocation2 + $0x3348] sm:$0xff] }
 0x42c   :  { %7497 = vmatpush1.bf16.msra.mxu1 %v7496_v57  ;;  %7139 = vmatprep.subr.bf16.mxu0 %v7138_v59  ;;  %v1623_v57 = vld [vmem:[#allocation2 + $0x2f38] sm:$0xff]  ;;  %v7152_v59 = vpack.c.bf16 %v1596_v46, %v1584_v45  ;;  %v7524_v45 = vpack.c.bf16 %v1670_v39, %v1658_v63  ;;  %v7166_v46 = vpack.c.bf16 %v1693_v41, %v1681_v40  ;;  %v1754_v63 = vld [vmem:[#allocation2 + $0x3350] sm:$0xff]  ;;  %v1777_v40 = vld [vmem:[#allocation2 + $0x3408] sm:$0xff] }
 0x42d   :  { %7499 = vmatprep.subr.bf16.mxu1 %v7498_v5  ;;  %v1620_v5 = vld [vmem:[#allocation2 + $0x2f20] sm:$0xff]  ;;  %v7514_v13 = vpack.c.bf16 %v1623_v57, %v1611_v56  ;;  %v1705_v56 = vld [vmem:[#allocation2 + $0x31c8] sm:$0xff]  ;;  %v1766_v39 = vld [vmem:[#allocation2 + $0x33b0] sm:$0xff] }
 0x42e   :  { %v1717_v57 = vld [vmem:[#allocation2 + $0x3228] sm:$0xff] }
 0x42f   :  { %7141 = vmatpush1.bf16.msra.mxu0 %v7140_v18  ;;  %v1635_v18 = vld [vmem:[#allocation2 + $0x2f98] sm:$0xff]  ;;  %v1789_v41 = vld [vmem:[#allocation2 + $0x3468] sm:$0xff] }
 0x430   :  { %7501 = vmatpush1.bf16.msra.mxu1 %v7500_v19  ;;  %7143 = vmatprep.subr.bf16.mxu0 %v7142_v20  ;;  %v1647_v19 = vld [vmem:[#allocation2 + $0x2ff8] sm:$0xff]  ;;  %v7156_v20 = vpack.c.bf16 %v1620_v5, %v1608_v3  ;;  %v7528_v3 = vpack.c.bf16 %v1694_v53, %v1682_v50  ;;  %v7170_v5 = vpack.c.bf16 %v1717_v57, %v1705_v56  ;;  %v1778_v50 = vld [vmem:[#allocation2 + $0x3410] sm:$0xff]  ;;  %v1801_v56 = vld [vmem:[#allocation2 + $0x34c8] sm:$0xff] }
 0x431   :  { %7503 = vmatprep.subr.bf16.mxu1 %v7502_v25  ;;  %v1644_v25 = vld [vmem:[#allocation2 + $0x2fe0] sm:$0xff]  ;;  %v7518_v22 = vpack.c.bf16 %v1647_v19, %v1635_v18  ;;  %v1729_v18 = vld [vmem:[#allocation2 + $0x3288] sm:$0xff]  ;;  %v1790_v53 = vld [vmem:[#allocation2 + $0x3470] sm:$0xff] }
 0x432   :  { %v1741_v19 = vld [vmem:[#allocation2 + $0x32e8] sm:$0xff] }
 0x433   :  { %7145 = vmatpush1.bf16.msra.mxu0 %v7144_v30  ;;  %v1659_v30 = vld [vmem:[#allocation2 + $0x3058] sm:$0xff]  ;;  %v1813_v57 = vld [vmem:[#allocation2 + $0x3528] sm:$0xff] }
 0x434   :  { %7505 = vmatpush1.bf16.msra.mxu1 %v7504_v32  ;;  %7147 = vmatprep.subr.bf16.mxu0 %v7146_v31  ;;  %v1671_v32 = vld [vmem:[#allocation2 + $0x30b8] sm:$0xff]  ;;  %v7160_v31 = vpack.c.bf16 %v1644_v25, %v1632_v26  ;;  %v7174_v26 = vpack.c.bf16 %v1741_v19, %v1729_v18  ;;  %v1728_v25 = vld [vmem:[#allocation2 + $0x3280] sm:$0xff]  ;;  %v1825_v18 = vld [vmem:[#allocation2 + $0x3588] sm:$0xff] }
 0x435   :  { %7507 = vmatprep.subr.bf16.mxu1 %v7506_v36  ;;  %v1668_v36 = vld [vmem:[#allocation2 + $0x30a0] sm:$0xff]  ;;  %v7522_v37 = vpack.c.bf16 %v1671_v32, %v1659_v30  ;;  %v1765_v30 = vld [vmem:[#allocation2 + $0x33a8] sm:$0xff]  ;;  %v1755_v32 = vld [vmem:[#allocation2 + $0x3358] sm:$0xff] }
 0x436   :  { %v1837_v19 = vld [vmem:[#allocation2 + $0x35e8] sm:$0xff] }
 0x437   :  { %7149 = vmatpush1.bf16.msra.mxu0 %v7148_v42  ;;  %v1683_v42 = vld [vmem:[#allocation2 + $0x3118] sm:$0xff] }
 0x438   :  { %7509 = vmatpush1.bf16.msra.mxu1 %v7508_v43  ;;  %7151 = vmatprep.subr.bf16.mxu0 %v7150_v44  ;;  %v1695_v43 = vld [vmem:[#allocation2 + $0x3178] sm:$0xff]  ;;  %v7164_v44 = vpack.c.bf16 %v1668_v36, %v1656_v35  ;;  %v1752_v35 = vld [vmem:[#allocation2 + $0x3340] sm:$0xff] }
 0x439   :  { %7511 = vmatprep.subr.bf16.mxu1 %v7510_v48  ;;  %v1692_v48 = vld [vmem:[#allocation2 + $0x3160] sm:$0xff]  ;;  %v7526_v51 = vpack.c.bf16 %v1695_v43, %v1683_v42  ;;  %v1779_v42 = vld [vmem:[#allocation2 + $0x3418] sm:$0xff] }
 0x43a   :  { %v1764_v36 = vld [vmem:[#allocation2 + $0x33a0] sm:$0xff]  ;;  %v1791_v43 = vld [vmem:[#allocation2 + $0x3478] sm:$0xff] }
 0x43b   :  { %7153 = vmatpush1.bf16.msra.mxu0 %v7152_v59  ;;  %v1707_v59 = vld [vmem:[#allocation2 + $0x31d8] sm:$0xff] }
 0x43c   :  { %7513 = vmatpush1.bf16.msra.mxu1 %v7512_v60  ;;  %7155 = vmatprep.subr.bf16.mxu0 %v7154_v0  ;;  %v1719_v60 = vld [vmem:[#allocation2 + $0x3238] sm:$0xff]  ;;  %v7168_v0 = vpack.c.bf16 %v1692_v48, %v1680_v47  ;;  %v1776_v47 = vld [vmem:[#allocation2 + $0x3400] sm:$0xff] }
 0x43d   :  { %7515 = vmatprep.subr.bf16.mxu1 %v7514_v13  ;;  %v1716_v13 = vld [vmem:[#allocation2 + $0x3220] sm:$0xff]  ;;  %v7530_v16 = vpack.c.bf16 %v1719_v60, %v1707_v59  ;;  %v1803_v59 = vld [vmem:[#allocation2 + $0x34d8] sm:$0xff] }
 0x43e   :  { %v1788_v48 = vld [vmem:[#allocation2 + $0x3460] sm:$0xff]  ;;  %v1815_v60 = vld [vmem:[#allocation2 + $0x3538] sm:$0xff] }
 0x43f   :  { %7157 = vmatpush1.bf16.msra.mxu0 %v7156_v20  ;;  %v1731_v20 = vld [vmem:[#allocation2 + $0x3298] sm:$0xff] }
 0x440   :  { %7517 = vmatpush1.bf16.msra.mxu1 %v7516_v21  ;;  %7159 = vmatprep.subr.bf16.mxu0 %v7158_v23  ;;  %v1743_v21 = vld [vmem:[#allocation2 + $0x32f8] sm:$0xff]  ;;  %v7532_v23 = vpack.c.bf16 %v1718_v17, %v1706_v14  ;;  %v1802_v14 = vld [vmem:[#allocation2 + $0x34d0] sm:$0xff] }
 0x441   :  { %7519 = vmatprep.subr.bf16.mxu1 %v7518_v22  ;;  %v1730_v22 = vld [vmem:[#allocation2 + $0x3290] sm:$0xff]  ;;  %v7534_v29 = vpack.c.bf16 %v1743_v21, %v1731_v20  ;;  %v1827_v20 = vld [vmem:[#allocation2 + $0x3598] sm:$0xff] }
 0x442   :  { %v1814_v17 = vld [vmem:[#allocation2 + $0x3530] sm:$0xff]  ;;  %v1839_v21 = vld [vmem:[#allocation2 + $0x35f8] sm:$0xff] }
 0x443   :  { %7161 = vmatpush1.bf16.msra.mxu0 %v7160_v31  ;;  %v1767_v31 = vld [vmem:[#allocation2 + $0x33b8] sm:$0xff] }
 0x444   :  { %7521 = vmatpush1.bf16.msra.mxu1 %v7520_v33  ;;  %7163 = vmatprep.subr.bf16.mxu0 %v7162_v34  ;;  %v7176_v33 = vpack.c.bf16 %v1740_v24, %v1728_v25  ;;  %v7178_v34 = vpack.c.bf16 %v1765_v30, %v1753_v28  ;;  %v1824_v25 = vld [vmem:[#allocation2 + $0x3580] sm:$0xff]  ;;  %v1849_v28 = vld [vmem:[#allocation2 + $0x3648] sm:$0xff] }
 0x445   :  { %7523 = vmatprep.subr.bf16.mxu1 %v7522_v37  ;;  %v7538_v37 = vpack.c.bf16 %v1767_v31, %v1755_v32  ;;  %v1836_v24 = vld [vmem:[#allocation2 + $0x35e0] sm:$0xff]  ;;  %v1861_v30 = vld [vmem:[#allocation2 + $0x36a8] sm:$0xff]  ;;  %v1851_v32 = vld [vmem:[#allocation2 + $0x3658] sm:$0xff] }
 0x446   :  { %4322 = vmatmul.mubr.f32.vlgmr.msra.gmra.mrb[4].mxu0 %v8223_v15  ;;  %v1863_v31 = vld [vmem:[#allocation2 + $0x36b8] sm:$0xff] }
 0x447   :  { %7165 = vmatpush1.bf16.msra.mxu0 %v7164_v44  ;;  %4748 = vmatmul.mubr.f32.vlgmr.msra.gmra.mrb[4].mxu1 %v8223_v15  ;;  %v7172_v15 = vpack.c.bf16 %v1716_v13, %v1704_v7  ;;  %v7180_v44 = vpack.c.bf16 %v1764_v36, %v1752_v35  ;;  %v1800_v7 = vld [vmem:[#allocation2 + $0x34c0] sm:$0xff] }
 0x448   :  { %7525 = vmatpush1.bf16.msra.mxu1 %v7524_v45  ;;  %7167 = vmatprep.subr.bf16.mxu0 %v7166_v46  ;;  %v7540_v45 = vpack.c.bf16 %v1766_v39, %v1754_v63  ;;  %v7182_v46 = vpack.c.bf16 %v1789_v41, %v1777_v40  ;;  %v1812_v13 = vld [vmem:[#allocation2 + $0x3520] sm:$0xff]  ;;  %v1850_v63 = vld [vmem:[#allocation2 + $0x3650] sm:$0xff]  ;;  %v1873_v40 = vld [vmem:[#allocation2 + $0x3708] sm:$0xff] }
 0x449   :  { %7527 = vmatprep.subr.bf16.mxu1 %v7526_v51  ;;  %4392 = vmatprep.mubr.f32.mxu0 %v8244_v4  ;;  %v7542_v51 = vpack.c.bf16 %v1791_v43, %v1779_v42  ;;  %v1848_v35 = vld [vmem:[#allocation2 + $0x3640] sm:$0xff]  ;;  %v1862_v39 = vld [vmem:[#allocation2 + $0x36b0] sm:$0xff]  ;;  %v1885_v41 = vld [vmem:[#allocation2 + $0x3768] sm:$0xff] }
 0x44a   :  { %4818 = vmatprep.mubr.f32.mxu1 %v8244_v4  ;;  %v7536_v4 = vpack.c.bf16 %v1742_v27, %v1730_v22  ;;  %v1826_v22 = vld [vmem:[#allocation2 + $0x3590] sm:$0xff]  ;;  %v1860_v36 = vld [vmem:[#allocation2 + $0x36a0] sm:$0xff]  ;;  %v1875_v42 = vld [vmem:[#allocation2 + $0x3718] sm:$0xff] }
 0x44b   :  { %7169 = vmatpush1.bf16.msra.mxu0 %v7168_v0  ;;  %v7184_v0 = vpack.c.bf16 %v1788_v48, %v1776_v47  ;;  %v1838_v27 = vld [vmem:[#allocation2 + $0x35f0] sm:$0xff]  ;;  %v1887_v43 = vld [vmem:[#allocation2 + $0x3778] sm:$0xff]  ;;  %v1872_v47 = vld [vmem:[#allocation2 + $0x3700] sm:$0xff] }
 0x44c   :  { %7529 = vmatpush1.bf16.msra.mxu1 %v7528_v3  ;;  %7171 = vmatprep.subr.bf16.mxu0 %v7170_v5  ;;  %v7544_v3 = vpack.c.bf16 %v1790_v53, %v1778_v50  ;;  %v7186_v5 = vpack.c.bf16 %v1813_v57, %v1801_v56  ;;  %v1884_v48 = vld [vmem:[#allocation2 + $0x3760] sm:$0xff]  ;;  %v1874_v50 = vld [vmem:[#allocation2 + $0x3710] sm:$0xff]  ;;  %v1897_v56 = vld [vmem:[#allocation2 + $0x37c8] sm:$0xff] }
 0x44d   :  { %7531 = vmatprep.subr.bf16.mxu1 %v7530_v16  ;;  %v7546_v16 = vpack.c.bf16 %v1815_v60, %v1803_v59  ;;  %v1886_v53 = vld [vmem:[#allocation2 + $0x3770] sm:$0xff]  ;;  %v1909_v57 = vld [vmem:[#allocation2 + $0x3828] sm:$0xff]  ;;  %v1899_v59 = vld [vmem:[#allocation2 + $0x37d8] sm:$0xff] }
 0x44e   :  { %v1911_v60 = vld [vmem:[#allocation2 + $0x3838] sm:$0xff] }
 0x44f   :  { %7173 = vmatpush1.bf16.msra.mxu0 %v7172_v15  ;;  %v7188_v15 = vpack.c.bf16 %v1812_v13, %v1800_v7  ;;  %v1896_v7 = vld [vmem:[#allocation2 + $0x37c0] sm:$0xff] }
 0x450   :  { %7533 = vmatpush1.bf16.msra.mxu1 %v7532_v23  ;;  %7175 = vmatprep.subr.bf16.mxu0 %v7174_v26  ;;  %v7548_v23 = vpack.c.bf16 %v1814_v17, %v1802_v14  ;;  %v7190_v26 = vpack.c.bf16 %v1837_v19, %v1825_v18  ;;  %v1908_v13 = vld [vmem:[#allocation2 + $0x3820] sm:$0xff]  ;;  %v1898_v14 = vld [vmem:[#allocation2 + $0x37d0] sm:$0xff]  ;;  %v1921_v18 = vld [vmem:[#allocation2 + $0x3888] sm:$0xff] }
 0x451   :  { %7535 = vmatprep.subr.bf16.mxu1 %v7534_v29  ;;  %v7550_v29 = vpack.c.bf16 %v1839_v21, %v1827_v20  ;;  %v1910_v17 = vld [vmem:[#allocation2 + $0x3830] sm:$0xff]  ;;  %v1933_v19 = vld [vmem:[#allocation2 + $0x38e8] sm:$0xff]  ;;  %v1923_v20 = vld [vmem:[#allocation2 + $0x3898] sm:$0xff] }
 0x452   :  { %v1935_v21 = vld [vmem:[#allocation2 + $0x38f8] sm:$0xff] }
 0x453   :  { %7177 = vmatpush1.bf16.msra.mxu0 %v7176_v33  ;;  %v7192_v33 = vpack.c.bf16 %v1836_v24, %v1824_v25  ;;  %v1920_v25 = vld [vmem:[#allocation2 + $0x3880] sm:$0xff] }
 0x454   :  { %7537 = vmatpush1.bf16.msra.mxu1 %v7536_v4  ;;  %7179 = vmatprep.subr.bf16.mxu0 %v7178_v34  ;;  %v7552_v4 = vpack.c.bf16 %v1838_v27, %v1826_v22  ;;  %v7194_v34 = vpack.c.bf16 %v1861_v30, %v1849_v28  ;;  %v1932_v24 = vld [vmem:[#allocation2 + $0x38e0] sm:$0xff]  ;;  %v1922_v22 = vld [vmem:[#allocation2 + $0x3890] sm:$0xff]  ;;  %v1945_v28 = vld [vmem:[#allocation2 + $0x3948] sm:$0xff] }
 0x455   :  { %7539 = vmatprep.subr.bf16.mxu1 %v7538_v37  ;;  %v7554_v37 = vpack.c.bf16 %v1863_v31, %v1851_v32  ;;  %v1934_v27 = vld [vmem:[#allocation2 + $0x38f0] sm:$0xff]  ;;  %v1957_v30 = vld [vmem:[#allocation2 + $0x39a8] sm:$0xff]  ;;  %v1947_v32 = vld [vmem:[#allocation2 + $0x3958] sm:$0xff] }
 0x456   :  { %v1959_v31 = vld [vmem:[#allocation2 + $0x39b8] sm:$0xff] }
 0x457   :  { %7181 = vmatpush1.bf16.msra.mxu0 %v7180_v44  ;;  %v7196_v44 = vpack.c.bf16 %v1860_v36, %v1848_v35  ;;  %v1944_v35 = vld [vmem:[#allocation2 + $0x3940] sm:$0xff] }
 0x458   :  { %7541 = vmatpush1.bf16.msra.mxu1 %v7540_v45  ;;  %7183 = vmatprep.subr.bf16.mxu0 %v7182_v46  ;;  %v7556_v45 = vpack.c.bf16 %v1862_v39, %v1850_v63  ;;  %v7198_v46 = vpack.c.bf16 %v1885_v41, %v1873_v40  ;;  %v1956_v36 = vld [vmem:[#allocation2 + $0x39a0] sm:$0xff]  ;;  %v1946_v63 = vld [vmem:[#allocation2 + $0x3950] sm:$0xff]  ;;  %v1969_v40 = vld [vmem:[#allocation2 + $0x3a08] sm:$0xff] }
 0x459   :  { %7543 = vmatprep.subr.bf16.mxu1 %v7542_v51  ;;  %v7558_v51 = vpack.c.bf16 %v1887_v43, %v1875_v42  ;;  %v1958_v39 = vld [vmem:[#allocation2 + $0x39b0] sm:$0xff]  ;;  %v1981_v41 = vld [vmem:[#allocation2 + $0x3a68] sm:$0xff]  ;;  %v1971_v42 = vld [vmem:[#allocation2 + $0x3a18] sm:$0xff] }
 0x45a   :  { %v1983_v43 = vld [vmem:[#allocation2 + $0x3a78] sm:$0xff] }
 0x45b   :  { %7185 = vmatpush1.bf16.msra.mxu0 %v7184_v0  ;;  %v7200_v0 = vpack.c.bf16 %v1884_v48, %v1872_v47  ;;  %v1968_v47 = vld [vmem:[#allocation2 + $0x3a00] sm:$0xff] }
 0x45c   :  { %7545 = vmatpush1.bf16.msra.mxu1 %v7544_v3  ;;  %7187 = vmatprep.subr.bf16.mxu0 %v7186_v5  ;;  %v7560_v3 = vpack.c.bf16 %v1886_v53, %v1874_v50  ;;  %v7202_v5 = vpack.c.bf16 %v1909_v57, %v1897_v56  ;;  %v1980_v48 = vld [vmem:[#allocation2 + $0x3a60] sm:$0xff]  ;;  %v1970_v50 = vld [vmem:[#allocation2 + $0x3a10] sm:$0xff]  ;;  %v1993_v56 = vld [vmem:[#allocation2 + $0x3ac8] sm:$0xff] }
 0x45d   :  { %7547 = vmatprep.subr.bf16.mxu1 %v7546_v16  ;;  %v7562_v16 = vpack.c.bf16 %v1911_v60, %v1899_v59  ;;  %v1982_v53 = vld [vmem:[#allocation2 + $0x3a70] sm:$0xff]  ;;  %v2005_v57 = vld [vmem:[#allocation2 + $0x3b28] sm:$0xff]  ;;  %v1995_v59 = vld [vmem:[#allocation2 + $0x3ad8] sm:$0xff] }
 0x45e   :  { %v2007_v60 = vld [vmem:[#allocation2 + $0x3b38] sm:$0xff] }
 0x45f   :  { %7189 = vmatpush1.bf16.msra.mxu0 %v7188_v15  ;;  %v7204_v15 = vpack.c.bf16 %v1908_v13, %v1896_v7  ;;  %v1992_v7 = vld [vmem:[#allocation2 + $0x3ac0] sm:$0xff] }
 0x460   :  { %7549 = vmatpush1.bf16.msra.mxu1 %v7548_v23  ;;  %7191 = vmatprep.subr.bf16.mxu0 %v7190_v26  ;;  %v7564_v23 = vpack.c.bf16 %v1910_v17, %v1898_v14  ;;  %v7206_v26 = vpack.c.bf16 %v1933_v19, %v1921_v18  ;;  %v2004_v13 = vld [vmem:[#allocation2 + $0x3b20] sm:$0xff]  ;;  %v1994_v14 = vld [vmem:[#allocation2 + $0x3ad0] sm:$0xff]  ;;  %v2017_v18 = vld [vmem:[#allocation2 + $0x3b88] sm:$0xff] }
 0x461   :  { %7551 = vmatprep.subr.bf16.mxu1 %v7550_v29  ;;  %v7566_v29 = vpack.c.bf16 %v1935_v21, %v1923_v20  ;;  %v2006_v17 = vld [vmem:[#allocation2 + $0x3b30] sm:$0xff]  ;;  %v2029_v19 = vld [vmem:[#allocation2 + $0x3be8] sm:$0xff]  ;;  %v2019_v20 = vld [vmem:[#allocation2 + $0x3b98] sm:$0xff] }
 0x462   :  { %v2031_v21 = vld [vmem:[#allocation2 + $0x3bf8] sm:$0xff] }
 0x463   :  { %7193 = vmatpush1.bf16.msra.mxu0 %v7192_v33  ;;  %v7208_v33 = vpack.c.bf16 %v1932_v24, %v1920_v25  ;;  %v2016_v25 = vld [vmem:[#allocation2 + $0x3b80] sm:$0xff] }
 0x464   :  { %7553 = vmatpush1.bf16.msra.mxu1 %v7552_v4  ;;  %7195 = vmatprep.subr.bf16.mxu0 %v7194_v34  ;;  %v7568_v4 = vpack.c.bf16 %v1934_v27, %v1922_v22  ;;  %v7210_v34 = vpack.c.bf16 %v1957_v30, %v1945_v28  ;;  %v2028_v24 = vld [vmem:[#allocation2 + $0x3be0] sm:$0xff]  ;;  %v2018_v22 = vld [vmem:[#allocation2 + $0x3b90] sm:$0xff]  ;;  %v2041_v28 = vld [vmem:[#allocation2 + $0x3c48] sm:$0xff] }
 0x465   :  { %7555 = vmatprep.subr.bf16.mxu1 %v7554_v37  ;;  %v7570_v37 = vpack.c.bf16 %v1959_v31, %v1947_v32  ;;  %v2030_v27 = vld [vmem:[#allocation2 + $0x3bf0] sm:$0xff]  ;;  %v2053_v30 = vld [vmem:[#allocation2 + $0x3ca8] sm:$0xff]  ;;  %v2043_v32 = vld [vmem:[#allocation2 + $0x3c58] sm:$0xff] }
 0x466   :  { %v2055_v31 = vld [vmem:[#allocation2 + $0x3cb8] sm:$0xff] }
 0x467   :  { %7197 = vmatpush1.bf16.msra.mxu0 %v7196_v44  ;;  %v7212_v44 = vpack.c.bf16 %v1956_v36, %v1944_v35  ;;  %v2040_v35 = vld [vmem:[#allocation2 + $0x3c40] sm:$0xff] }
 0x468   :  { %7557 = vmatpush1.bf16.msra.mxu1 %v7556_v45  ;;  %7199 = vmatprep.subr.bf16.mxu0 %v7198_v46  ;;  %v7572_v45 = vpack.c.bf16 %v1958_v39, %v1946_v63  ;;  %v7214_v46 = vpack.c.bf16 %v1981_v41, %v1969_v40  ;;  %v2052_v36 = vld [vmem:[#allocation2 + $0x3ca0] sm:$0xff]  ;;  %v2042_v63 = vld [vmem:[#allocation2 + $0x3c50] sm:$0xff]  ;;  %v2065_v40 = vld [vmem:[#allocation2 + $0x3d08] sm:$0xff] }
 0x469   :  { %7559 = vmatprep.subr.bf16.mxu1 %v7558_v51  ;;  %v7574_v51 = vpack.c.bf16 %v1983_v43, %v1971_v42  ;;  %v2054_v39 = vld [vmem:[#allocation2 + $0x3cb0] sm:$0xff]  ;;  %v2077_v41 = vld [vmem:[#allocation2 + $0x3d68] sm:$0xff]  ;;  %v2067_v42 = vld [vmem:[#allocation2 + $0x3d18] sm:$0xff] }
 0x46a   :  { %v2079_v43 = vld [vmem:[#allocation2 + $0x3d78] sm:$0xff] }
 0x46b   :  { %7201 = vmatpush1.bf16.msra.mxu0 %v7200_v0  ;;  %v7216_v0 = vpack.c.bf16 %v1980_v48, %v1968_v47  ;;  %v2064_v47 = vld [vmem:[#allocation2 + $0x3d00] sm:$0xff] }
 0x46c   :  { %7561 = vmatpush1.bf16.msra.mxu1 %v7560_v3  ;;  %7203 = vmatprep.subr.bf16.mxu0 %v7202_v5  ;;  %v7576_v3 = vpack.c.bf16 %v1982_v53, %v1970_v50  ;;  %v7218_v5 = vpack.c.bf16 %v2005_v57, %v1993_v56  ;;  %v2076_v48 = vld [vmem:[#allocation2 + $0x3d60] sm:$0xff]  ;;  %v2066_v50 = vld [vmem:[#allocation2 + $0x3d10] sm:$0xff]  ;;  %v2089_v56 = vld [vmem:[#allocation2 + $0x3dc8] sm:$0xff] }
 0x46d   :  { %7563 = vmatprep.subr.bf16.mxu1 %v7562_v16  ;;  %v7578_v16 = vpack.c.bf16 %v2007_v60, %v1995_v59  ;;  %v2078_v53 = vld [vmem:[#allocation2 + $0x3d70] sm:$0xff]  ;;  %v2101_v57 = vld [vmem:[#allocation2 + $0x3e28] sm:$0xff]  ;;  %v2091_v59 = vld [vmem:[#allocation2 + $0x3dd8] sm:$0xff] }
 0x46e   :  { %v2103_v60 = vld [vmem:[#allocation2 + $0x3e38] sm:$0xff] }
 0x46f   :  { %7205 = vmatpush1.bf16.msra.mxu0 %v7204_v15  ;;  %v7220_v15 = vpack.c.bf16 %v2004_v13, %v1992_v7  ;;  %v2088_v7 = vld [vmem:[#allocation2 + $0x3dc0] sm:$0xff] }
 0x470   :  { %7565 = vmatpush1.bf16.msra.mxu1 %v7564_v23  ;;  %7207 = vmatprep.subr.bf16.mxu0 %v7206_v26  ;;  %v7580_v23 = vpack.c.bf16 %v2006_v17, %v1994_v14  ;;  %v7222_v26 = vpack.c.bf16 %v2029_v19, %v2017_v18  ;;  %v2100_v13 = vld [vmem:[#allocation2 + $0x3e20] sm:$0xff]  ;;  %v2090_v14 = vld [vmem:[#allocation2 + $0x3dd0] sm:$0xff]  ;;  %v2113_v18 = vld [vmem:[#allocation2 + $0x3e88] sm:$0xff] }
 0x471   :  { %7567 = vmatprep.subr.bf16.mxu1 %v7566_v29  ;;  %v7582_v29 = vpack.c.bf16 %v2031_v21, %v2019_v20  ;;  %v2102_v17 = vld [vmem:[#allocation2 + $0x3e30] sm:$0xff]  ;;  %v2125_v19 = vld [vmem:[#allocation2 + $0x3ee8] sm:$0xff]  ;;  %v2115_v20 = vld [vmem:[#allocation2 + $0x3e98] sm:$0xff] }
 0x472   :  { %v2127_v21 = vld [vmem:[#allocation2 + $0x3ef8] sm:$0xff] }
 0x473   :  { %7209 = vmatpush1.bf16.msra.mxu0 %v7208_v33  ;;  %v7224_v33 = vpack.c.bf16 %v2028_v24, %v2016_v25  ;;  %v2124_v25 = vld [vmem:[#allocation2 + $0x3ee0] sm:$0xff]  ;;  %v2114_v24 = vld [vmem:[#allocation2 + $0x3e90] sm:$0xff] }
 0x474   :  { %7569 = vmatpush1.bf16.msra.mxu1 %v7568_v4  ;;  %7211 = vmatprep.subr.bf16.mxu0 %v7210_v34  ;;  %v7584_v4 = vpack.c.bf16 %v2030_v27, %v2018_v22  ;;  %v7226_v34 = vpack.c.bf16 %v2053_v30, %v2041_v28  ;;  %v7598_v22 = vpack.c.bf16 %v2127_v21, %v2115_v20  ;;  %v2137_v27 = vld [vmem:[#allocation2 + $0x3f48] sm:$0xff]  ;;  %v2139_v30 = vld [vmem:[#allocation2 + $0x3f58] sm:$0xff] }
 0x475   :  { %7571 = vmatprep.subr.bf16.mxu1 %v7570_v37  ;;  %v7586_v37 = vpack.c.bf16 %v2055_v31, %v2043_v32  ;;  %v2149_v28 = vld [vmem:[#allocation2 + $0x3fa8] sm:$0xff]  ;;  %v2151_v32 = vld [vmem:[#allocation2 + $0x3fb8] sm:$0xff] }
 0x477   :  { %7213 = vmatpush1.bf16.msra.mxu0 %v7212_v44  ;;  %v7228_v44 = vpack.c.bf16 %v2052_v36, %v2040_v35  ;;  %v2138_v35 = vld [vmem:[#allocation2 + $0x3f50] sm:$0xff]  ;;  %v7602_v36 = vpack.c.bf16 %v2151_v32, %v2139_v30 }
 0x478   :  { %7573 = vmatpush1.bf16.msra.mxu1 %v7572_v45  ;;  %7215 = vmatprep.subr.bf16.mxu0 %v7214_v46  ;;  %v7588_v45 = vpack.c.bf16 %v2054_v39, %v2042_v63  ;;  %v7230_v46 = vpack.c.bf16 %v2077_v41, %v2065_v40  ;;  %v2150_v63 = vld [vmem:[#allocation2 + $0x3fb0] sm:$0xff]  ;;  %v2173_v39 = vld [vmem:[#allocation2 + $0x4068] sm:$0xff]  ;;  %v2163_v40 = vld [vmem:[#allocation2 + $0x4018] sm:$0xff] }
 0x479   :  { %7575 = vmatprep.subr.bf16.mxu1 %v7574_v51  ;;  %v7590_v51 = vpack.c.bf16 %v2079_v43, %v2067_v42  ;;  %v2175_v41 = vld [vmem:[#allocation2 + $0x4078] sm:$0xff]  ;;  %v7604_v43 = vpack.c.bf16 %v2150_v63, %v2138_v35  ;;  %v2246_v35 = vld [vmem:[#allocation2 + $0x42b0] sm:$0xff]  ;;  %v2269_v63 = vld [vmem:[#allocation2 + $0x4368] sm:$0xff] }
 0x47b   :  { %7217 = vmatpush1.bf16.msra.mxu0 %v7216_v0  ;;  %v7232_v0 = vpack.c.bf16 %v2076_v48, %v2064_v47  ;;  %v2162_v47 = vld [vmem:[#allocation2 + $0x4010] sm:$0xff]  ;;  %v7606_v48 = vpack.c.bf16 %v2175_v41, %v2163_v40 }
 0x47c   :  { %7577 = vmatpush1.bf16.msra.mxu1 %v7576_v3  ;;  %7219 = vmatprep.subr.bf16.mxu0 %v7218_v5  ;;  %v7592_v3 = vpack.c.bf16 %v2078_v53, %v2066_v50  ;;  %v7234_v5 = vpack.c.bf16 %v2101_v57, %v2089_v56  ;;  %v2174_v50 = vld [vmem:[#allocation2 + $0x4070] sm:$0xff]  ;;  %v2197_v53 = vld [vmem:[#allocation2 + $0x4128] sm:$0xff]  ;;  %v2187_v56 = vld [vmem:[#allocation2 + $0x40d8] sm:$0xff] }
 0x47d   :  { %7579 = vmatprep.subr.bf16.mxu1 %v7578_v16  ;;  %v7594_v16 = vpack.c.bf16 %v2103_v60, %v2091_v59  ;;  %v2199_v57 = vld [vmem:[#allocation2 + $0x4138] sm:$0xff]  ;;  %v7608_v60 = vpack.c.bf16 %v2174_v50, %v2162_v47  ;;  %v2270_v47 = vld [vmem:[#allocation2 + $0x4370] sm:$0xff] }
 0x47e   :  { %v4971_v50 = vld [vmem:[#allocation7 + $0x88] sm:$0xff] }
 0x47f   :  { %7221 = vmatpush1.bf16.msra.mxu0 %v7220_v15  ;;  %v7596_v15 = vpack.c.bf16 %v2102_v17, %v2090_v14  ;;  %v2198_v14 = vld [vmem:[#allocation2 + $0x4130] sm:$0xff]  ;;  %v2221_v17 = vld [vmem:[#allocation2 + $0x41e8] sm:$0xff] }
 0x480   :  { %7581 = vmatpush1.bf16.msra.mxu1 %v7580_v23  ;;  %7223 = vmatprep.subr.bf16.mxu0 %v7222_v26  ;;  %v7238_v23 = vpack.c.bf16 %v2125_v19, %v2113_v18  ;;  %v2112_v26 = vld [vmem:[#allocation2 + $0x3e80] sm:$0xff]  ;;  %v2211_v18 = vld [vmem:[#allocation2 + $0x4198] sm:$0xff] }
 0x481   :  { %7583 = vmatprep.subr.bf16.mxu1 %v7582_v29  ;;  %v2126_v29 = vld [vmem:[#allocation2 + $0x3ef0] sm:$0xff]  ;;  %v7240_v31 = vpack.c.bf16 %v2124_v25, %v2112_v26  ;;  %v2223_v19 = vld [vmem:[#allocation2 + $0x41f8] sm:$0xff] }
 0x482   :  { %v2210_v26 = vld [vmem:[#allocation2 + $0x4190] sm:$0xff]  ;;  %v7614_v25 = vpack.c.bf16 %v2223_v19, %v2211_v18  ;;  %v8036_v19 = vmov 0.0|0.0  }
 0x483   :  { %7225 = vmatpush1.bf16.msra.mxu0 %v7224_v33  ;;  %v7242_v33 = vpack.c.bf16 %v2149_v28, %v2137_v27  ;;  %v2235_v27 = vld [vmem:[#allocation2 + $0x4258] sm:$0xff] }
 0x484   :  { %7585 = vmatpush1.bf16.msra.mxu1 %v7584_v4  ;;  %7227 = vmatprep.subr.bf16.mxu0 %v7226_v34  ;;  %v2136_v4 = vld [vmem:[#allocation2 + $0x3f40] sm:$0xff]  ;;  %v2247_v28 = vld [vmem:[#allocation2 + $0x42b8] sm:$0xff] }
 0x485   :  { %7587 = vmatprep.subr.bf16.mxu1 %v7586_v37  ;;  %v2148_v34 = vld [vmem:[#allocation2 + $0x3fa0] sm:$0xff]  ;;  %v2161_v37 = vld [vmem:[#allocation2 + $0x4008] sm:$0xff]  ;;  %v4988_v18 = vld [vmem:[#allocation7 + $0x110] sm:$0xff] }
 0x486   :  { %4393 = vmatmul.mubr.f32.vlgmr.msra.gmra.mrb[4].mxu0 %v8240_v52  ;;  %v7244_v42 = vpack.c.bf16 %v2148_v34, %v2136_v4  ;;  %v2234_v4 = vld [vmem:[#allocation2 + $0x4250] sm:$0xff]  ;;  %v7618_v34 = vpack.c.bf16 %v2247_v28, %v2235_v27  ;;  %v4977_v28 = vld [vmem:[#allocation7 + $0xb8] sm:$0xff] }
 0x487   :  { %7229 = vmatpush1.bf16.msra.mxu0 %v7228_v44  ;;  %4819 = vmatmul.mubr.f32.vlgmr.msra.gmra.mrb[4].mxu1 %v8240_v52  ;;  %v7236_v52 = vpack.c.bf16 %v2100_v13, %v2088_v7  ;;  %v7246_v44 = vpack.c.bf16 %v2173_v39, %v2161_v37  ;;  %v2186_v7 = vld [vmem:[#allocation2 + $0x40d0] sm:$0xff]  ;;  %v7610_v13 = vpack.c.bf16 %v2199_v57, %v2187_v56  ;;  %v2259_v37 = vld [vmem:[#allocation2 + $0x4318] sm:$0xff]  ;;  %v4954_v57 = vld [vmem:[#allocation7] sm:$0xff] }
 0x488   :  { %7589 = vmatpush1.bf16.msra.mxu1 %v7588_v45  ;;  %7231 = vmatprep.subr.bf16.mxu0 %v7230_v46  ;;  %v2160_v45 = vld [vmem:[#allocation2 + $0x4000] sm:$0xff]  ;;  %v7612_v21 = vpack.c.bf16 %v2198_v14, %v2186_v7  ;;  %v2271_v39 = vld [vmem:[#allocation2 + $0x4378] sm:$0xff]  ;;  %v7620_v41 = vpack.c.bf16 %v2246_v35, %v2234_v4  ;;  %v4979_v35 = vld [vmem:[#allocation7 + $0xc8] sm:$0xff] }
 0x489   :  { %7591 = vmatprep.subr.bf16.mxu1 %v7590_v51  ;;  %5323 = vmatprep.mubr.msk.f32.mxu0 %vm2337_vm0, %v8257_v54  ;;  %v2172_v46 = vld [vmem:[#allocation2 + $0x4060] sm:$0xff]  ;;  %v2185_v51 = vld [vmem:[#allocation2 + $0x40c8] sm:$0xff]  ;;  %v4976_v27 = vld [vmem:[#allocation7 + $0xb0] sm:$0xff] }
 0x48a   :  { %5324 = vmatprep.mubr.msk.f32.mxu1 %vm2337_vm0, %v8257_v54  ;;  %v7600_v54 = vpack.c.bf16 %v2126_v29, %v2114_v24  ;;  %v7248_v59 = vpack.c.bf16 %v2172_v46, %v2160_v45  ;;  %v2222_v24 = vld [vmem:[#allocation2 + $0x41f0] sm:$0xff]  ;;  %v2245_v29 = vld [vmem:[#allocation2 + $0x42a8] sm:$0xff]  ;;  %v7622_v46 = vpack.c.bf16 %v2271_v39, %v2259_v37  ;;  %v4993_v4 = vld [vmem:[#allocation7 + $0x138] sm:$0xff] }
 0x48b   :  { %7233 = vmatpush1.bf16.msra.mxu0 %v7232_v0  ;;  %v7250_v0 = vpack.c.bf16 %v2197_v53, %v2185_v51  ;;  %v7616_v32 = vpack.c.bf16 %v2222_v24, %v2210_v26  ;;  %v2258_v45 = vld [vmem:[#allocation2 + $0x4310] sm:$0xff]  ;;  %v4962_v39 = vld [vmem:[#allocation7 + $0x40] sm:$0xff] }
 0x48c   :  { %7593 = vmatpush1.bf16.msra.mxu1 %v7592_v3  ;;  %7235 = vmatprep.subr.bf16.mxu0 %v7234_v5  ;;  %v2184_v3 = vld [vmem:[#allocation2 + $0x40c0] sm:$0xff]  ;;  %v7624_v53 = vpack.c.bf16 %v2270_v47, %v2258_v45  ;;  %v4959_v24 = vld [vmem:[#allocation7 + $0x28] sm:$0xff] }
 0x48d   :  { %7595 = vmatprep.subr.bf16.mxu1 %v7594_v16  ;;  %v2196_v5 = vld [vmem:[#allocation2 + $0x4120] sm:$0xff]  ;;  %v2209_v16 = vld [vmem:[#allocation2 + $0x4188] sm:$0xff] }
 0x48e   :  { %v7252_v20 = vpack.c.bf16 %v2196_v5, %v2184_v3  ;;  %v4972_v3 = vld [vmem:[#allocation7 + $0x90] sm:$0xff]  ;;  %v4973_v5 = vld [vmem:[#allocation7 + $0x98] sm:$0xff] }
 0x48f   :  { %7237 = vmatpush1.bf16.msra.mxu0 %v7236_v52  ;;  %v7254_v52 = vpack.c.bf16 %v2221_v17, %v2209_v16  ;;  %v7630_v14 = vpack.c.bf16 %v4973_v5, %v4972_v3  ;;  %v4956_v16 = vld [vmem:[#allocation7 + $0x10] sm:$0xff]  ;;  %v4957_v17 = vld [vmem:[#allocation7 + $0x18] sm:$0xff]  ;;  %v4966_v3 = vld [vmem:[#allocation7 + $0x60] sm:$0xff] }
 0x490   :  { %7597 = vmatpush1.bf16.msra.mxu1 %v7596_v15  ;;  %7239 = vmatprep.subr.bf16.mxu0 %v7238_v23  ;;  %v2208_v15 = vld [vmem:[#allocation2 + $0x4180] sm:$0xff]  ;;  %v4967_v5 = vld [vmem:[#allocation7 + $0x68] sm:$0xff] }
 0x491   :  { %7599 = vmatprep.subr.bf16.mxu1 %v7598_v22  ;;  %v2220_v23 = vld [vmem:[#allocation2 + $0x41e0] sm:$0xff]  ;;  %v2233_v22 = vld [vmem:[#allocation2 + $0x4248] sm:$0xff] }
 0x492   :  { %v7256_v30 = vpack.c.bf16 %v2220_v23, %v2208_v15  ;;  %v7632_v15 = vpack.c.bf16 %v4957_v17, %v4956_v16  ;;  %v4984_v17 = vld [vmem:[#allocation7 + $0xf0] sm:$0xff] }
 0x493   :  { %7241 = vmatpush1.bf16.msra.mxu0 %v7240_v31  ;;  %v7258_v31 = vpack.c.bf16 %v2245_v29, %v2233_v22  ;;  %v4990_v22 = vld [vmem:[#allocation7 + $0x120] sm:$0xff]  ;;  %v4991_v29 = vld [vmem:[#allocation7 + $0x128] sm:$0xff] }
 0x494   :  { %7601 = vmatpush1.bf16.msra.mxu1 %v7600_v54  ;;  %7243 = vmatprep.subr.bf16.mxu0 %v7242_v33  ;;  %v2232_v54 = vld [vmem:[#allocation2 + $0x4240] sm:$0xff] }
 0x495   :  { %7603 = vmatprep.subr.bf16.mxu1 %v7602_v36  ;;  %v2244_v33 = vld [vmem:[#allocation2 + $0x42a0] sm:$0xff]  ;;  %v2257_v36 = vld [vmem:[#allocation2 + $0x4308] sm:$0xff] }
 0x496   :  { %v7260_v40 = vpack.c.bf16 %v2244_v33, %v2232_v54  ;;  %v4961_v54 = vld [vmem:[#allocation7 + $0x38] sm:$0xff]  ;;  %v4992_v33 = vld [vmem:[#allocation7 + $0x130] sm:$0xff] }
 0x497   :  { %7245 = vmatpush1.bf16.msra.mxu0 %v7244_v42  ;;  %v7262_v42 = vpack.c.bf16 %v2269_v63, %v2257_v36  ;;  %v7668_v63 = vpack.c.bf16 %v4993_v4, %v4992_v33 }
 0x498   :  { %7605 = vmatpush1.bf16.msra.mxu1 %v7604_v43  ;;  %7247 = vmatprep.subr.bf16.mxu0 %v7246_v44  ;;  %v2256_v43 = vld [vmem:[#allocation2 + $0x4300] sm:$0xff] }
 0x499   :  { %7607 = vmatprep.subr.bf16.mxu1 %v7606_v48  ;;  %v2268_v44 = vld [vmem:[#allocation2 + $0x4360] sm:$0xff] }
 0x49a   :  { %v4970_v48 = vld [vmem:[#allocation7 + $0x80] sm:$0xff]  ;;  %v7264_v51 = vpack.c.bf16 %v2268_v44, %v2256_v43  ;;  %v4980_v43 = vld [vmem:[#allocation7 + $0xd0] sm:$0xff]  ;;  %v4981_v44 = vld [vmem:[#allocation7 + $0xd8] sm:$0xff] }
 0x49b   :  { %7249 = vmatpush1.bf16.msra.mxu0 %v7248_v59  ;;  %v7626_v56 = vpack.c.bf16 %v4971_v50, %v4970_v48  ;;  %v4955_v59 = vld [vmem:[#allocation7 + $0x8] sm:$0xff]  ;;  %v7646_v47 = vpack.c.bf16 %v4981_v44, %v4980_v43  ;;  %v4964_v48 = vld [vmem:[#allocation7 + $0x50] sm:$0xff]  ;;  %v4965_v50 = vld [vmem:[#allocation7 + $0x58] sm:$0xff] }
 0x49c   :  { %7609 = vmatpush1.bf16.msra.mxu1 %v7608_v60  ;;  %7251 = vmatprep.subr.bf16.mxu0 %v7250_v0  ;;  %v4986_v60 = vld [vmem:[#allocation7 + $0x100] sm:$0xff]  ;;  %v4987_v0 = vld [vmem:[#allocation7 + $0x108] sm:$0xff]  ;;  %v7628_v7 = vpack.c.bf16 %v4955_v59, %v4954_v57 }
 0x49d   :  { %7611 = vmatprep.subr.bf16.mxu1 %v7610_v13  ;;  %v7659_v13 = vpack.c.bf16 %v4987_v0, %v4986_v60  ;;  %v4982_v59 = vld [vmem:[#allocation7 + $0xe0] sm:$0xff]  ;;  %v4983_v60 = vld [vmem:[#allocation7 + $0xe8] sm:$0xff] }
 0x49e   :  { %v7650_v0 = vpack.c.bf16 %v4983_v60, %v4982_v59  ;;  %v5164_v60 = vld [vmem:[#allocation10 + $0x60] sm:$0xff] }
 0x49f   :  { %7253 = vmatpush1.bf16.msra.mxu0 %v7252_v20  ;;  %v4989_v20 = vld [vmem:[#allocation7 + $0x118] sm:$0xff] }
 0x4a0   :  { %7613 = vmatpush1.bf16.msra.mxu1 %v7612_v21  ;;  %7255 = vmatprep.subr.bf16.mxu0 %v7254_v52  ;;  %v4974_v21 = vld [vmem:[#allocation7 + $0xa0] sm:$0xff]  ;;  %v4975_v52 = vld [vmem:[#allocation7 + $0xa8] sm:$0xff]  ;;  %v7662_v23 = vpack.c.bf16 %v4989_v20, %v4988_v18  ;;  %v4985_v18 = vld [vmem:[#allocation7 + $0xf8] sm:$0xff] }
 0x4a1   :  { %7615 = vmatprep.subr.bf16.mxu1 %v7614_v25  ;;  %v7634_v26 = vpack.c.bf16 %v4975_v52, %v4974_v21  ;;  %v4958_v25 = vld [vmem:[#allocation7 + $0x20] sm:$0xff]  ;;  %v7654_v20 = vpack.c.bf16 %v4985_v18, %v4984_v17  ;;  %v4968_v21 = vld [vmem:[#allocation7 + $0x70] sm:$0xff]  ;;  %v4969_v52 = vld [vmem:[#allocation7 + $0x78] sm:$0xff] }
 0x4a2   :  { %v5325_v17 = vld [vmem:[#allocation8] ss:$0 sm:$0xff] }
 0x4a3   :  { %7257 = vmatpush1.bf16.msra.mxu0 %v7256_v30  ;;  %v7636_v30 = vpack.c.bf16 %v4959_v24, %v4958_v25  ;;  %v8038_v24 = vmov 0.0  }
 0x4a4   :  { %7617 = vmatpush1.bf16.msra.mxu1 %v7616_v32  ;;  %7259 = vmatprep.subr.bf16.mxu0 %v7258_v31  ;;  %v7665_v32 = vpack.c.bf16 %v4991_v29, %v4990_v22  ;;  %v4960_v31 = vld [vmem:[#allocation7 + $0x30] sm:$0xff]  ;;  %v4909_v22 = vsub.s32 0, %v8170_v62  ;;  %v4913_v29 = vsub.s32 1, %v8170_v62 }
 0x4a5   :  { %7619 = vmatprep.subr.bf16.mxu1 %v7618_v34  ;;  %v4978_v34 = vld [vmem:[#allocation7 + $0xc0] sm:$0xff]  ;;  %v7640_v36 = vpack.c.bf16 %v4961_v54, %v4960_v31 }
 0x4a6   :  { %v7642_v37 = vpack.c.bf16 %v4979_v35, %v4978_v34 }
 0x4a7   :  { %7261 = vmatpush1.bf16.msra.mxu0 %v7260_v40  ;;  %v4963_v40 = vld [vmem:[#allocation7 + $0x48] sm:$0xff] }
 0x4a8   :  { %7621 = vmatpush1.bf16.msra.mxu1 %v7620_v41  ;;  %7263 = vmatprep.subr.bf16.mxu0 %v7262_v42  ;;  %v4994_v41 = vld [vmem:[#allocation7 + $0x140] sm:$0xff]  ;;  %v4995_v42 = vld [vmem:[#allocation7 + $0x148] sm:$0xff]  ;;  %v7644_v45 = vpack.c.bf16 %v4963_v40, %v4962_v39 }
 0x4a9   :  { %7623 = vmatprep.subr.bf16.mxu1 %v7622_v46  ;;  %v7671_v46 = vpack.c.bf16 %v4995_v42, %v4994_v41  ;;  %v5153_v39 = vld [vmem:[#allocation10 + $0x8] sm:$0xff] }
 0x4ab   :  { %7265 = vmatpush1.bf16.msra.mxu0 %v7264_v51  ;;  %v4996_v51 = vld [vmem:[#allocation7 + $0x150] sm:$0xff] }
 0x4ac   :  { %7625 = vmatpush1.bf16.msra.mxu1 %v7624_v53  ;;  %7627 = vmatprep.subr.bf16.mxu0 %v7626_v56  ;;  %v4997_v53 = vld [vmem:[#allocation7 + $0x158] sm:$0xff]  ;;  %v7648_v56 = vpack.c.bf16 %v4965_v50, %v4964_v48 }
 0x4ad   :  { %7658 = vmatprep.subr.bf16.mxu1 %v8036_v19  ;;  %v7674_v57 = vpack.c.bf16 %v4997_v53, %v4996_v51  ;;  %v5159_v48 = vld [vmem:[#allocation10 + $0x38] sm:$0xff]  ;;  %v5161_v51 = vld [vmem:[#allocation10 + $0x48] sm:$0xff] }
 0x4ae   :  { %4464 = vmatmul.mubr.f32.vlgmr.msra.gmra.mrb[4].mxu0 %v8253_v38 }
 0x4af   :  { %4890 = vmatmul.mubr.f32.vlgmr.msra.gmra.mrb[4].mxu1 %v8253_v38  ;;  %7629 = vmatpush3.bf16.msra.mxu0 %v7628_v7  ;;  %v7638_v38 = vpack.c.bf16 %v4977_v28, %v4976_v27  ;;  %v4998_v7 = vld [vmem:[#allocation7 + $0x160] sm:$0xff]  ;;  %v4905_v27 = vld [vmem:[#allocation5] sm:$0x7]  ;;  %v4917_v28 = vsub.s32 2, %v8170_v62 }
 0x4b0   :  { %7660 = vmatpush3.bf16.msra.mxu1 %v7659_v13  ;;  %7631 = vmatprep.subr.bf16.mxu0 %v7630_v14  ;;  %v7652_v13 = vpack.c.bf16 %v4967_v5, %v4966_v3  ;;  %v4999_v14 = vld [vmem:[#allocation7 + $0x168] sm:$0xff]  ;;  %v4910_v33 = vrot.slane %v4905_v27, %v4909_v22  ;;  %v4914_v34 = vrot.slane %v4905_v27, %v4913_v29  ;;  %v5166_v5 = vld [vmem:[#allocation10 + $0x70] sm:$0xff] }
 0x4b1   :  { %7661 = vmatprep.subr.bf16.mxu1 %v8036_v19  ;;  %v7677_v16 = vpack.c.bf16 %v4999_v14, %v4998_v7  ;;  %5428 = vmatprep.mubr.msk.f32.mxu1 %vm8037_vm1, %v8038_v24  ;;  %v5167_v7 = vld [vmem:[#allocation10 + $0x78] sm:$0xff] }
 0x4b3   :  { %7633 = vmatpush3.bf16.msra.mxu0 %v7632_v15  ;;  %v5000_v15 = vld [vmem:[#allocation7 + $0x170] sm:$0xff] }
 0x4b4   :  { %7663 = vmatpush3.bf16.msra.mxu1 %v7662_v23  ;;  %7635 = vmatprep.subr.bf16.mxu0 %v7634_v26  ;;  %v7656_v23 = vpack.c.bf16 %v4969_v52, %v4968_v21  ;;  %v5001_v26 = vld [vmem:[#allocation7 + $0x178] sm:$0xff] }
 0x4b5   :  { %7664 = vmatprep.subr.bf16.mxu1 %v8036_v19  ;;  %v7680_v25 = vpack.c.bf16 %v5001_v26, %v5000_v15  ;;  %v5326_v26 = vld [vmem:[#allocation11] ss:$0 sm:$0xff] }
 0x4b7   :  { %7637 = vmatpush3.bf16.msra.mxu0 %v7636_v30 }
 0x4b8   :  { %7666 = vmatpush3.bf16.msra.mxu1 %v7665_v32  ;;  %7639 = vmatprep.subr.bf16.mxu0 %v7638_v38 }
 0x4b9   :  { %7667 = vmatprep.subr.bf16.mxu1 %v8036_v19 }
 0x4bb   :  { %7641 = vmatpush3.bf16.msra.mxu0 %v7640_v36  ;;  %v4918_v36 = vrot.slane %v4905_v27, %v4917_v28 }
 0x4bc   :  { %7669 = vmatpush3.bf16.msra.mxu1 %v7668_v63  ;;  %7643 = vmatprep.subr.bf16.mxu0 %v7642_v37 }
 0x4bd   :  { %7670 = vmatprep.subr.bf16.mxu1 %v8036_v19 }
 0x4bf   :  { %7645 = vmatpush3.bf16.msra.mxu0 %v7644_v45 }
 0x4c0   :  { %7672 = vmatpush3.bf16.msra.mxu1 %v7671_v46  ;;  %7647 = vmatprep.subr.bf16.mxu0 %v7646_v47  ;;  %v5158_v47 = vld [vmem:[#allocation10 + $0x30] sm:$0xff] }
 0x4c1   :  { %7673 = vmatprep.subr.bf16.mxu1 %v8036_v19  ;;  %v7692_v50 = vpack.c.bf16 %v5159_v48, %v5158_v47 }
 0x4c3   :  { %7649 = vmatpush3.bf16.msra.mxu0 %v7648_v56  ;;  %v5162_v56 = vld [vmem:[#allocation10 + $0x50] sm:$0xff] }
 0x4c4   :  { %7675 = vmatpush3.bf16.msra.mxu1 %v7674_v57  ;;  %7651 = vmatprep.subr.bf16.mxu0 %v7650_v0  ;;  %v5163_v57 = vld [vmem:[#allocation10 + $0x58] sm:$0xff]  ;;  %v5165_v0 = vld [vmem:[#allocation10 + $0x68] sm:$0xff] }
 0x4c5   :  { %7676 = vmatprep.subr.bf16.mxu1 %v8036_v19  ;;  %v7698_v59 = vpack.c.bf16 %v5163_v57, %v5162_v56  ;;  %v7701_v3 = vpack.c.bf16 %v5165_v0, %v5164_v60 }
 0x4c7   :  { %7653 = vmatpush3.bf16.msra.mxu0 %v7652_v13  ;;  %v7704_v13 = vpack.c.bf16 %v5167_v7, %v5166_v5 }
 0x4c8   :  { %7678 = vmatpush3.bf16.msra.mxu1 %v7677_v16  ;;  %7655 = vmatprep.subr.bf16.mxu0 %v7654_v20 }
 0x4c9   :  { %7679 = vmatprep.subr.bf16.mxu1 %v8036_v19 }
 0x4cb   :  { %7657 = vmatpush3.bf16.msra.mxu0 %v7656_v23 }
 0x4cc   :  { %7681 = vmatpush3.bf16.msra.mxu1 %v7680_v25  ;;  %7682 = vmatprep.subr.bf16.mxu0 %v8036_v19 }
 0x581   :  { %v4465_v30 = vpop.f32.mrb[4].mxu0 }
 0x582   :  { %v4891_v32 = vpop.f32.mrb[4].mxu1  ;;  %v4467_v38 = vpop.f32.mrb[5].mxu0 }
 0x583   :  { %v4900_v31 = vmax.f32 %v8327_v49, %v4891_v32  ;;  %v4899_v54 = vmax.f32 %v8321_v10, %v4467_v38  ;;  %v4893_v4 = vpop.f32.mrb[5].mxu1  ;;  %v5152_v49 = vld [vmem:[#allocation10] sm:$0xff] }
 0x584   :  { %v4901_v35 = vmax.f32 %v4465_v30, %v4893_v4  ;;  %v7683_v44 = vpack.c.bf16 %v5153_v39, %v5152_v49 }
 0x585   :  { %v4903_v63 = vmax.f32 %v4897_v9, %v4900_v31  ;;  %v4902_v62 = vmax.f32 %v4896_v8, %v4899_v54  ;;  %v5155_v9 = vld [vmem:[#allocation10 + $0x18] sm:$0xff]  ;;  %v5156_v8 = vld [vmem:[#allocation10 + $0x20] sm:$0xff] }
 0x586   :  { %v4904_v37 = vmax.f32 %v4898_v55, %v4901_v35  ;;  %v7686_v6 = vpack.c.bf16 %v5155_v9, %v5154_v61  ;;  %v7689_v46 = vpack.c.bf16 %v5157_v12, %v5156_v8 }
 0x587   :  { %v4922_v10 = vadd.f32 %v4910_v33, %v4902_v62  ;;  %v4923_v40 = vadd.f32 %v4914_v34, %v4903_v63 }
 0x588   :  { %v4924_v41 = vadd.f32 %v4918_v36, %v4904_v37 }
 0x589   :  { %v4925_v42 = vmax.f32 %v4922_v10, 0.0  ;;  %v4926_v43 = vmax.f32 %v4923_v40, 0.0 }
 0x58a   :  { %v4927_v2 = vmax.f32 %v4924_v41, 0.0 }
 0x58b   :  { %v4931_v45 = vcombine.low %v4925_v42, %v4926_v43  ;;  %5073 = vmatprep.mubr.f32.mxu0 %v4926_v43 }
 0x58c   :  { %5074 = vmatmul.mubr.f32.vlgmr.msra.gmra.mrb[6].mxu0 %v4925_v42  ;;  %5429 = vmatmul.mubr.f32.vlgmr.msra.gmra.mrb[6].mxu1 %v4927_v2  ;;  %v4945_v58 = vrot.slane %v4927_v2, %v8173_v11 }
 0x58d   :  { %v4938_v1 = vrot.slane %v4931_v45, %v8173_v11  ;;  %7684 = vmatpush3.bf16.msra.mxu0 %v7683_v44  ;;  %5463 = vmatprep.mubr.msk.f32.mxu0 %vm8037_vm1, %v8038_v24  ;;  %v5160_v11 = vld [vmem:[#allocation10 + $0x40] sm:$0xff] }
 0x58e   :  { %7685 = vmatprep.subr.bf16.mxu0 %v8036_v19  ;;  %v7695_v53 = vpack.c.bf16 %v5161_v51, %v5160_v11 }
 0x58f   :  { %v4946_v55 = vcombine.low %v4938_v1, %v4945_v58 }
 0x591   :  { %7687 = vmatpush3.bf16.msra.mxu0 %v7686_v6  ;;  %4953 = vst.msk [vmem:[#allocation13] sm:$0x3f] %vm4952_vm6, %v4946_v55 }
 0x592   :  { %7688 = vmatprep.subr.bf16.mxu0 %v8036_v19 }
 0x595   :  { %7690 = vmatpush3.bf16.msra.mxu0 %v7689_v46 }
 0x596   :  { %7691 = vmatprep.subr.bf16.mxu0 %v8036_v19 }
 0x599   :  { %7693 = vmatpush3.bf16.msra.mxu0 %v7692_v50 }
 0x59a   :  { %7694 = vmatprep.subr.bf16.mxu0 %v8036_v19 }
 0x59d   :  { %7696 = vmatpush3.bf16.msra.mxu0 %v7695_v53 }
 0x59e   :  { %7697 = vmatprep.subr.bf16.mxu0 %v8036_v19 }
 0x5a1   :  { %7699 = vmatpush3.bf16.msra.mxu0 %v7698_v59 }
 0x5a2   :  { %7700 = vmatprep.subr.bf16.mxu0 %v8036_v19 }
 0x5a5   :  { %7702 = vmatpush3.bf16.msra.mxu0 %v7701_v3 }
 0x5a6   :  { %7703 = vmatprep.subr.bf16.mxu0 %v8036_v19 }
 0x5a9   :  { %7705 = vmatpush3.bf16.msra.mxu0 %v7704_v13 }
 0x65f   :  { %v5359_v14 = vpop.f32.mrb[6].mxu0  ;;  %v5145_v16 = vpop.f32.mrb[6].mxu1 }
 0x660   :  { %v5360_v18 = vpop.f32.mrb[7].mxu0  ;;  %v5430_v20 = vpop.f32.mrb[7].mxu1 }
 0x661   :  { %v5361_v21 = vadd.f32 %v5360_v18, %v5359_v14 }
 0x663   :  { %v5076_v52 = vadd.f32 %v5361_v21, %v5325_v17 }
 0x665   :  { %v5146_v15 = vadd.f32 %v5145_v16, %v5076_v52 }
 0x667   :  { %v5149_v23 = vmax.f32 %v5146_v15, 0.0 }
 0x669   :  { %5464 = vmatmul.mubr.f32.vlgmr.msra.gmra.mrb[8].mxu0 %v5149_v23  ;;  %5151 = vst.msk [vmem:[#allocation14] sm:$0x3] %vm5150_vm7, %v5149_v23 }
 0x73c   :  { %v5241_v25 = vpop.f32.mrb[8].mxu0 }
 0x73d   :  { %v5242_v19 = vadd.f32 %v5326_v26, %v5241_v25  ;;  %v5465_v24 = vpop.f32.mrb[9].mxu0 }
 0x73f   :  { %v5247_v22 = vsel %vm5245_vm8, %v5242_v19, -inf  ;;  %5246 = vst.msk [vmem:[#allocation16] sm:$0x3] %vm5245_vm8, %v5242_v19 }
 0x740   :  { %5248 = vmax.xlane.f32.xlu0 %v5247_v22 }
 0x7cd   :  { %v5249_v29 = vpop.xlane.xlu0 %5248 }
 0x7ce   :  { %v8377_v27 = vsub.f32 %v5242_v19, %v5249_v29 }
 0x7d0   :  { %v5251_v28 = vmul.f32 1.442695, %v8377_v27 }
 0x7d2   :  { %7787 = vpow2.f32 %v5251_v28 }
 0x7dc   :  { %v7788_v30 = vpop.eup %7787 }
 0x7dd   :  { %v5253_v32 = vsel %vm5245_vm8, %v7788_v30, 0.0 }
 0x7de   :  { %5254 = vadd.xlane.f32.xlu0 %v5253_v32 }
 0x7df   :  { %7934 = shalt.err (!%p7931_p10)
}
 0x7e0   :  { %s7935_s3 = scalar_lea.hbm %s8439_s8, 32 }
 0x7e1   :  { %p7936_p11 = scmp.ne.s32.totalorder %s8439_s8, %s7935_s3  ;;  %p7939_p12 = scmp.lt.u32.totalorder %s7935_s3, %s8439_s8 }
 0x7e3   :  { %p7941_p13 = pnand %p7939_p12, %p7936_p11 }
 0x7e5   :  { %7944 = shalt.err (!%p7941_p13)
}
 0x7e6   :  { %5279 = dma.vmem_to_hbm [thread:$0]  %s5277_s4, 32, %s8439_s8, [#allocation15]  }
 0x7e7   :  { %s7945_s19 = scalar_lea.vmem %s5267_s29, 96  ;;  %p7950_p1 = scmp.lt.s32.totalorder %s5267_s29, %s5267_s29 }
 0x7e8   :  { %p7946_p0 = scmp.ne.s32.totalorder %s5267_s29, %s7945_s19  ;;  %p7951_p2 = scmp.lt.s32.totalorder %s7945_s19, %s7945_s19 }
 0x7ea   :  { %p7952_p3 = por %p7951_p2, %p7950_p1 }
 0x7ec   :  { %p7953_p4 = pnand %p7952_p3, %p7946_p0 }
 0x7ee   :  { %7956 = shalt.err (!%p7953_p4)
}
 0x7ef   :  { %s7957_s23 = scalar_lea.hbm %s8438_s7, 96 }
 0x7f0   :  { %p7958_p5 = scmp.ne.s32.totalorder %s8438_s7, %s7957_s23  ;;  %p7961_p6 = scmp.lt.u32.totalorder %s7957_s23, %s8438_s7 }
 0x7f2   :  { %p7963_p7 = pnand %p7961_p6, %p7958_p5 }
 0x7f4   :  { %7966 = shalt.err (!%p7963_p7)
}
 0x7f5   :  { %5269 = dma.vmem_to_hbm [thread:$0]  %s5267_s29, 96, %s8438_s7, [#allocation4]  }
 0x7f6   :  { %s8041_s25 = smov [#allocation16]  }
 0x7f7   :  { %s5286_s26 = sshll.u32 %s8041_s25, 4  ;;  %s5287_s26 = int_to_ptr.vmem [resolvable:$true] %s5286_s26 }
 0x7f8   :  { %s7967_s27 = scalar_lea.vmem %s5287_s26, 32  ;;  %p7972_p9 = scmp.lt.s32.totalorder %s5287_s26, %s5287_s26 }
 0x7f9   :  { %p7968_p8 = scmp.ne.s32.totalorder %s5287_s26, %s7967_s27  ;;  %p7973_p10 = scmp.lt.s32.totalorder %s7967_s27, %s7967_s27 }
 0x7fb   :  { %p7974_p11 = por %p7973_p10, %p7972_p9 }
 0x7fd   :  { %p7975_p12 = pnand %p7974_p11, %p7968_p8 }
 0x7ff   :  { %7978 = shalt.err (!%p7975_p12)
}
 0x800   :  { %s7979_s4 = scalar_lea.hbm %s8440_s9, 32 }
 0x801   :  { %p7980_p13 = scmp.ne.s32.totalorder %s8440_s9, %s7979_s4  ;;  %p7983_p0 = scmp.lt.u32.totalorder %s7979_s4, %s8440_s9 }
 0x803   :  { %p7985_p1 = pnand %p7983_p0, %p7980_p13 }
 0x805   :  { %7988 = shalt.err (!%p7985_p1)
}
 0x806   :  { %5289 = dma.vmem_to_hbm [thread:$0]  %s5287_s26, 32, %s8440_s9, [#allocation15]  }
 0x807   :  { %s8042_s3 = smov [#allocation17]  }
 0x808   :  { %s5296_s12 = sshll.u32 %s8042_s3, 4  ;;  %s5297_s12 = int_to_ptr.vmem [resolvable:$true] %s5296_s12 }
 0x809   :  { %s7989_s15 = scalar_lea.vmem %s5297_s12, 32  ;;  %p7994_p3 = scmp.lt.s32.totalorder %s5297_s12, %s5297_s12 }
 0x80a   :  { %p7990_p2 = scmp.ne.s32.totalorder %s5297_s12, %s7989_s15  ;;  %p7995_p4 = scmp.lt.s32.totalorder %s7989_s15, %s7989_s15 }
 0x80c   :  { %p7996_p5 = por %p7995_p4, %p7994_p3 }
 0x80e   :  { %p7997_p6 = pnand %p7996_p5, %p7990_p2 }
 0x86b   :  { %v5255_v38 = vpop.xlane.xlu0 %5254 }
 0x86c   :  { %7789 = vlog2.f32 %v5255_v38 }
 0x876   :  { %v7790_v31 = vpop.eup %7789 }
 0x877   :  { %v5257_v54 = vmul.f32 0.6931472, %v7790_v31 }
 0x879   :  { %v5258_v33 = vsub.f32 %v8377_v27, %v5257_v54 }
 0x87b   :  { %5259 = vst.msk [vmem:[#allocation17] sm:$0x3] %vm5245_vm8, %v5258_v33 }
 0x87c   :  { %8000 = shalt.err (!%p7997_p6)
}
 0x87d   :  { %s8001_s18 = scalar_lea.hbm %s8441_s10, 32 }
 0x87e   :  { %p8002_p7 = scmp.ne.s32.totalorder %s8441_s10, %s8001_s18  ;;  %p8005_p8 = scmp.lt.u32.totalorder %s8001_s18, %s8441_s10 }
 0x880   :  { %p8007_p9 = pnand %p8005_p8, %p8002_p7 }
 0x882   :  { %8010 = shalt.err (!%p8007_p9)
}
 0x883   :  { %5299 = dma.vmem_to_hbm [thread:$0]  %s5297_s12, 32, %s8441_s10, [#allocation18]  }
 0x884   :  { %8019 = dma.done.wait [#allocation4], 96  }
 0x885   :  { %8020 = vsyncadd [#allocation4], 4294967200 }
 0x886   :  { %8021 = dma.done.wait [#allocation15], 64  }
 0x887   :  { %8022 = vsyncadd [#allocation15], 4294967232 }
 0x888   :  { %8023 = dma.done.wait [#allocation18], 32  }
 0x889   :  { %8024 = vsyncadd [#allocation18], 4294967264 }
 0x88a   :  { %5312 = vsyncpa [#allocation3], 1 }
 0x88b   :  { %5313 = vsyncpa [#allocation6], 1 }
 0x88c   :  { %5314 = vsyncpa [#allocation9], 1 }
 0x88d   :  { %5315 = vsyncpa [#allocation12], 1 }
 0x88e   :  { %5316 = vsyncpa [#allocation4], 1 }
 0x88f   :  { %5317 = vsyncpa [#allocation15], 1 }
 0x890   :  { %5318 = vsyncpa [#allocation18], 1 }

</bundles_post_ra>
